<compile_context>
chip_gen: v7x
topology: tpu7x:2x2x1
jax: 0.10.0
libtpu: 0.0.40
codegen_flags: <defaults>
</compile_context>

<pallas_src>
import functools

import jax
import jax.numpy as jnp
from jax import lax
from jax.experimental import pallas as pl
from jax.experimental.pallas import tpu as pltpu

_LANES = 128
_MXU_DTYPE = jnp.bfloat16     # MXU input dtype; accumulation stays f32.


# ----------------------------------------------------------------------------
# Per-chip knobs
# ----------------------------------------------------------------------------
@functools.lru_cache(maxsize=None)
def _vmem_budget():
    """(vmem_limit_bytes, row_tile_target) derived from the local chip."""
    cap = 0
    try:
        cap = int(getattr(pltpu.get_tpu_info(), "vmem_capacity_bytes", 0))
    except Exception:
        cap = 0
    if cap >= 128 * 1024 * 1024:          # v5e / v6e: plenty of VMEM headroom
        return 100 * 1024 * 1024, 256
    return 48 * 1024 * 1024, 128          # v7x-safe (64 MiB physical per TC)


# ----------------------------------------------------------------------------
# Wrapper-side layout plumbing (no compute hoisting)
# ----------------------------------------------------------------------------
def _pad_to_lanes(a, axis):
    amt = (-a.shape[axis]) % _LANES
    if amt == 0:
        return a
    widths = [(0, 0)] * a.ndim
    widths[axis] = (0, amt)
    return jnp.pad(a, widths)


def _flatten_weights(w_hwio, dtype=_MXU_DTYPE):
    """(k, k, Cin, Cout) HWIO -> lane-padded (k*k*Cin_p, Cout_p), MXU dtype."""
    w = _pad_to_lanes(_pad_to_lanes(w_hwio.astype(jnp.float32), 2), 3)
    k, _, cinp, coutp = w.shape
    return w.reshape(k * k * cinp, coutp).astype(dtype)


def _pick_row_tile(ho, wo, target=128):
    """Smallest divisor of `ho` whose row-block gives >= `target` matmul rows."""
    for tr in range(1, ho + 1):
        if ho % tr == 0 and tr * wo >= target:
            return tr
    return ho


def _bn_fold(ssum, ssq, count, gamma, beta, eps=1e-5):
    """Fold training-mode BN into lane-padded per-channel (scale, bias)."""
    mean = ssum / count
    # NOTE: single-pass E[x^2] - E[x]^2 in f32, clamped at 0.
    # TODO(synk): shifted/Welford accumulation for |mean| >> std activations.
    var = jnp.maximum(ssq / count - mean * mean, 0.0)
    g = _pad_to_lanes(gamma.astype(jnp.float32), 0)
    b = _pad_to_lanes(beta.astype(jnp.float32), 0)
    scale = g * lax.rsqrt(var + eps)
    bias = b - mean * scale
    return scale.reshape(1, -1), bias.reshape(1, -1)


# ----------------------------------------------------------------------------
# Kernels
# ----------------------------------------------------------------------------
def _conv_kernel(*refs, ksize, stride, pre_act, fuse_sc, use_slab, mxu_dtype):
    """One (sample, row-block) step: KxK conv as a single im2col matmul,
    optional fused 1x1 shortcut conv (reusing the centre tap), and fused
    per-channel BN-statistic accumulators."""
    it = iter(refs)
    x_ref = next(it)                      # (H, W, Cin_p)   resident per sample
    w_ref = next(it)                      # (K*K*Cin_p, Cout_p)  bf16, resident
    s_ref = next(it)                      # (1, Cin_p) BN scale (pre_act only)
    b_ref = next(it)                      # (1, Cin_p) BN bias  (pre_act only)
    wsc_ref = next(it) if fuse_sc else None   # (Cin_p, Cout_p) shortcut weight
    y_ref = next(it)                      # (TR, Wo, Cout_p) raw conv rows
    sum_ref = next(it)                    # (1, Cout_p) per-channel sum
    sq_ref = next(it)                     # (1, Cout_p) per-channel sum(x^2)
    if fuse_sc:
        ysc_ref = next(it)                # (TR, Wo, Cout_p) shortcut conv rows
        scsum_ref = next(it)
        scsq_ref = next(it)
    slab_ref = next(it) if use_slab else None   # (H+2p, W+2p, Cin_p) bf16 slab

    H, W, cin = x_ref.shape
    TR, Wo, cout = y_ref.shape
    pad = (ksize - 1) // 2
    r = pl.program_id(1)

    # --- once per sample: halo-padded (and optionally pre-activated) slab ---
    if use_slab:
        @pl.when(r == 0)
        def _():
            if pad > 0:
                slab_ref[...] = jnp.zeros(slab_ref.shape, mxu_dtype)   # memset
            x = x_ref[...]
            if pre_act:
                x = jnp.maximum(x * s_ref[...] + b_ref[...], 0.0)
            # direct interior store, no full-slab value materialization
            slab_ref[pl.ds(pad, H), pl.ds(pad, W), :] = x.astype(mxu_dtype)

    src = slab_ref if use_slab else x_ref
    row0 = pl.multiple_of(r * (TR * stride), TR * stride)

    def load_tap(kh, kw):
        # Ref-side (strided) loads: no materialized `rows` slab.
        if stride == 1:
            t = src[pl.ds(row0 + kh, TR), pl.ds(kw, Wo), :]
        else:
            t = src[pl.ds(row0 + kh, TR, stride), pl.ds(kw, Wo, stride), :]
        return t.reshape(TR * Wo, cin).astype(mxu_dtype)

    taps = [load_tap(kh, kw) for kh in range(ksize) for kw in range(ksize)]
    patches = taps[0] if len(taps) == 1 else jnp.concatenate(taps, axis=1)

    # single MXU matmul (bf16 in, f32 accumulate)
    acc = jnp.dot(patches, w_ref[...], preferred_element_type=jnp.float32)
    y_ref[...] = acc.reshape(TR, Wo, cout)

    @pl.when(r == 0)
    def _():
        sum_ref[...] = jnp.zeros_like(sum_ref)
        sq_ref[...] = jnp.zeros_like(sq_ref)

    sum_ref[...] += jnp.sum(acc, axis=0, keepdims=True)
    sq_ref[...] += jnp.sum(acc * acc, axis=0, keepdims=True)

    if fuse_sc:
        # 1x1 shortcut conv == matmul on the centre tap we already loaded.
        center = taps[(ksize * ksize) // 2]
        acc_sc = jnp.dot(center, wsc_ref[...],
                         preferred_element_type=jnp.float32)
        ysc_ref[...] = acc_sc.reshape(TR, Wo, cout)

        @pl.when(r == 0)
        def _():
            scsum_ref[...] = jnp.zeros_like(scsum_ref)
            scsq_ref[...] = jnp.zeros_like(scsq_ref)

        scsum_ref[...] += jnp.sum(acc_sc, axis=0, keepdims=True)
        scsq_ref[...] += jnp.sum(acc_sc * acc_sc, axis=0, keepdims=True)


def _fuse_kernel(y2_ref, s2_ref, b2_ref, ys_ref, ss_ref, bs_ref, o_ref):
    """out = relu( BN2(conv2_out) + BN_s(shortcut) ), BN folded to scale/bias."""
    y2 = y2_ref[...] * s2_ref[...] + b2_ref[...]
    ys = ys_ref[...] * ss_ref[...] + bs_ref[...]
    o_ref[...] = jnp.maximum(y2 + ys, 0.0)


# ----------------------------------------------------------------------------
# Pallas wrappers
# ----------------------------------------------------------------------------
def _conv_pallas(x, w_flat, scale, bias, *, ksize, stride, pre_act,
                 w_sc=None, mxu_dtype=_MXU_DTYPE):
    """Conv (+ fused stats, + optional fused 1x1 shortcut conv).

    Returns (y, sum, sq) or (y, sum, sq, y_sc, sum_sc, sq_sc)."""
    N, H, W, cinp = x.shape
    kkc, coutp = w_flat.shape
    assert kkc == ksize * ksize * cinp, (kkc, ksize, cinp)
    fuse_sc = w_sc is not None
    if fuse_sc:
        assert ksize == 3 and not pre_act
        assert w_sc.shape == (cinp, coutp), w_sc.shape

    pad = (ksize - 1) // 2
    Ho = (H + 2 * pad - ksize) // stride + 1
    Wo = (W + 2 * pad - ksize) // stride + 1
    vmem_limit, row_target = _vmem_budget()
    TR = _pick_row_tile(Ho, Wo, row_target)
    R = Ho // TR

    use_slab = (pad > 0) or pre_act
    scratch = ([pltpu.VMEM((H + 2 * pad, W + 2 * pad, cinp), mxu_dtype)]
               if use_slab else [])

    in_specs = [
        # full sample, resident in VMEM across the row-block axis
        pl.BlockSpec((None, H, W, cinp), lambda n, r: (n, 0, 0, 0)),
        # pre-flattened bf16 weights: one DMA, resident for the whole grid
        # TODO(synk): pipeline_mode=pl.Buffered(1) to single-buffer this
        #             constant block (v7x VMEM saver).
        pl.BlockSpec((kkc, coutp), lambda n, r: (0, 0)),
        pl.BlockSpec((1, cinp), lambda n, r: (0, 0)),
        pl.BlockSpec((1, cinp), lambda n, r: (0, 0)),
    ]
    inputs = [x, w_flat, scale, bias]
    if fuse_sc:
        in_specs.append(pl.BlockSpec((cinp, coutp), lambda n, r: (0, 0)))
        inputs.append(w_sc)

    def y_spec():
        return pl.BlockSpec((None, TR, Wo, coutp), lambda n, r: (n, r, 0, 0))

    def stat_spec():
        return pl.BlockSpec((None, 1, coutp), lambda n, r: (n, 0, 0))

    out_shapes = [jax.ShapeDtypeStruct((N, Ho, Wo, coutp), jnp.float32),
                  jax.ShapeDtypeStruct((N, 1, coutp), jnp.float32),
                  jax.ShapeDtypeStruct((N, 1, coutp), jnp.float32)]
    out_specs = [y_spec(), stat_spec(), stat_spec()]
    if fuse_sc:
        out_shapes += [jax.ShapeDtypeStruct((N, Ho, Wo, coutp), jnp.float32),
                       jax.ShapeDtypeStruct((N, 1, coutp), jnp.float32),
                       jax.ShapeDtypeStruct((N, 1, coutp), jnp.float32)]
        out_specs += [y_spec(), stat_spec(), stat_spec()]

    kernel = functools.partial(_conv_kernel, ksize=ksize, stride=stride,
                               pre_act=pre_act, fuse_sc=fuse_sc,
                               use_slab=use_slab, mxu_dtype=mxu_dtype)

    return pl.pallas_call(
        kernel,
        out_shape=tuple(out_shapes),
        grid_spec=pltpu.PrefetchScalarGridSpec(
            num_scalar_prefetch=0,
            grid=(N, R),
            in_specs=in_specs,
            out_specs=tuple(out_specs),
            scratch_shapes=scratch,
        ),
        compiler_params=pltpu.CompilerParams(
            dimension_semantics=("parallel", "arbitrary"),
            vmem_limit_bytes=vmem_limit),
    )(*inputs)


def _fuse_pallas(y2, s2, b2, ys, ss, bs):
    N, Ho, Wo, cp = y2.shape
    vmem_limit, row_target = _vmem_budget()
    TR = _pick_row_tile(Ho, Wo, row_target)
    R = Ho // TR

    def blk():
        return pl.BlockSpec((None, TR, Wo, cp), lambda n, r: (n, r, 0, 0))

    def vec():
        return pl.BlockSpec((1, cp), lambda n, r: (0, 0))

    return pl.pallas_call(
        _fuse_kernel,
        out_shape=jax.ShapeDtypeStruct((N, Ho, Wo, cp), jnp.float32),
        grid_spec=pltpu.PrefetchScalarGridSpec(
            num_scalar_prefetch=0,
            grid=(N, R),
            in_specs=[blk(), vec(), vec(), blk(), vec(), vec()],
            out_specs=blk(),
        ),
        compiler_params=pltpu.CompilerParams(
            dimension_semantics=("parallel", "parallel"),
            vmem_limit_bytes=vmem_limit),
    )(y2, s2, b2, ys, ss, bs)


# ----------------------------------------------------------------------------
# BasicBlock forward
# ----------------------------------------------------------------------------
def basic_block_forward(x_nchw, params, stride=1):
    x = jnp.transpose(x_nchw, (0, 2, 3, 1)).astype(jnp.float32)   # NCHW->NHWC
    N, H, W, in_planes = x.shape
    planes = params["conv1_w"].shape[-1]

    xp = _pad_to_lanes(x, 3)                     # lane-pad channels to 128
    cin_p = xp.shape[-1]
    cout_p = -(-planes // _LANES) * _LANES

    w1 = _flatten_weights(params["conv1_w"])
    w2 = _flatten_weights(params["conv2_w"])
    dummy = jnp.zeros((1, cin_p), jnp.float32)   # unused when pre_act=False

    has_sc = "sc_w" in params
    wsc = _flatten_weights(params["sc_w"]) if has_sc else None   # (Cin_p,Cout_p)

    # conv1 (+ fused 1x1 shortcut conv + fused per-channel stats epilogue)
    res = _conv_pallas(xp, w1, dummy, dummy, ksize=3, stride=stride,
                       pre_act=False, w_sc=wsc)
    if has_sc:
        y1, s1, q1, ysc, ssm, sqm = res
    else:
        y1, s1, q1 = res
    Ho, Wo = y1.shape[1], y1.shape[2]
    cnt = N * Ho * Wo
    sc1, b1 = _bn_fold(jnp.sum(s1, axis=(0, 1)), jnp.sum(q1, axis=(0, 1)), cnt,
                       params["bn1_gamma"], params["bn1_beta"])

    # conv2, with ReLU(BN1(.)) fused into the in-kernel slab build
    y2, s2, q2 = _conv_pallas(y1, w2, sc1, b1, ksize=3, stride=1, pre_act=True)
    sc2, b2 = _bn_fold(jnp.sum(s2, axis=(0, 1)), jnp.sum(q2, axis=(0, 1)), cnt,
                       params["bn2_gamma"], params["bn2_beta"])

    # shortcut branch
    if has_sc:
        scs, bss = _bn_fold(jnp.sum(ssm, axis=(0, 1)), jnp.sum(sqm, axis=(0, 1)),
                            cnt, params["sc_gamma"], params["sc_beta"])
        ys = ysc
    else:
        assert stride == 1 and in_planes == planes, (
            "identity shortcut requires stride == 1 and in_planes == planes")
        ys = xp
        scs = jnp.ones((1, cout_p), jnp.float32)
        bss = jnp.zeros((1, cout_p), jnp.float32)

    out = _fuse_pallas(y2, sc2, b2, ys, scs, bss)
    out = out[..., :planes]                              # strip lane padding
    return jnp.transpose(out, (0, 3, 1, 2))              # NHWC -> NCHW


# ----------------------------------------------------------------------------
# Deterministic parameter init (shapes follow the PyTorch module __init__)
# ----------------------------------------------------------------------------
def init_params(key, in_planes, planes, stride):
    ks = jax.random.split(key, 9)
    p = {
        "conv1_w": 0.1 * jax.random.normal(ks[0], (3, 3, in_planes, planes),
                                           jnp.float32),
        "bn1_gamma": 1.0 + 0.1 * jax.random.normal(ks[1], (planes,), jnp.float32),
        "bn1_beta": 0.1 * jax.random.normal(ks[2], (planes,), jnp.float32),
        "conv2_w": 0.1 * jax.random.normal(ks[3], (3, 3, planes, planes),
                                           jnp.float32),
        "bn2_gamma": 1.0 + 0.1 * jax.random.normal(ks[4], (planes,), jnp.float32),
        "bn2_beta": 0.1 * jax.random.normal(ks[5], (planes,), jnp.float32),
    }
    if stride != 1 or in_planes != planes:
        p["sc_w"] = 0.1 * jax.random.normal(ks[6], (1, 1, in_planes, planes),
                                            jnp.float32)
        p["sc_gamma"] = 1.0 + 0.1 * jax.random.normal(ks[7], (planes,),
                                                      jnp.float32)
        p["sc_beta"] = 0.1 * jax.random.normal(ks[8], (planes,), jnp.float32)
    return p


# ----------------------------------------------------------------------------
# Pure-JAX reference (f32 HIGHEST precision, for the correctness sanity check)
# ----------------------------------------------------------------------------
def reference_forward(x_nchw, params, stride=1):
    x = jnp.transpose(x_nchw, (0, 2, 3, 1)).astype(jnp.float32)
    dn = ("NHWC", "HWIO", "NHWC")

    def conv(inp, w, s, pad):
        return lax.conv_general_dilated(inp, w, (s, s),
                                        ((pad, pad), (pad, pad)),
                                        dimension_numbers=dn,
                                        precision=lax.Precision.HIGHEST)

    def bn(y, g, b, eps=1e-5):
        m = jnp.mean(y, axis=(0, 1, 2))
        v = jnp.mean((y - m) ** 2, axis=(0, 1, 2))
        return (y - m) * (g / jnp.sqrt(v + eps)) + b

    out = jax.nn.relu(bn(conv(x, params["conv1_w"], stride, 1),
                         params["bn1_gamma"], params["bn1_beta"]))
    out = bn(conv(out, params["conv2_w"], 1, 1),
             params["bn2_gamma"], params["bn2_beta"])
    if "sc_w" in params:
        sc = bn(conv(x, params["sc_w"], stride, 0),
                params["sc_gamma"], params["sc_beta"])
    else:
        sc = x
    out = jax.nn.relu(out + sc)
    return jnp.transpose(out, (0, 3, 1, 2))


if __name__ == "__main__":
    key = jax.random.PRNGKey(0)
    kx, kp = jax.random.split(key)

    N, C_IN, H, W = 2, 4, 16, 16
    PLANES, STRIDE = 8, 1            # in_planes != planes -> 1x1 conv shortcut

    x = jax.random.normal(kx, (N, C_IN, H, W), jnp.float32)
    params = init_params(kp, C_IN, PLANES, STRIDE)

    fwd = jax.jit(functools.partial(basic_block_forward, stride=STRIDE))
    out = jax.block_until_ready(fwd(x, params))

    ref = jax.block_until_ready(reference_forward(x, params, stride=STRIDE))

    assert out.shape == (N, PLANES, H // STRIDE, W // STRIDE), out.shape
    err = jnp.abs(out - ref)
    max_err = float(jnp.max(err))
    mean_err = float(jnp.mean(err))
    # bf16 MXU inputs (f32 accumulation) through two conv+BN layers: tolerance
    # relaxed vs the f32 HIGHEST-precision reference.
    assert max_err < 1e-1, (max_err, mean_err)
    assert mean_err < 2e-2, (max_err, mean_err)

    print("KERNEL_OK")
</pallas_src>

<mosaic_0001>
module attributes {stable_mosaic.version = 11 : i64} {
  func.func @_conv_kernel(%arg0: i32, %arg1: i32, %arg2: memref<1x16x16x128xf32, #tpu.memory_space<vmem>>, %arg3: memref<1152x128xbf16, #tpu.memory_space<vmem>>, %arg4: memref<1x128xf32, #tpu.memory_space<vmem>>, %arg5: memref<1x128xf32, #tpu.memory_space<vmem>>, %arg6: memref<128x128xbf16, #tpu.memory_space<vmem>>, %arg7: memref<1x8x16x128xf32, #tpu.memory_space<vmem>>, %arg8: memref<1x1x128xf32, #tpu.memory_space<vmem>>, %arg9: memref<1x1x128xf32, #tpu.memory_space<vmem>>, %arg10: memref<1x8x16x128xf32, #tpu.memory_space<vmem>>, %arg11: memref<1x1x128xf32, #tpu.memory_space<vmem>>, %arg12: memref<1x1x128xf32, #tpu.memory_space<vmem>>, %arg13: memref<18x18x128xbf16, #tpu.memory_space<vmem>>) attributes {dimension_semantics = [#tpu.dimension_semantics<parallel>, #tpu.dimension_semantics<arbitrary>], iteration_bounds = array<i64: 2, 2>, scalar_prefetch = 0 : i64, scratch_operands = 1 : i64, tpu.core_type = #tpu.core_type<tc>, window_params = [{transform_indices = @transform_0, window_bounds = array<i64: 1, 16, 16, 128>}, {pipeline_mode = #tpu.pipeline_mode<synchronous>, transform_indices = @transform_1, window_bounds = array<i64: 1152, 128>}, {pipeline_mode = #tpu.pipeline_mode<synchronous>, transform_indices = @transform_2, window_bounds = array<i64: 1, 128>}, {pipeline_mode = #tpu.pipeline_mode<synchronous>, transform_indices = @transform_3, window_bounds = array<i64: 1, 128>}, {pipeline_mode = #tpu.pipeline_mode<synchronous>, transform_indices = @transform_4, window_bounds = array<i64: 128, 128>}, {transform_indices = @transform_5, window_bounds = array<i64: 1, 8, 16, 128>}, {transform_indices = @transform_6, window_bounds = array<i64: 1, 1, 128>}, {transform_indices = @transform_7, window_bounds = array<i64: 1, 1, 128>}, {transform_indices = @transform_8, window_bounds = array<i64: 1, 8, 16, 128>}, {transform_indices = @transform_9, window_bounds = array<i64: 1, 1, 128>}, {transform_indices = @transform_10, window_bounds = array<i64: 1, 1, 128>}]} {
    %c0_i32 = arith.constant 0 : i32
    %0 = arith.cmpi eq, %arg1, %c0_i32 : i32
    %1 = arith.extui %0 : i1 to i32
    %c0_i32_0 = arith.constant 0 : i32
    %2 = arith.cmpi ne, %1, %c0_i32_0 : i32
    scf.if %2 {
      %cst_68 = arith.constant 0.000000e+00 : bf16
      %94 = vector.broadcast %cst_68 : bf16 to vector<18x18x128xbf16>
      %c0_69 = arith.constant 0 : index
      %c0_70 = arith.constant 0 : index
      %c0_71 = arith.constant 0 : index
      %95 = vector.load %arg13[%c0_69, %c0_70, %c0_71] : memref<18x18x128xbf16, #tpu.memory_space<vmem>>, vector<18x18x128xbf16>
      tpu.vector_store %arg13[%c0_69, %c0_70, %c0_71], %94 {strides = array<i32>} : memref<18x18x128xbf16, #tpu.memory_space<vmem>>, vector<18x18x128xbf16>,
      %c0_72 = arith.constant 0 : index
      %c0_73 = arith.constant 0 : index
      %c0_74 = arith.constant 0 : index
      %c0_75 = arith.constant 0 : index
      %96 = vector.load %arg2[%c0_72, %c0_73, %c0_74, %c0_75] : memref<1x16x16x128xf32, #tpu.memory_space<vmem>>, vector<1x16x16x128xf32>
      %97 = vector.shape_cast %96 : vector<1x16x16x128xf32> to vector<16x16x128xf32>
      %98 = arith.truncf %97 : vector<16x16x128xf32> to vector<16x16x128xbf16>
      %c1_76 = arith.constant 1 : index
      %c1_77 = arith.constant 1 : index
      %c0_78 = arith.constant 0 : index
      %99 = vector.load %arg13[%c1_76, %c1_77, %c0_78] : memref<18x18x128xbf16, #tpu.memory_space<vmem>>, vector<16x16x128xbf16>
      tpu.vector_store %arg13[%c1_76, %c1_77, %c0_78], %98 {strides = array<i32>} : memref<18x18x128xbf16, #tpu.memory_space<vmem>>, vector<16x16x128xbf16>,
    } else {
    }
    %c8_i32 = arith.constant 8 : i32
    %3 = arith.muli %arg1, %c8_i32 : i32
    %4 = tpu.assume_multiple %3, 8 : i32
    %c0_i32_1 = arith.constant 0 : i32
    %5 = arith.addi %4, %c0_i32_1 : i32
    %6 = arith.index_cast %5 : i32 to index
    %c0 = arith.constant 0 : index
    %c0_2 = arith.constant 0 : index
    %7 = vector.load %arg13[%6, %c0, %c0_2] : memref<18x18x128xbf16, #tpu.memory_space<vmem>>, vector<8x16x128xbf16>
    %8 = vector.shape_cast %7 : vector<8x16x128xbf16> to vector<128x128xbf16>
    %c0_i32_3 = arith.constant 0 : i32
    %9 = arith.addi %4, %c0_i32_3 : i32
    %10 = arith.index_cast %9 : i32 to index
    %c1 = arith.constant 1 : index
    %c0_4 = arith.constant 0 : index
    %11 = vector.load %arg13[%10, %c1, %c0_4] : memref<18x18x128xbf16, #tpu.memory_space<vmem>>, vector<8x16x128xbf16>
    %12 = vector.shape_cast %11 : vector<8x16x128xbf16> to vector<128x128xbf16>
    %c0_i32_5 = arith.constant 0 : i32
    %13 = arith.addi %4, %c0_i32_5 : i32
    %14 = arith.index_cast %13 : i32 to index
    %c2 = arith.constant 2 : index
    %c0_6 = arith.constant 0 : index
    %15 = vector.load %arg13[%14, %c2, %c0_6] : memref<18x18x128xbf16, #tpu.memory_space<vmem>>, vector<8x16x128xbf16>
    %16 = vector.shape_cast %15 : vector<8x16x128xbf16> to vector<128x128xbf16>
    %c1_i32 = arith.constant 1 : i32
    %17 = arith.addi %4, %c1_i32 : i32
    %18 = arith.index_cast %17 : i32 to index
    %c0_7 = arith.constant 0 : index
    %c0_8 = arith.constant 0 : index
    %19 = vector.load %arg13[%18, %c0_7, %c0_8] : memref<18x18x128xbf16, #tpu.memory_space<vmem>>, vector<8x16x128xbf16>
    %20 = vector.shape_cast %19 : vector<8x16x128xbf16> to vector<128x128xbf16>
    %c1_i32_9 = arith.constant 1 : i32
    %21 = arith.addi %4, %c1_i32_9 : i32
    %22 = arith.index_cast %21 : i32 to index
    %c1_10 = arith.constant 1 : index
    %c0_11 = arith.constant 0 : index
    %23 = vector.load %arg13[%22, %c1_10, %c0_11] : memref<18x18x128xbf16, #tpu.memory_space<vmem>>, vector<8x16x128xbf16>
    %24 = vector.shape_cast %23 : vector<8x16x128xbf16> to vector<128x128xbf16>
    %c1_i32_12 = arith.constant 1 : i32
    %25 = arith.addi %4, %c1_i32_12 : i32
    %26 = arith.index_cast %25 : i32 to index
    %c2_13 = arith.constant 2 : index
    %c0_14 = arith.constant 0 : index
    %27 = vector.load %arg13[%26, %c2_13, %c0_14] : memref<18x18x128xbf16, #tpu.memory_space<vmem>>, vector<8x16x128xbf16>
    %28 = vector.shape_cast %27 : vector<8x16x128xbf16> to vector<128x128xbf16>
    %c2_i32 = arith.constant 2 : i32
    %29 = arith.addi %4, %c2_i32 : i32
    %30 = arith.index_cast %29 : i32 to index
    %c0_15 = arith.constant 0 : index
    %c0_16 = arith.constant 0 : index
    %31 = vector.load %arg13[%30, %c0_15, %c0_16] : memref<18x18x128xbf16, #tpu.memory_space<vmem>>, vector<8x16x128xbf16>
    %32 = vector.shape_cast %31 : vector<8x16x128xbf16> to vector<128x128xbf16>
    %c2_i32_17 = arith.constant 2 : i32
    %33 = arith.addi %4, %c2_i32_17 : i32
    %34 = arith.index_cast %33 : i32 to index
    %c1_18 = arith.constant 1 : index
    %c0_19 = arith.constant 0 : index
    %35 = vector.load %arg13[%34, %c1_18, %c0_19] : memref<18x18x128xbf16, #tpu.memory_space<vmem>>, vector<8x16x128xbf16>
    %36 = vector.shape_cast %35 : vector<8x16x128xbf16> to vector<128x128xbf16>
    %c2_i32_20 = arith.constant 2 : i32
    %37 = arith.addi %4, %c2_i32_20 : i32
    %38 = arith.index_cast %37 : i32 to index
    %c2_21 = arith.constant 2 : index
    %c0_22 = arith.constant 0 : index
    %39 = vector.load %arg13[%38, %c2_21, %c0_22] : memref<18x18x128xbf16, #tpu.memory_space<vmem>>, vector<8x16x128xbf16>
    %40 = vector.shape_cast %39 : vector<8x16x128xbf16> to vector<128x128xbf16>
    %41 = tpu.concatenate %8, %12, %16, %20, %24, %28, %32, %36, %40 in 1 : vector<128x128xbf16>, vector<128x128xbf16>, vector<128x128xbf16>, vector<128x128xbf16>, vector<128x128xbf16>, vector<128x128xbf16>, vector<128x128xbf16>, vector<128x128xbf16>, vector<128x128xbf16> -> vector<128x1152xbf16>
    %c0_23 = arith.constant 0 : index
    %c0_24 = arith.constant 0 : index
    %42 = vector.load %arg3[%c0_23, %c0_24] : memref<1152x128xbf16, #tpu.memory_space<vmem>>, vector<1152x128xbf16>
    %cst = arith.constant dense<0.000000e+00> : vector<128x128xf32>
    %43 = tpu.matmul %41, %42, %cst {dimension_numbers = #tpu.dot_dimension_numbers<[1], [0], [0], [1], [0, 0, 1, 1], [], []>} : vector<128x1152xbf16>, vector<1152x128xbf16>, vector<128x128xf32> -> vector<128x128xf32>
    %44 = vector.shape_cast %43 : vector<128x128xf32> to vector<8x16x128xf32>
    %c0_25 = arith.constant 0 : index
    %c0_26 = arith.constant 0 : index
    %c0_27 = arith.constant 0 : index
    %c0_28 = arith.constant 0 : index
    %45 = vector.load %arg7[%c0_25, %c0_26, %c0_27, %c0_28] : memref<1x8x16x128xf32, #tpu.memory_space<vmem>>, vector<1x8x16x128xf32>
    %46 = vector.shape_cast %45 : vector<1x8x16x128xf32> to vector<8x16x128xf32>
    %47 = vector.shape_cast %44 : vector<8x16x128xf32> to vector<1x8x16x128xf32>
    tpu.vector_store %arg7[%c0_25, %c0_26, %c0_27, %c0_28], %47 {strides = array<i32>} : memref<1x8x16x128xf32, #tpu.memory_space<vmem>>, vector<1x8x16x128xf32>,
    %c0_i32_29 = arith.constant 0 : i32
    %48 = arith.cmpi eq, %arg1, %c0_i32_29 : i32
    %49 = arith.extui %48 : i1 to i32
    %c0_i32_30 = arith.constant 0 : i32
    %50 = arith.cmpi ne, %49, %c0_i32_30 : i32
    scf.if %50 {
      %cst_68 = arith.constant 0.000000e+00 : f32
      %94 = vector.broadcast %cst_68 : f32 to vector<1x128xf32>
      %c0_69 = arith.constant 0 : index
      %c0_70 = arith.constant 0 : index
      %c0_71 = arith.constant 0 : index
      %95 = vector.load %arg8[%c0_69, %c0_70, %c0_71] : memref<1x1x128xf32, #tpu.memory_space<vmem>>, vector<1x1x128xf32>
      %96 = vector.shape_cast %95 : vector<1x1x128xf32> to vector<1x128xf32>
      %97 = vector.shape_cast %94 : vector<1x128xf32> to vector<1x1x128xf32>
      tpu.vector_store %arg8[%c0_69, %c0_70, %c0_71], %97 {strides = array<i32>} : memref<1x1x128xf32, #tpu.memory_space<vmem>>, vector<1x1x128xf32>,
      %cst_72 = arith.constant 0.000000e+00 : f32
      %98 = vector.broadcast %cst_72 : f32 to vector<1x128xf32>
      %c0_73 = arith.constant 0 : index
      %c0_74 = arith.constant 0 : index
      %c0_75 = arith.constant 0 : index
      %99 = vector.load %arg9[%c0_73, %c0_74, %c0_75] : memref<1x1x128xf32, #tpu.memory_space<vmem>>, vector<1x1x128xf32>
      %100 = vector.shape_cast %99 : vector<1x1x128xf32> to vector<1x128xf32>
      %101 = vector.shape_cast %98 : vector<1x128xf32> to vector<1x1x128xf32>
      tpu.vector_store %arg9[%c0_73, %c0_74, %c0_75], %101 {strides = array<i32>} : memref<1x1x128xf32, #tpu.memory_space<vmem>>, vector<1x1x128xf32>,
    } else {
    }
    %c0_31 = arith.constant 0 : index
    %c0_32 = arith.constant 0 : index
    %c0_33 = arith.constant 0 : index
    %51 = vector.load %arg8[%c0_31, %c0_32, %c0_33] : memref<1x1x128xf32, #tpu.memory_space<vmem>>, vector<1x1x128xf32>
    %52 = vector.shape_cast %51 : vector<1x1x128xf32> to vector<1x128xf32>
    %cst_34 = arith.constant dense<0.000000e+00> : vector<128xf32>
    %53 = vector.multi_reduction <add>, %43, %cst_34 [0] : vector<128x128xf32> to vector<128xf32>
    %54 = vector.shape_cast %53 : vector<128xf32> to vector<1x128xf32>
    %55 = arith.addf %52, %54 : vector<1x128xf32>
    %c0_35 = arith.constant 0 : index
    %c0_36 = arith.constant 0 : index
    %c0_37 = arith.constant 0 : index
    %56 = vector.load %arg8[%c0_35, %c0_36, %c0_37] : memref<1x1x128xf32, #tpu.memory_space<vmem>>, vector<1x1x128xf32>
    %57 = vector.shape_cast %56 : vector<1x1x128xf32> to vector<1x128xf32>
    %58 = vector.shape_cast %55 : vector<1x128xf32> to vector<1x1x128xf32>
    tpu.vector_store %arg8[%c0_35, %c0_36, %c0_37], %58 {strides = array<i32>} : memref<1x1x128xf32, #tpu.memory_space<vmem>>, vector<1x1x128xf32>,
    %c0_38 = arith.constant 0 : index
    %c0_39 = arith.constant 0 : index
    %c0_40 = arith.constant 0 : index
    %59 = vector.load %arg9[%c0_38, %c0_39, %c0_40] : memref<1x1x128xf32, #tpu.memory_space<vmem>>, vector<1x1x128xf32>
    %60 = vector.shape_cast %59 : vector<1x1x128xf32> to vector<1x128xf32>
    %61 = arith.mulf %43, %43 : vector<128x128xf32>
    %cst_41 = arith.constant dense<0.000000e+00> : vector<128xf32>
    %62 = vector.multi_reduction <add>, %61, %cst_41 [0] : vector<128x128xf32> to vector<128xf32>
    %63 = vector.shape_cast %62 : vector<128xf32> to vector<1x128xf32>
    %64 = arith.addf %60, %63 : vector<1x128xf32>
    %c0_42 = arith.constant 0 : index
    %c0_43 = arith.constant 0 : index
    %c0_44 = arith.constant 0 : index
    %65 = vector.load %arg9[%c0_42, %c0_43, %c0_44] : memref<1x1x128xf32, #tpu.memory_space<vmem>>, vector<1x1x128xf32>
    %66 = vector.shape_cast %65 : vector<1x1x128xf32> to vector<1x128xf32>
    %67 = vector.shape_cast %64 : vector<1x128xf32> to vector<1x1x128xf32>
    tpu.vector_store %arg9[%c0_42, %c0_43, %c0_44], %67 {strides = array<i32>} : memref<1x1x128xf32, #tpu.memory_space<vmem>>, vector<1x1x128xf32>,
    %c0_45 = arith.constant 0 : index
    %c0_46 = arith.constant 0 : index
    %68 = vector.load %arg6[%c0_45, %c0_46] : memref<128x128xbf16, #tpu.memory_space<vmem>>, vector<128x128xbf16>
    %cst_47 = arith.constant dense<0.000000e+00> : vector<128x128xf32>
    %69 = tpu.matmul %24, %68, %cst_47 {dimension_numbers = #tpu.dot_dimension_numbers<[1], [0], [0], [1], [0, 0, 1, 1], [], []>} : vector<128x128xbf16>, vector<128x128xbf16>, vector<128x128xf32> -> vector<128x128xf32>
    %70 = vector.shape_cast %69 : vector<128x128xf32> to vector<8x16x128xf32>
    %c0_48 = arith.constant 0 : index
    %c0_49 = arith.constant 0 : index
    %c0_50 = arith.constant 0 : index
    %c0_51 = arith.constant 0 : index
    %71 = vector.load %arg10[%c0_48, %c0_49, %c0_50, %c0_51] : memref<1x8x16x128xf32, #tpu.memory_space<vmem>>, vector<1x8x16x128xf32>
    %72 = vector.shape_cast %71 : vector<1x8x16x128xf32> to vector<8x16x128xf32>
    %73 = vector.shape_cast %70 : vector<8x16x128xf32> to vector<1x8x16x128xf32>
    tpu.vector_store %arg10[%c0_48, %c0_49, %c0_50, %c0_51], %73 {strides = array<i32>} : memref<1x8x16x128xf32, #tpu.memory_space<vmem>>, vector<1x8x16x128xf32>,
    %c0_i32_52 = arith.constant 0 : i32
    %74 = arith.cmpi eq, %arg1, %c0_i32_52 : i32
    %75 = arith.extui %74 : i1 to i32
    %c0_i32_53 = arith.constant 0 : i32
    %76 = arith.cmpi ne, %75, %c0_i32_53 : i32
    scf.if %76 {
      %cst_68 = arith.constant 0.000000e+00 : f32
      %94 = vector.broadcast %cst_68 : f32 to vector<1x128xf32>
      %c0_69 = arith.constant 0 : index
      %c0_70 = arith.constant 0 : index
      %c0_71 = arith.constant 0 : index
      %95 = vector.load %arg11[%c0_69, %c0_70, %c0_71] : memref<1x1x128xf32, #tpu.memory_space<vmem>>, vector<1x1x128xf32>
      %96 = vector.shape_cast %95 : vector<1x1x128xf32> to vector<1x128xf32>
      %97 = vector.shape_cast %94 : vector<1x128xf32> to vector<1x1x128xf32>
      tpu.vector_store %arg11[%c0_69, %c0_70, %c0_71], %97 {strides = array<i32>} : memref<1x1x128xf32, #tpu.memory_space<vmem>>, vector<1x1x128xf32>,
      %cst_72 = arith.constant 0.000000e+00 : f32
      %98 = vector.broadcast %cst_72 : f32 to vector<1x128xf32>
      %c0_73 = arith.constant 0 : index
      %c0_74 = arith.constant 0 : index
      %c0_75 = arith.constant 0 : index
      %99 = vector.load %arg12[%c0_73, %c0_74, %c0_75] : memref<1x1x128xf32, #tpu.memory_space<vmem>>, vector<1x1x128xf32>
      %100 = vector.shape_cast %99 : vector<1x1x128xf32> to vector<1x128xf32>
      %101 = vector.shape_cast %98 : vector<1x128xf32> to vector<1x1x128xf32>
      tpu.vector_store %arg12[%c0_73, %c0_74, %c0_75], %101 {strides = array<i32>} : memref<1x1x128xf32, #tpu.memory_space<vmem>>, vector<1x1x128xf32>,
    } else {
    }
    %c0_54 = arith.constant 0 : index
    %c0_55 = arith.constant 0 : index
    %c0_56 = arith.constant 0 : index
    %77 = vector.load %arg11[%c0_54, %c0_55, %c0_56] : memref<1x1x128xf32, #tpu.memory_space<vmem>>, vector<1x1x128xf32>
    %78 = vector.shape_cast %77 : vector<1x1x128xf32> to vector<1x128xf32>
    %cst_57 = arith.constant dense<0.000000e+00> : vector<128xf32>
    %79 = vector.multi_reduction <add>, %69, %cst_57 [0] : vector<128x128xf32> to vector<128xf32>
    %80 = vector.shape_cast %79 : vector<128xf32> to vector<1x128xf32>
    %81 = arith.addf %78, %80 : vector<1x128xf32>
    %c0_58 = arith.constant 0 : index
    %c0_59 = arith.constant 0 : index
    %c0_60 = arith.constant 0 : index
    %82 = vector.load %arg11[%c0_58, %c0_59, %c0_60] : memref<1x1x128xf32, #tpu.memory_space<vmem>>, vector<1x1x128xf32>
    %83 = vector.shape_cast %82 : vector<1x1x128xf32> to vector<1x128xf32>
    %84 = vector.shape_cast %81 : vector<1x128xf32> to vector<1x1x128xf32>
    tpu.vector_store %arg11[%c0_58, %c0_59, %c0_60], %84 {strides = array<i32>} : memref<1x1x128xf32, #tpu.memory_space<vmem>>, vector<1x1x128xf32>,
    %c0_61 = arith.constant 0 : index
    %c0_62 = arith.constant 0 : index
    %c0_63 = arith.constant 0 : index
    %85 = vector.load %arg12[%c0_61, %c0_62, %c0_63] : memref<1x1x128xf32, #tpu.memory_space<vmem>>, vector<1x1x128xf32>
    %86 = vector.shape_cast %85 : vector<1x1x128xf32> to vector<1x128xf32>
    %87 = arith.mulf %69, %69 : vector<128x128xf32>
    %cst_64 = arith.constant dense<0.000000e+00> : vector<128xf32>
    %88 = vector.multi_reduction <add>, %87, %cst_64 [0] : vector<128x128xf32> to vector<128xf32>
    %89 = vector.shape_cast %88 : vector<128xf32> to vector<1x128xf32>
    %90 = arith.addf %86, %89 : vector<1x128xf32>
    %c0_65 = arith.constant 0 : index
    %c0_66 = arith.constant 0 : index
    %c0_67 = arith.constant 0 : index
    %91 = vector.load %arg12[%c0_65, %c0_66, %c0_67] : memref<1x1x128xf32, #tpu.memory_space<vmem>>, vector<1x1x128xf32>
    %92 = vector.shape_cast %91 : vector<1x1x128xf32> to vector<1x128xf32>
    %93 = vector.shape_cast %90 : vector<1x128xf32> to vector<1x1x128xf32>
    tpu.vector_store %arg12[%c0_65, %c0_66, %c0_67], %93 {strides = array<i32>} : memref<1x1x128xf32, #tpu.memory_space<vmem>>, vector<1x1x128xf32>,
    return
  }
  func.func @transform_0(%arg0: i32, %arg1: i32) -> (i32, i32, i32, i32) {
    %c0_i32 = arith.constant 0 : i32
    %c0_i32_0 = arith.constant 0 : i32
    %c0_i32_1 = arith.constant 0 : i32
    %c0_i32_2 = arith.constant 0 : i32
    return %arg0, %c0_i32, %c0_i32_0, %c0_i32_1 : i32, i32, i32, i32
  }
  func.func @transform_1(%arg0: i32, %arg1: i32) -> (i32, i32) {
    %c0_i32 = arith.constant 0 : i32
    %c0_i32_0 = arith.constant 0 : i32
    %c0_i32_1 = arith.constant 0 : i32
    return %c0_i32, %c0_i32_0 : i32, i32
  }
  func.func @transform_2(%arg0: i32, %arg1: i32) -> (i32, i32) {
    %c0_i32 = arith.constant 0 : i32
    %c0_i32_0 = arith.constant 0 : i32
    %c0_i32_1 = arith.constant 0 : i32
    return %c0_i32, %c0_i32_0 : i32, i32
  }
  func.func @transform_3(%arg0: i32, %arg1: i32) -> (i32, i32) {
    %c0_i32 = arith.constant 0 : i32
    %c0_i32_0 = arith.constant 0 : i32
    %c0_i32_1 = arith.constant 0 : i32
    return %c0_i32, %c0_i32_0 : i32, i32
  }
  func.func @transform_4(%arg0: i32, %arg1: i32) -> (i32, i32) {
    %c0_i32 = arith.constant 0 : i32
    %c0_i32_0 = arith.constant 0 : i32
    %c0_i32_1 = arith.constant 0 : i32
    return %c0_i32, %c0_i32_0 : i32, i32
  }
  func.func @transform_5(%arg0: i32, %arg1: i32) -> (i32, i32, i32, i32) {
    %c0_i32 = arith.constant 0 : i32
    %c0_i32_0 = arith.constant 0 : i32
    %c0_i32_1 = arith.constant 0 : i32
    return %arg0, %arg1, %c0_i32, %c0_i32_0 : i32, i32, i32, i32
  }
  func.func @transform_6(%arg0: i32, %arg1: i32) -> (i32, i32, i32) {
    %c0_i32 = arith.constant 0 : i32
    %c0_i32_0 = arith.constant 0 : i32
    %c0_i32_1 = arith.constant 0 : i32
    return %arg0, %c0_i32, %c0_i32_0 : i32, i32, i32
  }
  func.func @transform_7(%arg0: i32, %arg1: i32) -> (i32, i32, i32) {
    %c0_i32 = arith.constant 0 : i32
    %c0_i32_0 = arith.constant 0 : i32
    %c0_i32_1 = arith.constant 0 : i32
    return %arg0, %c0_i32, %c0_i32_0 : i32, i32, i32
  }
  func.func @transform_8(%arg0: i32, %arg1: i32) -> (i32, i32, i32, i32) {
    %c0_i32 = arith.constant 0 : i32
    %c0_i32_0 = arith.constant 0 : i32
    %c0_i32_1 = arith.constant 0 : i32
    return %arg0, %arg1, %c0_i32, %c0_i32_0 : i32, i32, i32, i32
  }
  func.func @transform_9(%arg0: i32, %arg1: i32) -> (i32, i32, i32) {
    %c0_i32 = arith.constant 0 : i32
    %c0_i32_0 = arith.constant 0 : i32
    %c0_i32_1 = arith.constant 0 : i32
    return %arg0, %c0_i32, %c0_i32_0 : i32, i32, i32
  }
  func.func @transform_10(%arg0: i32, %arg1: i32) -> (i32, i32, i32) {
    %c0_i32 = arith.constant 0 : i32
    %c0_i32_0 = arith.constant 0 : i32
    %c0_i32_1 = arith.constant 0 : i32
    return %arg0, %c0_i32, %c0_i32_0 : i32, i32, i32
  }
}

module attributes {stable_mosaic.version = 11 : i64} {
  func.func @_conv_kernel(%arg0: i32, %arg1: i32, %arg2: memref<1x16x16x128xf32, #tpu.memory_space<vmem>>, %arg3: memref<1152x128xbf16, #tpu.memory_space<vmem>>, %arg4: memref<1x128xf32, #tpu.memory_space<vmem>>, %arg5: memref<1x128xf32, #tpu.memory_space<vmem>>, %arg6: memref<1x8x16x128xf32, #tpu.memory_space<vmem>>, %arg7: memref<1x1x128xf32, #tpu.memory_space<vmem>>, %arg8: memref<1x1x128xf32, #tpu.memory_space<vmem>>, %arg9: memref<18x18x128xbf16, #tpu.memory_space<vmem>>) attributes {dimension_semantics = [#tpu.dimension_semantics<parallel>, #tpu.dimension_semantics<arbitrary>], iteration_bounds = array<i64: 2, 2>, scalar_prefetch = 0 : i64, scratch_operands = 1 : i64, tpu.core_type = #tpu.core_type<tc>, window_params = [{transform_indices = @transform_0, window_bounds = array<i64: 1, 16, 16, 128>}, {pipeline_mode = #tpu.pipeline_mode<synchronous>, transform_indices = @transform_1, window_bounds = array<i64: 1152, 128>}, {pipeline_mode = #tpu.pipeline_mode<synchronous>, transform_indices = @transform_2, window_bounds = array<i64: 1, 128>}, {pipeline_mode = #tpu.pipeline_mode<synchronous>, transform_indices = @transform_3, window_bounds = array<i64: 1, 128>}, {transform_indices = @transform_4, window_bounds = array<i64: 1, 8, 16, 128>}, {transform_indices = @transform_5, window_bounds = array<i64: 1, 1, 128>}, {transform_indices = @transform_6, window_bounds = array<i64: 1, 1, 128>}]} {
    %c0_i32 = arith.constant 0 : i32
    %0 = arith.cmpi eq, %arg1, %c0_i32 : i32
    %1 = arith.extui %0 : i1 to i32
    %c0_i32_0 = arith.constant 0 : i32
    %2 = arith.cmpi ne, %1, %c0_i32_0 : i32
    scf.if %2 {
      %cst_45 = arith.constant 0.000000e+00 : bf16
      %68 = vector.broadcast %cst_45 : bf16 to vector<18x18x128xbf16>
      %c0_46 = arith.constant 0 : index
      %c0_47 = arith.constant 0 : index
      %c0_48 = arith.constant 0 : index
      %69 = vector.load %arg9[%c0_46, %c0_47, %c0_48] : memref<18x18x128xbf16, #tpu.memory_space<vmem>>, vector<18x18x128xbf16>
      tpu.vector_store %arg9[%c0_46, %c0_47, %c0_48], %68 {strides = array<i32>} : memref<18x18x128xbf16, #tpu.memory_space<vmem>>, vector<18x18x128xbf16>,
      %c0_49 = arith.constant 0 : index
      %c0_50 = arith.constant 0 : index
      %c0_51 = arith.constant 0 : index
      %c0_52 = arith.constant 0 : index
      %70 = vector.load %arg2[%c0_49, %c0_50, %c0_51, %c0_52] : memref<1x16x16x128xf32, #tpu.memory_space<vmem>>, vector<1x16x16x128xf32>
      %71 = vector.shape_cast %70 : vector<1x16x16x128xf32> to vector<16x16x128xf32>
      %c0_53 = arith.constant 0 : index
      %c0_54 = arith.constant 0 : index
      %72 = vector.load %arg4[%c0_53, %c0_54] : memref<1x128xf32, #tpu.memory_space<vmem>>, vector<1x128xf32>
      %73 = vector.shape_cast %72 : vector<1x128xf32> to vector<1x1x128xf32>
      %74 = vector.broadcast %73 : vector<1x1x128xf32> to vector<16x16x128xf32>
      %75 = arith.mulf %71, %74 : vector<16x16x128xf32>
      %c0_55 = arith.constant 0 : index
      %c0_56 = arith.constant 0 : index
      %76 = vector.load %arg5[%c0_55, %c0_56] : memref<1x128xf32, #tpu.memory_space<vmem>>, vector<1x128xf32>
      %77 = vector.shape_cast %76 : vector<1x128xf32> to vector<1x1x128xf32>
      %78 = vector.broadcast %77 : vector<1x1x128xf32> to vector<16x16x128xf32>
      %79 = arith.addf %75, %78 : vector<16x16x128xf32>
      %cst_57 = arith.constant 0.000000e+00 : f32
      %80 = vector.broadcast %cst_57 : f32 to vector<16x16x128xf32>
      %81 = arith.maximumf %79, %80 : vector<16x16x128xf32>
      %82 = arith.truncf %81 : vector<16x16x128xf32> to vector<16x16x128xbf16>
      %c1_58 = arith.constant 1 : index
      %c1_59 = arith.constant 1 : index
      %c0_60 = arith.constant 0 : index
      %83 = vector.load %arg9[%c1_58, %c1_59, %c0_60] : memref<18x18x128xbf16, #tpu.memory_space<vmem>>, vector<16x16x128xbf16>
      tpu.vector_store %arg9[%c1_58, %c1_59, %c0_60], %82 {strides = array<i32>} : memref<18x18x128xbf16, #tpu.memory_space<vmem>>, vector<16x16x128xbf16>,
    } else {
    }
    %c8_i32 = arith.constant 8 : i32
    %3 = arith.muli %arg1, %c8_i32 : i32
    %4 = tpu.assume_multiple %3, 8 : i32
    %c0_i32_1 = arith.constant 0 : i32
    %5 = arith.addi %4, %c0_i32_1 : i32
    %6 = arith.index_cast %5 : i32 to index
    %c0 = arith.constant 0 : index
    %c0_2 = arith.constant 0 : index
    %7 = vector.load %arg9[%6, %c0, %c0_2] : memref<18x18x128xbf16, #tpu.memory_space<vmem>>, vector<8x16x128xbf16>
    %8 = vector.shape_cast %7 : vector<8x16x128xbf16> to vector<128x128xbf16>
    %c0_i32_3 = arith.constant 0 : i32
    %9 = arith.addi %4, %c0_i32_3 : i32
    %10 = arith.index_cast %9 : i32 to index
    %c1 = arith.constant 1 : index
    %c0_4 = arith.constant 0 : index
    %11 = vector.load %arg9[%10, %c1, %c0_4] : memref<18x18x128xbf16, #tpu.memory_space<vmem>>, vector<8x16x128xbf16>
    %12 = vector.shape_cast %11 : vector<8x16x128xbf16> to vector<128x128xbf16>
    %c0_i32_5 = arith.constant 0 : i32
    %13 = arith.addi %4, %c0_i32_5 : i32
    %14 = arith.index_cast %13 : i32 to index
    %c2 = arith.constant 2 : index
    %c0_6 = arith.constant 0 : index
    %15 = vector.load %arg9[%14, %c2, %c0_6] : memref<18x18x128xbf16, #tpu.memory_space<vmem>>, vector<8x16x128xbf16>
    %16 = vector.shape_cast %15 : vector<8x16x128xbf16> to vector<128x128xbf16>
    %c1_i32 = arith.constant 1 : i32
    %17 = arith.addi %4, %c1_i32 : i32
    %18 = arith.index_cast %17 : i32 to index
    %c0_7 = arith.constant 0 : index
    %c0_8 = arith.constant 0 : index
    %19 = vector.load %arg9[%18, %c0_7, %c0_8] : memref<18x18x128xbf16, #tpu.memory_space<vmem>>, vector<8x16x128xbf16>
    %20 = vector.shape_cast %19 : vector<8x16x128xbf16> to vector<128x128xbf16>
    %c1_i32_9 = arith.constant 1 : i32
    %21 = arith.addi %4, %c1_i32_9 : i32
    %22 = arith.index_cast %21 : i32 to index
    %c1_10 = arith.constant 1 : index
    %c0_11 = arith.constant 0 : index
    %23 = vector.load %arg9[%22, %c1_10, %c0_11] : memref<18x18x128xbf16, #tpu.memory_space<vmem>>, vector<8x16x128xbf16>
    %24 = vector.shape_cast %23 : vector<8x16x128xbf16> to vector<128x128xbf16>
    %c1_i32_12 = arith.constant 1 : i32
    %25 = arith.addi %4, %c1_i32_12 : i32
    %26 = arith.index_cast %25 : i32 to index
    %c2_13 = arith.constant 2 : index
    %c0_14 = arith.constant 0 : index
    %27 = vector.load %arg9[%26, %c2_13, %c0_14] : memref<18x18x128xbf16, #tpu.memory_space<vmem>>, vector<8x16x128xbf16>
    %28 = vector.shape_cast %27 : vector<8x16x128xbf16> to vector<128x128xbf16>
    %c2_i32 = arith.constant 2 : i32
    %29 = arith.addi %4, %c2_i32 : i32
    %30 = arith.index_cast %29 : i32 to index
    %c0_15 = arith.constant 0 : index
    %c0_16 = arith.constant 0 : index
    %31 = vector.load %arg9[%30, %c0_15, %c0_16] : memref<18x18x128xbf16, #tpu.memory_space<vmem>>, vector<8x16x128xbf16>
    %32 = vector.shape_cast %31 : vector<8x16x128xbf16> to vector<128x128xbf16>
    %c2_i32_17 = arith.constant 2 : i32
    %33 = arith.addi %4, %c2_i32_17 : i32
    %34 = arith.index_cast %33 : i32 to index
    %c1_18 = arith.constant 1 : index
    %c0_19 = arith.constant 0 : index
    %35 = vector.load %arg9[%34, %c1_18, %c0_19] : memref<18x18x128xbf16, #tpu.memory_space<vmem>>, vector<8x16x128xbf16>
    %36 = vector.shape_cast %35 : vector<8x16x128xbf16> to vector<128x128xbf16>
    %c2_i32_20 = arith.constant 2 : i32
    %37 = arith.addi %4, %c2_i32_20 : i32
    %38 = arith.index_cast %37 : i32 to index
    %c2_21 = arith.constant 2 : index
    %c0_22 = arith.constant 0 : index
    %39 = vector.load %arg9[%38, %c2_21, %c0_22] : memref<18x18x128xbf16, #tpu.memory_space<vmem>>, vector<8x16x128xbf16>
    %40 = vector.shape_cast %39 : vector<8x16x128xbf16> to vector<128x128xbf16>
    %41 = tpu.concatenate %8, %12, %16, %20, %24, %28, %32, %36, %40 in 1 : vector<128x128xbf16>, vector<128x128xbf16>, vector<128x128xbf16>, vector<128x128xbf16>, vector<128x128xbf16>, vector<128x128xbf16>, vector<128x128xbf16>, vector<128x128xbf16>, vector<128x128xbf16> -> vector<128x1152xbf16>
    %c0_23 = arith.constant 0 : index
    %c0_24 = arith.constant 0 : index
    %42 = vector.load %arg3[%c0_23, %c0_24] : memref<1152x128xbf16, #tpu.memory_space<vmem>>, vector<1152x128xbf16>
    %cst = arith.constant dense<0.000000e+00> : vector<128x128xf32>
    %43 = tpu.matmul %41, %42, %cst {dimension_numbers = #tpu.dot_dimension_numbers<[1], [0], [0], [1], [0, 0, 1, 1], [], []>} : vector<128x1152xbf16>, vector<1152x128xbf16>, vector<128x128xf32> -> vector<128x128xf32>
    %44 = vector.shape_cast %43 : vector<128x128xf32> to vector<8x16x128xf32>
    %c0_25 = arith.constant 0 : index
    %c0_26 = arith.constant 0 : index
    %c0_27 = arith.constant 0 : index
    %c0_28 = arith.constant 0 : index
    %45 = vector.load %arg6[%c0_25, %c0_26, %c0_27, %c0_28] : memref<1x8x16x128xf32, #tpu.memory_space<vmem>>, vector<1x8x16x128xf32>
    %46 = vector.shape_cast %45 : vector<1x8x16x128xf32> to vector<8x16x128xf32>
    %47 = vector.shape_cast %44 : vector<8x16x128xf32> to vector<1x8x16x128xf32>
    tpu.vector_store %arg6[%c0_25, %c0_26, %c0_27, %c0_28], %47 {strides = array<i32>} : memref<1x8x16x128xf32, #tpu.memory_space<vmem>>, vector<1x8x16x128xf32>,
    %c0_i32_29 = arith.constant 0 : i32
    %48 = arith.cmpi eq, %arg1, %c0_i32_29 : i32
    %49 = arith.extui %48 : i1 to i32
    %c0_i32_30 = arith.constant 0 : i32
    %50 = arith.cmpi ne, %49, %c0_i32_30 : i32
    scf.if %50 {
      %cst_45 = arith.constant 0.000000e+00 : f32
      %68 = vector.broadcast %cst_45 : f32 to vector<1x128xf32>
      %c0_46 = arith.constant 0 : index
      %c0_47 = arith.constant 0 : index
      %c0_48 = arith.constant 0 : index
      %69 = vector.load %arg7[%c0_46, %c0_47, %c0_48] : memref<1x1x128xf32, #tpu.memory_space<vmem>>, vector<1x1x128xf32>
      %70 = vector.shape_cast %69 : vector<1x1x128xf32> to vector<1x128xf32>
      %71 = vector.shape_cast %68 : vector<1x128xf32> to vector<1x1x128xf32>
      tpu.vector_store %arg7[%c0_46, %c0_47, %c0_48], %71 {strides = array<i32>} : memref<1x1x128xf32, #tpu.memory_space<vmem>>, vector<1x1x128xf32>,
      %cst_49 = arith.constant 0.000000e+00 : f32
      %72 = vector.broadcast %cst_49 : f32 to vector<1x128xf32>
      %c0_50 = arith.constant 0 : index
      %c0_51 = arith.constant 0 : index
      %c0_52 = arith.constant 0 : index
      %73 = vector.load %arg8[%c0_50, %c0_51, %c0_52] : memref<1x1x128xf32, #tpu.memory_space<vmem>>, vector<1x1x128xf32>
      %74 = vector.shape_cast %73 : vector<1x1x128xf32> to vector<1x128xf32>
      %75 = vector.shape_cast %72 : vector<1x128xf32> to vector<1x1x128xf32>
      tpu.vector_store %arg8[%c0_50, %c0_51, %c0_52], %75 {strides = array<i32>} : memref<1x1x128xf32, #tpu.memory_space<vmem>>, vector<1x1x128xf32>,
    } else {
    }
    %c0_31 = arith.constant 0 : index
    %c0_32 = arith.constant 0 : index
    %c0_33 = arith.constant 0 : index
    %51 = vector.load %arg7[%c0_31, %c0_32, %c0_33] : memref<1x1x128xf32, #tpu.memory_space<vmem>>, vector<1x1x128xf32>
    %52 = vector.shape_cast %51 : vector<1x1x128xf32> to vector<1x128xf32>
    %cst_34 = arith.constant dense<0.000000e+00> : vector<128xf32>
    %53 = vector.multi_reduction <add>, %43, %cst_34 [0] : vector<128x128xf32> to vector<128xf32>
    %54 = vector.shape_cast %53 : vector<128xf32> to vector<1x128xf32>
    %55 = arith.addf %52, %54 : vector<1x128xf32>
    %c0_35 = arith.constant 0 : index
    %c0_36 = arith.constant 0 : index
    %c0_37 = arith.constant 0 : index
    %56 = vector.load %arg7[%c0_35, %c0_36, %c0_37] : memref<1x1x128xf32, #tpu.memory_space<vmem>>, vector<1x1x128xf32>
    %57 = vector.shape_cast %56 : vector<1x1x128xf32> to vector<1x128xf32>
    %58 = vector.shape_cast %55 : vector<1x128xf32> to vector<1x1x128xf32>
    tpu.vector_store %arg7[%c0_35, %c0_36, %c0_37], %58 {strides = array<i32>} : memref<1x1x128xf32, #tpu.memory_space<vmem>>, vector<1x1x128xf32>,
    %c0_38 = arith.constant 0 : index
    %c0_39 = arith.constant 0 : index
    %c0_40 = arith.constant 0 : index
    %59 = vector.load %arg8[%c0_38, %c0_39, %c0_40] : memref<1x1x128xf32, #tpu.memory_space<vmem>>, vector<1x1x128xf32>
    %60 = vector.shape_cast %59 : vector<1x1x128xf32> to vector<1x128xf32>
    %61 = arith.mulf %43, %43 : vector<128x128xf32>
    %cst_41 = arith.constant dense<0.000000e+00> : vector<128xf32>
    %62 = vector.multi_reduction <add>, %61, %cst_41 [0] : vector<128x128xf32> to vector<128xf32>
    %63 = vector.shape_cast %62 : vector<128xf32> to vector<1x128xf32>
    %64 = arith.addf %60, %63 : vector<1x128xf32>
    %c0_42 = arith.constant 0 : index
    %c0_43 = arith.constant 0 : index
    %c0_44 = arith.constant 0 : index
    %65 = vector.load %arg8[%c0_42, %c0_43, %c0_44] : memref<1x1x128xf32, #tpu.memory_space<vmem>>, vector<1x1x128xf32>
    %66 = vector.shape_cast %65 : vector<1x1x128xf32> to vector<1x128xf32>
    %67 = vector.shape_cast %64 : vector<1x128xf32> to vector<1x1x128xf32>
    tpu.vector_store %arg8[%c0_42, %c0_43, %c0_44], %67 {strides = array<i32>} : memref<1x1x128xf32, #tpu.memory_space<vmem>>, vector<1x1x128xf32>,
    return
  }
  func.func @transform_0(%arg0: i32, %arg1: i32) -> (i32, i32, i32, i32) {
    %c0_i32 = arith.constant 0 : i32
    %c0_i32_0 = arith.constant 0 : i32
    %c0_i32_1 = arith.constant 0 : i32
    %c0_i32_2 = arith.constant 0 : i32
    return %arg0, %c0_i32, %c0_i32_0, %c0_i32_1 : i32, i32, i32, i32
  }
  func.func @transform_1(%arg0: i32, %arg1: i32) -> (i32, i32) {
    %c0_i32 = arith.constant 0 : i32
    %c0_i32_0 = arith.constant 0 : i32
    %c0_i32_1 = arith.constant 0 : i32
    return %c0_i32, %c0_i32_0 : i32, i32
  }
  func.func @transform_2(%arg0: i32, %arg1: i32) -> (i32, i32) {
    %c0_i32 = arith.constant 0 : i32
    %c0_i32_0 = arith.constant 0 : i32
    %c0_i32_1 = arith.constant 0 : i32
    return %c0_i32, %c0_i32_0 : i32, i32
  }
  func.func @transform_3(%arg0: i32, %arg1: i32) -> (i32, i32) {
    %c0_i32 = arith.constant 0 : i32
    %c0_i32_0 = arith.constant 0 : i32
    %c0_i32_1 = arith.constant 0 : i32
    return %c0_i32, %c0_i32_0 : i32, i32
  }
  func.func @transform_4(%arg0: i32, %arg1: i32) -> (i32, i32, i32, i32) {
    %c0_i32 = arith.constant 0 : i32
    %c0_i32_0 = arith.constant 0 : i32
    %c0_i32_1 = arith.constant 0 : i32
    return %arg0, %arg1, %c0_i32, %c0_i32_0 : i32, i32, i32, i32
  }
  func.func @transform_5(%arg0: i32, %arg1: i32) -> (i32, i32, i32) {
    %c0_i32 = arith.constant 0 : i32
    %c0_i32_0 = arith.constant 0 : i32
    %c0_i32_1 = arith.constant 0 : i32
    return %arg0, %c0_i32, %c0_i32_0 : i32, i32, i32
  }
  func.func @transform_6(%arg0: i32, %arg1: i32) -> (i32, i32, i32) {
    %c0_i32 = arith.constant 0 : i32
    %c0_i32_0 = arith.constant 0 : i32
    %c0_i32_1 = arith.constant 0 : i32
    return %arg0, %c0_i32, %c0_i32_0 : i32, i32, i32
  }
}

module attributes {stable_mosaic.version = 11 : i64} {
  func.func @_fuse_kernel(%arg0: i32, %arg1: i32, %arg2: memref<1x8x16x128xf32, #tpu.memory_space<vmem>>, %arg3: memref<1x128xf32, #tpu.memory_space<vmem>>, %arg4: memref<1x128xf32, #tpu.memory_space<vmem>>, %arg5: memref<1x8x16x128xf32, #tpu.memory_space<vmem>>, %arg6: memref<1x128xf32, #tpu.memory_space<vmem>>, %arg7: memref<1x128xf32, #tpu.memory_space<vmem>>, %arg8: memref<1x8x16x128xf32, #tpu.memory_space<vmem>>) attributes {dimension_semantics = [#tpu.dimension_semantics<parallel>, #tpu.dimension_semantics<parallel>], iteration_bounds = array<i64: 2, 2>, scalar_prefetch = 0 : i64, scratch_operands = 0 : i64, tpu.core_type = #tpu.core_type<tc>, window_params = [{transform_indices = @transform_0, window_bounds = array<i64: 1, 8, 16, 128>}, {pipeline_mode = #tpu.pipeline_mode<synchronous>, transform_indices = @transform_1, window_bounds = array<i64: 1, 128>}, {pipeline_mode = #tpu.pipeline_mode<synchronous>, transform_indices = @transform_2, window_bounds = array<i64: 1, 128>}, {transform_indices = @transform_3, window_bounds = array<i64: 1, 8, 16, 128>}, {pipeline_mode = #tpu.pipeline_mode<synchronous>, transform_indices = @transform_4, window_bounds = array<i64: 1, 128>}, {pipeline_mode = #tpu.pipeline_mode<synchronous>, transform_indices = @transform_5, window_bounds = array<i64: 1, 128>}, {transform_indices = @transform_6, window_bounds = array<i64: 1, 8, 16, 128>}]} {
    %c0 = arith.constant 0 : index
    %c0_0 = arith.constant 0 : index
    %c0_1 = arith.constant 0 : index
    %c0_2 = arith.constant 0 : index
    %0 = vector.load %arg2[%c0, %c0_0, %c0_1, %c0_2] : memref<1x8x16x128xf32, #tpu.memory_space<vmem>>, vector<1x8x16x128xf32>
    %1 = vector.shape_cast %0 : vector<1x8x16x128xf32> to vector<8x16x128xf32>
    %c0_3 = arith.constant 0 : index
    %c0_4 = arith.constant 0 : index
    %2 = vector.load %arg3[%c0_3, %c0_4] : memref<1x128xf32, #tpu.memory_space<vmem>>, vector<1x128xf32>
    %3 = vector.shape_cast %2 : vector<1x128xf32> to vector<1x1x128xf32>
    %4 = vector.broadcast %3 : vector<1x1x128xf32> to vector<8x16x128xf32>
    %5 = arith.mulf %1, %4 : vector<8x16x128xf32>
    %c0_5 = arith.constant 0 : index
    %c0_6 = arith.constant 0 : index
    %6 = vector.load %arg4[%c0_5, %c0_6] : memref<1x128xf32, #tpu.memory_space<vmem>>, vector<1x128xf32>
    %7 = vector.shape_cast %6 : vector<1x128xf32> to vector<1x1x128xf32>
    %8 = vector.broadcast %7 : vector<1x1x128xf32> to vector<8x16x128xf32>
    %9 = arith.addf %5, %8 : vector<8x16x128xf32>
    %c0_7 = arith.constant 0 : index
    %c0_8 = arith.constant 0 : index
    %c0_9 = arith.constant 0 : index
    %c0_10 = arith.constant 0 : index
    %10 = vector.load %arg5[%c0_7, %c0_8, %c0_9, %c0_10] : memref<1x8x16x128xf32, #tpu.memory_space<vmem>>, vector<1x8x16x128xf32>
    %11 = vector.shape_cast %10 : vector<1x8x16x128xf32> to vector<8x16x128xf32>
    %c0_11 = arith.constant 0 : index
    %c0_12 = arith.constant 0 : index
    %12 = vector.load %arg6[%c0_11, %c0_12] : memref<1x128xf32, #tpu.memory_space<vmem>>, vector<1x128xf32>
    %13 = vector.shape_cast %12 : vector<1x128xf32> to vector<1x1x128xf32>
    %14 = vector.broadcast %13 : vector<1x1x128xf32> to vector<8x16x128xf32>
    %15 = arith.mulf %11, %14 : vector<8x16x128xf32>
    %c0_13 = arith.constant 0 : index
    %c0_14 = arith.constant 0 : index
    %16 = vector.load %arg7[%c0_13, %c0_14] : memref<1x128xf32, #tpu.memory_space<vmem>>, vector<1x128xf32>
    %17 = vector.shape_cast %16 : vector<1x128xf32> to vector<1x1x128xf32>
    %18 = vector.broadcast %17 : vector<1x1x128xf32> to vector<8x16x128xf32>
    %19 = arith.addf %15, %18 : vector<8x16x128xf32>
    %20 = arith.addf %9, %19 : vector<8x16x128xf32>
    %cst = arith.constant 0.000000e+00 : f32
    %21 = vector.broadcast %cst : f32 to vector<8x16x128xf32>
    %22 = arith.maximumf %20, %21 : vector<8x16x128xf32>
    %c0_15 = arith.constant 0 : index
    %c0_16 = arith.constant 0 : index
    %c0_17 = arith.constant 0 : index
    %c0_18 = arith.constant 0 : index
    %23 = vector.load %arg8[%c0_15, %c0_16, %c0_17, %c0_18] : memref<1x8x16x128xf32, #tpu.memory_space<vmem>>, vector<1x8x16x128xf32>
    %24 = vector.shape_cast %23 : vector<1x8x16x128xf32> to vector<8x16x128xf32>
    %25 = vector.shape_cast %22 : vector<8x16x128xf32> to vector<1x8x16x128xf32>
    tpu.vector_store %arg8[%c0_15, %c0_16, %c0_17, %c0_18], %25 {strides = array<i32>} : memref<1x8x16x128xf32, #tpu.memory_space<vmem>>, vector<1x8x16x128xf32>,
    return
  }
  func.func @transform_0(%arg0: i32, %arg1: i32) -> (i32, i32, i32, i32) {
    %c0_i32 = arith.constant 0 : i32
    %c0_i32_0 = arith.constant 0 : i32
    %c0_i32_1 = arith.constant 0 : i32
    return %arg0, %arg1, %c0_i32, %c0_i32_0 : i32, i32, i32, i32
  }
  func.func @transform_1(%arg0: i32, %arg1: i32) -> (i32, i32) {
    %c0_i32 = arith.constant 0 : i32
    %c0_i32_0 = arith.constant 0 : i32
    %c0_i32_1 = arith.constant 0 : i32
    return %c0_i32, %c0_i32_0 : i32, i32
  }
  func.func @transform_2(%arg0: i32, %arg1: i32) -> (i32, i32) {
    %c0_i32 = arith.constant 0 : i32
    %c0_i32_0 = arith.constant 0 : i32
    %c0_i32_1 = arith.constant 0 : i32
    return %c0_i32, %c0_i32_0 : i32, i32
  }
  func.func @transform_3(%arg0: i32, %arg1: i32) -> (i32, i32, i32, i32) {
    %c0_i32 = arith.constant 0 : i32
    %c0_i32_0 = arith.constant 0 : i32
    %c0_i32_1 = arith.constant 0 : i32
    return %arg0, %arg1, %c0_i32, %c0_i32_0 : i32, i32, i32, i32
  }
  func.func @transform_4(%arg0: i32, %arg1: i32) -> (i32, i32) {
    %c0_i32 = arith.constant 0 : i32
    %c0_i32_0 = arith.constant 0 : i32
    %c0_i32_1 = arith.constant 0 : i32
    return %c0_i32, %c0_i32_0 : i32, i32
  }
  func.func @transform_5(%arg0: i32, %arg1: i32) -> (i32, i32) {
    %c0_i32 = arith.constant 0 : i32
    %c0_i32_0 = arith.constant 0 : i32
    %c0_i32_1 = arith.constant 0 : i32
    return %c0_i32, %c0_i32_0 : i32, i32
  }
  func.func @transform_6(%arg0: i32, %arg1: i32) -> (i32, i32, i32, i32) {
    %c0_i32 = arith.constant 0 : i32
    %c0_i32_0 = arith.constant 0 : i32
    %c0_i32_1 = arith.constant 0 : i32
    return %arg0, %arg1, %c0_i32, %c0_i32_0 : i32, i32, i32, i32
  }
}

</mosaic_0001>

<bundles_post_ra>
// kernel: basic_block_forward.5
= control target key start
LH: loop header
LB: loop body
LE: loop exit
PB: predicated region body
PF: predicated region fallthrough
CT: control target
= control target key end

     0   :  { %s765_s21 = smov 0   ;;  %s767_s22 = smov 0   ;;  %s962_s0 = inlined_call_operand.vmem [shape: f32[2,16,16,128], index: 0, kind: input, shape index: {}]   ;;  %s963_s1 = inlined_call_operand.vmem [shape: f32[1,128], index: 1, kind: input, shape index: {}]   ;;  %s964_s2 = inlined_call_operand.vmem [shape: f32[1,128], index: 2, kind: input, shape index: {}]   ;;  %s965_s3 = inlined_call_operand.vmem [shape: f32[2,16,16,128], index: 3, kind: input, shape index: {}]   ;;  %s966_s4 = inlined_call_operand.vmem [shape: f32[1,128], index: 4, kind: input, shape index: {}]   ;;  %s967_s5 = inlined_call_operand.vmem [shape: f32[1,128], index: 5, kind: input, shape index: {}]   ;;  %s968_s6 = inlined_call_operand.vmem [shape: f32[2,16,16,128], index: 6, kind: output, shape index: {}]  }
   0x1   :  { %s769_s23 = smov 0   ;;  %s771_s24 = smov 0  }
   0x2   :  { %s773_s25 = smov 0  }
   0x3 LB: > { %s25_s26 = sadd.s32 1, %s720_s23  ;;  %s28_s27 = sadd.s32 1, %s724_s24  ;;  %s728_s25 = sphi %s773_s25, %s16_s25   ;;  %s724_s24 = sphi %s771_s24, %s972_s24   ;;  %s720_s23 = sphi %s769_s23, %s971_s23   ;;  %s716_s22 = sphi %s767_s22, %s970_s22   ;;  %s712_s21 = sphi %s765_s21, %s969_s21  }
   0x4   : > { %p26_p0 = scmp.ge.s32.totalorder %s25_s26, 2  ;;  %p631_p1 = scmp.ge.s32.totalorder %s728_s25, 1 }
   0x5   : > { %p252_p2 = scmp.lt.s32.totalorder %s728_s25, 5 }
   0x6   : > { %s974_s26 = smov (%p26_p0, %s25_s26), 0  ;;  %s976_s27 = smov (!%p26_p0, %s28_s27), %s724_s24 }
   0x7   : > { %p253_p3 = pnand %p631_p1, %p252_p2  ;;  %p30_p4 = scmp.ge.s32.totalorder %s976_s27, 2 }
   0x8   : > { %s632_s28 = sshll.u32 (!%p253_p3), %s712_s21, 3  ;;  %p303_p5 = scmp.lt.s32.totalorder (!%p253_p3), %s716_s22, 1  ;;  %v800_v0 = vld [vmem:[%s963_s1] ss:$0 sm:$0xff] (!%p253_p3) }
   0x9   : > { %s978_s27 = smov (%p30_p4, %s976_s27), 0  ;;  %256 = sbr.rel (%p253_p3) target bundleno = 52 (0x34), region = 44 }
   0xa   : > { %p305_p6 = scmp.lt.s32.totalorder (!%p253_p3), %s632_s28, 15  ;;  %v805_v1 = vld [vmem:[%s966_s4] ss:$0 sm:$0xff] (!%p253_p3) }
   0xb   : > { %v822_v2 = vld [vmem:[%s964_s2] ss:$0 sm:$0xff] (!%p253_p3) }
   0xc   : > { %v827_v3 = vld [vmem:[%s967_s5] ss:$0 sm:$0xff] (!%p253_p3) }
  0x10   : > { %s980_s22 = smov (!%p303_p5, %s716_s22), 1  ;;  %s982_s28 = smov (!%p305_p6, %s632_s28), 15 }
  0x11   : > { %s634_s29 = sshll.u32 %s980_s22, 5  ;;  %s633_s30 = sshll.u32 %s982_s28, 1 }
  0x12   : > { %s309_s7 = sadd.s32 %s634_s29, %s633_s30 }
  0x13   : > { %s795_s8 = sshll.u32 %s309_s7, 3 }
  0x14   : > { %s811_s15 = scalar_lea.vmem %s962_s0, %s795_s8  ;;  %s817_s18 = scalar_lea.vmem %s965_s3, %s795_s8 }
  0x15   : > { %v335_v4 = vld [vmem:[%s811_s15] sm:$0xff]  ;;  %v336_v6 = vld [vmem:[%s811_s15 + $0x8] sm:$0xff]  ;;  %v337_v11 = vld [vmem:[%s811_s15 + $0x10] sm:$0xff]  ;;  %s862_s30 = scalar_lea.vmem %s968_s6, %s795_s8 }
  0x16   : > { %v397_v5 = vld [vmem:[%s817_s18] sm:$0xff]  ;;  %v358_v7 = vmul.f32 %v800_v0, %v335_v4  ;;  %v359_v9 = vmul.f32 %v800_v0, %v336_v6  ;;  %v398_v10 = vld [vmem:[%s817_s18 + $0x8] sm:$0xff]  ;;  %v399_v12 = vld [vmem:[%s817_s18 + $0x10] sm:$0xff]  ;;  %v360_v14 = vmul.f32 %v800_v0, %v337_v11 }
  0x17   : > { %v420_v8 = vmul.f32 %v805_v1, %v397_v5  ;;  %v421_v13 = vmul.f32 %v805_v1, %v398_v10  ;;  %v422_v15 = vmul.f32 %v805_v1, %v399_v12  ;;  %v338_v16 = vld [vmem:[%s811_s15 + $0x18] sm:$0xff]  ;;  %v339_v18 = vld [vmem:[%s811_s15 + $0x20] sm:$0xff]  ;;  %v340_v24 = vld [vmem:[%s811_s15 + $0x28] sm:$0xff] }
  0x18   : > { %v400_v17 = vld [vmem:[%s817_s18 + $0x18] sm:$0xff]  ;;  %v381_v19 = vadd.f32 %v822_v2, %v358_v7  ;;  %v382_v21 = vadd.f32 %v822_v2, %v359_v9  ;;  %v361_v22 = vmul.f32 %v800_v0, %v338_v16  ;;  %v401_v23 = vld [vmem:[%s817_s18 + $0x20] sm:$0xff]  ;;  %v383_v26 = vadd.f32 %v822_v2, %v360_v14  ;;  %v402_v29 = vld [vmem:[%s817_s18 + $0x28] sm:$0xff] }
  0x19   : > { %v443_v20 = vadd.f32 %v827_v3, %v420_v8  ;;  %v444_v25 = vadd.f32 %v827_v3, %v421_v13  ;;  %v445_v27 = vadd.f32 %v827_v3, %v422_v15  ;;  %v423_v28 = vmul.f32 %v805_v1, %v400_v17  ;;  %v341_v38 = vld [vmem:[%s811_s15 + $0x30] sm:$0xff]  ;;  %v342_v44 = vld [vmem:[%s811_s15 + $0x38] sm:$0xff]  ;;  %v343_v46 = vld [vmem:[%s811_s15 + $0x40] sm:$0xff] }
  0x1a   : > { %v384_v31 = vadd.f32 %v822_v2, %v361_v22  ;;  %v362_v32 = vmul.f32 %v800_v0, %v339_v18  ;;  %v424_v33 = vmul.f32 %v805_v1, %v401_v23  ;;  %v363_v37 = vmul.f32 %v800_v0, %v340_v24  ;;  %v403_v39 = vld [vmem:[%s817_s18 + $0x30] sm:$0xff]  ;;  %v404_v45 = vld [vmem:[%s817_s18 + $0x38] sm:$0xff]  ;;  %v405_v55 = vld [vmem:[%s817_s18 + $0x40] sm:$0xff] }
  0x1b   : > { %v459_v30 = vadd.f32 %v443_v20, %v381_v19  ;;  %v460_v34 = vadd.f32 %v444_v25, %v382_v21  ;;  %v461_v35 = vadd.f32 %v445_v27, %v383_v26  ;;  %v446_v36 = vadd.f32 %v827_v3, %v423_v28  ;;  %v344_v60 = vld [vmem:[%s811_s15 + $0x48] sm:$0xff]  ;;  %v345_v6 = vld [vmem:[%s811_s15 + $0x50] sm:$0xff]  ;;  %v346_v12 = vld [vmem:[%s811_s15 + $0x58] sm:$0xff] }
  0x1c   : > { %v385_v41 = vadd.f32 %v822_v2, %v362_v32  ;;  %v447_v42 = vadd.f32 %v827_v3, %v424_v33  ;;  %v425_v43 = vmul.f32 %v805_v1, %v402_v29  ;;  %v386_v50 = vadd.f32 %v822_v2, %v363_v37  ;;  %v406_v61 = vld [vmem:[%s817_s18 + $0x48] sm:$0xff]  ;;  %v407_v7 = vld [vmem:[%s817_s18 + $0x50] sm:$0xff]  ;;  %v408_v21 = vld [vmem:[%s817_s18 + $0x58] sm:$0xff] }
  0x1d   : > { %v475_v40 = vmax.f32 %v459_v30, 0.0  ;;  %v476_v47 = vmax.f32 %v460_v34, 0.0  ;;  %v477_v48 = vmax.f32 %v461_v35, 0.0  ;;  %v462_v49 = vadd.f32 %v446_v36, %v384_v31  ;;  %v347_v22 = vld [vmem:[%s811_s15 + $0x60] sm:$0xff]  ;;  %v348_v28 = vld [vmem:[%s811_s15 + $0x68] sm:$0xff] }
  0x1e   : > { %v463_v51 = vadd.f32 %v447_v42, %v385_v41  ;;  %v448_v52 = vadd.f32 %v827_v3, %v425_v43  ;;  %v364_v53 = vmul.f32 %v800_v0, %v341_v38  ;;  %v426_v54 = vmul.f32 %v805_v1, %v403_v39  ;;  %v409_v27 = vld [vmem:[%s817_s18 + $0x60] sm:$0xff]  ;;  %v410_v33 = vld [vmem:[%s817_s18 + $0x68] sm:$0xff]  ;;  %v349_v38 = vld [vmem:[%s811_s15 + $0x70] sm:$0xff] }
  0x1f   : > { %491 = vst [vmem:[%s862_s30] sm:$0xff] %v475_v40  ;;  %492 = vst [vmem:[%s862_s30 + $0x8] sm:$0xff] %v476_v47  ;;  %v478_v56 = vmax.f32 %v462_v49, 0.0  ;;  %v365_v57 = vmul.f32 %v800_v0, %v342_v44  ;;  %v427_v58 = vmul.f32 %v805_v1, %v404_v45  ;;  %v366_v59 = vmul.f32 %v800_v0, %v343_v46  ;;  %v411_v43 = vld [vmem:[%s817_s18 + $0x70] sm:$0xff]  ;;  %v350_v44 = vld [vmem:[%s811_s15 + $0x78] sm:$0xff] }
  0x20   : > { %493 = vst [vmem:[%s862_s30 + $0x10] sm:$0xff] %v477_v48  ;;  %v479_v62 = vmax.f32 %v463_v51, 0.0  ;;  %v464_v63 = vadd.f32 %v448_v52, %v386_v50  ;;  %v387_v4 = vadd.f32 %v822_v2, %v364_v53  ;;  %v449_v5 = vadd.f32 %v827_v3, %v426_v54  ;;  %v412_v49 = vld [vmem:[%s817_s18 + $0x78] sm:$0xff] }
  0x21   : > { %494 = vst [vmem:[%s862_s30 + $0x18] sm:$0xff] %v478_v56  ;;  %v388_v8 = vadd.f32 %v822_v2, %v365_v57  ;;  %v450_v9 = vadd.f32 %v827_v3, %v427_v58  ;;  %v389_v10 = vadd.f32 %v822_v2, %v366_v59  ;;  %v428_v11 = vmul.f32 %v805_v1, %v405_v55 }
  0x22   : > { %495 = vst [vmem:[%s862_s30 + $0x20] sm:$0xff] %v479_v62  ;;  %v480_v13 = vmax.f32 %v464_v63, 0.0  ;;  %v465_v14 = vadd.f32 %v449_v5, %v387_v4  ;;  %v367_v15 = vmul.f32 %v800_v0, %v344_v60  ;;  %v429_v16 = vmul.f32 %v805_v1, %v406_v61 }
  0x23   : > { %v466_v17 = vadd.f32 %v450_v9, %v388_v8  ;;  %v451_v18 = vadd.f32 %v827_v3, %v428_v11  ;;  %v368_v19 = vmul.f32 %v800_v0, %v345_v6  ;;  %v430_v20 = vmul.f32 %v805_v1, %v407_v7 }
  0x24   : > { %496 = vst [vmem:[%s862_s30 + $0x28] sm:$0xff] %v480_v13  ;;  %v481_v23 = vmax.f32 %v465_v14, 0.0  ;;  %v390_v24 = vadd.f32 %v822_v2, %v367_v15  ;;  %v452_v25 = vadd.f32 %v827_v3, %v429_v16  ;;  %v369_v26 = vmul.f32 %v800_v0, %v346_v12 }
  0x25   : > { %v482_v29 = vmax.f32 %v466_v17, 0.0  ;;  %v467_v30 = vadd.f32 %v451_v18, %v389_v10  ;;  %v391_v31 = vadd.f32 %v822_v2, %v368_v19  ;;  %v453_v32 = vadd.f32 %v827_v3, %v430_v20 }
  0x26   : > { %497 = vst [vmem:[%s862_s30 + $0x30] sm:$0xff] %v481_v23  ;;  %v468_v34 = vadd.f32 %v452_v25, %v390_v24  ;;  %v392_v35 = vadd.f32 %v822_v2, %v369_v26  ;;  %v431_v36 = vmul.f32 %v805_v1, %v408_v21  ;;  %v370_v37 = vmul.f32 %v800_v0, %v347_v22 }
  0x27   : > { %498 = vst [vmem:[%s862_s30 + $0x38] sm:$0xff] %v482_v29  ;;  %v483_v39 = vmax.f32 %v467_v30, 0.0  ;;  %v469_v40 = vadd.f32 %v453_v32, %v391_v31  ;;  %v432_v41 = vmul.f32 %v805_v1, %v409_v27  ;;  %v371_v42 = vmul.f32 %v800_v0, %v348_v28 }
  0x28   : > { %v484_v45 = vmax.f32 %v468_v34, 0.0  ;;  %v454_v46 = vadd.f32 %v827_v3, %v431_v36  ;;  %v393_v47 = vadd.f32 %v822_v2, %v370_v37  ;;  %v433_v48 = vmul.f32 %v805_v1, %v410_v33 }
  0x29   : > { %499 = vst [vmem:[%s862_s30 + $0x40] sm:$0xff] %v483_v39  ;;  %v485_v50 = vmax.f32 %v469_v40, 0.0  ;;  %v455_v51 = vadd.f32 %v827_v3, %v432_v41  ;;  %v394_v52 = vadd.f32 %v822_v2, %v371_v42  ;;  %v372_v53 = vmul.f32 %v800_v0, %v349_v38 }
  0x2a   : > { %500 = vst [vmem:[%s862_s30 + $0x48] sm:$0xff] %v484_v45  ;;  %v470_v54 = vadd.f32 %v454_v46, %v392_v35  ;;  %v456_v55 = vadd.f32 %v827_v3, %v433_v48  ;;  %v434_v56 = vmul.f32 %v805_v1, %v411_v43  ;;  %v373_v57 = vmul.f32 %v800_v0, %v350_v44 }
  0x2b   : > { %501 = vst [vmem:[%s862_s30 + $0x50] sm:$0xff] %v485_v50  ;;  %v471_v58 = vadd.f32 %v455_v51, %v393_v47  ;;  %v395_v59 = vadd.f32 %v822_v2, %v372_v53  ;;  %v435_v60 = vmul.f32 %v805_v1, %v412_v49 }
  0x2c   : > { %v486_v61 = vmax.f32 %v470_v54, 0.0  ;;  %v472_v62 = vadd.f32 %v456_v55, %v394_v52  ;;  %v457_v63 = vadd.f32 %v827_v3, %v434_v56  ;;  %v396_v4 = vadd.f32 %v822_v2, %v373_v57 }
  0x2d   : > { %v487_v5 = vmax.f32 %v471_v58, 0.0  ;;  %v458_v6 = vadd.f32 %v827_v3, %v435_v60 }
  0x2e   : > { %502 = vst [vmem:[%s862_s30 + $0x58] sm:$0xff] %v486_v61  ;;  %v488_v0 = vmax.f32 %v472_v62, 0.0  ;;  %v473_v7 = vadd.f32 %v457_v63, %v395_v59 }
  0x2f   : > { %503 = vst [vmem:[%s862_s30 + $0x60] sm:$0xff] %v487_v5  ;;  %v474_v8 = vadd.f32 %v458_v6, %v396_v4 }
  0x30   : > { %504 = vst [vmem:[%s862_s30 + $0x68] sm:$0xff] %v488_v0  ;;  %v489_v9 = vmax.f32 %v473_v7, 0.0 }
  0x31   : > { %v490_v10 = vmax.f32 %v474_v8, 0.0 }
  0x32   : > { %505 = vst [vmem:[%s862_s30 + $0x70] sm:$0xff] %v489_v9 }
  0x33   : > { %506 = vst [vmem:[%s862_s30 + $0x78] sm:$0xff] %v490_v10 }
  0x34 PF: > { %s16_s25 = sadd.s32 1, %s728_s25   ;;  %s969_s21 = smov %s720_s23 }
  0x35   : > { %p13_p7 = scmp.ge.s32.totalorder %s16_s25, 6   ;;  %s970_s22 = smov %s724_s24 }
  0x36   : > { %s971_s23 = smov %s974_s26  ;;  %s972_s24 = smov %s978_s27 }
  0x37   :  { %15 = sbr.rel (!%p13_p7) target bundleno = 3 (0x3), region = 77 }

// kernel: basic_block_forward.4
= control target key start
LH: loop header
LB: loop body
LE: loop exit
PB: predicated region body
PF: predicated region fallthrough
CT: control target
= control target key end

     0   :  { %s4427_s21 = smov 0   ;;  %s4429_s22 = smov 0   ;;  %s5795_s0 = inlined_call_operand.vmem [shape: f32[2,16,16,128], index: 0, kind: input, shape index: {}]   ;;  %s5796_s1 = inlined_call_operand.vmem [shape: bf16[1152,128], index: 1, kind: input, shape index: {}]   ;;  %s5797_s2 = inlined_call_operand.vmem [shape: f32[1,128], index: 2, kind: input, shape index: {}]   ;;  %s5798_s3 = inlined_call_operand.vmem [shape: f32[1,128], index: 3, kind: input, shape index: {}]   ;;  %s5799_s4 = inlined_call_operand.vmem [shape: f32[2,16,16,128], index: 4, kind: output, shape index: {0}]   ;;  %s5800_s5 = inlined_call_operand.vmem [shape: f32[2,1,128], index: 5, kind: output, shape index: {1}]   ;;  %s5801_s6 = inlined_call_operand.vmem [shape: f32[2,1,128], index: 6, kind: output, shape index: {2}]  }
   0x1   :  { %s4431_s23 = smov 0   ;;  %s4433_s24 = smov 0  }
   0x2   :  { %s4435_s25 = smov 0  }
   0x3 LB: > { %s26_s26 = sadd.s32 1, %s4380_s23  ;;  %s29_s27 = sadd.s32 1, %s4384_s24  ;;  %s4388_s25 = sphi %s4435_s25, %s17_s25   ;;  %s4384_s24 = sphi %s4433_s24, %s5821_s24   ;;  %s4380_s23 = sphi %s4431_s23, %s5820_s23   ;;  %s4376_s22 = sphi %s4429_s22, %s5819_s22   ;;  %s4372_s21 = sphi %s4427_s21, %s5818_s21  }
   0x4   : > { %p27_p0 = scmp.ge.s32.totalorder %s26_s26, 2  ;;  %p3574_p1 = scmp.ge.s32.totalorder %s4388_s25, 1 }
   0x5   : > { %p231_p2 = scmp.lt.s32.totalorder %s4388_s25, 5 }
   0x6   : > { %s5823_s26 = smov (%p27_p0, %s26_s26), 0  ;;  %s5825_s27 = smov (!%p27_p0, %s29_s27), %s4384_s24 }
   0x7   : > { %p232_p3 = pnand %p3574_p1, %p231_p2  ;;  %p31_p4 = scmp.ge.s32.totalorder %s5825_s27, 2 }
   0x8   : > { %p272_p5 = scmp.lt.s32.totalorder (!%p232_p3), %s4376_s22, 1  ;;  %s3577_s28 = sshll.u32 (!%p232_p3), %s4372_s21, 3 }
   0x9   : > { %s5827_s27 = smov (%p31_p4, %s5825_s27), 0  ;;  %235 = sbr.rel (%p232_p3) target bundleno = 564 (0x234), region = 36 }
   0xa   : > { %5802 = sst [smem:[#allocation3_spill]] %s5827_s27  ;;  %p280_p6 = scmp.lt.s32.totalorder (!%p232_p3), %s3577_s28, 15 }
   0xb   : > { %p3581_p7 = scmp.ne.s32.totalorder (!%p232_p3), %s4372_s21, 0 }
  0x10   : > { %s5829_s22 = smov (!%p272_p5, %s4376_s22), 1  ;;  %s5831_s28 = smov (!%p280_p6, %s3577_s28), 15 }
  0x11   : > { %s3858_s29 = sshll.u32 %s5829_s22, 8  ;;  %s3579_s30 = sshll.u32 %s5829_s22, 5  ;;  %v4487_v1 = vld [vmem:[%s5797_s2] ss:$0 sm:$0xff] (!%p3581_p7)  ;;  %v4390_v3 = vmov (!%p3581_p7), 0   ;;  %vm915_vm0 = vcmask (!%p3581_p7), 1043456  }
  0x12   : > { %s4463_s9 = scalar_lea.vmem %s5795_s0, %s3858_s29  ;;  %s3578_s10 = sshll.u32 %s5831_s28, 1  ;;  %v4492_v2 = vld [vmem:[%s5798_s3] ss:$0 sm:$0xff] (!%p3581_p7)  ;;  %302 = vst [vmem:[#allocation2 + $0xc] sm:$0xf] (!%p3581_p7), %v4390_v3  ;;  %vm922_vm4 = vcmask (!%p3581_p7), 1040384  }
  0x13   : > { %s284_s11 = sadd.s32 %s3579_s30, %s3578_s10  ;;  %s4468_s14 = scalar_lea.vmem %s5800_s5, %s5829_s22  ;;  %v353_v0 = vld [vmem:[%s4463_s9] sm:$0xff] (!%p3581_p7)  ;;  %299 = vst [vmem:[#allocation2] sm:$0xf] (!%p3581_p7), %v4390_v3  ;;  %300 = vst [vmem:[#allocation2 + $0x4] sm:$0xf] (!%p3581_p7), %v4390_v3  ;;  %v354_v5 = vld [vmem:[%s4463_s9 + $0x8] sm:$0xff] (!%p3581_p7) }
  0x14   : > { %s3580_s15 = sshll.u32 %s284_s11, 3  ;;  %s4473_s18 = scalar_lea.vmem %s5801_s6, %s5829_s22  ;;  %301 = vst [vmem:[#allocation2 + $0x8] sm:$0x1] (!%p3581_p7), %v4390_v3  ;;  %303 = vst [vmem:[#allocation2 + $0x10] sm:$0xf] (!%p3581_p7), %v4390_v3  ;;  %v392_v4 = vmul.f32 (!%p3581_p7), %v4487_v1, %v353_v0  ;;  %v393_v6 = vmul.f32 (!%p3581_p7), %v4487_v1, %v354_v5  ;;  %v355_v7 = vld [vmem:[%s4463_s9 + $0x10] sm:$0xff] (!%p3581_p7) }
  0x15   : > { %s4478_s27 = scalar_lea.vmem %s5799_s4, %s3580_s15  ;;  %298 = sbr.rel (%p3581_p7) target bundleno = 122 (0x7a), region = 40  ;;  %304 = vst [vmem:[#allocation2 + $0x14] sm:$0x1] (!%p3581_p7), %v4390_v3  ;;  %305 = vst [vmem:[#allocation2 + $0x18] sm:$0xf] (!%p3581_p7), %v4390_v3  ;;  %v356_v8 = vld [vmem:[%s4463_s9 + $0x18] sm:$0xff] (!%p3581_p7)  ;;  %v394_v10 = vmul.f32 (!%p3581_p7), %v4487_v1, %v355_v7 }
  0x16   : > { %306 = vst [vmem:[#allocation2 + $0x1c] sm:$0xf] (!%p3581_p7), %v4390_v3  ;;  %307 = vst [vmem:[#allocation2 + $0x20] sm:$0x1] (!%p3581_p7), %v4390_v3  ;;  %vm916_vm1 = vsmask.f32 (!%p3581_p7), 7938  ;;  %v431_v9 = vadd.f32 (!%p3581_p7), %v4492_v2, %v392_v4  ;;  %v395_v11 = vmul.f32 (!%p3581_p7), %v4487_v1, %v356_v8  ;;  %v432_v14 = vadd.f32 (!%p3581_p7), %v4492_v2, %v393_v6 }
  0x17   : > { %308 = vst [vmem:[#allocation2 + $0x24] sm:$0xf] (!%p3581_p7), %v4390_v3  ;;  %309 = vst [vmem:[#allocation2 + $0x28] sm:$0xf] (!%p3581_p7), %v4390_v3  ;;  %vm591_vm2 = vsmask.f32 (!%p3581_p7), 256  ;;  %v433_v20 = vadd.f32 (!%p3581_p7), %v4492_v2, %v394_v10 }
  0x18   : > { %310 = vst [vmem:[#allocation2 + $0x2c] sm:$0x1] (!%p3581_p7), %v4390_v3  ;;  %311 = vst [vmem:[#allocation2 + $0x30] sm:$0xf] (!%p3581_p7), %v4390_v3  ;;  %vm592_vm3 = vsmask.f32 (!%p3581_p7), 4368  ;;  %v434_v21 = vadd.f32 (!%p3581_p7), %v4492_v2, %v395_v11 }
  0x19   : > { %312 = vst [vmem:[#allocation2 + $0x34] sm:$0xf] (!%p3581_p7), %v4390_v3  ;;  %313 = vst [vmem:[#allocation2 + $0x38] sm:$0x1] (!%p3581_p7), %v4390_v3  ;;  %v357_v12 = vld [vmem:[%s4463_s9 + $0x20] sm:$0xff] (!%p3581_p7)  ;;  %v358_v13 = vld [vmem:[%s4463_s9 + $0x28] sm:$0xff] (!%p3581_p7) }
  0x1a   : > { %314 = vst [vmem:[#allocation2 + $0x3c] sm:$0xf] (!%p3581_p7), %v4390_v3  ;;  %315 = vst [vmem:[#allocation2 + $0x40] sm:$0xf] (!%p3581_p7), %v4390_v3  ;;  %v396_v15 = vmul.f32 (!%p3581_p7), %v4487_v1, %v357_v12  ;;  %v397_v16 = vmul.f32 (!%p3581_p7), %v4487_v1, %v358_v13  ;;  %v359_v17 = vld [vmem:[%s4463_s9 + $0x30] sm:$0xff] (!%p3581_p7)  ;;  %v360_v18 = vld [vmem:[%s4463_s9 + $0x38] sm:$0xff] (!%p3581_p7) }
  0x1b   : > { %316 = vst [vmem:[#allocation2 + $0x44] sm:$0x1] (!%p3581_p7), %v4390_v3  ;;  %317 = vst [vmem:[#allocation2 + $0x48] sm:$0xf] (!%p3581_p7), %v4390_v3  ;;  %v463_v19 = vmax.f32 (!%p3581_p7), %v431_v9, 0.0  ;;  %v398_v22 = vmul.f32 (!%p3581_p7), %v4487_v1, %v359_v17  ;;  %v361_v23 = vld [vmem:[%s4463_s9 + $0x40] sm:$0xff] (!%p3581_p7)  ;;  %v399_v28 = vmul.f32 (!%p3581_p7), %v4487_v1, %v360_v18 }
  0x1c   : > { %318 = vst [vmem:[#allocation2 + $0x4c] sm:$0xf] %v4390_v3  ;;  %319 = vst [vmem:[#allocation2 + $0x50] sm:$0x1] %v4390_v3  ;;  %v362_v24 = vld [vmem:[%s4463_s9 + $0x48] sm:$0xff]  ;;  %v464_v25 = vmax.f32 %v432_v14, 0.0  ;;  %v435_v26 = vadd.f32 %v4492_v2, %v396_v15  ;;  %v436_v27 = vadd.f32 %v4492_v2, %v397_v16  ;;  %v400_v35 = vmul.f32 %v4487_v1, %v361_v23 }
  0x1d   : > { %320 = vst [vmem:[#allocation2 + $0x54] sm:$0xf] %v4390_v3  ;;  %321 = vst [vmem:[#allocation2 + $0x58] sm:$0xf] %v4390_v3  ;;  %v3859_v29 = vpack.c.bf16 %v463_v19, %v463_v19  ;;  %v465_v30 = vmax.f32 %v433_v20, 0.0  ;;  %v466_v31 = vmax.f32 %v434_v21, 0.0  ;;  %v4518_v32 = vadd.f32 %v4492_v2, %v398_v22 }
  0x1e   : > { %322 = vst [vmem:[#allocation2 + $0x5c] sm:$0x1] %v4390_v3  ;;  %323 = vst [vmem:[#allocation2 + $0x60] sm:$0xf] %v4390_v3  ;;  %v3860_v33 = vpack.c.bf16 %v464_v25, %v464_v25  ;;  %v4521_v34 = vadd.f32 %v4492_v2, %v399_v28  ;;  %v401_v36 = vmul.f32 %v4487_v1, %v362_v24  ;;  %v467_v43 = vmax.f32 %v435_v26, 0.0  ;;  %v363_v19 = vld [vmem:[%s4463_s9 + $0x50] sm:$0xff] }
  0x1f   : > { %324 = vst [vmem:[#allocation2 + $0x64] sm:$0xf] %v4390_v3  ;;  %325 = vst [vmem:[#allocation2 + $0x68] sm:$0x1] %v4390_v3  ;;  %v595_v37 = vshrl.u32 %v3859_v29, 16  ;;  %v598_v38 = vshll.u32 %v3859_v29, 16  ;;  %v3861_v39 = vpack.c.bf16 %v465_v30, %v465_v30  ;;  %v3862_v40 = vpack.c.bf16 %v466_v31, %v466_v31 }
  0x20   : > { %326 = vst [vmem:[#allocation2 + $0x6c] sm:$0xf] %v4390_v3  ;;  %327 = vst [vmem:[#allocation2 + $0x70] sm:$0xf] %v4390_v3  ;;  %v603_v41 = vshrl.u32 %v3860_v33, 16  ;;  %v606_v42 = vshll.u32 %v3860_v33, 16  ;;  %v3863_v54 = vpack.c.bf16 %v467_v43, %v467_v43  ;;  %v440_v28 = vadd.f32 %v4492_v2, %v401_v36 }
  0x21   : > { %328 = vst [vmem:[#allocation2 + $0x74] sm:$0x1] %v4390_v3  ;;  %329 = vst [vmem:[#allocation2 + $0x78] sm:$0xf] %v4390_v3  ;;  %v468_v44 = vmax.f32 %v436_v27, 0.0  ;;  %v597_v45 = vrot.slane %v595_v37, 7  ;;  %v439_v27 = vadd.f32 %v4492_v2, %v400_v35  ;;  %v402_v33 = vmul.f32 %v4487_v1, %v363_v19 }
  0x22   : > { %330 = vst [vmem:[#allocation2 + $0x7c] sm:$0xf] %v4390_v3  ;;  %331 = vst [vmem:[#allocation2 + $0x80] sm:$0x1] %v4390_v3  ;;  %v612_v47 = vshrl.u32 %v3861_v39, 16  ;;  %v615_v48 = vshll.u32 %v3861_v39, 16 }
  0x23   : > { %332 = vst [vmem:[#allocation2 + $0x84] sm:$0xf] %v4390_v3  ;;  %333 = vst [vmem:[#allocation2 + $0x88] sm:$0xf] %v4390_v3  ;;  %v620_v49 = vshrl.u32 %v3862_v40, 16  ;;  %v605_v52 = vrot.slane %v603_v41, 7  ;;  %v3864_v55 = vpack.c.bf16 %v468_v44, %v468_v44  ;;  %v600_v56 = vor.u32 %v598_v38, %v597_v45 }
  0x24   : > { %334 = vst [vmem:[#allocation2 + $0x8c] sm:$0x1] %v4390_v3  ;;  %335 = vst [vmem:[#allocation2 + $0x90] sm:$0xf] %v4390_v3  ;;  %v918_v50 = vld [vmem:[#allocation2 + $0xc] sm:$0xf]  ;;  %v441_v36 = vadd.f32 %v4492_v2, %v402_v33 }
  0x25   : > { %336 = vst [vmem:[#allocation2 + $0x94] sm:$0xf] %v4390_v3  ;;  %337 = vst [vmem:[#allocation2 + $0x98] sm:$0x1] %v4390_v3  ;;  %v623_v53 = vshll.u32 %v3862_v40, 16  ;;  %v601_v57 = vrot.slane %v597_v45, 4  ;;  %v608_v62 = vor.u32 %v606_v42, %v605_v52 }
  0x26   : > { %338 = vst [vmem:[#allocation2 + $0x9c] sm:$0xf] %v4390_v3  ;;  %339 = vst [vmem:[#allocation2 + $0xa0] sm:$0xf] %v4390_v3  ;;  %v924_v59 = vld [vmem:[#allocation2 + $0x14] sm:$0x1] }
  0x27   : > { %340 = vst [vmem:[#allocation2 + $0xa4] sm:$0x1] %v4390_v3  ;;  %341 = vst [vmem:[#allocation2 + $0xa8] sm:$0xf] %v4390_v3  ;;  %v614_v60 = vrot.slane %v612_v47, 7  ;;  %v622_v61 = vrot.slane %v620_v49, 7 }
  0x28   : > { %342 = vst [vmem:[#allocation2 + $0xac] sm:$0xf] %v4390_v3  ;;  %343 = vst [vmem:[#allocation2 + $0xb0] sm:$0x1] %v4390_v3  ;;  %v610_v63 = vrot.slane %v605_v52, 4  ;;  %v632_v4 = vshll.u32 %v3863_v54, 16 }
  0x29   : > { %344 = vst [vmem:[#allocation2 + $0xb4] sm:$0xf] %v4390_v3  ;;  %345 = vst [vmem:[#allocation2 + $0xb8] sm:$0xf] %v4390_v3  ;;  %v927_v0 = vld [vmem:[#allocation2 + $0x18] sm:$0xf]  ;;  %v617_v6 = vor.u32 %v615_v48, %v614_v60  ;;  %v625_v8 = vor.u32 %v623_v53, %v622_v61 }
  0x2a   : > { %346 = vst [vmem:[#allocation2 + $0xbc] sm:$0x1] %v4390_v3  ;;  %347 = vst [vmem:[#allocation2 + $0xc0] sm:$0xf] %v4390_v3  ;;  %v618_v7 = vrot.slane %v614_v60, 4  ;;  %v627_v12 = vrot.slane %v622_v61, 4 }
  0x2b   : > { %348 = vst [vmem:[#allocation2 + $0xc4] sm:$0xf] %v4390_v3  ;;  %349 = vst [vmem:[#allocation2 + $0xc8] sm:$0x1] %v4390_v3  ;;  %v931_v9 = vld [vmem:[#allocation2 + $0x20] sm:$0x1] }
  0x2c   : > { %350 = vst [vmem:[#allocation2 + $0xcc] sm:$0xf] %v4390_v3  ;;  %351 = vst [vmem:[#allocation2 + $0xd0] sm:$0xf] %v4390_v3  ;;  %v934_v16 = vld [vmem:[#allocation2 + $0x24] sm:$0xf] }
  0x2d   : > { %352 = vst [vmem:[#allocation2 + $0xd4] sm:$0x1] %v4390_v3  ;;  %vm4527_vm5 = vmand %vm915_vm0, %vm916_vm1  ;;  %v629_v3 = vshrl.u32 %v3863_v54, 16  ;;  %v637_v17 = vshrl.u32 %v3864_v55, 16  ;;  %v640_v18 = vshll.u32 %v3864_v55, 16  ;;  %v364_v20 = vld [vmem:[%s4463_s9 + $0x58] sm:$0xff] }
  0x2e   : > { %vm4533_vm6 = vmor %vm591_vm2, %vm592_vm3  ;;  %v919_v5 = vsel %vm4527_vm5, %v600_v56, %v918_v50  ;;  %v928_v14 = vsel %vm4527_vm5, %v617_v6, %v927_v0  ;;  %v469_v24 = vmax.f32 %v4518_v32, 0.0  ;;  %v470_v26 = vmax.f32 %v4521_v34, 0.0  ;;  %v938_v30 = vld [vmem:[#allocation2 + $0x2c] sm:$0x1]  ;;  %v365_v42 = vld [vmem:[%s4463_s9 + $0x60] sm:$0xff] }
  0x2f   : > { %vm4539_vm7 = vmand %vm922_vm4, %vm591_vm2  ;;  %920 = vst [vmem:[#allocation2 + $0xc] sm:$0xf] %v919_v5  ;;  %v609_v10 = vsel %vm4533_vm6, %v601_v57, %v608_v62  ;;  %v631_v13 = vrot.slane %v629_v3, 7  ;;  %v626_v15 = vsel %vm4533_vm6, %v618_v7, %v625_v8  ;;  %v639_v25 = vrot.slane %v637_v17, 7  ;;  %v366_v43 = vld [vmem:[%s4463_s9 + $0x68] sm:$0xff] }
  0x30   : > { %v925_v11 = vsel %vm4539_vm7, %v610_v63, %v924_v59  ;;  %921 = vst [vmem:[#allocation2 + $0x10] sm:$0xf] %v609_v10  ;;  %929 = vst [vmem:[#allocation2 + $0x18] sm:$0xf] %v928_v14  ;;  %v932_v21 = vsel %vm4539_vm7, %v627_v12, %v931_v9  ;;  %v3865_v31 = vpack.c.bf16 %v469_v24, %v469_v24  ;;  %v471_v34 = vmax.f32 %v439_v27, 0.0 }
  0x31   : > { %926 = vst [vmem:[#allocation2 + $0x14] sm:$0x1] %v925_v11  ;;  %930 = vst [vmem:[#allocation2 + $0x1c] sm:$0xf] %v626_v15  ;;  %v634_v22 = vor.u32 %v632_v4, %v631_v13  ;;  %v635_v23 = vrot.slane %v631_v13, 4  ;;  %v403_v37 = vmul.f32 %v4487_v1, %v364_v20  ;;  %v642_v32 = vor.u32 %v640_v18, %v639_v25 }
  0x32   : > { %933 = vst [vmem:[#allocation2 + $0x20] sm:$0x1] %v932_v21  ;;  %v644_v38 = vrot.slane %v639_v25, 4  ;;  %v3866_v39 = vpack.c.bf16 %v470_v26, %v470_v26  ;;  %v646_v40 = vshrl.u32 %v3865_v31, 16  ;;  %v649_v35 = vshll.u32 %v3865_v31, 16  ;;  %v369_v31 = vld [vmem:[%s4463_s9 + $0x80] sm:$0xff] }
  0x33   : > { %v935_v29 = vsel %vm4527_vm5, %v634_v22, %v934_v16  ;;  %v472_v41 = vmax.f32 %v440_v28, 0.0  ;;  %v643_v44 = vsel %vm4533_vm6, %v635_v23, %v642_v32  ;;  %v3867_v50 = vpack.c.bf16 %v471_v34, %v471_v34  ;;  %v941_v54 = vld [vmem:[#allocation2 + $0x30] sm:$0xf]  ;;  %v945_v62 = vld [vmem:[#allocation2 + $0x38] sm:$0x1] }
  0x34   : > { %936 = vst [vmem:[#allocation2 + $0x24] sm:$0xf] %v935_v29  ;;  %v939_v45 = vsel %vm4539_vm7, %v644_v38, %v938_v30  ;;  %v654_v47 = vshrl.u32 %v3866_v39, 16  ;;  %v657_v48 = vshll.u32 %v3866_v39, 16  ;;  %937 = vst [vmem:[#allocation2 + $0x28] sm:$0xf] %v643_v44  ;;  %v442_v56 = vadd.f32 %v4492_v2, %v403_v37 }
  0x35   : > { %940 = vst [vmem:[#allocation2 + $0x2c] sm:$0x1] %v939_v45  ;;  %v648_v49 = vrot.slane %v646_v40, 7  ;;  %v3868_v52 = vpack.c.bf16 %v472_v41, %v472_v41  ;;  %v473_v53 = vmax.f32 %v441_v36, 0.0  ;;  %v404_v57 = vmul.f32 %v4487_v1, %v365_v42  ;;  %v948_v13 = vld [vmem:[#allocation2 + $0x3c] sm:$0xf] }
  0x36   : > { %v656_v55 = vrot.slane %v654_v47, 7  ;;  %v405_v59 = vmul.f32 %v4487_v1, %v366_v43  ;;  %v663_v63 = vshrl.u32 %v3867_v50, 16  ;;  %v666_v0 = vshll.u32 %v3867_v50, 16  ;;  %v367_v16 = vld [vmem:[%s4463_s9 + $0x70] sm:$0xff]  ;;  %v952_v19 = vld [vmem:[#allocation2 + $0x44] sm:$0x1] }
  0x37   : > { %v651_v60 = vor.u32 %v649_v35, %v648_v49  ;;  %v652_v61 = vrot.slane %v648_v49, 4  ;;  %v671_v5 = vshrl.u32 %v3868_v52, 16  ;;  %v674_v6 = vshll.u32 %v3868_v52, 16  ;;  %v368_v30 = vld [vmem:[%s4463_s9 + $0x78] sm:$0xff]  ;;  %v955_v32 = vld [vmem:[#allocation2 + $0x48] sm:$0xf] }
  0x38   : > { %v659_v3 = vor.u32 %v657_v48, %v656_v55  ;;  %v661_v4 = vrot.slane %v656_v55, 4  ;;  %v665_v8 = vrot.slane %v663_v63, 7  ;;  %v3869_v9 = vpack.c.bf16 %v473_v53, %v473_v53  ;;  %v959_v47 = vld [vmem:[#allocation2 + $0x50] sm:$0x1] }
  0x39   : > { %v942_v7 = vsel %vm4527_vm5, %v651_v60, %v941_v54  ;;  %v474_v10 = vmax.f32 %v442_v56, 0.0  ;;  %v673_v14 = vrot.slane %v671_v5, 7  ;;  %v443_v15 = vadd.f32 %v4492_v2, %v404_v57 }
  0x3a   : > { %943 = vst [vmem:[#allocation2 + $0x30] sm:$0xf] %v942_v7  ;;  %v660_v11 = vsel %vm4533_vm6, %v652_v61, %v659_v3  ;;  %v946_v12 = vsel %vm4539_vm7, %v661_v4, %v945_v62  ;;  %v668_v17 = vor.u32 %v666_v0, %v665_v8  ;;  %v669_v18 = vrot.slane %v665_v8, 4  ;;  %v370_v61 = vld [vmem:[%s4463_s9 + $0x88] sm:$0xff]  ;;  %v962_v0 = vld [vmem:[#allocation2 + $0x54] sm:$0xf] }
  0x3b   : > { %944 = vst [vmem:[#allocation2 + $0x34] sm:$0xf] %v660_v11  ;;  %947 = vst [vmem:[#allocation2 + $0x38] sm:$0x1] %v946_v12  ;;  %v680_v20 = vshrl.u32 %v3869_v9, 16  ;;  %v683_v21 = vshll.u32 %v3869_v9, 16  ;;  %v676_v22 = vor.u32 %v674_v6, %v673_v14  ;;  %v3870_v24 = vpack.c.bf16 %v474_v10, %v474_v10 }
  0x3c   : > { %v678_v23 = vrot.slane %v673_v14, 4  ;;  %v475_v25 = vmax.f32 %v443_v15, 0.0  ;;  %v949_v26 = vsel %vm4527_vm5, %v668_v17, %v948_v13  ;;  %v444_v28 = vadd.f32 %v4492_v2, %v405_v59  ;;  %v966_v9 = vld [vmem:[#allocation2 + $0x5c] sm:$0x1] }
  0x3d   : > { %v682_v27 = vrot.slane %v680_v20, 7  ;;  %v406_v29 = vmul.f32 %v4487_v1, %v367_v16  ;;  %950 = vst [vmem:[#allocation2 + $0x3c] sm:$0xf] %v949_v26  ;;  %v677_v33 = vsel %vm4533_vm6, %v669_v18, %v676_v22  ;;  %v688_v38 = vshrl.u32 %v3870_v24, 16  ;;  %v371_v22 = vld [vmem:[%s4463_s9 + $0x90] sm:$0xff] }
  0x3e   : > { %v953_v37 = vsel %vm4539_vm7, %v678_v23, %v952_v19  ;;  %v691_v39 = vshll.u32 %v3870_v24, 16  ;;  %951 = vst [vmem:[#allocation2 + $0x40] sm:$0xf] %v677_v33  ;;  %v3871_v35 = vpack.c.bf16 %v475_v25, %v475_v25  ;;  %v476_v41 = vmax.f32 %v444_v28, 0.0  ;;  %v372_v23 = vld [vmem:[%s4463_s9 + $0x98] sm:$0xff]  ;;  %v373_v24 = vld [vmem:[%s4463_s9 + $0xa0] sm:$0xff] }
  0x3f   : > { %954 = vst [vmem:[#allocation2 + $0x44] sm:$0x1] %v953_v37  ;;  %v685_v34 = vor.u32 %v683_v21, %v682_v27  ;;  %v686_v40 = vrot.slane %v682_v27, 4  ;;  %v690_v36 = vrot.slane %v688_v38, 7  ;;  %v445_v42 = vadd.f32 %v4492_v2, %v406_v29  ;;  %v969_v27 = vld [vmem:[#allocation2 + $0x60] sm:$0xf] }
  0x40   : > { %v407_v43 = vmul.f32 %v4487_v1, %v368_v30  ;;  %v408_v44 = vmul.f32 %v4487_v1, %v369_v31  ;;  %v697_v48 = vshrl.u32 %v3871_v35, 16  ;;  %v700_v49 = vshll.u32 %v3871_v35, 16 }
  0x41   : > { %v956_v45 = vsel %vm4527_vm5, %v685_v34, %v955_v32  ;;  %v3872_v50 = vpack.c.bf16 %v476_v41, %v476_v41  ;;  %v693_v52 = vor.u32 %v691_v39, %v690_v36  ;;  %v695_v53 = vrot.slane %v690_v36, 4  ;;  %v973_v32 = vld [vmem:[#allocation2 + $0x68] sm:$0x1] }
  0x42   : > { %957 = vst [vmem:[#allocation2 + $0x48] sm:$0xf] %v956_v45  ;;  %v477_v54 = vmax.f32 %v445_v42, 0.0  ;;  %v446_v55 = vadd.f32 %v4492_v2, %v407_v43  ;;  %v699_v56 = vrot.slane %v697_v48, 7  ;;  %v447_v60 = vadd.f32 %v4492_v2, %v408_v44  ;;  %v976_v42 = vld [vmem:[#allocation2 + $0x6c] sm:$0xf] }
  0x43   : > { %v705_v57 = vshrl.u32 %v3872_v50, 16  ;;  %v708_v59 = vshll.u32 %v3872_v50, 16  ;;  %v694_v62 = vsel %vm4533_vm6, %v686_v40, %v693_v52  ;;  %v960_v63 = vsel %vm4539_vm7, %v695_v53, %v959_v47  ;;  %v375_v50 = vld [vmem:[%s4463_s9 + $0xb0] sm:$0xff]  ;;  %v376_v52 = vld [vmem:[%s4463_s9 + $0xb8] sm:$0xff] }
  0x44   : > { %v3873_v3 = vpack.c.bf16 %v477_v54, %v477_v54  ;;  %v478_v4 = vmax.f32 %v446_v55, 0.0  ;;  %958 = vst [vmem:[#allocation2 + $0x4c] sm:$0xf] %v694_v62  ;;  %961 = vst [vmem:[#allocation2 + $0x50] sm:$0x1] %v960_v63  ;;  %v702_v5 = vor.u32 %v700_v49, %v699_v56  ;;  %v703_v6 = vrot.slane %v699_v56, 4 }
  0x45   : > { %v707_v7 = vrot.slane %v705_v57, 7  ;;  %v479_v8 = vmax.f32 %v447_v60, 0.0  ;;  %v409_v13 = vmul.f32 %v4487_v1, %v370_v61  ;;  %v410_v39 = vmul.f32 %v4487_v1, %v371_v22  ;;  %v374_v49 = vld [vmem:[%s4463_s9 + $0xa8] sm:$0xff]  ;;  %v377_v57 = vld [vmem:[%s4463_s9 + $0xc0] sm:$0xff] }
  0x46   : > { %v714_v10 = vshrl.u32 %v3873_v3, 16  ;;  %v717_v11 = vshll.u32 %v3873_v3, 16  ;;  %v3874_v12 = vpack.c.bf16 %v478_v4, %v478_v4  ;;  %v963_v14 = vsel %vm4527_vm5, %v702_v5, %v962_v0  ;;  %v980_v5 = vld [vmem:[#allocation2 + $0x74] sm:$0x1] }
  0x47   : > { %v710_v15 = vor.u32 %v708_v59, %v707_v7  ;;  %v712_v16 = vrot.slane %v707_v7, 4  ;;  %v3875_v17 = vpack.c.bf16 %v479_v8, %v479_v8  ;;  %964 = vst [vmem:[#allocation2 + $0x54] sm:$0xf] %v963_v14  ;;  %v448_v21 = vadd.f32 %v4492_v2, %v409_v13 }
  0x48   : > { %v716_v18 = vrot.slane %v714_v10, 7  ;;  %v722_v19 = vshrl.u32 %v3874_v12, 16  ;;  %v725_v20 = vshll.u32 %v3874_v12, 16  ;;  %v411_v34 = vmul.f32 %v4487_v1, %v372_v23 }
  0x49   : > { %v711_v25 = vsel %vm4533_vm6, %v703_v6, %v710_v15  ;;  %v967_v26 = vsel %vm4539_vm7, %v712_v16, %v966_v9  ;;  %v731_v28 = vshrl.u32 %v3875_v17, 16  ;;  %v734_v29 = vshll.u32 %v3875_v17, 16 }
  0x4a   : > { %965 = vst [vmem:[#allocation2 + $0x58] sm:$0xf] %v711_v25  ;;  %968 = vst [vmem:[#allocation2 + $0x5c] sm:$0x1] %v967_v26  ;;  %v719_v30 = vor.u32 %v717_v11, %v716_v18  ;;  %v720_v31 = vrot.slane %v716_v18, 4  ;;  %v724_v33 = vrot.slane %v722_v19, 7  ;;  %v412_v40 = vmul.f32 %v4487_v1, %v373_v24 }
  0x4b   : > { %v480_v37 = vmax.f32 %v448_v21, 0.0  ;;  %v733_v38 = vrot.slane %v731_v28, 7  ;;  %v449_v47 = vadd.f32 %v4492_v2, %v410_v39  ;;  %v450_v48 = vadd.f32 %v4492_v2, %v411_v34  ;;  %v983_v26 = vld [vmem:[#allocation2 + $0x78] sm:$0xf] }
  0x4c   : > { %v970_v35 = vsel %vm4527_vm5, %v719_v30, %v969_v27  ;;  %v727_v41 = vor.u32 %v725_v20, %v724_v33  ;;  %v729_v36 = vrot.slane %v724_v33, 4  ;;  %v451_v62 = vadd.f32 %v4492_v2, %v412_v40  ;;  %v987_v27 = vld [vmem:[#allocation2 + $0x80] sm:$0x1] }
  0x4d   : > { %v3876_v43 = vpack.c.bf16 %v480_v37, %v480_v37  ;;  %971 = vst [vmem:[#allocation2 + $0x60] sm:$0xf] %v970_v35  ;;  %v736_v44 = vor.u32 %v734_v29, %v733_v38  ;;  %v737_v45 = vrot.slane %v733_v38, 4  ;;  %v481_v60 = vmax.f32 %v449_v47, 0.0 }
  0x4e   : > { %v728_v53 = vsel %vm4533_vm6, %v720_v31, %v727_v41  ;;  %v974_v54 = vsel %vm4539_vm7, %v729_v36, %v973_v32  ;;  %v482_v61 = vmax.f32 %v450_v48, 0.0  ;;  %v413_v0 = vmul.f32 %v4487_v1, %v374_v49  ;;  %v378_v41 = vld [vmem:[%s4463_s9 + $0xc8] sm:$0xff] }
  0x4f   : > { %v739_v55 = vshrl.u32 %v3876_v43, 16  ;;  %v742_v56 = vshll.u32 %v3876_v43, 16  ;;  %972 = vst [vmem:[#allocation2 + $0x64] sm:$0xf] %v728_v53  ;;  %975 = vst [vmem:[#allocation2 + $0x68] sm:$0x1] %v974_v54  ;;  %v977_v59 = vsel %vm4527_vm5, %v736_v44, %v976_v42  ;;  %v414_v3 = vmul.f32 %v4487_v1, %v375_v50 }
  0x50   : > { %978 = vst [vmem:[#allocation2 + $0x6c] sm:$0xf] %v977_v59  ;;  %v415_v4 = vmul.f32 %v4487_v1, %v376_v52  ;;  %v3877_v6 = vpack.c.bf16 %v481_v60, %v481_v60  ;;  %v3878_v7 = vpack.c.bf16 %v482_v61, %v482_v61  ;;  %v483_v8 = vmax.f32 %v451_v62, 0.0  ;;  %v990_v44 = vld [vmem:[#allocation2 + $0x84] sm:$0xf] }
  0x51   : > { %v741_v63 = vrot.slane %v739_v55, 7  ;;  %v416_v9 = vmul.f32 %v4487_v1, %v377_v57  ;;  %v452_v12 = vadd.f32 %v4492_v2, %v413_v0  ;;  %v453_v13 = vadd.f32 %v4492_v2, %v414_v3  ;;  %v994_v52 = vld [vmem:[#allocation2 + $0x8c] sm:$0x1]  ;;  %v997_v62 = vld [vmem:[#allocation2 + $0x90] sm:$0xf] }
  0x52   : > { %v748_v14 = vshrl.u32 %v3877_v6, 16  ;;  %v751_v15 = vshll.u32 %v3877_v6, 16  ;;  %v756_v16 = vshrl.u32 %v3878_v7, 16  ;;  %v759_v17 = vshll.u32 %v3878_v7, 16  ;;  %v380_v6 = vld [vmem:[%s4463_s9 + $0xd8] sm:$0xff]  ;;  %v381_v7 = vld [vmem:[%s4463_s9 + $0xe0] sm:$0xff] }
  0x53   : > { %v744_v10 = vor.u32 %v742_v56, %v741_v63  ;;  %v746_v11 = vrot.slane %v741_v63, 4  ;;  %v3879_v20 = vpack.c.bf16 %v483_v8, %v483_v8  ;;  %v484_v21 = vmax.f32 %v452_v12, 0.0 }
  0x54   : > { %v750_v22 = vrot.slane %v748_v14, 7  ;;  %v758_v23 = vrot.slane %v756_v16, 7  ;;  %v485_v24 = vmax.f32 %v453_v13, 0.0  ;;  %v454_v25 = vadd.f32 %v4492_v2, %v415_v4  ;;  %v382_v16 = vld [vmem:[%s4463_s9 + $0xe8] sm:$0xff] }
  0x55   : > { %v745_v18 = vsel %vm4533_vm6, %v737_v45, %v744_v10  ;;  %v981_v19 = vsel %vm4539_vm7, %v746_v11, %v980_v5  ;;  %v765_v28 = vshrl.u32 %v3879_v20, 16  ;;  %v768_v29 = vshll.u32 %v3879_v20, 16  ;;  %v379_v5 = vld [vmem:[%s4463_s9 + $0xd0] sm:$0xff] }
  0x56   : > { %979 = vst [vmem:[#allocation2 + $0x70] sm:$0xf] %v745_v18  ;;  %982 = vst [vmem:[#allocation2 + $0x74] sm:$0x1] %v981_v19  ;;  %v3880_v30 = vpack.c.bf16 %v484_v21, %v484_v21  ;;  %v455_v31 = vadd.f32 %v4492_v2, %v416_v9  ;;  %v753_v33 = vor.u32 %v751_v15, %v750_v22  ;;  %v754_v37 = vrot.slane %v750_v22, 4 }
  0x57   : > { %v761_v32 = vor.u32 %v759_v17, %v758_v23  ;;  %v763_v38 = vrot.slane %v758_v23, 4  ;;  %v767_v39 = vrot.slane %v765_v28, 7  ;;  %v3881_v35 = vpack.c.bf16 %v485_v24, %v485_v24  ;;  %v1001_v18 = vld [vmem:[#allocation2 + $0x98] sm:$0x1] }
  0x58   : > { %v773_v34 = vshrl.u32 %v3880_v30, 16  ;;  %v776_v40 = vshll.u32 %v3880_v30, 16  ;;  %v984_v36 = vsel %vm4527_vm5, %v753_v33, %v983_v26  ;;  %v486_v45 = vmax.f32 %v454_v25, 0.0  ;;  %v1004_v26 = vld [vmem:[#allocation2 + $0x9c] sm:$0xf] }
  0x59   : > { %v762_v42 = vsel %vm4533_vm6, %v754_v37, %v761_v32  ;;  %v988_v43 = vsel %vm4539_vm7, %v763_v38, %v987_v27  ;;  %985 = vst [vmem:[#allocation2 + $0x78] sm:$0xf] %v984_v36  ;;  %v770_v47 = vor.u32 %v768_v29, %v767_v39  ;;  %v771_v48 = vrot.slane %v767_v39, 4 }
  0x5a   : > { %986 = vst [vmem:[#allocation2 + $0x7c] sm:$0xf] %v762_v42  ;;  %989 = vst [vmem:[#allocation2 + $0x80] sm:$0x1] %v988_v43  ;;  %v775_v49 = vrot.slane %v773_v34, 7  ;;  %v782_v50 = vshrl.u32 %v3881_v35, 16  ;;  %v3882_v54 = vpack.c.bf16 %v486_v45, %v486_v45  ;;  %v417_v56 = vmul.f32 %v4487_v1, %v378_v41 }
  0x5b   : > { %v785_v53 = vshll.u32 %v3881_v35, 16  ;;  %v487_v55 = vmax.f32 %v455_v31, 0.0  ;;  %v991_v57 = vsel %vm4527_vm5, %v770_v47, %v990_v44  ;;  %v418_v19 = vmul.f32 %v4487_v1, %v379_v5  ;;  %v383_v31 = vld [vmem:[%s4463_s9 + $0xf0] sm:$0xff]  ;;  %v384_v35 = vld [vmem:[%s4463_s9 + $0xf8] sm:$0xff]  ;;  %v1011_v5 = vld [vmem:[#allocation2 + $0xa8] sm:$0xf] }
  0x5c   : > { %v778_v59 = vor.u32 %v776_v40, %v775_v49  ;;  %v780_v60 = vrot.slane %v775_v49, 4  ;;  %v784_v61 = vrot.slane %v782_v50, 7  ;;  %992 = vst [vmem:[#allocation2 + $0x84] sm:$0xf] %v991_v57  ;;  %v790_v63 = vshrl.u32 %v3882_v54, 16 }
  0x5d   : > { %v793_v0 = vshll.u32 %v3882_v54, 16  ;;  %v3883_v3 = vpack.c.bf16 %v487_v55, %v487_v55  ;;  %v456_v4 = vadd.f32 %v4492_v2, %v417_v56  ;;  %v419_v20 = vmul.f32 %v4487_v1, %v380_v6  ;;  %v1008_v49 = vld [vmem:[#allocation2 + $0xa4] sm:$0x1] }
  0x5e   : > { %v779_v8 = vsel %vm4533_vm6, %v771_v48, %v778_v59  ;;  %v995_v9 = vsel %vm4539_vm7, %v780_v60, %v994_v52  ;;  %v787_v10 = vor.u32 %v785_v53, %v784_v61  ;;  %v788_v11 = vrot.slane %v784_v61, 4 }
  0x5f   : > { %993 = vst [vmem:[#allocation2 + $0x88] sm:$0xf] %v779_v8  ;;  %996 = vst [vmem:[#allocation2 + $0x8c] sm:$0x1] %v995_v9  ;;  %v792_v12 = vrot.slane %v790_v63, 7  ;;  %v799_v13 = vshrl.u32 %v3883_v3, 16  ;;  %v420_v21 = vmul.f32 %v4487_v1, %v381_v7  ;;  %v457_v27 = vadd.f32 %v4492_v2, %v418_v19 }
  0x60   : > { %v802_v14 = vshll.u32 %v3883_v3, 16  ;;  %v488_v15 = vmax.f32 %v456_v4, 0.0  ;;  %v998_v17 = vsel %vm4527_vm5, %v787_v10, %v997_v62  ;;  %v458_v28 = vadd.f32 %v4492_v2, %v419_v20  ;;  %v1015_v7 = vld [vmem:[#allocation2 + $0xb0] sm:$0x1] }
  0x61   : > { %999 = vst [vmem:[#allocation2 + $0x90] sm:$0xf] %v998_v17  ;;  %v795_v22 = vor.u32 %v793_v0, %v792_v12  ;;  %v797_v23 = vrot.slane %v792_v12, 4  ;;  %v801_v24 = vrot.slane %v799_v13, 7  ;;  %v459_v29 = vadd.f32 %v4492_v2, %v420_v21  ;;  %v1018_v13 = vld [vmem:[#allocation2 + $0xb4] sm:$0xf] }
  0x62   : > { %v3884_v25 = vpack.c.bf16 %v488_v15, %v488_v15  ;;  %v421_v30 = vmul.f32 %v4487_v1, %v382_v16  ;;  %v489_v34 = vmax.f32 %v457_v27, 0.0  ;;  %v490_v40 = vmax.f32 %v458_v28, 0.0 }
  0x63   : > { %v796_v33 = vsel %vm4533_vm6, %v788_v11, %v795_v22  ;;  %v1002_v37 = vsel %vm4539_vm7, %v797_v23, %v1001_v18  ;;  %v804_v32 = vor.u32 %v802_v14, %v801_v24  ;;  %v491_v36 = vmax.f32 %v459_v29, 0.0 }
  0x64   : > { %1000 = vst [vmem:[#allocation2 + $0x94] sm:$0xf] %v796_v33  ;;  %1003 = vst [vmem:[#allocation2 + $0x98] sm:$0x1] %v1002_v37  ;;  %v807_v38 = vshrl.u32 %v3884_v25, 16  ;;  %v810_v39 = vshll.u32 %v3884_v25, 16  ;;  %v460_v42 = vadd.f32 %v4492_v2, %v421_v30  ;;  %v422_v43 = vmul.f32 %v4487_v1, %v383_v31 }
  0x65   : > { %v1005_v41 = vsel %vm4527_vm5, %v804_v32, %v1004_v26  ;;  %v805_v44 = vrot.slane %v801_v24, 4  ;;  %v3885_v47 = vpack.c.bf16 %v489_v34, %v489_v34  ;;  %v3886_v48 = vpack.c.bf16 %v490_v40, %v490_v40  ;;  %v1022_v26 = vld [vmem:[#allocation2 + $0xbc] sm:$0x1] }
  0x66   : > { %1006 = vst [vmem:[#allocation2 + $0x9c] sm:$0xf] %v1005_v41  ;;  %v809_v45 = vrot.slane %v807_v38, 7  ;;  %v3887_v50 = vpack.c.bf16 %v491_v36, %v491_v36  ;;  %v492_v52 = vmax.f32 %v460_v42, 0.0  ;;  %v461_v53 = vadd.f32 %v4492_v2, %v422_v43  ;;  %v1025_v38 = vld [vmem:[#allocation2 + $0xc0] sm:$0xf] }
  0x67   : > { %v423_v54 = vmul.f32 %v4487_v1, %v384_v35  ;;  %v816_v57 = vshrl.u32 %v3885_v47, 16  ;;  %v819_v59 = vshll.u32 %v3885_v47, 16  ;;  %v824_v60 = vshrl.u32 %v3886_v48, 16  ;;  %v1029_v42 = vld [vmem:[#allocation2 + $0xc8] sm:$0x1] }
  0x68   : > { %v812_v55 = vor.u32 %v810_v39, %v809_v45  ;;  %v814_v56 = vrot.slane %v809_v45, 4  ;;  %v827_v61 = vshll.u32 %v3886_v48, 16  ;;  %v833_v62 = vshrl.u32 %v3887_v50, 16 }
  0x69   : > { %v836_v63 = vshll.u32 %v3887_v50, 16  ;;  %v818_v4 = vrot.slane %v816_v57, 7  ;;  %v3888_v6 = vpack.c.bf16 %v492_v52, %v492_v52  ;;  %v826_v1 = vrot.slane %v824_v60, 7 }
  0x6a   : > { %v813_v0 = vsel %vm4533_vm6, %v805_v44, %v812_v55  ;;  %v1009_v3 = vsel %vm4539_vm7, %v814_v56, %v1008_v49  ;;  %v835_v8 = vrot.slane %v833_v62, 7  ;;  %v493_v9 = vmax.f32 %v461_v53, 0.0 }
  0x6b   : > { %1007 = vst [vmem:[#allocation2 + $0xa0] sm:$0xf] %v813_v0  ;;  %1010 = vst [vmem:[#allocation2 + $0xa4] sm:$0x1] %v1009_v3  ;;  %v462_v10 = vadd.f32 %v4492_v2, %v423_v54  ;;  %v821_v11 = vor.u32 %v819_v59, %v818_v4  ;;  %v822_v12 = vrot.slane %v818_v4, 4  ;;  %v841_v14 = vshrl.u32 %v3888_v6, 16 }
  0x6c   : > { %v844_v15 = vshll.u32 %v3888_v6, 16  ;;  %v829_v16 = vor.u32 %v827_v61, %v826_v1  ;;  %v831_v17 = vrot.slane %v826_v1, 4  ;;  %v838_v18 = vor.u32 %v836_v63, %v835_v8 }
  0x6d   : > { %v839_v19 = vrot.slane %v835_v8, 4  ;;  %v1012_v20 = vsel %vm4527_vm5, %v821_v11, %v1011_v5  ;;  %v843_v21 = vrot.slane %v841_v14, 7  ;;  %v3889_v22 = vpack.c.bf16 %v493_v9, %v493_v9 }
  0x6e   : > { %v494_v23 = vmax.f32 %v462_v10, 0.0  ;;  %1013 = vst [vmem:[#allocation2 + $0xa8] sm:$0xf] %v1012_v20  ;;  %v830_v24 = vsel %vm4533_vm6, %v822_v12, %v829_v16  ;;  %v1016_v2 = vsel %vm4539_vm7, %v831_v17, %v1015_v7  ;;  %v1019_v25 = vsel %vm4527_vm5, %v838_v18, %v1018_v13 }
  0x6f   : > { %1014 = vst [vmem:[#allocation2 + $0xac] sm:$0xf] %v830_v24  ;;  %1017 = vst [vmem:[#allocation2 + $0xb0] sm:$0x1] %v1016_v2  ;;  %v846_v27 = vor.u32 %v844_v15, %v843_v21  ;;  %v848_v28 = vrot.slane %v843_v21, 4  ;;  %v850_v29 = vshrl.u32 %v3889_v22, 16 }
  0x70   : > { %1020 = vst [vmem:[#allocation2 + $0xb4] sm:$0xf] %v1019_v25  ;;  %v853_v30 = vshll.u32 %v3889_v22, 16  ;;  %v3890_v31 = vpack.c.bf16 %v494_v23, %v494_v23 }
  0x71   : > { %v847_v33 = vsel %vm4533_vm6, %v839_v19, %v846_v27  ;;  %v1023_v37 = vsel %vm4539_vm7, %v848_v28, %v1022_v26  ;;  %v852_v32 = vrot.slane %v850_v29, 7 }
  0x72   : > { %1021 = vst [vmem:[#allocation2 + $0xb8] sm:$0xf] %v847_v33  ;;  %1024 = vst [vmem:[#allocation2 + $0xbc] sm:$0x1] %v1023_v37  ;;  %v858_v39 = vshrl.u32 %v3890_v31, 16  ;;  %v861_v34 = vshll.u32 %v3890_v31, 16 }
  0x73   : > { %v855_v40 = vor.u32 %v853_v30, %v852_v32  ;;  %v856_v35 = vrot.slane %v852_v32, 4 }
  0x74   : > { %v860_v41 = vrot.slane %v858_v39, 7 }
  0x75   : > { %v1026_v36 = vsel %vm4527_vm5, %v855_v40, %v1025_v38 }
  0x76   : > { %1027 = vst [vmem:[#allocation2 + $0xc0] sm:$0xf] %v1026_v36  ;;  %v863_v43 = vor.u32 %v861_v34, %v860_v41  ;;  %v865_v44 = vrot.slane %v860_v41, 4 }
  0x78   : > { %v864_v45 = vsel %vm4533_vm6, %v856_v35, %v863_v43  ;;  %v1030_v47 = vsel %vm4539_vm7, %v865_v44, %v1029_v42 }
  0x79   : > { %1028 = vst [vmem:[#allocation2 + $0xc4] sm:$0xf] %v864_v45  ;;  %1031 = vst [vmem:[#allocation2 + $0xc8] sm:$0x1] %v1030_v47 }
  0x7a PF: > { %v4254_v48 = vld [vmem:[%s5796_s1 + $0x40] sm:$0xff]   ;;  %v4258_v49 = vld [vmem:[%s5796_s1 + $0x48] sm:$0xff]   ;;  %v4262_v54 = vld [vmem:[%s5796_s1 + $0x50] sm:$0xff]   ;;  %s3891_s11 = smul.u32 96, %s4372_s21  ;;  %vm1060_vm8 = vsmask.f32 3328 }
  0x7b   : > { %v4255_v46 = vld [vmem:[%s5796_s1 + $0xc0] sm:$0xff]   ;;  %3892 = vmatprep.subr.bf16.mxu0 %v4254_v48  ;;  %v4259_v50 = vld [vmem:[%s5796_s1 + $0xc8] sm:$0xff]   ;;  %v4263_v55 = vld [vmem:[%s5796_s1 + $0xd0] sm:$0xff]   ;;  %vm1061_vm9 = vsmask.f32 7440  ;;  %vm1287_vm10 = vcmask 1042432  }
  0x7c   : > { %v4256_v51 = vld [vmem:[%s5796_s1] sm:$0xff]   ;;  %3956 = vmatprep.subr.bf16.mxu1 %v4255_v46  ;;  %v4260_v52 = vld [vmem:[%s5796_s1 + $0x8] sm:$0xff]   ;;  %v4264_v56 = vld [vmem:[%s5796_s1 + $0x10] sm:$0xff]   ;;  %s4806_s8 = scalar_lea.vmem [#allocation2], %s3891_s11  ;;  %vm1288_vm11 = vcmask 1046532  }
  0x7d   : > { %v4257_v58 = vld [vmem:[%s5796_s1 + $0x80] sm:$0xff]   ;;  %3893 = vmatpush3.bf16.msra.mxu0 %v4256_v51  ;;  %v4261_v53 = vld [vmem:[%s5796_s1 + $0x88] sm:$0xff]   ;;  %v4265_v57 = vld [vmem:[%s5796_s1 + $0x90] sm:$0xff]  }
  0x7e   : > { %3957 = vmatpush3.bf16.msra.mxu1 %v4257_v58  ;;  %3894 = vmatprep.subr.bf16.mxu0 %v4258_v49  ;;  %v4266_v59 = vld [vmem:[%s5796_s1 + $0x58] sm:$0xff]   ;;  %v4270_v63 = vld [vmem:[%s5796_s1 + $0x60] sm:$0xff]   ;;  %v4274_v5 = vld [vmem:[%s5796_s1 + $0x68] sm:$0xff]  }
  0x7f   : > { %3958 = vmatprep.subr.bf16.mxu1 %v4259_v50  ;;  %v4267_v60 = vld [vmem:[%s5796_s1 + $0xd8] sm:$0xff]   ;;  %v4271_v0 = vld [vmem:[%s5796_s1 + $0xe0] sm:$0xff]   ;;  %v4275_v6 = vld [vmem:[%s5796_s1 + $0xe8] sm:$0xff]  }
  0x80   : > { %v4268_v61 = vld [vmem:[%s5796_s1 + $0x18] sm:$0xff]   ;;  %v4272_v3 = vld [vmem:[%s5796_s1 + $0x20] sm:$0xff]   ;;  %v4276_v1 = vld [vmem:[%s5796_s1 + $0x28] sm:$0xff]  }
  0x81   : > { %3895 = vmatpush3.bf16.msra.mxu0 %v4260_v52  ;;  %v4269_v62 = vld [vmem:[%s5796_s1 + $0x98] sm:$0xff]   ;;  %v4273_v4 = vld [vmem:[%s5796_s1 + $0xa0] sm:$0xff]   ;;  %v4277_v7 = vld [vmem:[%s5796_s1 + $0xa8] sm:$0xff]  }
  0x82   : > { %3959 = vmatpush3.bf16.msra.mxu1 %v4261_v53  ;;  %3896 = vmatprep.subr.bf16.mxu0 %v4262_v54  ;;  %v4278_v8 = vld [vmem:[%s5796_s1 + $0x70] sm:$0xff]   ;;  %v4282_v12 = vld [vmem:[%s5796_s1 + $0x78] sm:$0xff]   ;;  %v4809_v16 = vld [vmem:[%s4806_s8] sm:$0xf] }
  0x83   : > { %3960 = vmatprep.subr.bf16.mxu1 %v4263_v55  ;;  %v4279_v9 = vld [vmem:[%s5796_s1 + $0xf0] sm:$0xff]   ;;  %v4283_v13 = vld [vmem:[%s5796_s1 + $0xf8] sm:$0xff]   ;;  %v4812_v17 = vld [vmem:[%s4806_s8 + $0x4] sm:$0xf]  ;;  %v1064_v19 = vshrl.u32 %v4809_v16, 16  ;;  %v1067_v20 = vshll.u32 %v4809_v16, 16 }
  0x84   : > { %v4280_v10 = vld [vmem:[%s5796_s1 + $0x30] sm:$0xff]   ;;  %v4284_v14 = vld [vmem:[%s5796_s1 + $0x38] sm:$0xff]   ;;  %v4815_v18 = vld [vmem:[%s4806_s8 + $0x8] sm:$0x1]  ;;  %v1073_v21 = vshll.u32 %v4812_v17, 16  ;;  %v1077_v22 = vshrl.u32 %v4812_v17, 16 }
  0x85   : > { %3897 = vmatpush3.bf16.msra.mxu0 %v4264_v56  ;;  %v4281_v11 = vld [vmem:[%s5796_s1 + $0xb0] sm:$0xff]   ;;  %v4285_v15 = vld [vmem:[%s5796_s1 + $0xb8] sm:$0xff]   ;;  %v1083_v23 = vshll.u32 %v4815_v18, 16  ;;  %v3629_v24 = vld [vmem:[%s4806_s8 + $0xc] sm:$0xf]  ;;  %v1066_v2 = vrot.slane %v1064_v19, 4 }
  0x86   : > { %3961 = vmatpush3.bf16.msra.mxu1 %v4265_v57  ;;  %3898 = vmatprep.subr.bf16.mxu0 %v4266_v59  ;;  %v1069_v25 = vrot.slane %v1067_v20, 5  ;;  %v4824_v26 = vld [vmem:[%s4806_s8 + $0x10] sm:$0xf]  ;;  %v1375_v27 = vshrl.u32 %v3629_v24, 16  ;;  %v1378_v28 = vshll.u32 %v3629_v24, 16  ;;  %v1075_v29 = vrot.slane %v1073_v21, 5  ;;  %vm4834_vm12 = vmor %vm1060_vm8, %vm1061_vm9 }
  0x87   : > { %3962 = vmatprep.subr.bf16.mxu1 %v4267_v60  ;;  %v1079_v30 = vrot.slane %v1077_v22, 4  ;;  %v1384_v31 = vshll.u32 %v4824_v26, 16  ;;  %v1255_v33 = vld [vmem:[%s4806_s8] sm:$0xe]  ;;  %v1388_v39 = vshrl.u32 %v4824_v26, 16  ;;  %v1085_v41 = vrot.slane %v1083_v23, 5  ;;  %vm4844_vm13 = vmor %vm1287_vm10, %vm1288_vm11 }
  0x88   : > { %v1070_v37 = vor.u32 %v1069_v25, %v1066_v2  ;;  %v1377_v32 = vrot.slane %v1375_v27, 4  ;;  %v1380_v38 = vrot.slane %v1378_v28, 5  ;;  %v4288_v34 = vld [vmem:[%s5796_s1 + $0x140] sm:$0xff]   ;;  %v3735_v42 = vcombine.low %v3629_v24, %v4824_v26  ;;  %v1256_v23 = vld [vmem:[%s4806_s8 + $0xc] sm:$0xe] }
  0x89   : > { %3899 = vmatpush3.bf16.msra.mxu0 %v4268_v61  ;;  %v1080_v35 = vor.u32 %v1079_v30, %v1075_v29  ;;  %v4838_v36 = vrot.slane %v1384_v31, 5  ;;  %v1295_v44 = vrot.slane %v4815_v18, 5  ;;  %v1390_v47 = vrot.slane %v1388_v39, 4  ;;  %v4289_v46 = vld [vmem:[%s5796_s1 + $0x1c0] sm:$0xff]   ;;  %v4296_v18 = vld [vmem:[%s5796_s1 + $0x108] sm:$0xff]  }
  0x8a   : > { %3963 = vmatpush3.bf16.msra.mxu1 %v4269_v62  ;;  %3900 = vmatprep.subr.bf16.mxu0 %v4270_v63  ;;  %v1071_v43 = vrot.slane %v1070_v37, 4  ;;  %v1381_v45 = vor.u32 %v1380_v38, %v1377_v32  ;;  %v1600_v58 = vrot.slane %v4824_v26, 5  ;;  %v3619_v49 = vrot.slane %v1255_v33, 9  ;;  %v4290_v55 = vld [vmem:[%s5796_s1 + $0x100] sm:$0xff]   ;;  %v4871_v62 = vld [vmem:[%s4806_s8 + $0xc] sm:$0xf] }
  0x8b   : > { %3964 = vmatprep.subr.bf16.mxu1 %v4271_v0  ;;  %v1081_v51 = vrot.slane %v1080_v35, 4  ;;  %2979 = vmatprep.mubr.bf16.mxu1 %v3735_v42  ;;  %v1292_v50 = vrot.slane %v4812_v17, 5  ;;  %v1391_v54 = vor.u32 %v1390_v47, %v4838_v36  ;;  %v3711_v57 = vcombine.low %v4809_v16, %v4812_v17  ;;  %v4291_v61 = vld [vmem:[%s5796_s1 + $0x180] sm:$0xff]   ;;  %v4294_v63 = vld [vmem:[%s5796_s1 + $0x148] sm:$0xff]   ;;  %v4897_v16 = vld [vmem:[%s4806_s8 + $0x1c] sm:$0xf] }
  0x8c   : > { %v1076_v52 = vsel %vm4834_vm12, %v1071_v43, %v1075_v29  ;;  %v4855_v53 = vrot.slane %v1381_v45, 4  ;;  %v4297_v24 = vld [vmem:[%s5796_s1 + $0x188] sm:$0xff]   ;;  %v1412_v27 = vshrl.u32 %v4897_v16, 16  ;;  %v4300_v29 = vld [vmem:[%s5796_s1 + $0x150] sm:$0xff]   ;;  %v3620_v32 = vrot.slane %v1256_v23, 9 }
  0x8d   : > { %3901 = vmatpush3.bf16.msra.mxu0 %v4272_v3  ;;  %v1086_v56 = vsel %vm4834_vm12, %v1081_v51, %v1085_v41  ;;  %v1293_v59 = vsel %vm4844_vm13, %v3619_v49, %v1292_v50  ;;  %v1294_v60 = vrot.slane %v1292_v50, 4  ;;  %v4301_v37 = vld [vmem:[%s5796_s1 + $0x1d0] sm:$0xff]   ;;  %v4934_v51 = vld [vmem:[%s4806_s8 + $0x18] sm:$0xf]  ;;  %v4937_v49 = vld [vmem:[%s4806_s8 + $0x1c] sm:$0xf] }
  0x8e   : > { %3965 = vmatpush3.bf16.msra.mxu1 %v4273_v4  ;;  %3902 = vmatprep.subr.bf16.mxu0 %v4274_v5  ;;  %v3719_v0 = vcombine.low %v1076_v52, %v1086_v56  ;;  %v1387_v3 = vsel %vm4834_vm12, %v4855_v53, %v4838_v36  ;;  %v4880_v4 = vrot.slane %v1391_v54, 4  ;;  %v4883_v5 = vld [vmem:[%s4806_s8 + $0x10] sm:$0xf]  ;;  %v1054_v50 = vld [vmem:[%s4806_s8 + $0x20] sm:$0x1]  ;;  %v1115_v56 = vshll.u32 %v4934_v51, 16 }
  0x8f   : > { %3966 = vmatprep.subr.bf16.mxu1 %v4275_v6  ;;  %v1053_v6 = vld [vmem:[%s4806_s8 + $0x14] sm:$0x1]  ;;  %v1299_v38 = vrot.slane %v4883_v5, 5 }
  0x90   : > { %2882 = vmatprep.mubr.bf16.mxu0 %v3719_v0  ;;  %v1302_v39 = vrot.slane %v1053_v6, 5  ;;  %v1257_v0 = vld [vmem:[%s4806_s8 + $0x18] sm:$0xe] }
  0x91   : > { %3903 = vmatpush3.bf16.msra.mxu0 %v4276_v1  ;;  %v1088_v1 = vshrl.u32 %v4871_v62, 16  ;;  %v1300_v42 = vsel %vm4844_vm13, %v3620_v32, %v1299_v38  ;;  %v1301_v43 = vrot.slane %v1299_v38, 4 }
  0x92   : > { %3967 = vmatpush3.bf16.msra.mxu1 %v4277_v7  ;;  %3904 = vmatprep.subr.bf16.mxu0 %v4278_v8  ;;  %v1296_v7 = vsel %vm4844_vm13, %v1294_v60, %v1295_v44  ;;  %v1091_v8 = vshll.u32 %v4871_v62, 16  ;;  %v4303_v44 = vld [vmem:[%s5796_s1 + $0x190] sm:$0xff]  }
  0x93   : > { %3968 = vmatprep.subr.bf16.mxu1 %v4279_v9  ;;  %v1097_v9 = vshll.u32 %v4883_v5, 16  ;;  %v1303_v54 = vsel %vm4844_vm13, %v1301_v43, %v1302_v39 }
  0x94   : > { %v1093_v19 = vrot.slane %v1091_v8, 5  ;;  %v3728_v60 = vcombine.low %v1300_v42, %v1303_v54 }
  0x95   : > { %3905 = vmatpush3.bf16.msra.mxu0 %v4280_v10  ;;  %v1101_v10 = vshrl.u32 %v4883_v5, 16  ;;  %v1099_v20 = vrot.slane %v1097_v9, 5 }
  0x96   : > { %3969 = vmatpush3.bf16.msra.mxu1 %v4281_v11  ;;  %3906 = vmatprep.subr.bf16.mxu0 %v4282_v12  ;;  %v3631_v11 = vld [vmem:[%s4806_s8 + $0x18] sm:$0xf]  ;;  %v4295_v12 = vld [vmem:[%s5796_s1 + $0x1c8] sm:$0xff]  }
  0x97   : > { %3970 = vmatprep.subr.bf16.mxu1 %v4283_v13  ;;  %v3727_v13 = vcombine.low %v1293_v59, %v1296_v7  ;;  %v1399_v17 = vshrl.u32 %v3631_v11, 16  ;;  %v1103_v21 = vrot.slane %v1101_v10, 4  ;;  %v1402_v22 = vshll.u32 %v3631_v11, 16  ;;  %v4946_v59 = vld [vmem:[%s4806_s8 + $0x28] sm:$0xf] }
  0x98   : > { %v3736_v28 = vcombine.low %v3631_v11, %v4897_v16 }
  0x99   : > { %3907 = vmatpush3.bf16.msra.mxu0 %v4284_v14  ;;  %v1090_v14 = vrot.slane %v1088_v1, 4  ;;  %v4906_v25 = vrot.slane %v1399_v17, 4  ;;  %v1104_v31 = vor.u32 %v1103_v21, %v1099_v20  ;;  %v4913_v33 = vrot.slane %v1402_v22, 5 }
  0x9a   : > { %3971 = vmatpush3.bf16.msra.mxu1 %v4285_v15  ;;  %4020 = vmatprep.subr.bf16.mxu0 %v4288_v34  ;;  %v1107_v15 = vshll.u32 %v1053_v6, 16  ;;  %v4302_v34 = vld [vmem:[%s5796_s1 + $0x110] sm:$0xff]   ;;  %v1117_v1 = vrot.slane %v1115_v56, 5  ;;  %v1309_v22 = vrot.slane %v1054_v50, 5 }
  0x9b   : > { %4084 = vmatprep.subr.bf16.mxu1 %v4289_v46  ;;  %v1094_v30 = vor.u32 %v1093_v19, %v1090_v14  ;;  %v1105_v41 = vrot.slane %v1104_v31, 4  ;;  %v3712_v46 = vcombine.low %v4871_v62, %v4883_v5  ;;  %v1125_v62 = vshrl.u32 %v4937_v49, 16  ;;  %v4306_v5 = vld [vmem:[%s5796_s1 + $0x158] sm:$0xff]  }
  0x9c   : > { %2883 = vmatmul.mubr.bf16.vlgmr.msra.gmra.mrb[0].mxu0 %v3711_v57  ;;  %v1109_v2 = vrot.slane %v1107_v15, 5  ;;  %v3633_v57 = vld [vmem:[%s4806_s8 + $0x24] sm:$0xf]  ;;  %v3621_v19 = vrot.slane %v1257_v0, 9 }
  0x9d   : > { %2980 = vmatmul.mubr.bf16.vlgmr.msra.gmra.mrb[0].mxu1 %v3727_v13  ;;  %4021 = vmatpush3.bf16.msra.mxu0 %v4290_v55  ;;  %v1095_v35 = vrot.slane %v1094_v30, 4  ;;  %v1112_v55 = vshrl.u32 %v4934_v51, 16  ;;  %v1423_v7 = vshrl.u32 %v3633_v57, 16  ;;  %v1426_v8 = vshll.u32 %v3633_v57, 16  ;;  %v4969_v30 = vld [vmem:[%s4806_s8 + $0x28] sm:$0xf] }
  0x9e   : > { %4085 = vmatpush3.bf16.msra.mxu1 %v4291_v61  ;;  %4022 = vmatprep.subr.bf16.mxu0 %v4294_v63  ;;  %v1110_v47 = vsel %vm4834_vm12, %v1105_v41, %v1109_v2  ;;  %v1121_v61 = vshll.u32 %v4937_v49, 16  ;;  %v1131_v63 = vshll.u32 %v1054_v50, 16  ;;  %v1127_v10 = vrot.slane %v1125_v62, 4  ;;  %v1258_v50 = vld [vmem:[%s4806_s8 + $0x24] sm:$0xe] }
  0x9f   : > { %2987 = vmatprep.mubr.bf16.mxu1 %v3736_v28  ;;  %4086 = vmatprep.subr.bf16.mxu1 %v4295_v12  ;;  %v1100_v45 = vsel %vm4834_vm12, %v1095_v35, %v1099_v20  ;;  %v1114_v6 = vrot.slane %v1112_v55, 4  ;;  %v1436_v12 = vshrl.u32 %v4946_v59, 16  ;;  %v4955_v14 = vrot.slane %v1423_v7, 4 }
  0xa0   : > { %v3720_v52 = vcombine.low %v1100_v45, %v1110_v47  ;;  %v1123_v9 = vrot.slane %v1121_v61, 5  ;;  %v1133_v11 = vrot.slane %v1131_v63, 5  ;;  %v4957_v15 = vrot.slane %v1426_v8, 5  ;;  %v4987_v45 = vld [vmem:[%s4806_s8 + $0x34] sm:$0xf] }
  0xa1   : > { %4023 = vmatpush3.bf16.msra.mxu0 %v4296_v18  ;;  %v1118_v13 = vor.u32 %v1117_v1, %v1114_v6  ;;  %v3737_v17 = vcombine.low %v3633_v57, %v4946_v59  ;;  %v1306_v20 = vrot.slane %v4937_v49, 5  ;;  %v1145_v39 = vshll.u32 %v4969_v30, 16 }
  0xa2   : > { %4087 = vmatpush3.bf16.msra.mxu1 %v4297_v24  ;;  %4024 = vmatprep.subr.bf16.mxu0 %v4300_v29  ;;  %v1128_v18 = vor.u32 %v1127_v10, %v1123_v9  ;;  %v3713_v24 = vcombine.low %v4934_v51, %v4937_v49  ;;  %v4966_v29 = vld [vmem:[%s4806_s8 + $0x24] sm:$0xf]  ;;  %v1149_v42 = vshrl.u32 %v4969_v30, 16  ;;  %v1460_v61 = vshrl.u32 %v4987_v45, 16  ;;  %v4309_v10 = vld [vmem:[%s5796_s1 + $0x198] sm:$0xff]  }
  0xa3   : > { %4088 = vmatprep.subr.bf16.mxu1 %v4301_v37  ;;  %2890 = vmatprep.mubr.bf16.mxu0 %v3720_v52  ;;  %v1119_v21 = vrot.slane %v1118_v13, 4  ;;  %v1307_v2 = vsel %vm4844_vm13, %v3621_v19, %v1306_v20  ;;  %v1308_v28 = vrot.slane %v1306_v20, 4  ;;  %v1055_v37 = vld [vmem:[%s4806_s8 + $0x2c] sm:$0x1]  ;;  %v1136_v32 = vshrl.u32 %v4966_v29, 16  ;;  %v4312_v13 = vld [vmem:[%s5796_s1 + $0x160] sm:$0xff]  }
  0xa4   : > { %2891 = vmatmul.mubr.bf16.gmra.mrb[4].mxu0 %v3712_v46  ;;  %v1129_v23 = vrot.slane %v1128_v18, 4  ;;  %v1139_v38 = vshll.u32 %v4966_v29, 16  ;;  %v1155_v43 = vshll.u32 %v1055_v37, 16  ;;  %v1147_v52 = vrot.slane %v1145_v39, 5 }
  0xa5   : > { %4025 = vmatpush3.bf16.msra.mxu0 %v4302_v34  ;;  %2988 = vmatmul.mubr.bf16.gmra.mrb[4].mxu1 %v3728_v60  ;;  %v1124_v31 = vsel %vm4834_vm12, %v1119_v21, %v1123_v9  ;;  %v4307_v34 = vld [vmem:[%s5796_s1 + $0x1d8] sm:$0xff]   ;;  %v1310_v41 = vsel %vm4844_vm13, %v1308_v28, %v1309_v22  ;;  %v1138_v51 = vrot.slane %v1136_v32, 4  ;;  %v1151_v54 = vrot.slane %v1149_v42, 4  ;;  %v5013_v21 = vld [vmem:[%s4806_s8 + $0x30] sm:$0xf] }
  0xa6   : > { %4089 = vmatpush3.bf16.msra.mxu1 %v4303_v44  ;;  %4026 = vmatprep.subr.bf16.mxu0 %v4306_v5  ;;  %v1134_v35 = vsel %vm4834_vm12, %v1129_v23, %v1133_v11  ;;  %v3635_v44 = vld [vmem:[%s4806_s8 + $0x30] sm:$0xf]  ;;  %v3729_v46 = vcombine.low %v1307_v2, %v1310_v41  ;;  %v1141_v49 = vrot.slane %v1139_v38, 5  ;;  %v1157_v55 = vrot.slane %v1155_v43, 5  ;;  %v4308_v9 = vld [vmem:[%s5796_s1 + $0x118] sm:$0xff]   ;;  %v4313_v23 = vld [vmem:[%s5796_s1 + $0x1e0] sm:$0xff]  }
  0xa7   : > { %2995 = vmatprep.mubr.bf16.mxu1 %v3737_v17  ;;  %v3721_v47 = vcombine.low %v1124_v31, %v1134_v35  ;;  %4090 = vmatprep.subr.bf16.mxu1 %v4307_v34  ;;  %v1447_v56 = vshrl.u32 %v3635_v44, 16  ;;  %v1450_v60 = vshll.u32 %v3635_v44, 16  ;;  %v3738_v62 = vcombine.low %v3635_v44, %v4987_v45  ;;  %v5016_v22 = vld [vmem:[%s4806_s8 + $0x34] sm:$0xf]  ;;  %v1056_v2 = vld [vmem:[%s4806_s8 + $0x38] sm:$0x1] }
  0xa8   : > { %v1142_v57 = vor.u32 %v1141_v49, %v1138_v51  ;;  %v1152_v63 = vor.u32 %v1151_v54, %v1147_v52  ;;  %v3622_v5 = vrot.slane %v1258_v50, 9  ;;  %v1313_v7 = vrot.slane %v4969_v30, 5  ;;  %v4314_v31 = vld [vmem:[%s5796_s1 + $0x120] sm:$0xff]   ;;  %v3637_v34 = vld [vmem:[%s4806_s8 + $0x3c] sm:$0xf] }
  0xa9   : > { %2898 = vmatprep.mubr.bf16.mxu0 %v3721_v47  ;;  %v4992_v0 = vrot.slane %v1447_v56, 4  ;;  %v4994_v1 = vrot.slane %v1450_v60, 5  ;;  %v1316_v8 = vrot.slane %v1055_v37, 5  ;;  %v3714_v18 = vcombine.low %v4966_v29, %v4969_v30  ;;  %4027 = vmatpush3.bf16.msra.mxu0 %v4308_v9  ;;  %v5035_v35 = vld [vmem:[%s4806_s8 + $0x40] sm:$0xf] }
  0xaa   : > { %v1143_v6 = vrot.slane %v1142_v57, 4  ;;  %v1153_v11 = vrot.slane %v1152_v63, 4  ;;  %v1314_v19 = vsel %vm4844_vm13, %v3622_v5, %v1313_v7  ;;  %v1315_v20 = vrot.slane %v1313_v7, 4  ;;  %4091 = vmatpush3.bf16.msra.mxu1 %v4309_v10  ;;  %4028 = vmatprep.subr.bf16.mxu0 %v4312_v13  ;;  %v1259_v47 = vld [vmem:[%s4806_s8 + $0x30] sm:$0xe]  ;;  %v4318_v57 = vld [vmem:[%s5796_s1 + $0x168] sm:$0xff]  }
  0xab   : > { %v1160_v28 = vshrl.u32 %v5013_v21, 16  ;;  %v1163_v29 = vshll.u32 %v5013_v21, 16  ;;  %v1169_v30 = vshll.u32 %v5016_v22, 16  ;;  %v1173_v38 = vshrl.u32 %v5016_v22, 16  ;;  %4092 = vmatprep.subr.bf16.mxu1 %v4313_v23  ;;  %v4320_v10 = vld [vmem:[%s5796_s1 + $0x128] sm:$0xff]   ;;  %v4324_v23 = vld [vmem:[%s5796_s1 + $0x170] sm:$0xff]  }
  0xac   : > { %2899 = vmatmul.mubr.bf16.gmra.mrb[8].mxu0 %v3713_v24  ;;  %v1148_v17 = vsel %vm4834_vm12, %v1143_v6, %v1147_v52  ;;  %v1158_v24 = vsel %vm4834_vm12, %v1153_v11, %v1157_v55  ;;  %v1317_v32 = vsel %vm4844_vm13, %v1315_v20, %v1316_v8  ;;  %v1179_v39 = vshll.u32 %v1056_v2, 16  ;;  %v4319_v6 = vld [vmem:[%s5796_s1 + $0x1e8] sm:$0xff]   ;;  %v5065_v20 = vld [vmem:[%s4806_s8 + $0x3c] sm:$0xf] }
  0xad   : > { %2996 = vmatmul.mubr.bf16.gmra.mrb[8].mxu1 %v3729_v46  ;;  %v3722_v37 = vcombine.low %v1148_v17, %v1158_v24  ;;  %v3730_v41 = vcombine.low %v1314_v19, %v1317_v32  ;;  %v1162_v42 = vrot.slane %v1160_v28, 4  ;;  %v1165_v43 = vrot.slane %v1163_v29, 5  ;;  %v4315_v46 = vld [vmem:[%s5796_s1 + $0x1a0] sm:$0xff]   ;;  %4029 = vmatpush3.bf16.msra.mxu0 %v4314_v31  ;;  %v4321_v13 = vld [vmem:[%s5796_s1 + $0x1a8] sm:$0xff]  }
  0xae   : > { %3003 = vmatprep.mubr.bf16.mxu1 %v3738_v62  ;;  %v1171_v44 = vrot.slane %v1169_v30, 5  ;;  %v1175_v51 = vrot.slane %v1173_v38, 4  ;;  %v1181_v49 = vrot.slane %v1179_v39, 5  ;;  %v1471_v50 = vshrl.u32 %v3637_v34, 16  ;;  %4093 = vmatpush3.bf16.msra.mxu1 %v4315_v46  ;;  %v5075_v28 = vld [vmem:[%s4806_s8 + $0x40] sm:$0xf] }
  0xaf   : > { %2906 = vmatprep.mubr.bf16.mxu0 %v3722_v37  ;;  %v1474_v52 = vshll.u32 %v3637_v34, 16  ;;  %v1166_v54 = vor.u32 %v1165_v43, %v1162_v42  ;;  %v1484_v55 = vshrl.u32 %v5035_v35, 16  ;;  %v3739_v56 = vcombine.low %v3637_v34, %v5035_v35  ;;  %4030 = vmatprep.subr.bf16.mxu0 %v4318_v57  ;;  %v1057_v29 = vld [vmem:[%s4806_s8 + $0x44] sm:$0x1]  ;;  %v3639_v34 = vld [vmem:[%s4806_s8 + $0x48] sm:$0xf] }
  0xb0   : > { %v1176_v60 = vor.u32 %v1175_v51, %v1171_v44  ;;  %v5046_v62 = vrot.slane %v1471_v50, 4  ;;  %v3623_v5 = vrot.slane %v1259_v47, 9  ;;  %v1320_v8 = vrot.slane %v5016_v22, 5  ;;  %4094 = vmatprep.subr.bf16.mxu1 %v4319_v6  ;;  %v4325_v47 = vld [vmem:[%s5796_s1 + $0x1f0] sm:$0xff]  }
  0xb1   : > { %v5048_v63 = vrot.slane %v1474_v52, 5  ;;  %v1167_v7 = vrot.slane %v1166_v54, 4  ;;  %v1323_v9 = vrot.slane %v1056_v2, 5  ;;  %4031 = vmatpush3.bf16.msra.mxu0 %v4320_v10  ;;  %v3715_v2 = vcombine.low %v5013_v21, %v5016_v22 }
  0xb2   : > { %v1177_v11 = vrot.slane %v1176_v60, 4  ;;  %v1322_v19 = vrot.slane %v1320_v8, 4  ;;  %v1184_v30 = vshrl.u32 %v5065_v20, 16  ;;  %v1187_v31 = vshll.u32 %v5065_v20, 16  ;;  %4095 = vmatpush3.bf16.msra.mxu1 %v4321_v13  ;;  %4032 = vmatprep.subr.bf16.mxu0 %v4324_v23  ;;  %v4326_v13 = vld [vmem:[%s5796_s1 + $0x130] sm:$0xff]  }
  0xb3   : > { %v1172_v17 = vsel %vm4834_vm12, %v1167_v7, %v1171_v44  ;;  %v1193_v38 = vshll.u32 %v5075_v28, 16  ;;  %v1197_v39 = vshrl.u32 %v5075_v28, 16  ;;  %v1203_v43 = vshll.u32 %v1057_v29, 16  ;;  %v1260_v44 = vld [vmem:[%s4806_s8 + $0x3c] sm:$0xe]  ;;  %4096 = vmatprep.subr.bf16.mxu1 %v4325_v47 }
  0xb4   : > { %2907 = vmatmul.mubr.bf16.gmra.mrb[12].mxu0 %v3714_v18  ;;  %v1321_v18 = vsel %vm4844_vm13, %v3623_v5, %v1320_v8  ;;  %v1182_v24 = vsel %vm4834_vm12, %v1177_v11, %v1181_v49  ;;  %v1324_v32 = vsel %vm4844_vm13, %v1322_v19, %v1323_v9  ;;  %v1186_v22 = vrot.slane %v1184_v30, 4  ;;  %v4327_v30 = vld [vmem:[%s5796_s1 + $0x1b0] sm:$0xff]  }
  0xb5   : > { %3004 = vmatmul.mubr.bf16.gmra.mrb[12].mxu1 %v3730_v41  ;;  %v3723_v37 = vcombine.low %v1172_v17, %v1182_v24  ;;  %v5086_v41 = vld [vmem:[%s4806_s8 + $0x4c] sm:$0xf]  ;;  %v3731_v21 = vcombine.low %v1321_v18, %v1324_v32  ;;  %v1189_v42 = vrot.slane %v1187_v31, 5  ;;  %v1195_v46 = vrot.slane %v1193_v38, 5  ;;  %4033 = vmatpush3.bf16.msra.mxu0 %v4326_v13  ;;  %v4330_v38 = vld [vmem:[%s5796_s1 + $0x178] sm:$0xff]  }
  0xb6   : > { %3011 = vmatprep.mubr.bf16.mxu1 %v3739_v56  ;;  %v1199_v51 = vrot.slane %v1197_v39, 4  ;;  %v1495_v49 = vshrl.u32 %v3639_v34, 16  ;;  %v1498_v50 = vshll.u32 %v3639_v34, 16  ;;  %v1205_v54 = vrot.slane %v1203_v43, 5  ;;  %v5136_v43 = vld [vmem:[%s4806_s8 + $0x58] sm:$0xf]  ;;  %4097 = vmatpush3.bf16.msra.mxu1 %v4327_v30 }
  0xb7   : > { %2914 = vmatprep.mubr.bf16.mxu0 %v3723_v37  ;;  %v1190_v52 = vor.u32 %v1189_v42, %v1186_v22  ;;  %v3740_v57 = vcombine.low %v3639_v34, %v5086_v41  ;;  %v3624_v8 = vrot.slane %v1260_v44, 9  ;;  %v1327_v9 = vrot.slane %v5075_v28, 5  ;;  %v5122_v37 = vld [vmem:[%s4806_s8 + $0x50] sm:$0x1]  ;;  %v3641_v42 = vld [vmem:[%s4806_s8 + $0x54] sm:$0xf]  ;;  %4034 = vmatprep.subr.bf16.mxu0 %v4330_v38 }
  0xb8   : > { %v1200_v60 = vor.u32 %v1199_v51, %v1195_v46  ;;  %v5094_v5 = vrot.slane %v1495_v49, 4  ;;  %v5096_v6 = vrot.slane %v1498_v50, 5  ;;  %v1330_v10 = vrot.slane %v1057_v29, 5  ;;  %v5114_v29 = vld [vmem:[%s4806_s8 + $0x4c] sm:$0xf]  ;;  %v4331_v50 = vld [vmem:[%s5796_s1 + $0x1f8] sm:$0xff]  }
  0xb9   : > { %v1191_v7 = vrot.slane %v1190_v52, 4  ;;  %v1405_v17 = vor.u32 %v4913_v33, %v4906_v25  ;;  %v3716_v19 = vcombine.low %v5065_v20, %v5075_v28  ;;  %v1328_v23 = vsel %vm4844_vm13, %v3624_v8, %v1327_v9  ;;  %v1261_v49 = vld [vmem:[%s4806_s8 + $0x48] sm:$0xe]  ;;  %4098 = vmatprep.subr.bf16.mxu1 %v4331_v50  ;;  %v5165_v38 = vld [vmem:[%s5796_s1 + $0x200] sm:$0xff]   ;;  %v5186_v50 = vld [vmem:[%s4806_s8 + $0x58] sm:$0xf] }
  0xba   : > { %v1201_v11 = vrot.slane %v1200_v60, 4  ;;  %v1329_v24 = vrot.slane %v1327_v9, 4  ;;  %v1217_v32 = vshll.u32 %v5114_v29, 16  ;;  %v1227_v22 = vshll.u32 %v5122_v37, 16 }
  0xbb   : > { %v1196_v18 = vsel %vm4834_vm12, %v1191_v7, %v1195_v46  ;;  %v1522_v60 = vshll.u32 %v3641_v42, 16  ;;  %v3741_v9 = vcombine.low %v3641_v42, %v5136_v43 }
  0xbc   : > { %2915 = vmatmul.mubr.bf16.gmra.mrb[16].mxu0 %v3715_v2  ;;  %v5111_v2 = vld [vmem:[%s4806_s8 + $0x48] sm:$0xf]  ;;  %v1206_v31 = vsel %vm4834_vm12, %v1201_v11, %v1205_v54  ;;  %v1331_v34 = vsel %vm4844_vm13, %v1329_v24, %v1330_v10  ;;  %v1219_v51 = vrot.slane %v1217_v32, 5  ;;  %v1229_v54 = vrot.slane %v1227_v22, 5  ;;  %v4332_v10 = vld [vmem:[%s5796_s1 + $0x138] sm:$0xff]  }
  0xbd   : > { %3012 = vmatmul.mubr.bf16.gmra.mrb[16].mxu1 %v3731_v21  ;;  %v1208_v20 = vshrl.u32 %v5111_v2, 16  ;;  %v1211_v28 = vshll.u32 %v5111_v2, 16  ;;  %v3724_v39 = vcombine.low %v1196_v18, %v1206_v31  ;;  %v1221_v21 = vshrl.u32 %v5114_v29, 16  ;;  %4035 = vmatpush3.bf16.msra.mxu0 %v4332_v10 }
  0xbe   : > { %3019 = vmatprep.mubr.bf16.mxu1 %v3740_v57  ;;  %v3732_v44 = vcombine.low %v1328_v23, %v1331_v34  ;;  %v1519_v57 = vshrl.u32 %v3641_v42, 16  ;;  %v1429_v11 = vor.u32 %v4957_v15, %v4955_v14  ;;  %v5151_v23 = vrot.slane %v1522_v60, 5  ;;  %4164 = vmatprep.subr.bf16.mxu0 %v5165_v38 }
  0xbf   : > { %v1210_v47 = vrot.slane %v1208_v20, 4  ;;  %v1213_v46 = vrot.slane %v1211_v28, 5  ;;  %2922 = vmatprep.mubr.bf16.mxu0 %v3724_v39  ;;  %v1223_v52 = vrot.slane %v1221_v21, 4  ;;  %v3625_v24 = vrot.slane %v1261_v49, 9 }
  0xc0   : > { %v5149_v18 = vrot.slane %v1519_v57, 4  ;;  %v1334_v31 = vrot.slane %v5114_v29, 5  ;;  %v1337_v20 = vrot.slane %v5122_v37, 5  ;;  %v5160_v28 = vrot.slane %v1600_v58, 4 }
  0xc1   : > { %v1214_v7 = vor.u32 %v1213_v46, %v1210_v47  ;;  %v1224_v13 = vor.u32 %v1223_v52, %v1219_v51  ;;  %v1453_v39 = vor.u32 %v4994_v1, %v4992_v0  ;;  %v1477_v37 = vor.u32 %v5048_v63, %v5046_v62  ;;  %v5425_v1 = vld [vmem:[%s4806_s8 + $0x48] sm:$0xf] }
  0xc2   : > { %v1335_v22 = vsel %vm4844_vm13, %v3625_v24, %v1334_v31  ;;  %v1336_v42 = vrot.slane %v1334_v31, 4  ;;  %v1607_v47 = vrot.slane %v4897_v16, 5  ;;  %v3717_v49 = vcombine.low %v5111_v2, %v5114_v29  ;;  %v3643_v29 = vld [vmem:[%s4806_s8 + $0x60] sm:$0xf] }
  0xc3   : > { %v1215_v30 = vrot.slane %v1214_v7, 4  ;;  %v1225_v32 = vrot.slane %v1224_v13, 4  ;;  %v1245_v2 = vshrl.u32 %v5186_v50, 16  ;;  %v1543_v8 = vshrl.u32 %v3643_v29, 16 }
  0xc4   : > { %2923 = vmatmul.mubr.bf16.gmra.mrb[20].mxu0 %v3716_v19  ;;  %v4333_v19 = vld [vmem:[%s5796_s1 + $0x1b8] sm:$0xff]   ;;  %v1338_v7 = vsel %vm4844_vm13, %v1336_v42, %v1337_v20 }
  0xc5   : > { %3020 = vmatmul.mubr.bf16.gmra.mrb[20].mxu1 %v3732_v44  ;;  %v1220_v21 = vsel %vm4834_vm12, %v1215_v30, %v1219_v51  ;;  %v5178_v44 = vld [vmem:[%s4806_s8 + $0x54] sm:$0xf]  ;;  %v1230_v46 = vsel %vm4834_vm12, %v1225_v32, %v1229_v54  ;;  %v1059_v51 = vld [vmem:[%s4806_s8 + $0x5c] sm:$0x1]  ;;  %v1241_v54 = vshll.u32 %v5186_v50, 16  ;;  %v3733_v10 = vcombine.low %v1335_v22, %v1338_v7 }
  0xc6   : > { %3027 = vmatprep.mubr.bf16.mxu1 %v3741_v9  ;;  %4099 = vmatpush3.bf16.msra.mxu1 %v4333_v19  ;;  %v1232_v52 = vshrl.u32 %v5178_v44, 16  ;;  %v1235_v57 = vshll.u32 %v5178_v44, 16  ;;  %v3725_v60 = vcombine.low %v1220_v21, %v1230_v46  ;;  %v5199_v9 = vld [vmem:[%s4806_s8 + $0x64] sm:$0xf]  ;;  %v1251_v19 = vshll.u32 %v1059_v51, 16 }
  0xc7   : > { %4196 = vmatprep.subr.bf16.mxu1 %v5165_v38  ;;  %v1262_v30 = vld [vmem:[%s4806_s8 + $0x54] sm:$0xe]  ;;  %v1243_v31 = vrot.slane %v1241_v54, 5  ;;  %v1247_v32 = vrot.slane %v1245_v2, 4  ;;  %v1546_v21 = vshll.u32 %v3643_v29, 16  ;;  %v1556_v46 = vshrl.u32 %v5199_v9, 16 }
  0xc8   : > { %v1234_v13 = vrot.slane %v1232_v52, 4  ;;  %v1237_v24 = vrot.slane %v1235_v57, 5  ;;  %2930 = vmatprep.mubr.bf16.mxu0 %v3725_v60  ;;  %v1253_v42 = vrot.slane %v1251_v19, 5  ;;  %v3742_v56 = vcombine.low %v3643_v29, %v5199_v9 }
  0xc9   : > { %v1248_v34 = vor.u32 %v1247_v32, %v1243_v31  ;;  %v5204_v22 = vrot.slane %v1543_v8, 4  ;;  %v5206_v52 = vrot.slane %v1546_v21, 5  ;;  %v1525_v57 = vor.u32 %v5151_v23, %v5149_v18  ;;  %v5231_v21 = vld [vmem:[%s4806_s8 + $0x18] sm:$0xf] }
  0xca   : > { %v1238_v20 = vor.u32 %v1237_v24, %v1234_v13  ;;  %v1341_v7 = vrot.slane %v5186_v50, 5  ;;  %v1344_v54 = vrot.slane %v1059_v51, 5  ;;  %v3718_v29 = vcombine.low %v5178_v44, %v5186_v50  ;;  %v3645_v51 = vld [vmem:[%s4806_s8 + $0x14] sm:$0x1] }
  0xcb   : > { %v1249_v2 = vrot.slane %v1248_v34, 4  ;;  %v1609_v8 = vrot.slane %v1607_v47, 4  ;;  %v3653_v34 = vld [vmem:[%s4806_s8 + $0xc] sm:$0xe]  ;;  %v5226_v44 = vrot.slane %v1405_v17, 4  ;;  %v1394_v19 = vshll.u32 %v3645_v51, 16 }
  0xcc   : > { %2931 = vmatmul.mubr.bf16.gmra.mrb[24].mxu0 %v3717_v49  ;;  %v1239_v60 = vrot.slane %v1238_v20, 4  ;;  %v3626_v49 = vrot.slane %v1262_v30, 9  ;;  %v1343_v24 = vrot.slane %v1341_v7, 4  ;;  %v3661_v30 = vrot.slane %v3653_v34, 9 }
  0xcd   : > { %3028 = vmatmul.mubr.bf16.gmra.mrb[24].mxu1 %v3733_v10  ;;  %v1549_v10 = vor.u32 %v5206_v52, %v5204_v22  ;;  %v1254_v50 = vsel %vm4834_vm12, %v1249_v2, %v1253_v42  ;;  %v1603_v32 = vrot.slane %v3645_v51, 5  ;;  %v1683_v25 = vshrl.u32 %v5231_v21, 16 }
  0xce   : > { %3035 = vmatprep.mubr.bf16.mxu1 %v3742_v56  ;;  %v1244_v56 = vsel %vm4834_vm12, %v1239_v60, %v1243_v31  ;;  %v1342_v13 = vsel %vm4844_vm13, %v3626_v49, %v1341_v7  ;;  %v1345_v20 = vsel %vm4844_vm13, %v1343_v24, %v1344_v54  ;;  %v5236_v60 = vld [vmem:[%s4806_s8 + $0x1c] sm:$0xf]  ;;  %v5239_v49 = vld [vmem:[%s4806_s8 + $0x20] sm:$0x1]  ;;  %v1686_v33 = vshll.u32 %v5231_v21, 16 }
  0xcf   : > { %v3726_v31 = vcombine.low %v1244_v56, %v1254_v50  ;;  %v3734_v17 = vcombine.low %v1342_v13, %v1345_v20  ;;  %v1396_v42 = vrot.slane %v1394_v19, 5  ;;  %v1601_v7 = vsel %vm4844_vm13, %v3661_v30, %v1600_v58  ;;  %v3646_v13 = vld [vmem:[%s4806_s8 + $0x20] sm:$0x1]  ;;  %v3654_v50 = vld [vmem:[%s4806_s8 + $0x18] sm:$0xe] }
  0xd0   : > { %v1604_v54 = vsel %vm4844_vm13, %v5160_v28, %v1603_v32  ;;  %v1685_v56 = vrot.slane %v1683_v25, 4  ;;  %v1688_v24 = vrot.slane %v1686_v33, 5  ;;  %v1692_v51 = vshll.u32 %v5236_v60, 16  ;;  %v5261_v19 = vld [vmem:[%s4806_s8 + $0x24] sm:$0xf] }
  0xd1   : > { %2938 = vmatprep.mubr.bf16.mxu0 %v3726_v31  ;;  %v3751_v2 = vcombine.low %v1601_v7, %v1604_v54  ;;  %v1696_v26 = vshrl.u32 %v5236_v60, 16  ;;  %v1702_v34 = vshll.u32 %v5239_v49, 16  ;;  %v1397_v58 = vsel %vm4834_vm12, %v4880_v4, %v1396_v42  ;;  %v5269_v20 = vld [vmem:[%s4806_s8 + $0x28] sm:$0xf]  ;;  %v5272_v25 = vld [vmem:[%s4806_s8 + $0x2c] sm:$0x1] }
  0xd2   : > { %v3759_v28 = vcombine.low %v5231_v21, %v5236_v60  ;;  %v1689_v30 = vor.u32 %v1688_v24, %v1685_v56  ;;  %v1694_v32 = vrot.slane %v1692_v51, 5  ;;  %v3662_v31 = vrot.slane %v3654_v50, 9 }
  0xd3   : > { %v1698_v4 = vrot.slane %v1696_v26, 4  ;;  %v1704_v33 = vrot.slane %v1702_v34, 5  ;;  %v1610_v21 = vrot.slane %v3646_v13, 5  ;;  %v1710_v36 = vshll.u32 %v5261_v19, 16 }
  0xd4   : > { %2939 = vmatmul.mubr.bf16.gmra.mrb[28].mxu0 %v3718_v29  ;;  %v3743_v29 = vcombine.low %v1387_v3, %v1397_v58  ;;  %v1690_v42 = vrot.slane %v1689_v30, 4  ;;  %v1608_v7 = vsel %vm4844_vm13, %v3662_v31, %v1607_v47  ;;  %v1716_v53 = vshll.u32 %v5269_v20, 16  ;;  %v5289_v47 = vld [vmem:[%s5796_s1 + $0x208] sm:$0xff]   ;;  %v5359_v31 = vld [vmem:[%s4806_s8 + $0x3c] sm:$0xf] }
  0xd5   : > { %3036 = vmatmul.mubr.bf16.gmra.mrb[28].mxu1 %v3734_v17  ;;  %3076 = vmatprep.mubr.bf16.mxu0 %v3751_v2  ;;  %v1707_v17 = vshrl.u32 %v5261_v19, 16  ;;  %v1699_v3 = vor.u32 %v1698_v4, %v1694_v32  ;;  %v1611_v54 = vsel %vm4844_vm13, %v1609_v8, %v1610_v21  ;;  %v1720_v56 = vshrl.u32 %v5269_v20, 16  ;;  %v5292_v58 = vld [vmem:[%s4806_s8 + $0x2c] sm:$0x1]  ;;  %v3655_v4 = vld [vmem:[%s4806_s8 + $0x24] sm:$0xe] }
  0xd6   : > { %v1695_v24 = vsel %vm4834_vm12, %v1690_v42, %v1694_v32  ;;  %v3752_v51 = vcombine.low %v1608_v7, %v1611_v54  ;;  %v1712_v26 = vrot.slane %v1710_v36, 5  ;;  %v1718_v34 = vrot.slane %v1716_v53, 5  ;;  %v5305_v54 = vld [vmem:[%s4806_s8 + $0x30] sm:$0xf] }
  0xd7   : > { %v1709_v2 = vrot.slane %v1707_v17, 4  ;;  %v1700_v50 = vrot.slane %v1699_v3, 4  ;;  %v1722_v30 = vrot.slane %v1720_v56, 4  ;;  %v1726_v8 = vshll.u32 %v5272_v25, 16 }
  0xd8   : > { %v1408_v32 = vshll.u32 %v4897_v16, 16  ;;  %v1414_v17 = vrot.slane %v1412_v27, 4  ;;  %v1418_v42 = vshll.u32 %v3646_v13, 16  ;;  %v3760_v3 = vcombine.low %v5261_v19, %v5269_v20 }
  0xd9   : > { %v1713_v21 = vor.u32 %v1712_v26, %v1709_v2  ;;  %v1705_v7 = vsel %vm4834_vm12, %v1700_v50, %v1704_v33  ;;  %v1723_v36 = vor.u32 %v1722_v30, %v1718_v34  ;;  %v1728_v53 = vrot.slane %v1726_v8, 5  ;;  %v5317_v50 = vld [vmem:[%s4806_s8 + $0x34] sm:$0xf] }
  0xda   : > { %v3767_v56 = vcombine.low %v1695_v24, %v1705_v7  ;;  %v1410_v27 = vrot.slane %v1408_v32, 5  ;;  %v1420_v13 = vrot.slane %v1418_v42, 5  ;;  %v3663_v2 = vrot.slane %v3655_v4, 9 }
  0xdb   : > { %v1714_v16 = vrot.slane %v1713_v21, 4  ;;  %v1724_v33 = vrot.slane %v1723_v36, 4  ;;  %v1614_v26 = vrot.slane %v4946_v59, 5  ;;  %v1617_v24 = vrot.slane %v5292_v58, 5  ;;  %v5325_v21 = vld [vmem:[%s4806_s8 + $0x38] sm:$0x1] }
  0xdc   : > { %3077 = vmatmul.mubr.bf16.vlgmr.msra.gmra.mrb[32].mxu0 %v3743_v29  ;;  %v5311_v29 = vld [vmem:[%s5796_s1 + $0x210] sm:$0xff]   ;;  %3173 = vmatprep.mubr.bf16.mxu1 %v3767_v56  ;;  %v1411_v30 = vsel %vm4834_vm12, %v5226_v44, %v1410_v27  ;;  %v1415_v8 = vor.u32 %v1414_v17, %v1410_v27  ;;  %v1731_v32 = vshrl.u32 %v5305_v54, 16  ;;  %v1734_v36 = vshll.u32 %v5305_v54, 16  ;;  %v5345_v27 = vld [vmem:[%s5796_s1 + $0x218] sm:$0xff]  }
  0xdd   : > { %4165 = vmatpush3.bf16.msra.mxu0 %v5165_v38  ;;  %3084 = vmatprep.mubr.bf16.mxu0 %v3752_v51  ;;  %v1719_v51 = vsel %vm4834_vm12, %v1714_v16, %v1718_v34  ;;  %v1729_v4 = vsel %vm4834_vm12, %v1724_v33, %v1728_v53  ;;  %v1615_v42 = vsel %vm4844_vm13, %v3663_v2, %v1614_v26  ;;  %v1616_v7 = vrot.slane %v1614_v26, 4 }
  0xde   : > { %4166 = vmatprep.subr.bf16.mxu0 %v5289_v47  ;;  %3174 = vmatmul.mubr.bf16.vlgmr.msra.gmra.mrb[32].mxu1 %v3759_v28  ;;  %v3768_v34 = vcombine.low %v1719_v51, %v1729_v4  ;;  %v1416_v56 = vrot.slane %v1415_v8, 4  ;;  %v1733_v44 = vrot.slane %v1731_v32, 4  ;;  %v1740_v28 = vshll.u32 %v5317_v50, 16  ;;  %v5355_v51 = vld [vmem:[%s4806_s8 + $0x38] sm:$0x1] }
  0xdf   : > { %4204 = vmatpush3.bf16.msra.mxu1 %v5165_v38  ;;  %v1618_v17 = vsel %vm4844_vm13, %v1616_v7, %v1617_v24  ;;  %v1736_v53 = vrot.slane %v1734_v36, 5  ;;  %v1744_v16 = vshrl.u32 %v5317_v50, 16  ;;  %v1750_v38 = vshll.u32 %v5325_v21, 16  ;;  %v3656_v8 = vld [vmem:[%s4806_s8 + $0x30] sm:$0xe] }
  0xe0   : > { %4197 = vmatprep.subr.bf16.mxu1 %v5289_v47  ;;  %3181 = vmatprep.mubr.bf16.mxu1 %v3768_v34  ;;  %v1421_v33 = vsel %vm4834_vm12, %v1416_v56, %v1420_v13  ;;  %v3753_v2 = vcombine.low %v1615_v42, %v1618_v17  ;;  %v1742_v26 = vrot.slane %v1740_v28, 5  ;;  %v5352_v24 = vrot.slane %v1429_v11, 4 }
  0xe1   : > { %4167 = vmatpush3.bf16.msra.mxu0 %v5289_v47  ;;  %v3744_v32 = vcombine.low %v1411_v30, %v1421_v33  ;;  %v1737_v4 = vor.u32 %v1736_v53, %v1733_v44  ;;  %v1746_v7 = vrot.slane %v1744_v16, 4  ;;  %v1752_v36 = vrot.slane %v1750_v38, 5  ;;  %v5378_v44 = vld [vmem:[%s4806_s8 + $0x40] sm:$0xf] }
  0xe2   : > { %4168 = vmatprep.subr.bf16.mxu0 %v5311_v29  ;;  %v1432_v13 = vshll.u32 %v4946_v59, 16  ;;  %v1438_v42 = vrot.slane %v1436_v12, 4  ;;  %v1442_v14 = vshll.u32 %v5292_v58, 16  ;;  %v3761_v15 = vcombine.low %v5305_v54, %v5317_v50  ;;  %v5374_v59 = vld [vmem:[%s5796_s1 + $0x220] sm:$0xff]  }
  0xe3   : > { %4205 = vmatpush3.bf16.msra.mxu1 %v5289_v47  ;;  %v1738_v11 = vrot.slane %v1737_v4, 4  ;;  %v1747_v30 = vor.u32 %v1746_v7, %v1742_v26  ;;  %v3664_v34 = vrot.slane %v3656_v8, 9  ;;  %v1621_v47 = vrot.slane %v4987_v45, 5  ;;  %v5394_v8 = vld [vmem:[%s4806_s8 + $0x44] sm:$0x1] }
  0xe4   : > { %3085 = vmatmul.mubr.bf16.gmra.mrb[36].mxu0 %v3744_v32  ;;  %4198 = vmatprep.subr.bf16.mxu1 %v5311_v29  ;;  %v1434_v12 = vrot.slane %v1432_v13, 5  ;;  %v1444_v58 = vrot.slane %v1442_v14, 5  ;;  %v1624_v56 = vrot.slane %v5355_v51, 5  ;;  %v1755_v28 = vshrl.u32 %v5359_v31, 16 }
  0xe5   : > { %4169 = vmatpush3.bf16.msra.mxu0 %v5311_v29  ;;  %3092 = vmatprep.mubr.bf16.mxu0 %v3753_v2  ;;  %v1743_v17 = vsel %vm4834_vm12, %v1738_v11, %v1742_v26  ;;  %v1748_v53 = vrot.slane %v1747_v30, 4  ;;  %v1622_v16 = vsel %vm4844_vm13, %v3664_v34, %v1621_v47  ;;  %v1623_v38 = vrot.slane %v1621_v47, 4  ;;  %v3657_v47 = vld [vmem:[%s4806_s8 + $0x3c] sm:$0xe] }
  0xe6   : > { %4170 = vmatprep.subr.bf16.mxu0 %v5345_v27  ;;  %3182 = vmatmul.mubr.bf16.gmra.mrb[36].mxu1 %v3760_v3  ;;  %v1435_v33 = vsel %vm4834_vm12, %v5352_v24, %v1434_v12  ;;  %v1439_v2 = vor.u32 %v1438_v42, %v1434_v12  ;;  %v1757_v32 = vrot.slane %v1755_v28, 4  ;;  %v1758_v19 = vshll.u32 %v5359_v31, 16 }
  0xe7   : > { %4206 = vmatpush3.bf16.msra.mxu1 %v5311_v29  ;;  %v1753_v3 = vsel %vm4834_vm12, %v1748_v53, %v1752_v36  ;;  %v1625_v26 = vsel %vm4844_vm13, %v1623_v38, %v1624_v56  ;;  %v1764_v4 = vshll.u32 %v5378_v44, 16  ;;  %v1768_v24 = vshrl.u32 %v5378_v44, 16  ;;  %v4345_v36 = vld [vmem:[%s5796_s1 + $0x228] sm:$0xff]   ;;  %v5421_v53 = vld [vmem:[%s4806_s8 + $0x44] sm:$0x1] }
  0xe8   : > { %4199 = vmatprep.subr.bf16.mxu1 %v5345_v27  ;;  %v3769_v29 = vcombine.low %v1743_v17, %v1753_v3  ;;  %v1440_v7 = vrot.slane %v1439_v2, 4  ;;  %v3754_v13 = vcombine.low %v1622_v16, %v1625_v26  ;;  %v1760_v42 = vrot.slane %v1758_v19, 5  ;;  %v5440_v3 = vld [vmem:[%s4806_s8 + $0x4c] sm:$0xf] }
  0xe9   : > { %4171 = vmatpush3.bf16.msra.mxu0 %v5345_v27  ;;  %v1766_v14 = vrot.slane %v1764_v4, 5  ;;  %v1770_v11 = vrot.slane %v1768_v24, 4  ;;  %v1774_v30 = vshll.u32 %v5394_v8, 16  ;;  %v1454_v34 = vrot.slane %v1453_v39, 4  ;;  %v5447_v24 = vld [vmem:[%s4806_s8 + $0x50] sm:$0x1] }
  0xea   : > { %4172 = vmatprep.subr.bf16.mxu0 %v5374_v59  ;;  %3189 = vmatprep.mubr.bf16.mxu1 %v3769_v29  ;;  %v1445_v12 = vsel %vm4834_vm12, %v1440_v7, %v1444_v58  ;;  %v1761_v56 = vor.u32 %v1760_v42, %v1757_v32  ;;  %v1456_v28 = vshll.u32 %v4987_v45, 16  ;;  %v1462_v17 = vrot.slane %v1460_v61, 4 }
  0xeb   : > { %4207 = vmatpush3.bf16.msra.mxu1 %v5345_v27  ;;  %v3745_v16 = vcombine.low %v1435_v33, %v1445_v12  ;;  %v1771_v38 = vor.u32 %v1770_v11, %v1766_v14  ;;  %v1776_v2 = vrot.slane %v1774_v30, 5  ;;  %v1466_v0 = vshll.u32 %v5355_v51, 16  ;;  %v4347_v27 = vld [vmem:[%s5796_s1 + $0x230] sm:$0xff]  }
  0xec   : > { %4200 = vmatprep.subr.bf16.mxu1 %v5374_v59  ;;  %v1762_v39 = vrot.slane %v1761_v56, 4  ;;  %v1458_v58 = vrot.slane %v1456_v28, 5  ;;  %v3762_v45 = vcombine.low %v5359_v31, %v5378_v44  ;;  %v3665_v61 = vrot.slane %v3657_v47, 9 }
  0xed   : > { %4173 = vmatpush3.bf16.msra.mxu0 %v5374_v59  ;;  %v1772_v51 = vrot.slane %v1771_v38, 4  ;;  %v1468_v33 = vrot.slane %v1466_v0, 5  ;;  %v1628_v32 = vrot.slane %v5035_v35, 5  ;;  %v1631_v19 = vrot.slane %v5421_v53, 5 }
  0xee   : > { %4174 = vmatprep.subr.bf16.mxu0 %v4345_v36  ;;  %3093 = vmatmul.mubr.bf16.gmra.mrb[40].mxu0 %v3745_v16  ;;  %v1767_v31 = vsel %vm4834_vm12, %v1762_v39, %v1766_v14  ;;  %v1459_v26 = vsel %vm4834_vm12, %v1454_v34, %v1458_v58  ;;  %v1463_v4 = vor.u32 %v1462_v17, %v1458_v58  ;;  %v1779_v54 = vshrl.u32 %v5425_v1, 16 }
  0xef   : > { %3190 = vmatmul.mubr.bf16.gmra.mrb[40].mxu1 %v3761_v15  ;;  %3100 = vmatprep.mubr.bf16.mxu0 %v3754_v13  ;;  %v1777_v15 = vsel %vm4834_vm12, %v1772_v51, %v1776_v2  ;;  %v1629_v29 = vsel %vm4844_vm13, %v3665_v61, %v1628_v32  ;;  %v1630_v7 = vrot.slane %v1628_v32, 4  ;;  %v1782_v13 = vshll.u32 %v5425_v1, 16  ;;  %v3658_v2 = vld [vmem:[%s4806_s8 + $0x48] sm:$0xe]  ;;  %v5471_v51 = vld [vmem:[%s4806_s8 + $0x50] sm:$0x1] }
  0xf0   : > { %4208 = vmatpush3.bf16.msra.mxu1 %v5374_v59  ;;  %v3770_v42 = vcombine.low %v1767_v31, %v1777_v15  ;;  %v1464_v14 = vrot.slane %v1463_v4, 4  ;;  %v1781_v11 = vrot.slane %v1779_v54, 4  ;;  %v1788_v30 = vshll.u32 %v5440_v3, 16  ;;  %v4349_v59 = vld [vmem:[%s5796_s1 + $0x238] sm:$0xff]   ;;  %v5474_v32 = vld [vmem:[%s4806_s8 + $0x54] sm:$0xf] }
  0xf1   : > { %4201 = vmatprep.subr.bf16.mxu1 %v4345_v36  ;;  %4175 = vmatpush3.bf16.msra.mxu0 %v4345_v36  ;;  %v1632_v34 = vsel %vm4844_vm13, %v1630_v7, %v1631_v19  ;;  %v1784_v47 = vrot.slane %v1782_v13, 5  ;;  %v1792_v12 = vshrl.u32 %v5440_v3, 16  ;;  %v1798_v56 = vshll.u32 %v5447_v24, 16 }
  0xf2   : > { %4176 = vmatprep.subr.bf16.mxu0 %v4347_v27  ;;  %3197 = vmatprep.mubr.bf16.mxu1 %v3770_v42  ;;  %v1469_v28 = vsel %vm4834_vm12, %v1464_v14, %v1468_v33  ;;  %v3755_v17 = vcombine.low %v1629_v29, %v1632_v34  ;;  %v1790_v16 = vrot.slane %v1788_v30, 5  ;;  %v1478_v38 = vrot.slane %v1477_v37, 4  ;;  %v5495_v42 = vld [vmem:[%s4806_s8 + $0x5c] sm:$0x1] }
  0xf3   : > { %v3746_v0 = vcombine.low %v1459_v26, %v1469_v28  ;;  %v1785_v39 = vor.u32 %v1784_v47, %v1781_v11  ;;  %v1794_v58 = vrot.slane %v1792_v12, 4  ;;  %v1800_v61 = vrot.slane %v1798_v56, 5 }
  0xf4   : > { %4209 = vmatpush3.bf16.msra.mxu1 %v4345_v36  ;;  %v1480_v33 = vshll.u32 %v5035_v35, 16  ;;  %v1486_v19 = vrot.slane %v1484_v55, 4  ;;  %v1490_v62 = vshll.u32 %v5421_v53, 16  ;;  %v3763_v63 = vcombine.low %v5425_v1, %v5440_v3  ;;  %v5485_v55 = vld [vmem:[%s4806_s8 + $0x58] sm:$0xf] }
  0xf5   : > { %4202 = vmatprep.subr.bf16.mxu1 %v4347_v27  ;;  %4177 = vmatpush3.bf16.msra.mxu0 %v4347_v27  ;;  %v1786_v37 = vrot.slane %v1785_v39, 4  ;;  %v1795_v36 = vor.u32 %v1794_v58, %v1790_v16  ;;  %v3666_v31 = vrot.slane %v3658_v2, 9  ;;  %v1635_v26 = vrot.slane %v5086_v41, 5 }
  0xf6   : > { %4178 = vmatprep.subr.bf16.mxu0 %v4349_v59  ;;  %3101 = vmatmul.mubr.bf16.gmra.mrb[44].mxu0 %v3746_v0  ;;  %v1482_v4 = vrot.slane %v1480_v33, 5  ;;  %v1492_v54 = vrot.slane %v1490_v62, 5  ;;  %v1638_v35 = vrot.slane %v5471_v51, 5  ;;  %v1803_v53 = vshrl.u32 %v5474_v32, 16  ;;  %v3651_v62 = vld [vmem:[%s4806_s8 + $0x5c] sm:$0x1] }
  0xf7   : > { %3198 = vmatmul.mubr.bf16.gmra.mrb[44].mxu1 %v3762_v45  ;;  %3108 = vmatprep.mubr.bf16.mxu0 %v3755_v17  ;;  %v1791_v1 = vsel %vm4834_vm12, %v1786_v37, %v1790_v16  ;;  %v1796_v45 = vrot.slane %v1795_v36, 4  ;;  %v1636_v15 = vsel %vm4844_vm13, %v3666_v31, %v1635_v26  ;;  %v1637_v29 = vrot.slane %v1635_v26, 4 }
  0xf8   : > { %4210 = vmatpush3.bf16.msra.mxu1 %v4347_v27  ;;  %v1483_v7 = vsel %vm4834_vm12, %v1478_v38, %v1482_v4  ;;  %v1487_v13 = vor.u32 %v1486_v19, %v1482_v4  ;;  %v1805_v14 = vrot.slane %v1803_v53, 4  ;;  %v1806_v11 = vshll.u32 %v5474_v32, 16 }
  0xf9   : > { %4203 = vmatprep.subr.bf16.mxu1 %v4349_v59  ;;  %4179 = vmatpush3.bf16.msra.mxu0 %v4349_v59  ;;  %v1801_v27 = vsel %vm4834_vm12, %v1796_v45, %v1800_v61  ;;  %v1639_v30 = vsel %vm4844_vm13, %v1637_v29, %v1638_v35  ;;  %v1812_v34 = vshll.u32 %v5485_v55, 16  ;;  %v1816_v47 = vshrl.u32 %v5485_v55, 16  ;;  %v5524_v29 = vld [vmem:[%s4806_s8 + $0x64] sm:$0xf] }
  0xfa   : > { %v3771_v12 = vcombine.low %v1791_v1, %v1801_v27  ;;  %v1488_v56 = vrot.slane %v1487_v13, 4  ;;  %v3756_v28 = vcombine.low %v1636_v15, %v1639_v30  ;;  %v1808_v17 = vrot.slane %v1806_v11, 5 }
  0xfb   : > { %v1814_v16 = vrot.slane %v1812_v34, 5  ;;  %v1818_v38 = vrot.slane %v1816_v47, 4  ;;  %v1822_v2 = vshll.u32 %v5495_v42, 16  ;;  %v1946_v0 = vrot.slane %v5495_v42, 5 }
  0xfc   : > { %4211 = vmatpush3.bf16.msra.mxu1 %v4349_v59  ;;  %3205 = vmatprep.mubr.bf16.mxu1 %v3771_v12  ;;  %v1493_v39 = vsel %vm4834_vm12, %v1488_v56, %v1492_v54  ;;  %v1809_v58 = vor.u32 %v1808_v17, %v1805_v14  ;;  %v5813_v61 = vor.u32 %v5096_v6, %v5094_v5  ;;  %v1504_v19 = vshll.u32 %v5086_v41, 16  ;;  %v3659_v59 = vld [vmem:[%s4806_s8 + $0x54] sm:$0xe]  ;;  %v5520_v6 = vld [vmem:[%s4806_s8 + $0x60] sm:$0xf] }
  0xfd   : > { %v3747_v37 = vcombine.low %v1483_v7, %v1493_v39  ;;  %v1819_v36 = vor.u32 %v1818_v38, %v1814_v16  ;;  %v1824_v31 = vrot.slane %v1822_v2, 5  ;;  %v5814_v26 = vshrl.u32 %v5086_v41, 16 }
  0xfe   : > { %v1502_v33 = vrot.slane %v5813_v61, 4  ;;  %v1810_v35 = vrot.slane %v1809_v58, 4  ;;  %v1506_v54 = vrot.slane %v1504_v19, 5  ;;  %v1514_v53 = vshll.u32 %v5471_v51, 16 }
  0xff   : > { %3206 = vmatmul.mubr.bf16.gmra.mrb[48].mxu1 %v3763_v63  ;;  %v1510_v4 = vrot.slane %v5814_v26, 4  ;;  %v3764_v5 = vcombine.low %v5474_v32, %v5485_v55  ;;  %3109 = vmatmul.mubr.bf16.gmra.mrb[48].mxu0 %v3747_v37  ;;  %v1820_v1 = vrot.slane %v1819_v36, 4  ;;  %v3667_v45 = vrot.slane %v3659_v59, 9  ;;  %v5531_v32 = vld [vmem:[%s4806_s8 + $0x68] sm:$0x1] }
 0x100   : > { %v1642_v63 = vrot.slane %v5136_v43, 5  ;;  %v1645_v15 = vrot.slane %v3651_v62, 5  ;;  %3116 = vmatprep.mubr.bf16.mxu0 %v3756_v28  ;;  %v1815_v41 = vsel %vm4834_vm12, %v1810_v35, %v1814_v16  ;;  %v1507_v51 = vsel %vm4834_vm12, %v1502_v33, %v1506_v54  ;;  %v3660_v33 = vld [vmem:[%s4806_s8 + $0x60] sm:$0xe] }
 0x101   : > { %v1511_v7 = vor.u32 %v1510_v4, %v1506_v54  ;;  %v1516_v13 = vrot.slane %v1514_v53, 5  ;;  %v1825_v14 = vsel %vm4834_vm12, %v1820_v1, %v1824_v31  ;;  %v1827_v30 = vshrl.u32 %v5520_v6, 16  ;;  %v3652_v31 = vld [vmem:[%s4806_s8 + $0x68] sm:$0x1]  ;;  %v5555_v1 = vld [vmem:[%s4806_s8 + $0x6c] sm:$0xf] }
 0x102   : > { %v1643_v11 = vsel %vm4844_vm13, %v3667_v45, %v1642_v63  ;;  %v1644_v27 = vrot.slane %v1642_v63, 4  ;;  %v3772_v34 = vcombine.low %v1815_v41, %v1825_v14  ;;  %v1830_v12 = vshll.u32 %v5520_v6, 16 }
 0x103   : > { %v1512_v47 = vrot.slane %v1511_v7, 4  ;;  %v1836_v56 = vshll.u32 %v5524_v29, 16  ;;  %v1829_v17 = vrot.slane %v1827_v30, 4  ;;  %v1840_v16 = vshrl.u32 %v5524_v29, 16 }
 0x104   : > { %v1646_v28 = vsel %vm4844_vm13, %v1644_v27, %v1645_v15  ;;  %v1846_v38 = vshll.u32 %v5531_v32, 16  ;;  %3213 = vmatprep.mubr.bf16.mxu1 %v3772_v34  ;;  %v1832_v58 = vrot.slane %v1830_v12, 5  ;;  %v1526_v36 = vrot.slane %v1525_v57, 4  ;;  %v5571_v27 = vld [vmem:[%s4806_s8 + $0x74] sm:$0x1] }
 0x105   : > { %v1517_v2 = vsel %vm4834_vm12, %v1512_v47, %v1516_v13  ;;  %v3757_v39 = vcombine.low %v1643_v11, %v1646_v28  ;;  %v1838_v61 = vrot.slane %v1836_v56, 5  ;;  %v1842_v59 = vrot.slane %v1840_v16, 4 }
 0x106   : > { %v3748_v19 = vcombine.low %v1507_v51, %v1517_v2  ;;  %v1848_v37 = vrot.slane %v1846_v38, 5  ;;  %v1833_v26 = vor.u32 %v1832_v58, %v1829_v17  ;;  %v1528_v4 = vshll.u32 %v5136_v43, 16  ;;  %v5561_v51 = vld [vmem:[%s4806_s8 + $0x70] sm:$0xf] }
 0x107   : > { %3214 = vmatmul.mubr.bf16.gmra.mrb[52].mxu1 %v3764_v5  ;;  %v5815_v35 = vshrl.u32 %v5136_v43, 16  ;;  %v1538_v53 = vshll.u32 %v3651_v62, 16  ;;  %v1843_v45 = vor.u32 %v1842_v59, %v1838_v61  ;;  %v3765_v5 = vcombine.low %v5520_v6, %v5524_v29 }
 0x108   : > { %3117 = vmatmul.mubr.bf16.gmra.mrb[52].mxu0 %v3748_v19  ;;  %v3668_v63 = vrot.slane %v3660_v33, 9  ;;  %v1649_v18 = vrot.slane %v5199_v9, 5  ;;  %v1834_v23 = vrot.slane %v1833_v26, 4  ;;  %v1530_v57 = vrot.slane %v1528_v4, 5  ;;  %v3695_v33 = vld [vmem:[%s4806_s8 + $0x18] sm:$0xe] }
 0x109   : > { %v1534_v54 = vrot.slane %v5815_v35, 4  ;;  %3124 = vmatprep.mubr.bf16.mxu0 %v3757_v39  ;;  %v1540_v15 = vrot.slane %v1538_v53, 5  ;;  %v1652_v41 = vrot.slane %v3652_v31, 5  ;;  %v1844_v43 = vrot.slane %v1843_v45, 4  ;;  %v3699_v53 = vld [vmem:[%s4806_s8 + $0x48] sm:$0xe] }
 0x10a   : > { %v1650_v62 = vsel %vm4844_vm13, %v3668_v63, %v1649_v18  ;;  %v1651_v7 = vrot.slane %v1649_v18, 4  ;;  %v1851_v13 = vshrl.u32 %v5555_v1, 16  ;;  %v1839_v6 = vsel %vm4834_vm12, %v1834_v23, %v1838_v61 }
 0x10b   : > { %v1531_v14 = vsel %vm4834_vm12, %v1526_v36, %v1530_v57  ;;  %v1535_v11 = vor.u32 %v1534_v54, %v1530_v57  ;;  %v1854_v30 = vshll.u32 %v5555_v1, 16  ;;  %v1849_v34 = vsel %vm4834_vm12, %v1844_v43, %v1848_v37 }
 0x10c   : > { %v1653_v47 = vsel %vm4844_vm13, %v1651_v7, %v1652_v41  ;;  %v1853_v12 = vrot.slane %v1851_v13, 4  ;;  %v1860_v56 = vshll.u32 %v5561_v51, 16  ;;  %v3773_v28 = vcombine.low %v1839_v6, %v1849_v34  ;;  %v3700_v6 = vld [vmem:[%s4806_s8 + $0x54] sm:$0xe] }
 0x10d   : > { %v1536_v17 = vrot.slane %v1535_v11, 4  ;;  %v3758_v16 = vcombine.low %v1650_v62, %v1653_v47  ;;  %v1856_v38 = vrot.slane %v1854_v30, 5  ;;  %v1864_v39 = vshrl.u32 %v5561_v51, 16  ;;  %v3697_v47 = vld [vmem:[%s4806_s8 + $0x30] sm:$0xe] }
 0x10e   : > { %v1862_v2 = vrot.slane %v1860_v56, 5  ;;  %v1870_v58 = vshll.u32 %v5571_v27, 16  ;;  %v1550_v61 = vrot.slane %v1549_v10, 4  ;;  %3221 = vmatprep.mubr.bf16.mxu1 %v3773_v28  ;;  %v1552_v37 = vshll.u32 %v5199_v9, 16  ;;  %v3701_v56 = vld [vmem:[%s4806_s8 + $0x60] sm:$0xe] }
 0x10f   : > { %v1541_v19 = vsel %vm4834_vm12, %v1536_v17, %v1540_v15  ;;  %v1857_v59 = vor.u32 %v1856_v38, %v1853_v12  ;;  %v1558_v36 = vrot.slane %v1556_v46, 4  ;;  %3222 = vmatmul.mubr.bf16.gmra.mrb[56].mxu1 %v3765_v5  ;;  %v1866_v4 = vrot.slane %v1864_v39, 4  ;;  %v3696_v46 = vld [vmem:[%s4806_s8 + $0x24] sm:$0xe] }
 0x110   : > { %v3749_v26 = vcombine.low %v1531_v14, %v1541_v19  ;;  %v1872_v35 = vrot.slane %v1870_v58, 5  ;;  %v1562_v54 = vshll.u32 %v3652_v31, 16  ;;  %v1554_v52 = vrot.slane %v1552_v37, 5 }
 0x111   : > { %v1858_v22 = vrot.slane %v1857_v59, 4  ;;  %v3766_v10 = vcombine.low %v5555_v1, %v5561_v51  ;;  %v3703_v45 = vrot.slane %v3695_v33, 9  ;;  %v1867_v63 = vor.u32 %v1866_v4, %v1862_v2 }
 0x112   : > { %3125 = vmatmul.mubr.bf16.gmra.mrb[56].mxu0 %v3749_v26  ;;  %v1564_v18 = vrot.slane %v1562_v54, 5  ;;  %v1908_v23 = vrot.slane %v5236_v60, 5  ;;  %v1911_v9 = vrot.slane %v5239_v49, 5  ;;  %v1555_v5 = vsel %vm4834_vm12, %v1550_v61, %v1554_v52 }
 0x113   : > { %3132 = vmatprep.mubr.bf16.mxu0 %v3758_v16  ;;  %v1863_v31 = vsel %vm4834_vm12, %v1858_v22, %v1862_v2  ;;  %v1559_v57 = vor.u32 %v1558_v36, %v1554_v52  ;;  %v3707_v1 = vrot.slane %v3699_v53, 9  ;;  %v1868_v15 = vrot.slane %v1867_v63, 4  ;;  %v3698_v36 = vld [vmem:[%s4806_s8 + $0x3c] sm:$0xe]  ;;  %v3702_v53 = vld [vmem:[%s4806_s8 + $0x6c] sm:$0xe] }
 0x114   : > { %v1909_v41 = vsel %vm4844_vm13, %v3703_v45, %v1908_v23  ;;  %v1910_v43 = vrot.slane %v1908_v23, 4  ;;  %v1936_v60 = vrot.slane %v5440_v3, 5  ;;  %v1939_v62 = vrot.slane %v5447_v24, 5 }
 0x115   : > { %v1560_v49 = vrot.slane %v1559_v57, 4  ;;  %v3704_v7 = vrot.slane %v3696_v46, 9  ;;  %v1915_v13 = vrot.slane %v5269_v20, 5  ;;  %v1873_v14 = vsel %vm4834_vm12, %v1868_v15, %v1872_v35 }
 0x116   : > { %v1912_v11 = vsel %vm4844_vm13, %v1910_v43, %v1911_v9  ;;  %v1937_v30 = vsel %vm4844_vm13, %v3707_v1, %v1936_v60  ;;  %v1938_v34 = vrot.slane %v1936_v60, 4  ;;  %v3774_v12 = vcombine.low %v1863_v31, %v1873_v14 }
 0x117   : > { %v1565_v3 = vsel %vm4834_vm12, %v1560_v49, %v1564_v18  ;;  %v3775_v24 = vcombine.low %v1909_v41, %v1912_v11  ;;  %v1916_v20 = vsel %vm4844_vm13, %v3704_v7, %v1915_v13  ;;  %v1917_v16 = vrot.slane %v1915_v13, 4 }
 0x118   : > { %v3750_v28 = vcombine.low %v1555_v5, %v1565_v3  ;;  %v1940_v17 = vsel %vm4844_vm13, %v1938_v34, %v1939_v62  ;;  %v3708_v38 = vrot.slane %v3700_v6, 9  ;;  %3229 = vmatprep.mubr.bf16.mxu1 %v3774_v12  ;;  %v1943_v39 = vrot.slane %v5485_v55, 5 }
 0x119   : > { %v3779_v2 = vcombine.low %v1937_v30, %v1940_v17  ;;  %v3705_v58 = vrot.slane %v3697_v47, 9  ;;  %v1922_v40 = vrot.slane %v5317_v50, 5  ;;  %3230 = vmatmul.mubr.bf16.gmra.mrb[60].mxu1 %v3766_v10  ;;  %v5816_v61 = vrot.slane %v5272_v25, 5 }
 0x11a   : > { %3133 = vmatmul.mubr.bf16.gmra.mrb[60].mxu0 %v3750_v28  ;;  %v1925_v19 = vrot.slane %v5325_v21, 5  ;;  %v3709_v59 = vrot.slane %v3701_v56, 9  ;;  %v1950_v37 = vrot.slane %v5524_v29, 5  ;;  %v1944_v50 = vsel %vm4844_vm13, %v3708_v38, %v1943_v39 }
 0x11b   : > { %v1919_v33 = vsel %vm4844_vm13, %v1917_v16, %v5816_v61  ;;  %4180 = vmatprep.mubr.bf16.mxu0 %v3775_v24  ;;  %4188 = vmatprep.mubr.bf16.mxu1 %v3779_v2  ;;  %v1945_v26 = vrot.slane %v1943_v39, 4  ;;  %v1923_v25 = vsel %vm4844_vm13, %v3705_v58, %v1922_v40  ;;  %v1924_v4 = vrot.slane %v1922_v40, 4 }
 0x11c   : > { %v3776_v55 = vcombine.low %v1916_v20, %v1919_v33  ;;  %v1951_v35 = vsel %vm4844_vm13, %v3709_v59, %v1950_v37  ;;  %v1952_v54 = vrot.slane %v1950_v37, 4  ;;  %v1953_v21 = vrot.slane %v5531_v32, 5 }
 0x11d   : > { %v1947_v29 = vsel %vm4844_vm13, %v1945_v26, %v1946_v0  ;;  %v3706_v22 = vrot.slane %v3698_v36, 9  ;;  %v1929_v52 = vrot.slane %v5378_v44, 5  ;;  %v1926_v45 = vsel %vm4844_vm13, %v1924_v4, %v1925_v19 }
 0x11e   : > { %v3780_v10 = vcombine.low %v1944_v50, %v1947_v29  ;;  %v1954_v63 = vsel %vm4844_vm13, %v1952_v54, %v1953_v21  ;;  %v1932_v18 = vrot.slane %v5394_v8, 5  ;;  %v3777_v23 = vcombine.low %v1923_v25, %v1926_v45 }
 0x11f   : > { %v3781_v32 = vcombine.low %v1951_v35, %v1954_v63  ;;  %v1931_v9 = vrot.slane %v1929_v52, 4  ;;  %v3710_v46 = vrot.slane %v3702_v53, 9  ;;  %v1957_v42 = vrot.slane %v5561_v51, 5 }
 0x120   : > { %v1960_v0 = vrot.slane %v5571_v27, 5  ;;  %v1930_v31 = vsel %vm4844_vm13, %v3706_v22, %v1929_v52 }
 0x121   : > { %4189 = vmatmul.mubr.bf16.vlgmr.msra.gmra.mrb[64].mxu1 %v3780_v10  ;;  %v1959_v44 = vrot.slane %v1957_v42, 4  ;;  %v1933_v5 = vsel %vm4844_vm13, %v1931_v9, %v1932_v18  ;;  %v1958_v8 = vsel %vm4844_vm13, %v3710_v46, %v1957_v42 }
 0x122   : > { %4181 = vmatmul.mubr.bf16.vlgmr.msra.gmra.mrb[64].mxu0 %v3776_v55  ;;  %4192 = vmatprep.mubr.bf16.mxu1 %v3781_v32  ;;  %v3778_v51 = vcombine.low %v1930_v31, %v1933_v5 }
 0x123   : > { %4184 = vmatprep.mubr.bf16.mxu0 %v3777_v23  ;;  %v1961_v57 = vsel %vm4844_vm13, %v1959_v44, %v1960_v0 }
 0x124   : > { %v3782_v1 = vcombine.low %v1958_v8, %v1961_v57 }
 0x129   : > { %4193 = vmatmul.mubr.bf16.gmra.mrb[68].mxu1 %v3782_v1 }
 0x12a   : > { %4185 = vmatmul.mubr.bf16.gmra.mrb[68].mxu0 %v3778_v51 }
 0x16f   : > { %v3908_v27 = vpop.f32.mrb[0].mxu0 }
 0x170   : > { %v3972_v15 = vpop.f32.mrb[0].mxu1  ;;  %v3909_v41 = vpop.f32.mrb[1].mxu0 }
 0x171   : > { %v3910_v43 = vadd.f32 %v3909_v41, %v3908_v27  ;;  %v3973_v60 = vpop.f32.mrb[1].mxu1  ;;  %v3911_v49 = vpop.f32.mrb[2].mxu0 }
 0x172   : > { %v3974_v62 = vadd.f32 %v3973_v60, %v3972_v15  ;;  %v3975_v7 = vpop.f32.mrb[2].mxu1  ;;  %v3912_v13 = vpop.f32.mrb[3].mxu0 }
 0x173   : > { %v3913_v6 = vadd.f32 %v3912_v13, %v3911_v49  ;;  %v3976_v14 = vpop.f32.mrb[3].mxu1 }
 0x174   : > { %v5657_v11 = vadd.f32 %v3974_v62, %v3910_v43  ;;  %v3977_v30 = vadd.f32 %v3976_v14, %v3975_v7 }
 0x176   : > { %v5659_v48 = vadd.f32 %v3977_v30, %v3913_v6 }
 0x177   : > { %v3914_v34 = vpop.f32.mrb[4].mxu0 }
 0x178   : > { %v3978_v47 = vpop.f32.mrb[4].mxu1  ;;  %v3915_v12 = vpop.f32.mrb[5].mxu0 }
 0x179   : > { %v3979_v3 = vpop.f32.mrb[5].mxu1  ;;  %v3916_v24 = vadd.f32 %v3915_v12, %v3914_v34  ;;  %v3917_v56 = vpop.f32.mrb[6].mxu0 }
 0x17a   : > { %v3980_v20 = vadd.f32 %v3979_v3, %v3978_v47  ;;  %v3981_v28 = vpop.f32.mrb[6].mxu1  ;;  %v3918_v17 = vpop.f32.mrb[7].mxu0 }
 0x17b   : > { %v3982_v16 = vpop.f32.mrb[7].mxu1  ;;  %v3919_v2 = vadd.f32 %v3918_v17, %v3917_v56 }
 0x17c   : > { %v5661_v38 = vadd.f32 %v3980_v20, %v3916_v24  ;;  %v3983_v39 = vadd.f32 %v3982_v16, %v3981_v28 }
 0x17e   : > { %v5663_v58 = vadd.f32 %v3983_v39, %v3919_v2 }
 0x17f   : > { %v3920_v61 = vpop.f32.mrb[8].mxu0 }
 0x180   : > { %v3984_v40 = vpop.f32.mrb[8].mxu1  ;;  %v3921_v19 = vpop.f32.mrb[9].mxu0 }
 0x181   : > { %v3985_v33 = vpop.f32.mrb[9].mxu1  ;;  %v3922_v36 = vadd.f32 %v3921_v19, %v3920_v61  ;;  %v3923_v55 = vpop.f32.mrb[10].mxu0 }
 0x182   : > { %v3986_v59 = vadd.f32 %v3985_v33, %v3984_v40  ;;  %v3987_v37 = vpop.f32.mrb[10].mxu1  ;;  %v3924_v26 = vpop.f32.mrb[11].mxu0 }
 0x183   : > { %v3988_v50 = vpop.f32.mrb[11].mxu1  ;;  %v3925_v35 = vadd.f32 %v3924_v26, %v3923_v55 }
 0x184   : > { %v3989_v25 = vadd.f32 %v3988_v50, %v3987_v37  ;;  %v5665_v4 = vadd.f32 %v3986_v59, %v3922_v36 }
 0x186   : > { %v5667_v54 = vadd.f32 %v3989_v25, %v3925_v35 }
 0x187   : > { %v3926_v21 = vpop.f32.mrb[12].mxu0 }
 0x188   : > { %v3990_v53 = vpop.f32.mrb[12].mxu1  ;;  %v3927_v29 = vpop.f32.mrb[13].mxu0 }
 0x189   : > { %v3991_v22 = vpop.f32.mrb[13].mxu1  ;;  %v3928_v52 = vadd.f32 %v3927_v29, %v3926_v21  ;;  %v3929_v45 = vpop.f32.mrb[14].mxu0 }
 0x18a   : > { %v3992_v10 = vadd.f32 %v3991_v22, %v3990_v53  ;;  %v3993_v63 = vpop.f32.mrb[14].mxu1  ;;  %v3930_v18 = vpop.f32.mrb[15].mxu0 }
 0x18b   : > { %v3994_v23 = vpop.f32.mrb[15].mxu1  ;;  %v3931_v9 = vadd.f32 %v3930_v18, %v3929_v45 }
 0x18c   : > { %v5669_v32 = vadd.f32 %v3992_v10, %v3928_v52  ;;  %v3995_v46 = vadd.f32 %v3994_v23, %v3993_v63 }
 0x18e   : > { %v5671_v42 = vadd.f32 %v3995_v46, %v3931_v9 }
 0x18f   : > { %v3932_v0 = vpop.f32.mrb[16].mxu0 }
 0x190   : > { %v3996_v44 = vpop.f32.mrb[16].mxu1  ;;  %v3933_v31 = vpop.f32.mrb[17].mxu0 }
 0x191   : > { %v3997_v5 = vpop.f32.mrb[17].mxu1  ;;  %v3934_v8 = vadd.f32 %v3933_v31, %v3932_v0  ;;  %v3935_v51 = vpop.f32.mrb[18].mxu0 }
 0x192   : > { %v3998_v57 = vadd.f32 %v3997_v5, %v3996_v44  ;;  %v3999_v1 = vpop.f32.mrb[18].mxu1  ;;  %v3936_v27 = vpop.f32.mrb[19].mxu0 }
 0x193   : > { %v4000_v15 = vpop.f32.mrb[19].mxu1  ;;  %v3937_v43 = vadd.f32 %v3936_v27, %v3935_v51 }
 0x194   : > { %v5673_v41 = vadd.f32 %v3998_v57, %v3934_v8  ;;  %v4001_v60 = vadd.f32 %v4000_v15, %v3999_v1 }
 0x196   : > { %v5675_v49 = vadd.f32 %v4001_v60, %v3937_v43 }
 0x197   : > { %v3938_v62 = vpop.f32.mrb[20].mxu0 }
 0x198   : > { %v4002_v7 = vpop.f32.mrb[20].mxu1  ;;  %v3939_v13 = vpop.f32.mrb[21].mxu0 }
 0x199   : > { %v4003_v6 = vpop.f32.mrb[21].mxu1  ;;  %v3940_v14 = vadd.f32 %v3939_v13, %v3938_v62  ;;  %v3941_v34 = vpop.f32.mrb[22].mxu0 }
 0x19a   : > { %v4004_v30 = vadd.f32 %v4003_v6, %v4002_v7  ;;  %v4005_v47 = vpop.f32.mrb[22].mxu1  ;;  %v3942_v12 = vpop.f32.mrb[23].mxu0 }
 0x19b   : > { %v4006_v3 = vpop.f32.mrb[23].mxu1  ;;  %v3943_v20 = vadd.f32 %v3942_v12, %v3941_v34 }
 0x19c   : > { %v5677_v24 = vadd.f32 %v4004_v30, %v3940_v14  ;;  %v4007_v56 = vadd.f32 %v4006_v3, %v4005_v47 }
 0x19e   : > { %v5679_v28 = vadd.f32 %v4007_v56, %v3943_v20 }
 0x19f   : > { %v3944_v17 = vpop.f32.mrb[24].mxu0 }
 0x1a0   : > { %v4008_v16 = vpop.f32.mrb[24].mxu1  ;;  %v3945_v2 = vpop.f32.mrb[25].mxu0 }
 0x1a1   : > { %v4009_v39 = vpop.f32.mrb[25].mxu1  ;;  %v3946_v40 = vadd.f32 %v3945_v2, %v3944_v17  ;;  %v3947_v33 = vpop.f32.mrb[26].mxu0 }
 0x1a2   : > { %v4010_v61 = vadd.f32 %v4009_v39, %v4008_v16  ;;  %v4011_v19 = vpop.f32.mrb[26].mxu1  ;;  %v3948_v59 = vpop.f32.mrb[27].mxu0 }
 0x1a3   : > { %v4012_v37 = vpop.f32.mrb[27].mxu1  ;;  %v3949_v55 = vadd.f32 %v3948_v59, %v3947_v33 }
 0x1a4   : > { %v5681_v36 = vadd.f32 %v4010_v61, %v3946_v40  ;;  %v4013_v50 = vadd.f32 %v4012_v37, %v4011_v19 }
 0x1a6   : > { %v5683_v26 = vadd.f32 %v4013_v50, %v3949_v55 }
 0x1a7   : > { %v3950_v25 = vpop.f32.mrb[28].mxu0 }
 0x1a8   : > { %v4014_v35 = vpop.f32.mrb[28].mxu1  ;;  %v3951_v21 = vpop.f32.mrb[29].mxu0 }
 0x1a9   : > { %v4015_v53 = vpop.f32.mrb[29].mxu1  ;;  %v3952_v29 = vadd.f32 %v3951_v21, %v3950_v25  ;;  %v3953_v52 = vpop.f32.mrb[30].mxu0 }
 0x1aa   : > { %v4016_v22 = vadd.f32 %v4015_v53, %v4014_v35  ;;  %v4017_v10 = vpop.f32.mrb[30].mxu1  ;;  %v3954_v45 = vpop.f32.mrb[31].mxu0 }
 0x1ab   : > { %v4018_v63 = vpop.f32.mrb[31].mxu1  ;;  %v3955_v23 = vadd.f32 %v3954_v45, %v3953_v52 }
 0x1ac   : > { %v5685_v18 = vadd.f32 %v4016_v22, %v3952_v29  ;;  %v4019_v9 = vadd.f32 %v4018_v63, %v4017_v10 }
 0x1ae   : > { %v5687_v46 = vadd.f32 %v4019_v9, %v3955_v23 }
 0x1af   : > { %v4036_v0 = vpop.f32.mrb[32].mxu0 }
 0x1b0   : > { %v4037_v44 = vpop.f32.mrb[33].mxu0 }
 0x1b1   : > { %v4038_v31 = vadd.f32 %v4037_v44, %v4036_v0  ;;  %v4039_v5 = vpop.f32.mrb[34].mxu0  ;;  %v4100_v57 = vpop.f32.mrb[32].mxu1 }
 0x1b2   : > { %v4040_v8 = vpop.f32.mrb[35].mxu0  ;;  %v4101_v27 = vpop.f32.mrb[33].mxu1 }
 0x1b3   : > { %v3079_v51 = vadd.f32 %v4038_v31, %v5657_v11  ;;  %v4041_v1 = vadd.f32 %v4040_v8, %v4039_v5  ;;  %v4102_v15 = vadd.f32 %v4101_v27, %v4100_v57  ;;  %v4103_v43 = vpop.f32.mrb[34].mxu1 }
 0x1b4   : > { %v4104_v62 = vpop.f32.mrb[35].mxu1 }
 0x1b5   : > { %v3082_v60 = vadd.f32 %v4041_v1, %v5659_v48  ;;  %v4105_v7 = vadd.f32 %v4104_v62, %v4103_v43  ;;  %v5691_v13 = vadd.f32 %v4102_v15, %v3079_v51 }
 0x1b7   : > { %v4042_v6 = vpop.f32.mrb[36].mxu0  ;;  %v5693_v14 = vadd.f32 %v4105_v7, %v3082_v60 }
 0x1b8   : > { %v4043_v30 = vpop.f32.mrb[37].mxu0 }
 0x1b9   : > { %v4106_v34 = vpop.f32.mrb[36].mxu1  ;;  %v4044_v47 = vadd.f32 %v4043_v30, %v4042_v6  ;;  %v4045_v12 = vpop.f32.mrb[38].mxu0 }
 0x1ba   : > { %v4107_v3 = vpop.f32.mrb[37].mxu1  ;;  %v4046_v20 = vpop.f32.mrb[39].mxu0 }
 0x1bb   : > { %v3087_v11 = vadd.f32 %v4044_v47, %v5661_v38  ;;  %v4108_v56 = vadd.f32 %v4107_v3, %v4106_v34  ;;  %v4109_v17 = vpop.f32.mrb[38].mxu1  ;;  %v4047_v16 = vadd.f32 %v4046_v20, %v4045_v12 }
 0x1bc   : > { %v4110_v2 = vpop.f32.mrb[39].mxu1 }
 0x1bd   : > { %v3090_v48 = vadd.f32 %v4047_v16, %v5663_v58  ;;  %v4111_v39 = vadd.f32 %v4110_v2, %v4109_v17  ;;  %v5697_v40 = vadd.f32 %v4108_v56, %v3087_v11 }
 0x1bf   : > { %v5699_v61 = vadd.f32 %v4111_v39, %v3090_v48 }
 0x1c1   : > { %v4048_v33 = vpop.f32.mrb[40].mxu0 }
 0x1c2   : > { %v4112_v19 = vpop.f32.mrb[40].mxu1  ;;  %v4049_v59 = vpop.f32.mrb[41].mxu0 }
 0x1c3   : > { %v4113_v37 = vpop.f32.mrb[41].mxu1  ;;  %v4050_v55 = vadd.f32 %v4049_v59, %v4048_v33  ;;  %v4051_v25 = vpop.f32.mrb[42].mxu0 }
 0x1c4   : > { %v4114_v50 = vadd.f32 %v4113_v37, %v4112_v19  ;;  %v4115_v35 = vpop.f32.mrb[42].mxu1  ;;  %v4052_v38 = vpop.f32.mrb[43].mxu0 }
 0x1c5   : > { %v4116_v21 = vpop.f32.mrb[43].mxu1  ;;  %v3095_v53 = vadd.f32 %v4050_v55, %v5665_v4  ;;  %v4053_v29 = vadd.f32 %v4052_v38, %v4051_v25 }
 0x1c6   : > { %v4117_v22 = vadd.f32 %v4116_v21, %v4115_v35 }
 0x1c7   : > { %v3098_v58 = vadd.f32 %v4053_v29, %v5667_v54  ;;  %v5703_v52 = vadd.f32 %v4114_v50, %v3095_v53 }
 0x1c9   : > { %v4054_v10 = vpop.f32.mrb[44].mxu0  ;;  %v5705_v63 = vadd.f32 %v4117_v22, %v3098_v58 }
 0x1ca   : > { %v4118_v45 = vpop.f32.mrb[44].mxu1  ;;  %v4055_v23 = vpop.f32.mrb[45].mxu0 }
 0x1cb   : > { %v4119_v9 = vpop.f32.mrb[45].mxu1  ;;  %v4056_v0 = vadd.f32 %v4055_v23, %v4054_v10  ;;  %v4057_v31 = vpop.f32.mrb[46].mxu0 }
 0x1cc   : > { %v4120_v44 = vadd.f32 %v4119_v9, %v4118_v45  ;;  %v4121_v5 = vpop.f32.mrb[46].mxu1  ;;  %v4058_v8 = vpop.f32.mrb[47].mxu0 }
 0x1cd   : > { %v4122_v57 = vpop.f32.mrb[47].mxu1  ;;  %v3103_v4 = vadd.f32 %v4056_v0, %v5669_v32  ;;  %v4059_v51 = vadd.f32 %v4058_v8, %v4057_v31 }
 0x1ce   : > { %v4123_v1 = vadd.f32 %v4122_v57, %v4121_v5 }
 0x1cf   : > { %v3106_v54 = vadd.f32 %v4059_v51, %v5671_v42  ;;  %v5709_v27 = vadd.f32 %v4120_v44, %v3103_v4 }
 0x1d1   : > { %v5711_v43 = vadd.f32 %v4123_v1, %v3106_v54 }
 0x1d2   : > { %v4124_v15 = vpop.f32.mrb[48].mxu1  ;;  %v4060_v62 = vpop.f32.mrb[48].mxu0 }
 0x1d3   : > { %v4125_v60 = vpop.f32.mrb[49].mxu1  ;;  %v4061_v30 = vpop.f32.mrb[49].mxu0 }
 0x1d4   : > { %v4126_v7 = vadd.f32 %v4125_v60, %v4124_v15  ;;  %v4127_v6 = vpop.f32.mrb[50].mxu1  ;;  %v4062_v47 = vadd.f32 %v4061_v30, %v4060_v62  ;;  %v4063_v12 = vpop.f32.mrb[50].mxu0 }
 0x1d5   : > { %v4128_v34 = vpop.f32.mrb[51].mxu1  ;;  %v4064_v20 = vpop.f32.mrb[51].mxu0 }
 0x1d6   : > { %v4129_v3 = vadd.f32 %v4128_v34, %v4127_v6  ;;  %v3111_v32 = vadd.f32 %v4062_v47, %v5673_v41  ;;  %v4065_v11 = vadd.f32 %v4064_v20, %v4063_v12 }
 0x1d8   : > { %v3114_v42 = vadd.f32 %v4065_v11, %v5675_v49  ;;  %v3208_v17 = vadd.f32 %v4126_v7, %v3111_v32 }
 0x1da   : > { %v4130_v56 = vpop.f32.mrb[52].mxu1  ;;  %v5715_v33 = vadd.f32 %v4129_v3, %v3114_v42 }
 0x1db   : > { %v4131_v16 = vpop.f32.mrb[53].mxu1  ;;  %v4066_v2 = vpop.f32.mrb[52].mxu0 }
 0x1dc   : > { %v4132_v48 = vadd.f32 %v4131_v16, %v4130_v56  ;;  %v4133_v39 = vpop.f32.mrb[54].mxu1  ;;  %v4067_v19 = vpop.f32.mrb[53].mxu0 }
 0x1dd   : > { %v4134_v59 = vpop.f32.mrb[55].mxu1  ;;  %v4068_v37 = vadd.f32 %v4067_v19, %v4066_v2  ;;  %v4069_v55 = vpop.f32.mrb[54].mxu0 }
 0x1de   : > { %v4135_v50 = vadd.f32 %v4134_v59, %v4133_v39  ;;  %v4070_v25 = vpop.f32.mrb[55].mxu0 }
 0x1df   : > { %v3119_v35 = vadd.f32 %v4068_v37, %v5677_v24  ;;  %v4071_v41 = vadd.f32 %v4070_v25, %v4069_v55 }
 0x1e1   : > { %v3122_v38 = vadd.f32 %v4071_v41, %v5679_v28  ;;  %v3216_v49 = vadd.f32 %v4132_v48, %v3119_v35 }
 0x1e2   : > { %v4136_v21 = vpop.f32.mrb[56].mxu1 }
 0x1e3   : > { %v3219_v53 = vadd.f32 %v4135_v50, %v3122_v38  ;;  %v4137_v29 = vpop.f32.mrb[57].mxu1 }
 0x1e4   : > { %v4138_v58 = vadd.f32 %v4137_v29, %v4136_v21  ;;  %v4139_v10 = vpop.f32.mrb[58].mxu1 }
 0x1e5   : > { %v4072_v22 = vpop.f32.mrb[56].mxu0  ;;  %v4140_v23 = vpop.f32.mrb[59].mxu1 }
 0x1e6   : > { %v4073_v45 = vpop.f32.mrb[57].mxu0  ;;  %v4141_v44 = vadd.f32 %v4140_v23, %v4139_v10 }
 0x1e7   : > { %v4074_v9 = vadd.f32 %v4073_v45, %v4072_v22  ;;  %v4075_v0 = vpop.f32.mrb[58].mxu0 }
 0x1e8   : > { %v4076_v31 = vpop.f32.mrb[59].mxu0 }
 0x1e9   : > { %v3127_v5 = vadd.f32 %v4074_v9, %v5681_v36  ;;  %v4077_v8 = vadd.f32 %v4076_v31, %v4075_v0 }
 0x1eb   : > { %v3130_v24 = vadd.f32 %v4077_v8, %v5683_v26  ;;  %v3224_v57 = vadd.f32 %v4138_v58, %v3127_v5 }
 0x1ec   : > { %v4142_v4 = vpop.f32.mrb[60].mxu1 }
 0x1ed   : > { %v4078_v28 = vpop.f32.mrb[60].mxu0  ;;  %v3227_v51 = vadd.f32 %v4141_v44, %v3130_v24  ;;  %v4143_v54 = vpop.f32.mrb[61].mxu1 }
 0x1ee   : > { %v4079_v1 = vpop.f32.mrb[61].mxu0  ;;  %v4144_v60 = vadd.f32 %v4143_v54, %v4142_v4  ;;  %v4145_v7 = vpop.f32.mrb[62].mxu1 }
 0x1ef   : > { %v4080_v15 = vadd.f32 %v4079_v1, %v4078_v28  ;;  %v4081_v62 = vpop.f32.mrb[62].mxu0  ;;  %v4146_v30 = vpop.f32.mrb[63].mxu1 }
 0x1f0   : > { %v4082_v6 = vpop.f32.mrb[63].mxu0  ;;  %v4147_v36 = vadd.f32 %v4146_v30, %v4145_v7 }
 0x1f1   : > { %v3135_v34 = vadd.f32 %v4080_v15, %v5685_v18  ;;  %v4083_v47 = vadd.f32 %v4082_v6, %v4081_v62 }
 0x1f3   : > { %v3138_v26 = vadd.f32 %v4083_v47, %v5687_v46  ;;  %v3232_v12 = vadd.f32 %v4144_v60, %v3135_v34 }
 0x1f4   : > { %v4190_v20 = vpop.f32.mrb[64].mxu1 }
 0x1f5   : > { %v4182_v3 = vpop.f32.mrb[64].mxu0  ;;  %v3235_v32 = vadd.f32 %v4147_v36, %v3138_v26  ;;  %v5724_v42 = vadd.f32 %v4190_v20, %v3216_v49  ;;  %v3304_v16 = vpop.f32.mrb[65].mxu1 }
 0x1f6   : > { %v3281_v11 = vadd.f32 %v4182_v3, %v5697_v40  ;;  %v3272_v56 = vpop.f32.mrb[65].mxu0  ;;  %v5727_v2 = vadd.f32 %v3304_v16, %v3208_v17  ;;  %v4191_v48 = vpop.f32.mrb[66].mxu1 }
 0x1f7   : > { %v3273_v18 = vadd.f32 %v3272_v56, %v5691_v13  ;;  %v4183_v46 = vpop.f32.mrb[66].mxu0  ;;  %3345 = vst [vmem:[%s4478_s27 + $0x50] sm:$0xff] %v5724_v42  ;;  %v5733_v40 = vadd.f32 %v4191_v48, %v3219_v53  ;;  %v3307_v59 = vpop.f32.mrb[67].mxu1 }
 0x1f8   : > { %3337 = vst [vmem:[%s4478_s27 + $0x10] sm:$0xff] %v3281_v11  ;;  %v3284_v39 = vadd.f32 %v4183_v46, %v5699_v61  ;;  %v3275_v19 = vpop.f32.mrb[67].mxu0  ;;  %3343 = vst [vmem:[%s4478_s27 + $0x40] sm:$0xff] %v5727_v2  ;;  %v3308_v17 = vadd.f32 %v3307_v59, %v5715_v33 }
 0x1f9   : > { %3335 = vst [vmem:[%s4478_s27] sm:$0xff] %v3273_v18  ;;  %v3276_v13 = vadd.f32 %v3275_v19, %v5693_v14  ;;  %3346 = vst [vmem:[%s4478_s27 + $0x58] sm:$0xff] %v5733_v40 }
 0x1fa   : > { %3338 = vst [vmem:[%s4478_s27 + $0x18] sm:$0xff] %v3284_v39  ;;  %3344 = vst [vmem:[%s4478_s27 + $0x48] sm:$0xff] %v3308_v17 }
 0x1fb   : > { %3336 = vst [vmem:[%s4478_s27 + $0x8] sm:$0xff] %v3276_v13 }
 0x1fc   : > { %v4194_v61 = vpop.f32.mrb[68].mxu1 }
 0x1fd   : > { %v4186_v37 = vpop.f32.mrb[68].mxu0  ;;  %v5746_v50 = vadd.f32 %v4194_v61, %v3232_v12  ;;  %v3320_v14 = vpop.f32.mrb[69].mxu1  ;;  %3353 = sbr.rel (%p3581_p7) target bundleno = 517 (0x205), region = 44 }
 0x1fe   : > { %v3297_v55 = vadd.f32 %v4186_v37, %v5709_v27  ;;  %v3288_v25 = vpop.f32.mrb[69].mxu0  ;;  %v3321_v35 = vadd.f32 %v3320_v14, %v3224_v57  ;;  %v4195_v38 = vpop.f32.mrb[70].mxu1 }
 0x1ff   : > { %v3289_v33 = vadd.f32 %v3288_v25, %v5703_v52  ;;  %v4187_v41 = vpop.f32.mrb[70].mxu0  ;;  %3349 = vst [vmem:[%s4478_s27 + $0x70] sm:$0xff] %v5746_v50  ;;  %v3332_v21 = vadd.f32 %v4195_v38, %v3235_v32  ;;  %v3323_v53 = vpop.f32.mrb[71].mxu1  ;;  %v4391_v52 = vmov (!%p3581_p7), 0.0  }
 0x200   : > { %3341 = vst [vmem:[%s4478_s27 + $0x30] sm:$0xff] %v3297_v55  ;;  %v3300_v49 = vadd.f32 %v4187_v41, %v5711_v43  ;;  %v3291_v27 = vpop.f32.mrb[71].mxu0  ;;  %3347 = vst [vmem:[%s4478_s27 + $0x60] sm:$0xff] %v3321_v35  ;;  %v3324_v22 = vadd.f32 %v3323_v53, %v3227_v51 }
 0x201   : > { %3339 = vst [vmem:[%s4478_s27 + $0x20] sm:$0xff] %v3289_v33  ;;  %v3292_v29 = vadd.f32 %v3291_v27, %v5705_v63  ;;  %3350 = vst [vmem:[%s4478_s27 + $0x78] sm:$0xff] %v3332_v21 }
 0x202   : > { %3342 = vst [vmem:[%s4478_s27 + $0x38] sm:$0xff] %v3300_v49  ;;  %3348 = vst [vmem:[%s4478_s27 + $0x68] sm:$0xff] %v3324_v22 }
 0x203   : > { %3340 = vst [vmem:[%s4478_s27 + $0x28] sm:$0xff] %v3292_v29  ;;  %3354 = vst [vmem:[%s4468_s14] sm:$0x1] (!%p3581_p7), %v4391_v52 }
 0x204   : > { %3355 = vst [vmem:[%s4473_s18] sm:$0x1] %v4391_v52 }
 0x205 PF: > { %v3357_v43 = vadd.f32 %v3276_v13, %v3273_v18  ;;  %v3381_v58 = vmul.f32 %v3273_v18, %v3273_v18  ;;  %v3382_v10 = vmul.f32 %v3276_v13, %v3276_v13  ;;  %v3383_v23 = vmul.f32 %v3281_v11, %v3281_v11 }
 0x206   : > { %v3384_v9 = vmul.f32 %v3284_v39, %v3284_v39  ;;  %v3385_v31 = vmul.f32 %v3289_v33, %v3289_v33  ;;  %v3386_v24 = vmul.f32 %v3292_v29, %v3292_v29  ;;  %v3387_v4 = vmul.f32 %v3297_v55, %v3297_v55 }
 0x207   : > { %v3358_v45 = vadd.f32 %v3357_v43, %v3281_v11  ;;  %v3397_v0 = vadd.f32 %v3382_v10, %v3381_v58  ;;  %v3388_v54 = vmul.f32 %v3300_v49, %v3300_v49  ;;  %v3389_v62 = vmul.f32 %v5727_v2, %v5727_v2 }
 0x208   : > { %v3390_v30 = vmul.f32 %v3308_v17, %v3308_v17  ;;  %v3391_v36 = vmul.f32 %v5724_v42, %v5724_v42  ;;  %v3392_v3 = vmul.f32 %v5733_v40, %v5733_v40  ;;  %v3393_v11 = vmul.f32 %v3321_v35, %v3321_v35 }
 0x209   : > { %v3359_v63 = vadd.f32 %v3358_v45, %v3284_v39  ;;  %v3398_v5 = vadd.f32 %v3397_v0, %v3383_v23  ;;  %v3394_v18 = vmul.f32 %v3324_v22, %v3324_v22  ;;  %v3395_v48 = vmul.f32 %v5746_v50, %v5746_v50 }
 0x20a   : > { %v3396_v19 = vmul.f32 %v3332_v21, %v3332_v21 }
 0x20b   : > { %v3360_v44 = vadd.f32 %v3359_v63, %v3289_v33  ;;  %v3399_v57 = vadd.f32 %v3398_v5, %v3384_v9  ;;  %v3356_v41 = vld [vmem:[%s4468_s14] sm:$0x1] }
 0x20d   : > { %v3361_v8 = vadd.f32 %v3360_v44, %v3292_v29  ;;  %v3400_v51 = vadd.f32 %v3399_v57, %v3385_v31 }
 0x20f   : > { %v3362_v28 = vadd.f32 %v3361_v8, %v3297_v55  ;;  %v3401_v15 = vadd.f32 %v3400_v51, %v3386_v24 }
 0x211   : > { %v3363_v1 = vadd.f32 %v3362_v28, %v3300_v49  ;;  %v3402_v7 = vadd.f32 %v3401_v15, %v3387_v4 }
 0x213   : > { %v3364_v60 = vadd.f32 %v3363_v1, %v5727_v2  ;;  %v3403_v34 = vadd.f32 %v3402_v7, %v3388_v54 }
 0x215   : > { %v3365_v6 = vadd.f32 %v3364_v60, %v3308_v17  ;;  %v3404_v26 = vadd.f32 %v3403_v34, %v3389_v62 }
 0x217   : > { %v3366_v47 = vadd.f32 %v3365_v6, %v5724_v42  ;;  %v3405_v20 = vadd.f32 %v3404_v26, %v3390_v30 }
 0x219   : > { %v3367_v12 = vadd.f32 %v3366_v47, %v5733_v40  ;;  %v3406_v56 = vadd.f32 %v3405_v20, %v3391_v36 }
 0x21b   : > { %v3368_v32 = vadd.f32 %v3367_v12, %v3321_v35  ;;  %v3407_v2 = vadd.f32 %v3406_v56, %v3392_v3 }
 0x21d   : > { %v3369_v16 = vadd.f32 %v3368_v32, %v3324_v22  ;;  %v3408_v42 = vadd.f32 %v3407_v2, %v3393_v11 }
 0x21f   : > { %v3370_v46 = vadd.f32 %v3369_v16, %v5746_v50  ;;  %v3409_v59 = vadd.f32 %v3408_v42, %v3394_v18 }
 0x221   : > { %v3371_v39 = vadd.f32 %v3370_v46, %v3332_v21  ;;  %v3410_v40 = vadd.f32 %v3409_v59, %v3395_v48  ;;  %v3380_v21 = vld [vmem:[%s4473_s18] sm:$0x1] }
 0x223   : > { %v3372_v13 = vrot.slane %v3371_v39, 4  ;;  %v3411_v37 = vadd.f32 %v3410_v40, %v3396_v19 }
 0x225   : > { %v3373_v17 = vadd.f32 %v3372_v13, %v3371_v39  ;;  %v3412_v55 = vrot.slane %v3411_v37, 4 }
 0x227   : > { %v3374_v61 = vrot.slane %v3373_v17, 2  ;;  %v3413_v14 = vadd.f32 %v3412_v55, %v3411_v37 }
 0x229   : > { %v3375_v25 = vadd.f32 %v3374_v61, %v3373_v17  ;;  %v3414_v35 = vrot.slane %v3413_v14, 2 }
 0x22b   : > { %v3376_v33 = vrot.slane %v3375_v25, 1  ;;  %v3415_v50 = vadd.f32 %v3414_v35, %v3413_v14 }
 0x22d   : > { %v3377_v38 = vadd.f32 %v3376_v33, %v3375_v25  ;;  %v3416_v27 = vrot.slane %v3415_v50, 1 }
 0x22f   : > { %v3378_v49 = vadd.f32 %v3377_v38, %v3356_v41  ;;  %v3417_v53 = vadd.f32 %v3416_v27, %v3415_v50 }
 0x231   : > { %3379 = vst [vmem:[%s4468_s14] sm:$0x1] %v3378_v49  ;;  %v3418_v29 = vadd.f32 %v3417_v53, %v3380_v21 }
 0x233   : > { %3419 = vst [vmem:[%s4473_s18] sm:$0x1] %v3418_v29 }
 0x234 PF: > { %s17_s25 = sadd.s32 1, %s4388_s25   ;;  %s5817_s27 = sld [smem:[#allocation3_spill]] }
 0x235   : > { %p14_p8 = scmp.ge.s32.totalorder %s17_s25, 6   ;;  %s5818_s21 = smov %s4380_s23 }
 0x236   : > { %s5819_s22 = smov %s4384_s24  ;;  %s5820_s23 = smov %s5823_s26 }
 0x237   :  { %16 = sbr.rel (!%p14_p8) target bundleno = 3 (0x3), region = 102 }
 0x23a   : > { %s5821_s24 = smov %s5817_s27 }

// kernel: basic_block_forward.3
= control target key start
LH: loop header
LB: loop body
LE: loop exit
PB: predicated region body
PF: predicated region fallthrough
CT: control target
= control target key end

     0   :  { %s4891_s11 = smov 0   ;;  %s4893_s12 = smov 0   ;;  %s6231_s0 = inlined_call_operand.vmem [shape: f32[2,16,16,128], index: 0, kind: input, shape index: {}]   ;;  %s6232_s1 = inlined_call_operand.vmem [shape: bf16[1152,128], index: 1, kind: input, shape index: {}]   ;;  %s6233_s2 = inlined_call_operand.vmem [shape: f32[1,128], index: 2, kind: input, shape index: {}, may-alias: {2,3}]   ;;  %s6234_s3 = inlined_call_operand.vmem [shape: f32[1,128], index: 3, kind: input, shape index: {}, may-alias: {2,3}]   ;;  %s6235_s4 = inlined_call_operand.vmem [shape: bf16[128,128], index: 4, kind: input, shape index: {}]   ;;  %s6236_s5 = inlined_call_operand.vmem [shape: f32[2,16,16,128], index: 5, kind: output, shape index: {0}]   ;;  %s6237_s6 = inlined_call_operand.vmem [shape: f32[2,1,128], index: 6, kind: output, shape index: {1}]   ;;  %s6238_s7 = inlined_call_operand.vmem [shape: f32[2,1,128], index: 7, kind: output, shape index: {2}]   ;;  %s6239_s8 = inlined_call_operand.vmem [shape: f32[2,16,16,128], index: 8, kind: output, shape index: {3}]   ;;  %s6240_s9 = inlined_call_operand.vmem [shape: f32[2,1,128], index: 9, kind: output, shape index: {4}]   ;;  %s6241_s10 = inlined_call_operand.vmem [shape: f32[2,1,128], index: 10, kind: output, shape index: {5}]  }
   0x1   :  { %s4895_s13 = smov 0   ;;  %s4897_s14 = smov 0  }
   0x2   :  { %s4899_s15 = smov 0  }
   0x3 LB: > { %6243 = sst [smem:[#allocation3_spill]] %s4827_s14  ;;  %s30_s16 = sadd.s32 1, %s4823_s13  ;;  %s4831_s15 = sphi %s4899_s15, %s21_s15   ;;  %s4827_s14 = sphi %s4897_s14, %s6261_s14   ;;  %s4823_s13 = sphi %s4895_s13, %s6263_s13   ;;  %s4819_s12 = sphi %s4893_s12, %s6259_s12   ;;  %s4815_s11 = sphi %s4891_s11, %s6262_s11  }
   0x4   : > { %s33_s17 = sadd.s32 1, %s4827_s14  ;;  %p31_p0 = scmp.ge.s32.totalorder %s30_s16, 2 }
   0x5   : > { %p3965_p1 = scmp.ge.s32.totalorder %s4831_s15, 1  ;;  %p339_p2 = scmp.lt.s32.totalorder %s4831_s15, 5 }
   0x6   : > { %s6265_s16 = smov (%p31_p0, %s30_s16), 0  ;;  %s6267_s17 = smov (!%p31_p0, %s33_s17), %s4827_s14 }
   0x7   : > { %6244 = sst [smem:[#allocation4_spill]] %s6265_s16  ;;  %p340_p3 = pnand %p3965_p1, %p339_p2 }
   0x8   : > { %p35_p4 = scmp.ge.s32.totalorder %s6267_s17, 2  ;;  %p404_p5 = scmp.lt.s32.totalorder (!%p340_p3), %s4819_s12, 1 }
   0x9   : > { %343 = sbr.rel (%p340_p3) target bundleno = 823 (0x337), region = 40  ;;  %s3968_s18 = sshll.u32 (!%p340_p3), %s4815_s11, 3 }
   0xa   : > { %s6269_s17 = smov (%p35_p4, %s6267_s17), 0  ;;  %p412_p6 = scmp.lt.s32.totalorder (!%p340_p3), %s3968_s18, 15 }
   0xb   : > { %6245 = sst [smem:[#allocation5_spill]] %s6269_s17  ;;  %p3976_p7 = scmp.ne.s32.totalorder (!%p340_p3), %s4815_s11, 0 }
  0x10   : > { %s6271_s12 = smov (!%p404_p5, %s4819_s12), 1  ;;  %s6273_s18 = smov (!%p412_p6, %s3968_s18), 15 }
  0x11   : > { %s4260_s19 = sshll.u32 %s6271_s12, 8  ;;  %s3970_s20 = sshll.u32 %s6271_s12, 5  ;;  %vm954_vm0 = vcmask (!%p3976_p7), 1043456   ;;  %v4833_v2 = vmov (!%p3976_p7), 0   ;;  %vm955_vm1 = vsmask.f32 (!%p3976_p7), 7938 }
  0x12   : > { %s4927_s23 = scalar_lea.vmem %s6231_s0, %s4260_s19  ;;  %s3969_s24 = sshll.u32 %s6273_s18, 1  ;;  %451 = vst [vmem:[#allocation2 + $0xc] sm:$0xf] (!%p3976_p7), %v4833_v2  ;;  %448 = vst [vmem:[#allocation2] sm:$0xf] (!%p3976_p7), %v4833_v2  ;;  %vm961_vm4 = vcmask (!%p3976_p7), 1040384  }
  0x13   : > { %s416_s25 = sadd.s32 %s3970_s20, %s3969_s24  ;;  %s4932_s28 = scalar_lea.vmem %s6237_s6, %s6271_s12  ;;  %v502_v0 = vld [vmem:[%s4927_s23] sm:$0xff] (!%p3976_p7)  ;;  %v503_v1 = vld [vmem:[%s4927_s23 + $0x8] sm:$0xff] (!%p3976_p7)  ;;  %449 = vst [vmem:[#allocation2 + $0x4] sm:$0xf] (!%p3976_p7), %v4833_v2  ;;  %450 = vst [vmem:[#allocation2 + $0x8] sm:$0x1] (!%p3976_p7), %v4833_v2 }
  0x14   : > { %s3971_s29 = sshll.u32 %s416_s25, 3  ;;  %s4937_s3 = scalar_lea.vmem %s6238_s7, %s6271_s12  ;;  %452 = vst [vmem:[#allocation2 + $0x10] sm:$0xf] (!%p3976_p7), %v4833_v2  ;;  %453 = vst [vmem:[#allocation2 + $0x14] sm:$0x1] (!%p3976_p7), %v4833_v2  ;;  %v4261_v3 = vpack.c.bf16 (!%p3976_p7), %v502_v0, %v502_v0  ;;  %v4262_v4 = vpack.c.bf16 (!%p3976_p7), %v503_v1, %v503_v1  ;;  %v504_v5 = vld [vmem:[%s4927_s23 + $0x10] sm:$0xff] (!%p3976_p7) }
  0x15   : > { %s4942_s14 = scalar_lea.vmem %s6236_s5, %s3971_s29  ;;  %s4947_s18 = scalar_lea.vmem %s6239_s8, %s3971_s29  ;;  %454 = vst [vmem:[#allocation2 + $0x18] sm:$0xf] (!%p3976_p7), %v4833_v2  ;;  %455 = vst [vmem:[#allocation2 + $0x1c] sm:$0xf] (!%p3976_p7), %v4833_v2  ;;  %vm630_vm2 = vsmask.f32 (!%p3976_p7), 256  ;;  %v4263_v7 = vpack.c.bf16 (!%p3976_p7), %v504_v5, %v504_v5 }
  0x16   : > { %s4952_s24 = scalar_lea.vmem %s6240_s9, %s6271_s12  ;;  %s4957_s27 = scalar_lea.vmem %s6241_s10, %s6271_s12  ;;  %456 = vst [vmem:[#allocation2 + $0x20] sm:$0x1] (!%p3976_p7), %v4833_v2  ;;  %457 = vst [vmem:[#allocation2 + $0x24] sm:$0xf] (!%p3976_p7), %v4833_v2  ;;  %v505_v6 = vld [vmem:[%s4927_s23 + $0x18] sm:$0xff] (!%p3976_p7)  ;;  %v506_v9 = vld [vmem:[%s4927_s23 + $0x20] sm:$0xff] (!%p3976_p7) }
  0x17   : > { %447 = sbr.rel (%p3976_p7) target bundleno = 98 (0x62), region = 44  ;;  %458 = vst [vmem:[#allocation2 + $0x28] sm:$0xf] (!%p3976_p7), %v4833_v2  ;;  %459 = vst [vmem:[#allocation2 + $0x2c] sm:$0x1] (!%p3976_p7), %v4833_v2  ;;  %v4264_v8 = vpack.c.bf16 (!%p3976_p7), %v505_v6, %v505_v6  ;;  %v507_v10 = vld [vmem:[%s4927_s23 + $0x28] sm:$0xff] (!%p3976_p7)  ;;  %v4265_v25 = vpack.c.bf16 (!%p3976_p7), %v506_v9, %v506_v9 }
  0x18   : > { %460 = vst [vmem:[#allocation2 + $0x30] sm:$0xf] (!%p3976_p7), %v4833_v2  ;;  %461 = vst [vmem:[#allocation2 + $0x34] sm:$0xf] (!%p3976_p7), %v4833_v2  ;;  %vm631_vm3 = vsmask.f32 (!%p3976_p7), 4368  ;;  %v4266_v26 = vpack.c.bf16 (!%p3976_p7), %v507_v10, %v507_v10 }
  0x19   : > { %462 = vst [vmem:[#allocation2 + $0x38] sm:$0x1] (!%p3976_p7), %v4833_v2  ;;  %463 = vst [vmem:[#allocation2 + $0x3c] sm:$0xf] (!%p3976_p7), %v4833_v2  ;;  %v634_v11 = vshrl.u32 (!%p3976_p7), %v4261_v3, 16  ;;  %v637_v12 = vshll.u32 (!%p3976_p7), %v4261_v3, 16 }
  0x1a   : > { %464 = vst [vmem:[#allocation2 + $0x40] sm:$0xf] (!%p3976_p7), %v4833_v2  ;;  %465 = vst [vmem:[#allocation2 + $0x44] sm:$0x1] (!%p3976_p7), %v4833_v2  ;;  %v642_v13 = vshrl.u32 (!%p3976_p7), %v4262_v4, 16  ;;  %v645_v14 = vshll.u32 (!%p3976_p7), %v4262_v4, 16 }
  0x1b   : > { %466 = vst [vmem:[#allocation2 + $0x48] sm:$0xf] (!%p3976_p7), %v4833_v2  ;;  %467 = vst [vmem:[#allocation2 + $0x4c] sm:$0xf] (!%p3976_p7), %v4833_v2  ;;  %v508_v15 = vld [vmem:[%s4927_s23 + $0x30] sm:$0xff] (!%p3976_p7)  ;;  %v509_v16 = vld [vmem:[%s4927_s23 + $0x38] sm:$0xff] (!%p3976_p7) }
  0x1c   : > { %468 = vst [vmem:[#allocation2 + $0x50] sm:$0x1] (!%p3976_p7), %v4833_v2  ;;  %469 = vst [vmem:[#allocation2 + $0x54] sm:$0xf] (!%p3976_p7), %v4833_v2  ;;  %v651_v18 = vshrl.u32 (!%p3976_p7), %v4263_v7, 16  ;;  %v654_v19 = vshll.u32 (!%p3976_p7), %v4263_v7, 16  ;;  %v4267_v32 = vpack.c.bf16 (!%p3976_p7), %v508_v15, %v508_v15  ;;  %v4268_v33 = vpack.c.bf16 (!%p3976_p7), %v509_v16, %v509_v16 }
  0x1d   : > { %470 = vst [vmem:[#allocation2 + $0x58] sm:$0xf] (!%p3976_p7), %v4833_v2  ;;  %471 = vst [vmem:[#allocation2 + $0x5c] sm:$0x1] (!%p3976_p7), %v4833_v2  ;;  %v659_v20 = vshrl.u32 (!%p3976_p7), %v4264_v8, 16  ;;  %v662_v21 = vshll.u32 (!%p3976_p7), %v4264_v8, 16 }
  0x1e   : > { %472 = vst [vmem:[#allocation2 + $0x60] sm:$0xf] %v4833_v2  ;;  %473 = vst [vmem:[#allocation2 + $0x64] sm:$0xf] %v4833_v2  ;;  %v636_v22 = vrot.slane %v634_v11, 7  ;;  %v644_v24 = vrot.slane %v642_v13, 7 }
  0x1f   : > { %474 = vst [vmem:[#allocation2 + $0x68] sm:$0x1] %v4833_v2  ;;  %475 = vst [vmem:[#allocation2 + $0x6c] sm:$0xf] %v4833_v2  ;;  %v510_v27 = vld [vmem:[%s4927_s23 + $0x40] sm:$0xff]  ;;  %v511_v28 = vld [vmem:[%s4927_s23 + $0x48] sm:$0xff] }
  0x20   : > { %476 = vst [vmem:[#allocation2 + $0x70] sm:$0xf] %v4833_v2  ;;  %477 = vst [vmem:[#allocation2 + $0x74] sm:$0x1] %v4833_v2  ;;  %v653_v30 = vrot.slane %v651_v18, 7  ;;  %v661_v31 = vrot.slane %v659_v20, 7  ;;  %v639_v34 = vor.u32 %v637_v12, %v636_v22  ;;  %v647_v36 = vor.u32 %v645_v14, %v644_v24 }
  0x21   : > { %478 = vst [vmem:[#allocation2 + $0x78] sm:$0xf] %v4833_v2  ;;  %479 = vst [vmem:[#allocation2 + $0x7c] sm:$0xf] %v4833_v2  ;;  %v640_v35 = vrot.slane %v636_v22, 4  ;;  %v649_v37 = vrot.slane %v644_v24, 4  ;;  %v4269_v43 = vpack.c.bf16 %v510_v27, %v510_v27  ;;  %v4990_v44 = vpack.c.bf16 %v511_v28, %v511_v28 }
  0x22   : > { %480 = vst [vmem:[#allocation2 + $0x80] sm:$0x1] %v4833_v2  ;;  %481 = vst [vmem:[#allocation2 + $0x84] sm:$0xf] %v4833_v2  ;;  %v957_v38 = vld [vmem:[#allocation2 + $0xc] sm:$0xf]  ;;  %v656_v40 = vor.u32 %v654_v19, %v653_v30  ;;  %v664_v42 = vor.u32 %v662_v21, %v661_v31 }
  0x23   : > { %482 = vst [vmem:[#allocation2 + $0x88] sm:$0xf] %v4833_v2  ;;  %483 = vst [vmem:[#allocation2 + $0x8c] sm:$0x1] %v4833_v2  ;;  %v963_v39 = vld [vmem:[#allocation2 + $0x14] sm:$0x1] }
  0x24   : > { %484 = vst [vmem:[#allocation2 + $0x90] sm:$0xf] %v4833_v2  ;;  %485 = vst [vmem:[#allocation2 + $0x94] sm:$0xf] %v4833_v2  ;;  %v966_v41 = vld [vmem:[#allocation2 + $0x18] sm:$0xf] }
  0x25   : > { %486 = vst [vmem:[#allocation2 + $0x98] sm:$0x1] %v4833_v2  ;;  %487 = vst [vmem:[#allocation2 + $0x9c] sm:$0xf] %v4833_v2  ;;  %v657_v48 = vrot.slane %v653_v30, 4  ;;  %v666_v51 = vrot.slane %v661_v31, 4 }
  0x26   : > { %488 = vst [vmem:[#allocation2 + $0xa0] sm:$0xf] %v4833_v2  ;;  %489 = vst [vmem:[#allocation2 + $0xa4] sm:$0x1] %v4833_v2  ;;  %v970_v49 = vld [vmem:[#allocation2 + $0x20] sm:$0x1] }
  0x27   : > { %490 = vst [vmem:[#allocation2 + $0xa8] sm:$0xf] %v4833_v2  ;;  %491 = vst [vmem:[#allocation2 + $0xac] sm:$0xf] %v4833_v2  ;;  %v668_v52 = vshrl.u32 %v4265_v25, 16  ;;  %v671_v53 = vshll.u32 %v4265_v25, 16 }
  0x28   : > { %492 = vst [vmem:[#allocation2 + $0xb0] sm:$0x1] %v4833_v2  ;;  %493 = vst [vmem:[#allocation2 + $0xb4] sm:$0xf] %v4833_v2  ;;  %v676_v55 = vshrl.u32 %v4266_v26, 16  ;;  %v679_v56 = vshll.u32 %v4266_v26, 16 }
  0x29   : > { %494 = vst [vmem:[#allocation2 + $0xb8] sm:$0xf] %v4833_v2  ;;  %495 = vst [vmem:[#allocation2 + $0xbc] sm:$0x1] %v4833_v2  ;;  %v685_v57 = vshrl.u32 %v4267_v32, 16  ;;  %v670_v59 = vrot.slane %v668_v52, 7 }
  0x2a   : > { %496 = vst [vmem:[#allocation2 + $0xc0] sm:$0xf] %v4833_v2  ;;  %497 = vst [vmem:[#allocation2 + $0xc4] sm:$0xf] %v4833_v2  ;;  %v973_v60 = vld [vmem:[#allocation2 + $0x24] sm:$0xf] }
  0x2b   : > { %498 = vst [vmem:[#allocation2 + $0xc8] sm:$0x1] %v4833_v2  ;;  %499 = vst [vmem:[#allocation2 + $0xcc] sm:$0xf] %v4833_v2  ;;  %v688_v61 = vshll.u32 %v4267_v32, 16  ;;  %v693_v62 = vshrl.u32 %v4268_v33, 16  ;;  %v673_v4 = vor.u32 %v671_v53, %v670_v59 }
  0x2c   : > { %500 = vst [vmem:[#allocation2 + $0xd0] sm:$0xf] %v4833_v2  ;;  %501 = vst [vmem:[#allocation2 + $0xd4] sm:$0x1] %v4833_v2  ;;  %v678_v63 = vrot.slane %v676_v55, 7  ;;  %v687_v1 = vrot.slane %v685_v57, 7 }
  0x2d   : > { %vm4972_vm5 = vmand %vm954_vm0, %vm955_vm1  ;;  %v977_v0 = vld [vmem:[#allocation2 + $0x2c] sm:$0x1]  ;;  %v696_v2 = vshll.u32 %v4268_v33, 16  ;;  %v702_v3 = vshrl.u32 %v4269_v43, 16  ;;  %v674_v5 = vrot.slane %v670_v59, 4  ;;  %v695_v7 = vrot.slane %v693_v62, 7 }
  0x2e   : > { %vm4978_vm6 = vmor %vm630_vm2, %vm631_vm3  ;;  %v958_v45 = vsel %vm4972_vm5, %v639_v34, %v957_v38  ;;  %v967_v50 = vsel %vm4972_vm5, %v656_v40, %v966_v41  ;;  %v980_v6 = vld [vmem:[#allocation2 + $0x30] sm:$0xf]  ;;  %v705_v8 = vshll.u32 %v4269_v43, 16  ;;  %v681_v9 = vor.u32 %v679_v56, %v678_v63  ;;  %v984_v13 = vld [vmem:[#allocation2 + $0x38] sm:$0x1] }
  0x2f   : > { %vm4986_vm7 = vmand %vm961_vm4, %vm630_vm2  ;;  %v648_v46 = vsel %vm4978_vm6, %v640_v35, %v647_v36  ;;  %959 = vst [vmem:[#allocation2 + $0xc] sm:$0xf] %v958_v45  ;;  %v665_v54 = vsel %vm4978_vm6, %v657_v48, %v664_v42  ;;  %v683_v10 = vrot.slane %v678_v63, 4  ;;  %v690_v11 = vor.u32 %v688_v61, %v687_v1  ;;  %v512_v19 = vld [vmem:[%s4927_s23 + $0x50] sm:$0xff]  ;;  %v513_v20 = vld [vmem:[%s4927_s23 + $0x58] sm:$0xff] }
  0x30   : > { %v964_v47 = vsel %vm4986_vm7, %v649_v37, %v963_v39  ;;  %960 = vst [vmem:[#allocation2 + $0x10] sm:$0xf] %v648_v46  ;;  %968 = vst [vmem:[#allocation2 + $0x18] sm:$0xf] %v967_v50  ;;  %v971_v58 = vsel %vm4986_vm7, %v666_v51, %v970_v49  ;;  %v691_v12 = vrot.slane %v687_v1, 4  ;;  %v974_v14 = vsel %vm4972_vm5, %v673_v4, %v973_v60  ;;  %v514_v21 = vld [vmem:[%s4927_s23 + $0x60] sm:$0xff] }
  0x31   : > { %965 = vst [vmem:[#allocation2 + $0x14] sm:$0x1] %v964_v47  ;;  %969 = vst [vmem:[#allocation2 + $0x1c] sm:$0xf] %v665_v54  ;;  %v698_v15 = vor.u32 %v696_v2, %v695_v7  ;;  %v700_v16 = vrot.slane %v695_v7, 4  ;;  %v704_v18 = vrot.slane %v702_v3, 7  ;;  %v682_v22 = vsel %vm4978_vm6, %v674_v5, %v681_v9 }
  0x32   : > { %972 = vst [vmem:[#allocation2 + $0x20] sm:$0x1] %v971_v58  ;;  %975 = vst [vmem:[#allocation2 + $0x24] sm:$0xf] %v974_v14  ;;  %v978_v24 = vsel %vm4986_vm7, %v683_v10, %v977_v0  ;;  %v981_v25 = vsel %vm4972_vm5, %v690_v11, %v980_v6  ;;  %v987_v26 = vld [vmem:[#allocation2 + $0x3c] sm:$0xf]  ;;  %v4271_v37 = vpack.c.bf16 %v512_v19, %v512_v19 }
  0x33   : > { %v710_v27 = vshrl.u32 %v4990_v44, 16  ;;  %v515_v28 = vld [vmem:[%s4927_s23 + $0x68] sm:$0xff]  ;;  %v516_v30 = vld [vmem:[%s4927_s23 + $0x70] sm:$0xff]  ;;  %976 = vst [vmem:[#allocation2 + $0x28] sm:$0xf] %v682_v22  ;;  %v699_v31 = vsel %vm4978_vm6, %v691_v12, %v698_v15  ;;  %v985_v32 = vsel %vm4986_vm7, %v700_v16, %v984_v13  ;;  %v707_v33 = vor.u32 %v705_v8, %v704_v18  ;;  %v517_v3 = vld [vmem:[%s4927_s23 + $0x78] sm:$0xff] }
  0x34   : > { %979 = vst [vmem:[#allocation2 + $0x2c] sm:$0x1] %v978_v24  ;;  %982 = vst [vmem:[#allocation2 + $0x30] sm:$0xf] %v981_v25  ;;  %v708_v34 = vrot.slane %v704_v18, 4  ;;  %v713_v36 = vshll.u32 %v4990_v44, 16  ;;  %v4272_v38 = vpack.c.bf16 %v513_v20, %v513_v20  ;;  %v4273_v41 = vpack.c.bf16 %v514_v21, %v514_v21 }
  0x35   : > { %983 = vst [vmem:[#allocation2 + $0x34] sm:$0xf] %v699_v31  ;;  %986 = vst [vmem:[#allocation2 + $0x38] sm:$0x1] %v985_v32  ;;  %v712_v35 = vrot.slane %v710_v27, 7  ;;  %v988_v39 = vsel %vm4972_vm5, %v707_v33, %v987_v26  ;;  %v4274_v42 = vpack.c.bf16 %v515_v28, %v515_v28  ;;  %v4275_v43 = vpack.c.bf16 %v516_v30, %v516_v30  ;;  %v518_v13 = vld [vmem:[%s4927_s23 + $0x80] sm:$0xff] }
  0x36   : > { %v991_v40 = vld [vmem:[#allocation2 + $0x44] sm:$0x1]  ;;  %989 = vst [vmem:[#allocation2 + $0x3c] sm:$0xf] %v988_v39  ;;  %v719_v47 = vshrl.u32 %v4271_v37, 16  ;;  %v722_v48 = vshll.u32 %v4271_v37, 16  ;;  %v4276_v21 = vpack.c.bf16 %v517_v3, %v517_v3  ;;  %v4277_v32 = vpack.c.bf16 %v518_v13, %v518_v13 }
  0x37   : > { %v715_v45 = vor.u32 %v713_v36, %v712_v35  ;;  %v717_v46 = vrot.slane %v712_v35, 4  ;;  %v727_v49 = vshrl.u32 %v4272_v38, 16  ;;  %v730_v50 = vshll.u32 %v4272_v38, 16  ;;  %v994_v55 = vld [vmem:[#allocation2 + $0x48] sm:$0xf]  ;;  %v520_v15 = vld [vmem:[%s4927_s23 + $0x90] sm:$0xff] }
  0x38   : > { %v736_v51 = vshrl.u32 %v4273_v41, 16  ;;  %v739_v52 = vshll.u32 %v4273_v41, 16  ;;  %v721_v54 = vrot.slane %v719_v47, 7  ;;  %v744_v56 = vshrl.u32 %v4274_v42, 16  ;;  %v998_v58 = vld [vmem:[#allocation2 + $0x50] sm:$0x1] }
  0x39   : > { %v716_v44 = vsel %vm4978_vm6, %v708_v34, %v715_v45  ;;  %v992_v53 = vsel %vm4986_vm7, %v717_v46, %v991_v40  ;;  %v729_v57 = vrot.slane %v727_v49, 7  ;;  %v747_v60 = vshll.u32 %v4274_v42, 16  ;;  %v1001_v0 = vld [vmem:[#allocation2 + $0x54] sm:$0xf]  ;;  %v1005_v8 = vld [vmem:[#allocation2 + $0x5c] sm:$0x1] }
  0x3a   : > { %990 = vst [vmem:[#allocation2 + $0x40] sm:$0xf] %v716_v44  ;;  %993 = vst [vmem:[#allocation2 + $0x44] sm:$0x1] %v992_v53  ;;  %v738_v59 = vrot.slane %v736_v51, 7  ;;  %v753_v61 = vshrl.u32 %v4275_v43, 16  ;;  %v724_v62 = vor.u32 %v722_v48, %v721_v54  ;;  %v4279_v35 = vpack.c.bf16 %v520_v15, %v520_v15 }
  0x3b   : > { %v725_v63 = vrot.slane %v721_v54, 4  ;;  %v746_v1 = vrot.slane %v744_v56, 7  ;;  %v756_v2 = vshll.u32 %v4275_v43, 16  ;;  %v732_v4 = vor.u32 %v730_v50, %v729_v57  ;;  %v519_v14 = vld [vmem:[%s4927_s23 + $0x88] sm:$0xff]  ;;  %v1008_v20 = vld [vmem:[#allocation2 + $0x60] sm:$0xf] }
  0x3c   : > { %v734_v5 = vrot.slane %v729_v57, 4  ;;  %v741_v6 = vor.u32 %v739_v52, %v738_v59  ;;  %v742_v7 = vrot.slane %v738_v59, 4  ;;  %v995_v9 = vsel %vm4972_vm5, %v724_v62, %v994_v55  ;;  %v521_v22 = vld [vmem:[%s4927_s23 + $0x98] sm:$0xff]  ;;  %v522_v24 = vld [vmem:[%s4927_s23 + $0xa0] sm:$0xff]  ;;  %v1012_v42 = vld [vmem:[#allocation2 + $0x68] sm:$0x1] }
  0x3d   : > { %v749_v10 = vor.u32 %v747_v60, %v746_v1  ;;  %v751_v11 = vrot.slane %v746_v1, 4  ;;  %v755_v12 = vrot.slane %v753_v61, 7  ;;  %996 = vst [vmem:[#allocation2 + $0x48] sm:$0xf] %v995_v9  ;;  %v733_v16 = vsel %vm4978_vm6, %v725_v63, %v732_v4  ;;  %v1015_v52 = vld [vmem:[#allocation2 + $0x6c] sm:$0xf] }
  0x3e   : > { %v999_v18 = vsel %vm4986_vm7, %v734_v5, %v998_v58  ;;  %v1002_v19 = vsel %vm4972_vm5, %v741_v6, %v1001_v0  ;;  %997 = vst [vmem:[#allocation2 + $0x4c] sm:$0xf] %v733_v16  ;;  %v761_v30 = vshrl.u32 %v4276_v21, 16  ;;  %v764_v31 = vshll.u32 %v4276_v21, 16  ;;  %v1019_v60 = vld [vmem:[#allocation2 + $0x74] sm:$0x1] }
  0x3f   : > { %1000 = vst [vmem:[#allocation2 + $0x50] sm:$0x1] %v999_v18  ;;  %1003 = vst [vmem:[#allocation2 + $0x54] sm:$0xf] %v1002_v19  ;;  %v750_v25 = vsel %vm4978_vm6, %v742_v7, %v749_v10  ;;  %v1006_v26 = vsel %vm4986_vm7, %v751_v11, %v1005_v8  ;;  %v758_v27 = vor.u32 %v756_v2, %v755_v12  ;;  %v759_v28 = vrot.slane %v755_v12, 4  ;;  %v523_v3 = vld [vmem:[%s4927_s23 + $0xa8] sm:$0xff] }
  0x40   : > { %1004 = vst [vmem:[#allocation2 + $0x58] sm:$0xf] %v750_v25  ;;  %1007 = vst [vmem:[#allocation2 + $0x5c] sm:$0x1] %v1006_v26  ;;  %v4278_v33 = vpack.c.bf16 %v519_v14, %v519_v14  ;;  %v4280_v36 = vpack.c.bf16 %v521_v22, %v521_v22  ;;  %v4281_v37 = vpack.c.bf16 %v522_v24, %v522_v24  ;;  %v763_v38 = vrot.slane %v761_v30, 7  ;;  %v524_v8 = vld [vmem:[%s4927_s23 + $0xb0] sm:$0xff] }
  0x41   : > { %v1009_v34 = vsel %vm4972_vm5, %v758_v27, %v1008_v20  ;;  %v770_v39 = vshrl.u32 %v4277_v32, 16  ;;  %v773_v40 = vshll.u32 %v4277_v32, 16  ;;  %v787_v45 = vshrl.u32 %v4279_v35, 16  ;;  %v1022_v61 = vld [vmem:[#allocation2 + $0x78] sm:$0xf]  ;;  %v526_v10 = vld [vmem:[%s4927_s23 + $0xc0] sm:$0xff] }
  0x42   : > { %1010 = vst [vmem:[#allocation2 + $0x60] sm:$0xf] %v1009_v34  ;;  %v778_v41 = vshrl.u32 %v4278_v33, 16  ;;  %v781_v43 = vshll.u32 %v4278_v33, 16  ;;  %v790_v46 = vshll.u32 %v4279_v35, 16  ;;  %v795_v47 = vshrl.u32 %v4280_v36, 16 }
  0x43   : > { %v766_v48 = vor.u32 %v764_v31, %v763_v38  ;;  %v768_v49 = vrot.slane %v763_v38, 4  ;;  %v772_v50 = vrot.slane %v770_v39, 7  ;;  %v789_v44 = vrot.slane %v787_v45, 7  ;;  %v1026_v2 = vld [vmem:[#allocation2 + $0x80] sm:$0x1]  ;;  %v525_v9 = vld [vmem:[%s4927_s23 + $0xb8] sm:$0xff] }
  0x44   : > { %v780_v51 = vrot.slane %v778_v41, 7  ;;  %v797_v53 = vrot.slane %v795_v47, 7  ;;  %v798_v54 = vshll.u32 %v4280_v36, 16  ;;  %v804_v55 = vshrl.u32 %v4281_v37, 16  ;;  %v527_v15 = vld [vmem:[%s4927_s23 + $0xc8] sm:$0xff]  ;;  %v528_v16 = vld [vmem:[%s4927_s23 + $0xd0] sm:$0xff] }
  0x45   : > { %v767_v56 = vsel %vm4978_vm6, %v759_v28, %v766_v48  ;;  %v1013_v57 = vsel %vm4986_vm7, %v768_v49, %v1012_v42  ;;  %v775_v58 = vor.u32 %v773_v40, %v772_v50  ;;  %v776_v59 = vrot.slane %v772_v50, 4  ;;  %v1029_v20 = vld [vmem:[#allocation2 + $0x84] sm:$0xf]  ;;  %v1033_v38 = vld [vmem:[#allocation2 + $0x8c] sm:$0x1] }
  0x46   : > { %1011 = vst [vmem:[#allocation2 + $0x64] sm:$0xf] %v767_v56  ;;  %1014 = vst [vmem:[#allocation2 + $0x68] sm:$0x1] %v1013_v57  ;;  %v783_v62 = vor.u32 %v781_v43, %v780_v51  ;;  %v785_v63 = vrot.slane %v780_v51, 4  ;;  %v792_v0 = vor.u32 %v790_v46, %v789_v44  ;;  %v793_v1 = vrot.slane %v789_v44, 4 }
  0x47   : > { %v1016_v4 = vsel %vm4972_vm5, %v775_v58, %v1015_v52  ;;  %v800_v5 = vor.u32 %v798_v54, %v797_v53  ;;  %v802_v6 = vrot.slane %v797_v53, 4  ;;  %v806_v7 = vrot.slane %v804_v55, 7  ;;  %v1036_v43 = vld [vmem:[#allocation2 + $0x90] sm:$0xf]  ;;  %v1040_v50 = vld [vmem:[#allocation2 + $0x98] sm:$0x1] }
  0x48   : > { %1017 = vst [vmem:[#allocation2 + $0x6c] sm:$0xf] %v1016_v4  ;;  %v784_v11 = vsel %vm4978_vm6, %v776_v59, %v783_v62  ;;  %v1020_v12 = vsel %vm4986_vm7, %v785_v63, %v1019_v60  ;;  %v1023_v13 = vsel %vm4972_vm5, %v792_v0, %v1022_v61  ;;  %v807_v14 = vshll.u32 %v4281_v37, 16  ;;  %v1043_v56 = vld [vmem:[#allocation2 + $0x9c] sm:$0xf]  ;;  %v530_v62 = vld [vmem:[%s4927_s23 + $0xe0] sm:$0xff] }
  0x49   : > { %1018 = vst [vmem:[#allocation2 + $0x70] sm:$0xf] %v784_v11  ;;  %1021 = vst [vmem:[#allocation2 + $0x74] sm:$0x1] %v1020_v12  ;;  %v801_v18 = vsel %vm4978_vm6, %v793_v1, %v800_v5  ;;  %v1027_v19 = vsel %vm4986_vm7, %v802_v6, %v1026_v2  ;;  %v4282_v21 = vpack.c.bf16 %v523_v3, %v523_v3  ;;  %v810_v22 = vrot.slane %v806_v7, 4  ;;  %v529_v57 = vld [vmem:[%s4927_s23 + $0xd8] sm:$0xff] }
  0x4a   : > { %1024 = vst [vmem:[#allocation2 + $0x78] sm:$0xf] %v1023_v13  ;;  %1025 = vst [vmem:[#allocation2 + $0x7c] sm:$0xf] %v801_v18  ;;  %v809_v24 = vor.u32 %v807_v14, %v806_v7  ;;  %v4283_v25 = vpack.c.bf16 %v524_v8, %v524_v8  ;;  %v4284_v26 = vpack.c.bf16 %v525_v9, %v525_v9  ;;  %v531_v63 = vld [vmem:[%s4927_s23 + $0xe8] sm:$0xff] }
  0x4b   : > { %1028 = vst [vmem:[#allocation2 + $0x80] sm:$0x1] %v1027_v19  ;;  %v4285_v27 = vpack.c.bf16 %v526_v10, %v526_v10  ;;  %v812_v28 = vshrl.u32 %v4282_v21, 16  ;;  %v815_v30 = vshll.u32 %v4282_v21, 16  ;;  %v4286_v31 = vpack.c.bf16 %v527_v15, %v527_v15  ;;  %v1047_v5 = vld [vmem:[#allocation2 + $0xa4] sm:$0x1] }
  0x4c   : > { %v4287_v32 = vpack.c.bf16 %v528_v16, %v528_v16  ;;  %v1030_v33 = vsel %vm4972_vm5, %v809_v24, %v1029_v20  ;;  %v821_v34 = vshrl.u32 %v4283_v25, 16  ;;  %v824_v35 = vshll.u32 %v4283_v25, 16  ;;  %v1050_v11 = vld [vmem:[#allocation2 + $0xa8] sm:$0xf]  ;;  %v532_v19 = vld [vmem:[%s4927_s23 + $0xf0] sm:$0xff]  ;;  %v533_v20 = vld [vmem:[%s4927_s23 + $0xf8] sm:$0xff] }
  0x4d   : > { %v829_v36 = vshrl.u32 %v4284_v26, 16  ;;  %1031 = vst [vmem:[#allocation2 + $0x84] sm:$0xf] %v1030_v33  ;;  %v814_v37 = vrot.slane %v812_v28, 7  ;;  %v832_v39 = vshll.u32 %v4284_v26, 16  ;;  %v838_v40 = vshrl.u32 %v4285_v27, 16 }
  0x4e   : > { %v841_v41 = vshll.u32 %v4285_v27, 16  ;;  %v823_v42 = vrot.slane %v821_v34, 7  ;;  %v846_v46 = vshrl.u32 %v4286_v31, 16  ;;  %v849_v47 = vshll.u32 %v4286_v31, 16  ;;  %v1054_v31 = vld [vmem:[#allocation2 + $0xb0] sm:$0x1] }
  0x4f   : > { %v831_v45 = vrot.slane %v829_v36, 7  ;;  %v817_v48 = vor.u32 %v815_v30, %v814_v37  ;;  %v819_v49 = vrot.slane %v814_v37, 4  ;;  %v840_v51 = vrot.slane %v838_v40, 7  ;;  %v1057_v37 = vld [vmem:[#allocation2 + $0xb4] sm:$0xf] }
  0x50   : > { %v855_v52 = vshrl.u32 %v4287_v32, 16  ;;  %v826_v44 = vor.u32 %v824_v35, %v823_v42  ;;  %v827_v53 = vrot.slane %v823_v42, 4  ;;  %v848_v3 = vrot.slane %v846_v46, 7 }
  0x51   : > { %v834_v54 = vor.u32 %v832_v39, %v831_v45  ;;  %v836_v55 = vrot.slane %v831_v45, 4  ;;  %v818_v58 = vsel %vm4978_vm6, %v810_v22, %v817_v48  ;;  %v1034_v59 = vsel %vm4986_vm7, %v819_v49, %v1033_v38 }
  0x52   : > { %v843_v60 = vor.u32 %v841_v41, %v840_v51  ;;  %v844_v61 = vrot.slane %v840_v51, 4  ;;  %1032 = vst [vmem:[#allocation2 + $0x88] sm:$0xf] %v818_v58  ;;  %1035 = vst [vmem:[#allocation2 + $0x8c] sm:$0x1] %v1034_v59  ;;  %v1037_v0 = vsel %vm4972_vm5, %v826_v44, %v1036_v43  ;;  %v857_v6 = vrot.slane %v855_v52, 7 }
  0x53   : > { %v835_v1 = vsel %vm4978_vm6, %v827_v53, %v834_v54  ;;  %v1041_v2 = vsel %vm4986_vm7, %v836_v55, %v1040_v50  ;;  %1038 = vst [vmem:[#allocation2 + $0x90] sm:$0xf] %v1037_v0  ;;  %v858_v7 = vshll.u32 %v4287_v32, 16  ;;  %v4288_v8 = vpack.c.bf16 %v529_v57, %v529_v57  ;;  %v1061_v41 = vld [vmem:[#allocation2 + $0xbc] sm:$0x1] }
  0x54   : > { %1039 = vst [vmem:[#allocation2 + $0x94] sm:$0xf] %v835_v1  ;;  %1042 = vst [vmem:[#allocation2 + $0x98] sm:$0x1] %v1041_v2  ;;  %v1044_v4 = vsel %vm4972_vm5, %v843_v60, %v1043_v56  ;;  %v851_v9 = vor.u32 %v849_v47, %v848_v3  ;;  %v853_v10 = vrot.slane %v848_v3, 4  ;;  %v4289_v12 = vpack.c.bf16 %v530_v62, %v530_v62 }
  0x55   : > { %1045 = vst [vmem:[#allocation2 + $0x9c] sm:$0xf] %v1044_v4  ;;  %v4290_v13 = vpack.c.bf16 %v531_v63, %v531_v63  ;;  %v860_v14 = vor.u32 %v858_v7, %v857_v6  ;;  %v861_v15 = vrot.slane %v857_v6, 4  ;;  %v863_v16 = vshrl.u32 %v4288_v8, 16  ;;  %v1064_v54 = vld [vmem:[#allocation2 + $0xc0] sm:$0xf] }
  0x56   : > { %v866_v18 = vshll.u32 %v4288_v8, 16  ;;  %v852_v21 = vsel %vm4978_vm6, %v844_v61, %v851_v9  ;;  %v1048_v22 = vsel %vm4986_vm7, %v853_v10, %v1047_v5  ;;  %v872_v24 = vshrl.u32 %v4289_v12, 16  ;;  %v1068_v58 = vld [vmem:[#allocation2 + $0xc8] sm:$0x1] }
  0x57   : > { %v875_v25 = vshll.u32 %v4289_v12, 16  ;;  %1046 = vst [vmem:[#allocation2 + $0xa0] sm:$0xf] %v852_v21  ;;  %1049 = vst [vmem:[#allocation2 + $0xa4] sm:$0x1] %v1048_v22  ;;  %v1051_v26 = vsel %vm4972_vm5, %v860_v14, %v1050_v11  ;;  %v865_v27 = vrot.slane %v863_v16, 7  ;;  %v4291_v33 = vpack.c.bf16 %v532_v19, %v532_v19 }
  0x58   : > { %v880_v28 = vshrl.u32 %v4290_v13, 16  ;;  %v883_v30 = vshll.u32 %v4290_v13, 16  ;;  %1052 = vst [vmem:[#allocation2 + $0xa8] sm:$0xf] %v1051_v26  ;;  %v874_v32 = vrot.slane %v872_v24, 7  ;;  %v4292_v34 = vpack.c.bf16 %v533_v20, %v533_v20 }
  0x59   : > { %v868_v35 = vor.u32 %v866_v18, %v865_v27  ;;  %v870_v36 = vrot.slane %v865_v27, 4  ;;  %v889_v42 = vshrl.u32 %v4291_v33, 16  ;;  %v892_v43 = vshll.u32 %v4291_v33, 16 }
  0x5a   : > { %v882_v38 = vrot.slane %v880_v28, 7  ;;  %v877_v39 = vor.u32 %v875_v25, %v874_v32  ;;  %v878_v40 = vrot.slane %v874_v32, 4  ;;  %v897_v51 = vshrl.u32 %v4292_v34, 16 }
  0x5b   : > { %v869_v45 = vsel %vm4978_vm6, %v861_v15, %v868_v35  ;;  %v1055_v46 = vsel %vm4986_vm7, %v870_v36, %v1054_v31  ;;  %v891_v50 = vrot.slane %v889_v42, 7  ;;  %v900_v52 = vshll.u32 %v4292_v34, 16 }
  0x5c   : > { %v885_v47 = vor.u32 %v883_v30, %v882_v38  ;;  %v887_v48 = vrot.slane %v882_v38, 4  ;;  %1053 = vst [vmem:[#allocation2 + $0xac] sm:$0xf] %v869_v45  ;;  %1056 = vst [vmem:[#allocation2 + $0xb0] sm:$0x1] %v1055_v46  ;;  %v1058_v49 = vsel %vm4972_vm5, %v877_v39, %v1057_v37  ;;  %v899_v57 = vrot.slane %v897_v51, 7 }
  0x5d   : > { %1059 = vst [vmem:[#allocation2 + $0xb4] sm:$0xf] %v1058_v49  ;;  %v894_v55 = vor.u32 %v892_v43, %v891_v50  ;;  %v895_v56 = vrot.slane %v891_v50, 4 }
  0x5e   : > { %v886_v44 = vsel %vm4978_vm6, %v878_v40, %v885_v47  ;;  %v1062_v53 = vsel %vm4986_vm7, %v887_v48, %v1061_v41  ;;  %v902_v60 = vor.u32 %v900_v52, %v899_v57  ;;  %v904_v61 = vrot.slane %v899_v57, 4 }
  0x5f   : > { %1060 = vst [vmem:[#allocation2 + $0xb8] sm:$0xf] %v886_v44  ;;  %1063 = vst [vmem:[#allocation2 + $0xbc] sm:$0x1] %v1062_v53  ;;  %v1065_v59 = vsel %vm4972_vm5, %v894_v55, %v1064_v54 }
  0x60   : > { %1066 = vst [vmem:[#allocation2 + $0xc0] sm:$0xf] %v1065_v59  ;;  %v903_v62 = vsel %vm4978_vm6, %v895_v56, %v902_v60  ;;  %v1069_v63 = vsel %vm4986_vm7, %v904_v61, %v1068_v58 }
  0x61   : > { %1067 = vst [vmem:[#allocation2 + $0xc4] sm:$0xf] %v903_v62  ;;  %1070 = vst [vmem:[#allocation2 + $0xc8] sm:$0x1] %v1069_v63 }
  0x62 PF: > { %v4689_v0 = vld [vmem:[%s6232_s1 + $0x40] sm:$0xff]   ;;  %v4693_v1 = vld [vmem:[%s6232_s1 + $0x48] sm:$0xff]   ;;  %v4697_v5 = vld [vmem:[%s6232_s1 + $0x50] sm:$0xff]   ;;  %s4293_s12 = smul.u32 96, %s4815_s11  ;;  %vm1326_vm8 = vcmask 1042432   ;;  %vm1327_vm11 = vcmask 1046532  }
  0x63   : > { %v4690_v17 = vld [vmem:[%s6232_s1 + $0xc0] sm:$0xff]   ;;  %4294 = vmatprep.subr.bf16.mxu0 %v4689_v0  ;;  %v4694_v2 = vld [vmem:[%s6232_s1 + $0xc8] sm:$0xff]   ;;  %v4698_v6 = vld [vmem:[%s6232_s1 + $0xd0] sm:$0xff]   ;;  %vm1099_vm9 = vsmask.f32 3328 }
  0x64   : > { %v4691_v23 = vld [vmem:[%s6232_s1] sm:$0xff]   ;;  %4358 = vmatprep.subr.bf16.mxu1 %v4690_v17  ;;  %v4695_v3 = vld [vmem:[%s6232_s1 + $0x8] sm:$0xff]   ;;  %v4699_v7 = vld [vmem:[%s6232_s1 + $0x10] sm:$0xff]   ;;  %s5209_s16 = scalar_lea.vmem [#allocation2], %s4293_s12  ;;  %vm1100_vm10 = vsmask.f32 7440 }
  0x65   : > { %v4692_v29 = vld [vmem:[%s6232_s1 + $0x80] sm:$0xff]   ;;  %4295 = vmatpush3.bf16.msra.mxu0 %v4691_v23  ;;  %v4696_v4 = vld [vmem:[%s6232_s1 + $0x88] sm:$0xff]   ;;  %v4700_v8 = vld [vmem:[%s6232_s1 + $0x90] sm:$0xff]  }
  0x66   : > { %4359 = vmatpush3.bf16.msra.mxu1 %v4692_v29  ;;  %4296 = vmatprep.subr.bf16.mxu0 %v4693_v1  ;;  %v4701_v9 = vld [vmem:[%s6232_s1 + $0x58] sm:$0xff]   ;;  %v4705_v13 = vld [vmem:[%s6232_s1 + $0x60] sm:$0xff]   ;;  %v4709_v18 = vld [vmem:[%s6232_s1 + $0x68] sm:$0xff]  }
  0x67   : > { %4360 = vmatprep.subr.bf16.mxu1 %v4694_v2  ;;  %v4702_v10 = vld [vmem:[%s6232_s1 + $0xd8] sm:$0xff]   ;;  %v4706_v14 = vld [vmem:[%s6232_s1 + $0xe0] sm:$0xff]   ;;  %v4710_v19 = vld [vmem:[%s6232_s1 + $0xe8] sm:$0xff]  }
  0x68   : > { %v4703_v11 = vld [vmem:[%s6232_s1 + $0x18] sm:$0xff]   ;;  %v4707_v15 = vld [vmem:[%s6232_s1 + $0x20] sm:$0xff]   ;;  %v4711_v20 = vld [vmem:[%s6232_s1 + $0x28] sm:$0xff]  }
  0x69   : > { %4297 = vmatpush3.bf16.msra.mxu0 %v4695_v3  ;;  %v4704_v12 = vld [vmem:[%s6232_s1 + $0x98] sm:$0xff]   ;;  %v4708_v16 = vld [vmem:[%s6232_s1 + $0xa0] sm:$0xff]   ;;  %v4712_v21 = vld [vmem:[%s6232_s1 + $0xa8] sm:$0xff]  }
  0x6a   : > { %4361 = vmatpush3.bf16.msra.mxu1 %v4696_v4  ;;  %4298 = vmatprep.subr.bf16.mxu0 %v4697_v5  ;;  %v4713_v22 = vld [vmem:[%s6232_s1 + $0x70] sm:$0xff]   ;;  %v4717_v27 = vld [vmem:[%s6232_s1 + $0x78] sm:$0xff]   ;;  %v5212_v32 = vld [vmem:[%s5209_s16] sm:$0xf] }
  0x6b   : > { %4362 = vmatprep.subr.bf16.mxu1 %v4698_v6  ;;  %v4714_v24 = vld [vmem:[%s6232_s1 + $0xf0] sm:$0xff]   ;;  %v4718_v28 = vld [vmem:[%s6232_s1 + $0xf8] sm:$0xff]   ;;  %v5215_v33 = vld [vmem:[%s5209_s16 + $0x4] sm:$0xf]  ;;  %v1103_v35 = vshrl.u32 %v5212_v32, 16  ;;  %v1106_v36 = vshll.u32 %v5212_v32, 16 }
  0x6c   : > { %v4715_v25 = vld [vmem:[%s6232_s1 + $0x30] sm:$0xff]   ;;  %v4719_v30 = vld [vmem:[%s6232_s1 + $0x38] sm:$0xff]   ;;  %v5218_v34 = vld [vmem:[%s5209_s16 + $0x8] sm:$0x1]  ;;  %v1112_v37 = vshll.u32 %v5215_v33, 16  ;;  %v1116_v38 = vshrl.u32 %v5215_v33, 16  ;;  %v4104_v29 = vcombine.low %v5212_v32, %v5215_v33 }
  0x6d   : > { %4299 = vmatpush3.bf16.msra.mxu0 %v4699_v7  ;;  %v4716_v26 = vld [vmem:[%s6232_s1 + $0xb0] sm:$0xff]   ;;  %v4720_v31 = vld [vmem:[%s6232_s1 + $0xb8] sm:$0xff]   ;;  %v1122_v39 = vshll.u32 %v5218_v34, 16  ;;  %v4022_v40 = vld [vmem:[%s5209_s16 + $0xc] sm:$0xf]  ;;  %v1105_v41 = vrot.slane %v1103_v35, 4 }
  0x6e   : > { %4363 = vmatpush3.bf16.msra.mxu1 %v4700_v8  ;;  %4300 = vmatprep.subr.bf16.mxu0 %v4701_v9  ;;  %v1108_v42 = vrot.slane %v1106_v36, 5  ;;  %v5227_v43 = vld [vmem:[%s5209_s16 + $0x10] sm:$0xf]  ;;  %v1414_v45 = vshrl.u32 %v4022_v40, 16  ;;  %v1417_v46 = vshll.u32 %v4022_v40, 16  ;;  %v1114_v47 = vrot.slane %v1112_v37, 5  ;;  %vm5238_vm12 = vmor %vm1099_vm9, %vm1100_vm10 }
  0x6f   : > { %4364 = vmatprep.subr.bf16.mxu1 %v4702_v10  ;;  %v1118_v48 = vrot.slane %v1116_v38, 4  ;;  %v1334_v49 = vrot.slane %v5218_v34, 5  ;;  %v1423_v50 = vshll.u32 %v5227_v43, 16  ;;  %v1294_v51 = vld [vmem:[%s5209_s16] sm:$0xe]  ;;  %v1427_v54 = vshrl.u32 %v5227_v43, 16  ;;  %vm5248_vm13 = vmor %vm1326_vm8, %vm1327_vm11 }
  0x70   : > { %v1109_v52 = vor.u32 %v1108_v42, %v1105_v41  ;;  %v1416_v44 = vrot.slane %v1414_v45, 4  ;;  %v1419_v53 = vrot.slane %v1417_v46, 5  ;;  %v4723_v55 = vld [vmem:[%s6232_s1 + $0x140] sm:$0xff]   ;;  %v1124_v58 = vrot.slane %v1122_v39, 5  ;;  %v5256_v3 = vld [vmem:[%s5209_s16 + $0xc] sm:$0xf] }
  0x71   : > { %4301 = vmatpush3.bf16.msra.mxu0 %v4703_v11  ;;  %v1119_v57 = vor.u32 %v1118_v48, %v1114_v47  ;;  %v5242_v59 = vrot.slane %v1423_v50, 5  ;;  %v4128_v60 = vcombine.low %v4022_v40, %v5227_v43  ;;  %v1429_v63 = vrot.slane %v1427_v54, 4  ;;  %v4724_v7 = vld [vmem:[%s6232_s1 + $0x100] sm:$0xff]   ;;  %v5267_v8 = vld [vmem:[%s5209_s16 + $0x10] sm:$0xf]  ;;  %v4728_v42 = vld [vmem:[%s6232_s1 + $0x108] sm:$0xff]  }
  0x72   : > { %4365 = vmatpush3.bf16.msra.mxu1 %v4704_v12  ;;  %4302 = vmatprep.subr.bf16.mxu0 %v4705_v13  ;;  %v1110_v61 = vrot.slane %v1109_v52, 4  ;;  %v1420_v62 = vor.u32 %v1419_v53, %v1416_v44  ;;  %v1639_v0 = vrot.slane %v5227_v43, 5  ;;  %v4012_v1 = vrot.slane %v1294_v51, 9  ;;  %v5270_v9 = vld [vmem:[%s5209_s16 + $0x14] sm:$0x1] }
  0x73   : > { %4366 = vmatprep.subr.bf16.mxu1 %v4706_v14  ;;  %v1120_v23 = vrot.slane %v1119_v57, 4  ;;  %3018 = vmatprep.mubr.bf16.mxu1 %v4128_v60  ;;  %v1331_v2 = vrot.slane %v5215_v33, 5  ;;  %v1430_v6 = vor.u32 %v1429_v63, %v5242_v59  ;;  %v1127_v10 = vshrl.u32 %v5256_v3, 16  ;;  %v5307_v45 = vld [vmem:[%s5209_s16 + $0x18] sm:$0xf]  ;;  %v4731_v51 = vld [vmem:[%s6232_s1 + $0x150] sm:$0xff]  }
  0x74   : > { %v1115_v4 = vsel %vm5238_vm12, %v1110_v61, %v1114_v47  ;;  %v5260_v5 = vrot.slane %v1420_v62, 4  ;;  %v1130_v14 = vshll.u32 %v5256_v3, 16  ;;  %v4105_v48 = vcombine.low %v5256_v3, %v5267_v8  ;;  %v5312_v50 = vld [vmem:[%s5209_s16 + $0x1c] sm:$0xf]  ;;  %v5320_v53 = vld [vmem:[%s5209_s16 + $0x20] sm:$0x1] }
  0x75   : > { %4303 = vmatpush3.bf16.msra.mxu0 %v4707_v15  ;;  %v1125_v11 = vsel %vm5238_vm12, %v1120_v23, %v1124_v58  ;;  %v1332_v12 = vsel %vm5248_vm13, %v4012_v1, %v1331_v2  ;;  %v1333_v13 = vrot.slane %v1331_v2, 4  ;;  %v4024_v15 = vld [vmem:[%s5209_s16 + $0x18] sm:$0xf]  ;;  %v1338_v52 = vrot.slane %v5267_v8, 5  ;;  %v4732_v57 = vld [vmem:[%s6232_s1 + $0x110] sm:$0xff]  }
  0x76   : > { %4367 = vmatpush3.bf16.msra.mxu1 %v4708_v16  ;;  %4304 = vmatprep.subr.bf16.mxu0 %v4709_v18  ;;  %v5280_v16 = vld [vmem:[%s5209_s16 + $0x1c] sm:$0xf]  ;;  %v4112_v18 = vcombine.low %v1115_v4, %v1125_v11  ;;  %v1438_v32 = vshrl.u32 %v4024_v15, 16  ;;  %v1441_v33 = vshll.u32 %v4024_v15, 16  ;;  %v1341_v44 = vrot.slane %v5270_v9, 5 }
  0x77   : > { %4368 = vmatprep.subr.bf16.mxu1 %v4710_v19  ;;  %v1426_v19 = vsel %vm5238_vm12, %v5260_v5, %v5242_v59  ;;  %v1451_v37 = vshrl.u32 %v5280_v16, 16  ;;  %v4129_v41 = vcombine.low %v4024_v15, %v5280_v16  ;;  %v1151_v54 = vshrl.u32 %v5307_v45, 16  ;;  %v4026_v63 = vld [vmem:[%s5209_s16 + $0x24] sm:$0xf]  ;;  %v5333_v23 = vld [vmem:[%s5209_s16 + $0x28] sm:$0xf] }
  0x78   : > { %2921 = vmatprep.mubr.bf16.mxu0 %v4112_v18  ;;  %v5298_v39 = vrot.slane %v1438_v32, 4  ;;  %v5300_v40 = vrot.slane %v1441_v33, 5  ;;  %v1160_v61 = vshll.u32 %v5312_v50, 16  ;;  %v1164_v62 = vshrl.u32 %v5312_v50, 16  ;;  %v5363_v33 = vld [vmem:[%s5209_s16 + $0x28] sm:$0xf] }
  0x79   : > { %4305 = vmatpush3.bf16.msra.mxu0 %v4711_v20  ;;  %v5286_v20 = vrot.slane %v1430_v6, 4  ;;  %v1340_v2 = vrot.slane %v1338_v52, 4  ;;  %v1153_v3 = vrot.slane %v1151_v54, 4  ;;  %v1296_v6 = vld [vmem:[%s5209_s16 + $0x18] sm:$0xe]  ;;  %v1170_v11 = vshll.u32 %v5320_v53, 16 }
  0x7a   : > { %4369 = vmatpush3.bf16.msra.mxu1 %v4712_v21  ;;  %4306 = vmatprep.subr.bf16.mxu0 %v4713_v22  ;;  %v1129_v21 = vrot.slane %v1127_v10, 4  ;;  %v1295_v22 = vld [vmem:[%s5209_s16 + $0xc] sm:$0xe]  ;;  %v1166_v10 = vrot.slane %v1164_v62, 4  ;;  %v1462_v18 = vshrl.u32 %v4026_v63, 16  ;;  %v4130_v32 = vcombine.low %v4026_v63, %v5333_v23 }
  0x7b   : > { %4370 = vmatprep.subr.bf16.mxu1 %v4714_v24  ;;  %v1335_v24 = vsel %vm5248_vm13, %v1333_v13, %v1334_v49  ;;  %v4013_v49 = vrot.slane %v1295_v22, 9  ;;  %v1184_v54 = vshll.u32 %v5363_v33, 16  ;;  %v5663_v59 = vld [vmem:[%s5209_s16 + $0x24] sm:$0xf] }
  0x7d   : > { %4307 = vmatpush3.bf16.msra.mxu0 %v4715_v25  ;;  %v1132_v25 = vrot.slane %v1130_v14, 5  ;;  %v1339_v1 = vsel %vm5248_vm13, %v4013_v49, %v1338_v52  ;;  %v1342_v14 = vsel %vm5248_vm13, %v1340_v2, %v1341_v44  ;;  %v1348_v49 = vrot.slane %v5320_v53, 5 }
  0x7e   : > { %4371 = vmatpush3.bf16.msra.mxu1 %v4716_v26  ;;  %4308 = vmatprep.subr.bf16.mxu0 %v4717_v27  ;;  %v1136_v26 = vshll.u32 %v5267_v8, 16  ;;  %v1140_v27 = vshrl.u32 %v5267_v8, 16  ;;  %v4121_v22 = vcombine.low %v1339_v1, %v1342_v14  ;;  %v1186_v2 = vrot.slane %v1184_v54, 5 }
  0x7f   : > { %4372 = vmatprep.subr.bf16.mxu1 %v4718_v28  ;;  %v4727_v28 = vld [vmem:[%s6232_s1 + $0x148] sm:$0xff]   ;;  %v1133_v34 = vor.u32 %v1132_v25, %v1129_v21  ;;  %v4736_v21 = vld [vmem:[%s6232_s1 + $0x118] sm:$0xff]   ;;  %v1172_v25 = vrot.slane %v1170_v11, 5  ;;  %v4749_v11 = vld [vmem:[%s6232_s1 + $0x1d0] sm:$0xff]  }
  0x80   : > { %v1138_v35 = vrot.slane %v1136_v26, 5  ;;  %v1142_v36 = vrot.slane %v1140_v27, 4  ;;  %v1465_v26 = vshll.u32 %v4026_v63, 16  ;;  %v5356_v27 = vld [vmem:[%s5209_s16 + $0x24] sm:$0xf] }
  0x81   : > { %4309 = vmatpush3.bf16.msra.mxu0 %v4719_v30  ;;  %v4120_v30 = vcombine.low %v1332_v12, %v1335_v24  ;;  %v1134_v46 = vrot.slane %v1133_v34, 4  ;;  %v4735_v12 = vld [vmem:[%s6232_s1 + $0x158] sm:$0xff]   ;;  %v4743_v34 = vld [vmem:[%s6232_s1 + $0x1c8] sm:$0xff]   ;;  %v1178_v44 = vshll.u32 %v5356_v27, 16  ;;  %v1297_v63 = vld [vmem:[%s5209_s16 + $0x24] sm:$0xe] }
  0x82   : > { %4373 = vmatpush3.bf16.msra.mxu1 %v4720_v31  ;;  %4422 = vmatprep.subr.bf16.mxu0 %v4723_v55  ;;  %v1146_v31 = vshll.u32 %v5270_v9, 16  ;;  %v1143_v47 = vor.u32 %v1142_v36, %v1138_v35  ;;  %v1154_v55 = vshll.u32 %v5307_v45, 16  ;;  %v1162_v9 = vrot.slane %v1160_v61, 5 }
  0x83   : > { %v1139_v58 = vsel %vm5238_vm12, %v1134_v46, %v1138_v35  ;;  %v5368_v36 = vrot.slane %v1465_v26, 5  ;;  %v4744_v46 = vld [vmem:[%s6232_s1 + $0x188] sm:$0xff]   ;;  %v1180_v1 = vrot.slane %v1178_v44, 5 }
  0x84   : > { %2922 = vmatmul.mubr.bf16.vlgmr.msra.gmra.mrb[0].mxu0 %v4104_v29  ;;  %v1148_v38 = vrot.slane %v1146_v31, 5  ;;  %v1144_v60 = vrot.slane %v1143_v47, 4  ;;  %v4737_v29 = vld [vmem:[%s6232_s1 + $0x1c0] sm:$0xff]   ;;  %v1156_v4 = vrot.slane %v1154_v55, 5  ;;  %v1167_v24 = vor.u32 %v1166_v10, %v1162_v9  ;;  %v4748_v10 = vld [vmem:[%s6232_s1 + $0x128] sm:$0xff]  }
  0x85   : > { %3019 = vmatmul.mubr.bf16.vlgmr.msra.gmra.mrb[0].mxu1 %v4120_v30  ;;  %4423 = vmatpush3.bf16.msra.mxu0 %v4724_v7  ;;  %v4738_v7 = vld [vmem:[%s6232_s1 + $0x180] sm:$0xff]   ;;  %v5358_v30 = vrot.slane %v1462_v18, 4  ;;  %v1475_v31 = vshrl.u32 %v5333_v23, 16  ;;  %v1188_v55 = vshrl.u32 %v5363_v33, 16  ;;  %v4750_v18 = vld [vmem:[%s6232_s1 + $0x190] sm:$0xff]  }
  0x86   : > { %4424 = vmatprep.subr.bf16.mxu0 %v4727_v28  ;;  %3026 = vmatprep.mubr.bf16.mxu1 %v4129_v41  ;;  %v1149_v8 = vsel %vm5238_vm12, %v1144_v60, %v1148_v38  ;;  %v1157_v15 = vor.u32 %v1156_v4, %v1153_v3  ;;  %v1168_v35 = vrot.slane %v1167_v24, 4  ;;  %v4106_v38 = vcombine.low %v5307_v45, %v5312_v50  ;;  %v5383_v45 = vld [vmem:[%s5209_s16 + $0x2c] sm:$0x1] }
  0x87   : > { %4486 = vmatprep.subr.bf16.mxu1 %v4737_v29  ;;  %v4113_v13 = vcombine.low %v1139_v58, %v1149_v8  ;;  %v4014_v41 = vrot.slane %v1296_v6, 9  ;;  %v5393_v58 = vld [vmem:[%s5209_s16 + $0x34] sm:$0xf]  ;;  %v4747_v29 = vld [vmem:[%s6232_s1 + $0x168] sm:$0xff]   ;;  %v1190_v3 = vrot.slane %v1188_v55, 4  ;;  %v1194_v4 = vshll.u32 %v5383_v45, 16 }
  0x88   : > { %4487 = vmatpush3.bf16.msra.mxu1 %v4738_v7  ;;  %v1158_v28 = vrot.slane %v1157_v15, 4  ;;  %v1173_v52 = vsel %vm5238_vm12, %v1168_v35, %v1172_v25  ;;  %v1355_v35 = vrot.slane %v5383_v45, 5  ;;  %v4753_v45 = vld [vmem:[%s6232_s1 + $0x198] sm:$0xff]   ;;  %v5450_v55 = vld [vmem:[%s5209_s16 + $0x40] sm:$0xf] }
  0x89   : > { %4425 = vmatpush3.bf16.msra.mxu0 %v4728_v42  ;;  %2929 = vmatprep.mubr.bf16.mxu0 %v4113_v13  ;;  %v4741_v42 = vld [vmem:[%s6232_s1 + $0x160] sm:$0xff]   ;;  %v1191_v14 = vor.u32 %v1190_v3, %v1186_v2  ;;  %v1196_v15 = vrot.slane %v1194_v4, 5 }
  0x8a   : > { %4426 = vmatprep.subr.bf16.mxu0 %v4731_v51  ;;  %v1163_v47 = vsel %vm5238_vm12, %v1158_v28, %v1162_v9  ;;  %v1175_v51 = vshrl.u32 %v5356_v27, 16  ;;  %4488 = vmatprep.subr.bf16.mxu1 %v4743_v34  ;;  %v1499_v9 = vshrl.u32 %v5393_v58, 16  ;;  %v4015_v28 = vrot.slane %v1297_v63, 9  ;;  %v4756_v63 = vld [vmem:[%s6232_s1 + $0x130] sm:$0xff]   ;;  %v4757_v4 = vld [vmem:[%s6232_s1 + $0x1e0] sm:$0xff]  }
  0x8b   : > { %v4114_v53 = vcombine.low %v1163_v47, %v1173_v52  ;;  %v1192_v26 = vrot.slane %v1191_v14, 4  ;;  %v4107_v34 = vcombine.low %v5356_v27, %v5363_v33  ;;  %v4758_v14 = vld [vmem:[%s6232_s1 + $0x1a0] sm:$0xff]  }
  0x8c   : > { %2930 = vmatmul.mubr.bf16.gmra.mrb[4].mxu0 %v4105_v48  ;;  %v1345_v48 = vrot.slane %v5312_v50, 5  ;;  %v4742_v50 = vld [vmem:[%s6232_s1 + $0x120] sm:$0xff]   ;;  %v1177_v62 = vrot.slane %v1175_v51, 4  ;;  %4489 = vmatpush3.bf16.msra.mxu1 %v4744_v46 }
  0x8d   : > { %4427 = vmatpush3.bf16.msra.mxu0 %v4732_v57  ;;  %3027 = vmatmul.mubr.bf16.gmra.mrb[4].mxu1 %v4121_v22  ;;  %v4028_v57 = vld [vmem:[%s5209_s16 + $0x30] sm:$0xf]  ;;  %v1197_v47 = vsel %vm5238_vm12, %v1192_v26, %v1196_v15  ;;  %v4759_v26 = vld [vmem:[%s6232_s1 + $0x1e8] sm:$0xff]  }
  0x8e   : > { %3034 = vmatprep.mubr.bf16.mxu1 %v4130_v32  ;;  %4428 = vmatprep.subr.bf16.mxu0 %v4735_v12  ;;  %v1346_v60 = vsel %vm5248_vm13, %v4014_v41, %v1345_v48  ;;  %v1347_v61 = vrot.slane %v1345_v48, 4  ;;  %v1486_v7 = vshrl.u32 %v4028_v57, 16  ;;  %v1489_v8 = vshll.u32 %v4028_v57, 16  ;;  %v5427_v41 = vld [vmem:[%s5209_s16 + $0x30] sm:$0xf] }
  0x8f   : > { %2937 = vmatprep.mubr.bf16.mxu0 %v4114_v53  ;;  %v1181_v13 = vor.u32 %v1180_v1, %v1177_v62  ;;  %v4131_v24 = vcombine.low %v4028_v57, %v5393_v58  ;;  %4490 = vmatprep.subr.bf16.mxu1 %v4749_v11  ;;  %v1352_v32 = vrot.slane %v5363_v33, 5  ;;  %v1095_v48 = vld [vmem:[%s5209_s16 + $0x38] sm:$0x1]  ;;  %v1199_v52 = vshrl.u32 %v5427_v41, 16  ;;  %v4755_v57 = vld [vmem:[%s6232_s1 + $0x170] sm:$0xff]  }
  0x90   : > { %v1349_v6 = vsel %vm5248_vm13, %v1347_v61, %v1348_v49  ;;  %v5419_v22 = vrot.slane %v1489_v8, 5  ;;  %v4030_v49 = vld [vmem:[%s5209_s16 + $0x3c] sm:$0xf]  ;;  %4491 = vmatpush3.bf16.msra.mxu1 %v4750_v18  ;;  %v1202_v44 = vshll.u32 %v5427_v41, 16  ;;  %v1298_v62 = vld [vmem:[%s5209_s16 + $0x30] sm:$0xe] }
  0x91   : > { %4429 = vmatpush3.bf16.msra.mxu0 %v4736_v21  ;;  %v4122_v12 = vcombine.low %v1346_v60, %v1349_v6  ;;  %v5417_v21 = vrot.slane %v1486_v7, 4  ;;  %v1182_v25 = vrot.slane %v1181_v13, 4  ;;  %v1353_v27 = vsel %vm5248_vm13, %v4015_v28, %v1352_v32 }
  0x92   : > { %4430 = vmatprep.subr.bf16.mxu0 %v4741_v42  ;;  %v5430_v42 = vld [vmem:[%s5209_s16 + $0x34] sm:$0xf]  ;;  %v1354_v33 = vrot.slane %v1352_v32, 4  ;;  %v1218_v60 = vshll.u32 %v1095_v48, 16  ;;  %v1510_v61 = vshrl.u32 %v4030_v49, 16  ;;  %v1201_v1 = vrot.slane %v1199_v52, 4 }
  0x93   : > { %v1187_v46 = vsel %vm5238_vm12, %v1182_v25, %v1186_v2  ;;  %v1208_v54 = vshll.u32 %v5430_v42, 16  ;;  %v1212_v53 = vshrl.u32 %v5430_v42, 16  ;;  %v1204_v2 = vrot.slane %v1202_v44, 5 }
  0x94   : > { %2938 = vmatmul.mubr.bf16.gmra.mrb[8].mxu0 %v4106_v38  ;;  %v4751_v38 = vld [vmem:[%s6232_s1 + $0x1d8] sm:$0xff]   ;;  %v4115_v51 = vcombine.low %v1187_v46, %v1197_v47  ;;  %v1220_v7 = vrot.slane %v1218_v60, 5  ;;  %v5465_v8 = vrot.slane %v1510_v61, 4  ;;  %v4132_v13 = vcombine.low %v4030_v49, %v5450_v55 }
  0x95   : > { %4431 = vmatpush3.bf16.msra.mxu0 %v4742_v50  ;;  %3035 = vmatmul.mubr.bf16.gmra.mrb[8].mxu1 %v4122_v12  ;;  %v1356_v50 = vsel %vm5248_vm13, %v1354_v33, %v1355_v35  ;;  %v1210_v3 = vrot.slane %v1208_v54, 5  ;;  %v1214_v6 = vrot.slane %v1212_v53, 4  ;;  %v1205_v11 = vor.u32 %v1204_v2, %v1201_v1  ;;  %v5481_v46 = vld [vmem:[%s5209_s16 + $0x3c] sm:$0xf]  ;;  %v5488_v33 = vld [vmem:[%s5209_s16 + $0x40] sm:$0xf] }
  0x96   : > { %3042 = vmatprep.mubr.bf16.mxu1 %v4131_v24  ;;  %4432 = vmatprep.subr.bf16.mxu0 %v4747_v29  ;;  %v4123_v29 = vcombine.low %v1353_v27, %v1356_v50  ;;  %v1523_v12 = vshrl.u32 %v5450_v55, 16  ;;  %v4016_v24 = vrot.slane %v1298_v62, 9  ;;  %v1359_v25 = vrot.slane %v5430_v42, 5  ;;  %v1299_v61 = vld [vmem:[%s5209_s16 + $0x3c] sm:$0xe] }
  0x97   : > { %4492 = vmatprep.subr.bf16.mxu1 %v4751_v38  ;;  %2945 = vmatprep.mubr.bf16.mxu0 %v4115_v51  ;;  %v1215_v15 = vor.u32 %v1214_v6, %v1210_v3  ;;  %v1206_v28 = vrot.slane %v1205_v11, 4  ;;  %v1362_v32 = vrot.slane %v1095_v48, 5  ;;  %v4108_v27 = vcombine.low %v5427_v41, %v5430_v42  ;;  %v1096_v48 = vld [vmem:[%s5209_s16 + $0x44] sm:$0x1]  ;;  %v4032_v41 = vld [vmem:[%s5209_s16 + $0x48] sm:$0xf] }
  0x98   : > { %4493 = vmatpush3.bf16.msra.mxu1 %v4753_v45  ;;  %v1361_v38 = vrot.slane %v1359_v25, 4  ;;  %v1226_v45 = vshll.u32 %v5481_v46, 16  ;;  %v1232_v44 = vshll.u32 %v5488_v33, 16  ;;  %v1236_v54 = vshrl.u32 %v5488_v33, 16  ;;  %v5501_v42 = vld [vmem:[%s5209_s16 + $0x4c] sm:$0xf] }
  0x99   : > { %4433 = vmatpush3.bf16.msra.mxu0 %v4748_v10  ;;  %v1513_v10 = vshll.u32 %v4030_v49, 16  ;;  %4494 = vmatprep.subr.bf16.mxu1 %v4757_v4  ;;  %v1216_v35 = vrot.slane %v1215_v15, 4  ;;  %v1211_v47 = vsel %vm5238_vm12, %v1206_v28, %v1210_v3  ;;  %v1223_v49 = vshrl.u32 %v5481_v46, 16 }
  0x9a   : > { %4434 = vmatprep.subr.bf16.mxu0 %v4755_v57  ;;  %v1363_v52 = vsel %vm5248_vm13, %v1361_v38, %v1362_v32  ;;  %v1228_v60 = vrot.slane %v1226_v45, 5  ;;  %v1234_v62 = vrot.slane %v1232_v44, 5  ;;  %v1534_v1 = vshrl.u32 %v4032_v41, 16  ;;  %v4761_v38 = vld [vmem:[%s6232_s1 + $0x1a8] sm:$0xff]  }
  0x9b   : > { %v5472_v18 = vrot.slane %v1513_v10, 5  ;;  %v1221_v51 = vsel %vm5238_vm12, %v1216_v35, %v1220_v7  ;;  %v1225_v53 = vrot.slane %v1223_v49, 4  ;;  %v1537_v3 = vshll.u32 %v4032_v41, 16  ;;  %v1097_v49 = vld [vmem:[%s5209_s16 + $0x50] sm:$0x1] }
  0x9c   : > { %2946 = vmatmul.mubr.bf16.gmra.mrb[12].mxu0 %v4107_v34  ;;  %v1360_v34 = vsel %vm5248_vm13, %v4016_v24, %v1359_v25  ;;  %4495 = vmatpush3.bf16.msra.mxu1 %v4758_v14  ;;  %v4116_v57 = vcombine.low %v1211_v47, %v1221_v51  ;;  %v1547_v4 = vshrl.u32 %v5501_v42, 16  ;;  %v4133_v6 = vcombine.low %v4032_v41, %v5501_v42 }
  0x9d   : > { %4435 = vmatpush3.bf16.msra.mxu0 %v4756_v63  ;;  %3043 = vmatmul.mubr.bf16.gmra.mrb[12].mxu1 %v4123_v29  ;;  %v4124_v50 = vcombine.low %v1360_v34, %v1363_v52  ;;  %v1238_v63 = vrot.slane %v1236_v54, 4  ;;  %v1242_v29 = vshll.u32 %v1096_v48, 16  ;;  %v1229_v2 = vor.u32 %v1228_v60, %v1225_v53  ;;  %v5516_v34 = vld [vmem:[%s5209_s16 + $0x48] sm:$0xf] }
  0x9e   : > { %3050 = vmatprep.mubr.bf16.mxu1 %v4132_v13  ;;  %4496 = vmatprep.subr.bf16.mxu1 %v4759_v26  ;;  %v5506_v11 = vrot.slane %v1534_v1, 4  ;;  %v5508_v14 = vrot.slane %v1537_v3, 5  ;;  %v4017_v15 = vrot.slane %v1299_v61, 9  ;;  %v1366_v24 = vrot.slane %v5488_v33, 5  ;;  %v4763_v61 = vld [vmem:[%s6232_s1 + $0x178] sm:$0xff]  }
  0x9f   : > { %2953 = vmatprep.mubr.bf16.mxu0 %v4116_v57  ;;  %v1239_v7 = vor.u32 %v1238_v63, %v1234_v62  ;;  %v1244_v10 = vrot.slane %v1242_v29, 5  ;;  %v1230_v13 = vrot.slane %v1229_v2, 4  ;;  %v1369_v26 = vrot.slane %v1096_v48, 5  ;;  %v5526_v48 = vld [vmem:[%s5209_s16 + $0x4c] sm:$0xf]  ;;  %4436 = vmatprep.subr.bf16.mxu0 %v4763_v61 }
  0xa0   : > { %v1367_v32 = vsel %vm5248_vm13, %v4017_v15, %v1366_v24  ;;  %v1368_v35 = vrot.slane %v1366_v24, 4  ;;  %v1247_v45 = vshrl.u32 %v5516_v34, 16  ;;  %v1250_v51 = vshll.u32 %v5516_v34, 16  ;;  %v4034_v57 = vld [vmem:[%s5209_s16 + $0x54] sm:$0xf]  ;;  %4497 = vmatpush3.bf16.msra.mxu1 %v4761_v38  ;;  %v4764_v38 = vld [vmem:[%s6232_s1 + $0x138] sm:$0xff]  }
  0xa1   : > { %v1240_v25 = vrot.slane %v1239_v7, 4  ;;  %v1235_v28 = vsel %vm5238_vm12, %v1230_v13, %v1234_v62  ;;  %v1256_v54 = vshll.u32 %v5526_v48, 16  ;;  %v1260_v41 = vshrl.u32 %v5526_v48, 16  ;;  %4437 = vmatpush3.bf16.msra.mxu0 %v4764_v38 }
  0xa2   : > { %v1370_v44 = vsel %vm5248_vm13, %v1368_v35, %v1369_v26  ;;  %v1252_v53 = vrot.slane %v1250_v51, 5  ;;  %v1266_v60 = vshll.u32 %v1097_v49, 16  ;;  %v1558_v29 = vshrl.u32 %v4034_v57, 16  ;;  %v4765_v51 = vld [vmem:[%s6232_s1 + $0x1f0] sm:$0xff]  }
  0xa3   : > { %v1245_v47 = vsel %vm5238_vm12, %v1240_v25, %v1244_v10  ;;  %v1258_v62 = vrot.slane %v1256_v54, 5  ;;  %v1262_v63 = vrot.slane %v1260_v41, 4  ;;  %v1561_v1 = vshll.u32 %v4034_v57, 16  ;;  %v1300_v10 = vld [vmem:[%s5209_s16 + $0x48] sm:$0xe]  ;;  %4498 = vmatprep.subr.bf16.mxu1 %v4765_v51 }
  0xa4   : > { %2954 = vmatmul.mubr.bf16.gmra.mrb[16].mxu0 %v4108_v27  ;;  %v4109_v27 = vcombine.low %v5481_v46, %v5488_v33  ;;  %v4117_v52 = vcombine.low %v1235_v28, %v1245_v47  ;;  %v4125_v46 = vcombine.low %v1367_v32, %v1370_v44  ;;  %v1249_v33 = vrot.slane %v1247_v45, 4  ;;  %v5565_v44 = vld [vmem:[%s5209_s16 + $0x54] sm:$0xf] }
  0xa5   : > { %3051 = vmatmul.mubr.bf16.gmra.mrb[16].mxu1 %v4124_v50  ;;  %v5537_v50 = vld [vmem:[%s5209_s16 + $0x58] sm:$0xf]  ;;  %v1268_v3 = vrot.slane %v1266_v60, 5  ;;  %v1263_v13 = vor.u32 %v1262_v63, %v1258_v62  ;;  %v5545_v15 = vrot.slane %v1558_v29, 4  ;;  %v5547_v24 = vrot.slane %v1561_v1, 5  ;;  %v4766_v63 = vld [vmem:[%s6232_s1 + $0x1b0] sm:$0xff]  }
  0xa6   : > { %3058 = vmatprep.mubr.bf16.mxu1 %v4133_v6  ;;  %2961 = vmatprep.mubr.bf16.mxu0 %v4117_v52  ;;  %v1253_v2 = vor.u32 %v1252_v53, %v1249_v33  ;;  %v1571_v6 = vshrl.u32 %v5537_v50, 16  ;;  %v4134_v7 = vcombine.low %v4034_v57, %v5537_v50  ;;  %v4018_v26 = vrot.slane %v1300_v10, 9  ;;  %v5570_v57 = vld [vmem:[%s5209_s16 + $0x58] sm:$0xf] }
  0xa7   : > { %v1373_v28 = vrot.slane %v5526_v48, 5  ;;  %v1376_v32 = vrot.slane %v1097_v49, 5  ;;  %v1264_v35 = vrot.slane %v1263_v13, 4  ;;  %v4110_v52 = vcombine.low %v5516_v34, %v5526_v48  ;;  %4499 = vmatpush3.bf16.msra.mxu1 %v4766_v63 }
  0xa8   : > { %v1254_v25 = vrot.slane %v1253_v2, 4  ;;  %v1271_v33 = vshrl.u32 %v5565_v44, 16  ;;  %v1274_v53 = vshll.u32 %v5565_v44, 16  ;;  %v1280_v61 = vshll.u32 %v5570_v57, 16  ;;  %v5582_v2 = vld [vmem:[%s5209_s16 + $0x64] sm:$0xf] }
  0xa9   : > { %v1375_v45 = vrot.slane %v1373_v28, 4  ;;  %v1269_v49 = vsel %vm5238_vm12, %v1264_v35, %v1268_v3  ;;  %v1284_v34 = vshrl.u32 %v5570_v57, 16  ;;  %v1380_v51 = vrot.slane %v5570_v57, 5 }
  0xaa   : > { %v1259_v47 = vsel %vm5238_vm12, %v1254_v25, %v1258_v62  ;;  %v4036_v62 = vld [vmem:[%s5209_s16 + $0x60] sm:$0xf]  ;;  %v1273_v29 = vrot.slane %v1271_v33, 4  ;;  %v1276_v1 = vrot.slane %v1274_v53, 5  ;;  %v1282_v10 = vrot.slane %v1280_v61, 5 }
  0xab   : > { %v4118_v54 = vcombine.low %v1259_v47, %v1269_v49  ;;  %v1377_v41 = vsel %vm5248_vm13, %v1375_v45, %v1376_v32  ;;  %v1582_v3 = vshrl.u32 %v4036_v62, 16  ;;  %v1286_v13 = vrot.slane %v1284_v34, 4  ;;  %v1301_v47 = vld [vmem:[%s5209_s16 + $0x54] sm:$0xe] }
  0xac   : > { %2962 = vmatmul.mubr.bf16.gmra.mrb[20].mxu0 %v4109_v27  ;;  %v1374_v27 = vsel %vm5248_vm13, %v4018_v26, %v1373_v28  ;;  %v1277_v28 = vor.u32 %v1276_v1, %v1273_v29  ;;  %v4135_v38 = vcombine.low %v4036_v62, %v5582_v2  ;;  %v4019_v45 = vrot.slane %v1301_v47, 9  ;;  %v4769_v47 = vld [vmem:[%s6232_s1 + $0x200] sm:$0xff]  }
  0xad   : > { %3059 = vmatmul.mubr.bf16.gmra.mrb[20].mxu1 %v4125_v46  ;;  %v1098_v46 = vld [vmem:[%s5209_s16 + $0x5c] sm:$0x1]  ;;  %v4126_v60 = vcombine.low %v1374_v27, %v1377_v41  ;;  %2969 = vmatprep.mubr.bf16.mxu0 %v4118_v54  ;;  %v5585_v32 = vrot.slane %v1582_v3, 4  ;;  %v1287_v27 = vor.u32 %v1286_v13, %v1282_v10  ;;  %v1382_v33 = vrot.slane %v1380_v51, 4  ;;  %v4046_v3 = vld [vmem:[%s5209_s16 + $0xc] sm:$0xe] }
  0xae   : > { %3066 = vmatprep.mubr.bf16.mxu1 %v4134_v7  ;;  %v1290_v48 = vshll.u32 %v1098_v46, 16  ;;  %v1585_v7 = vshll.u32 %v4036_v62, 16  ;;  %v1278_v49 = vrot.slane %v1277_v28, 4  ;;  %v1381_v41 = vsel %vm5248_vm13, %v4019_v45, %v1380_v51  ;;  %v5635_v51 = vld [vmem:[%s5209_s16 + $0x1c] sm:$0xf]  ;;  %4582 = vmatprep.subr.bf16.mxu0 %v4769_v47 }
  0xaf   : > { %v1288_v54 = vrot.slane %v1287_v27, 4  ;;  %v4111_v61 = vcombine.low %v5565_v44, %v5570_v57  ;;  %v1641_v62 = vrot.slane %v1639_v0, 4  ;;  %v4768_v44 = vld [vmem:[%s6232_s1 + $0x1b8] sm:$0xff]   ;;  %v1444_v57 = vor.u32 %v5300_v40, %v5298_v39 }
  0xb0   : > { %v1292_v25 = vrot.slane %v1290_v48, 5  ;;  %v5587_v35 = vrot.slane %v1585_v7, 5  ;;  %v1283_v53 = vsel %vm5238_vm12, %v1278_v49, %v1282_v10  ;;  %v4038_v48 = vld [vmem:[%s5209_s16 + $0x14] sm:$0x1]  ;;  %v4054_v10 = vrot.slane %v4046_v3, 9 }
  0xb1   : > { %v1433_v1 = vshll.u32 %v4038_v48, 16  ;;  %v1642_v7 = vrot.slane %v4038_v48, 5  ;;  %v1468_v13 = vor.u32 %v5368_v36, %v5358_v30  ;;  %v5624_v27 = vld [vmem:[%s5209_s16 + $0x18] sm:$0xf]  ;;  %v1516_v39 = vor.u32 %v5472_v18, %v5465_v8  ;;  %v5638_v49 = vld [vmem:[%s5209_s16 + $0x20] sm:$0x1] }
  0xb2   : > { %v1540_v40 = vor.u32 %v5508_v14, %v5506_v11  ;;  %v1640_v45 = vsel %vm5248_vm13, %v4054_v10, %v1639_v0  ;;  %v1731_v0 = vshll.u32 %v5635_v51, 16  ;;  %v1646_v10 = vrot.slane %v5280_v16, 5  ;;  %v4049_v36 = vld [vmem:[%s5209_s16 + $0x30] sm:$0xe] }
  0xb3   : > { %v1435_v28 = vrot.slane %v1433_v1, 5  ;;  %v4057_v26 = vrot.slane %v4049_v36, 9  ;;  %v5748_v1 = vld [vmem:[%s5209_s16 + $0x3c] sm:$0xf]  ;;  %v1549_v11 = vrot.slane %v1547_v4, 4 }
  0xb4   : > { %2970 = vmatmul.mubr.bf16.gmra.mrb[24].mxu0 %v4110_v52  ;;  %v1383_v52 = vrot.slane %v1098_v46, 5  ;;  %v4767_v46 = vld [vmem:[%s6232_s1 + $0x1f8] sm:$0xff]  }
  0xb5   : > { %3067 = vmatmul.mubr.bf16.gmra.mrb[24].mxu1 %v4126_v60  ;;  %v1293_v60 = vsel %vm5238_vm12, %v1288_v54, %v1292_v25  ;;  %4500 = vmatprep.subr.bf16.mxu1 %v4767_v46  ;;  %v1492_v25 = vor.u32 %v5419_v22, %v5417_v21  ;;  %v1725_v54 = vshll.u32 %v5624_v27, 16  ;;  %v1436_v43 = vsel %vm5238_vm12, %v5286_v20, %v1435_v28  ;;  %v5769_v22 = vld [vmem:[%s5209_s16 + $0x40] sm:$0xf] }
  0xb6   : > { %3074 = vmatprep.mubr.bf16.mxu1 %v4135_v38  ;;  %v1384_v34 = vsel %vm5248_vm13, %v1382_v33, %v1383_v52  ;;  %v4119_v63 = vcombine.low %v1283_v53, %v1293_v60  ;;  %v1643_v38 = vsel %vm5248_vm13, %v1641_v62, %v1642_v7  ;;  %4501 = vmatpush3.bf16.msra.mxu1 %v4768_v44  ;;  %v1722_v52 = vshrl.u32 %v5624_v27, 16  ;;  %v4039_v60 = vld [vmem:[%s5209_s16 + $0x20] sm:$0x1] }
  0xb7   : > { %v4127_v29 = vcombine.low %v1381_v41, %v1384_v34  ;;  %v1564_v41 = vor.u32 %v5547_v24, %v5545_v15  ;;  %v4144_v33 = vcombine.low %v1640_v45, %v1643_v38  ;;  %v1735_v53 = vshrl.u32 %v5635_v51, 16  ;;  %v5669_v45 = vld [vmem:[%s5209_s16 + $0x28] sm:$0xf] }
  0xb8   : > { %2977 = vmatprep.mubr.bf16.mxu0 %v4119_v63  ;;  %v5656_v34 = vcombine.low %v1426_v19, %v1436_v43  ;;  %v1724_v46 = vrot.slane %v1722_v52, 4  ;;  %v1727_v48 = vrot.slane %v1725_v54, 5  ;;  %v1741_v20 = vshll.u32 %v5638_v49, 16 }
  0xb9   : > { %v1733_v62 = vrot.slane %v1731_v0, 5  ;;  %v1737_v63 = vrot.slane %v1735_v53, 4  ;;  %v1649_v44 = vrot.slane %v4039_v60, 5  ;;  %v1445_v19 = vrot.slane %v1444_v57, 4  ;;  %v4771_v0 = vld [vmem:[%s6232_s1 + $0x208] sm:$0xff]  }
  0xba   : > { %v1728_v3 = vor.u32 %v1727_v48, %v1724_v46  ;;  %v1743_v7 = vrot.slane %v1741_v20, 5  ;;  %v1447_v28 = vshll.u32 %v5280_v16, 16  ;;  %v1453_v38 = vrot.slane %v1451_v37, 4  ;;  %v5686_v48 = vld [vmem:[%s5209_s16 + $0x2c] sm:$0x1] }
  0xbb   : > { %v1738_v5 = vor.u32 %v1737_v63, %v1733_v62  ;;  %v1457_v43 = vshll.u32 %v4039_v60, 16  ;;  %v1749_v16 = vshll.u32 %v5663_v59, 16  ;;  %v4152_v60 = vcombine.low %v5624_v27, %v5635_v51 }
  0xbc   : > { %2978 = vmatmul.mubr.bf16.gmra.mrb[28].mxu0 %v4111_v61  ;;  %v4047_v61 = vld [vmem:[%s5209_s16 + $0x18] sm:$0xe]  ;;  %v1729_v52 = vrot.slane %v1728_v3, 4  ;;  %v1449_v53 = vrot.slane %v1447_v28, 5  ;;  %v1755_v20 = vshll.u32 %v5669_v45, 16 }
  0xbd   : > { %3075 = vmatmul.mubr.bf16.gmra.mrb[28].mxu1 %v4127_v29  ;;  %3115 = vmatprep.mubr.bf16.mxu0 %v4144_v33  ;;  %v4055_v29 = vrot.slane %v4047_v61, 9  ;;  %v1648_v33 = vrot.slane %v1646_v10, 4  ;;  %v1739_v57 = vrot.slane %v1738_v5, 4  ;;  %v1746_v61 = vshrl.u32 %v5663_v59, 16 }
  0xbe   : > { %v1734_v37 = vsel %vm5238_vm12, %v1729_v52, %v1733_v62  ;;  %v1454_v3 = vor.u32 %v1453_v38, %v1449_v53  ;;  %v4048_v62 = vld [vmem:[%s5209_s16 + $0x24] sm:$0xe]  ;;  %v1450_v27 = vsel %vm5238_vm12, %v1445_v19, %v1449_v53  ;;  %v4040_v52 = vld [vmem:[%s5209_s16 + $0x2c] sm:$0x1]  ;;  %v1765_v38 = vshll.u32 %v5686_v48, 16 }
  0xbf   : > { %v1647_v54 = vsel %vm5248_vm13, %v4055_v29, %v1646_v10  ;;  %v1650_v46 = vsel %vm5248_vm13, %v1648_v33, %v1649_v44  ;;  %v1744_v63 = vsel %vm5238_vm12, %v1739_v57, %v1743_v7  ;;  %v1459_v10 = vrot.slane %v1457_v43, 5  ;;  %v4773_v33 = vld [vmem:[%s6232_s1 + $0x210] sm:$0xff]  }
  0xc0   : > { %v4145_v29 = vcombine.low %v1647_v54, %v1650_v46  ;;  %v4160_v5 = vcombine.low %v1734_v37, %v1744_v63  ;;  %v1748_v28 = vrot.slane %v1746_v61, 4  ;;  %v1751_v44 = vrot.slane %v1749_v16, 5  ;;  %v5701_v43 = vld [vmem:[%s5209_s16 + $0x30] sm:$0xf] }
  0xc1   : > { %v1455_v7 = vrot.slane %v1454_v3, 4  ;;  %v1759_v54 = vshrl.u32 %v5669_v45, 16  ;;  %v4056_v53 = vrot.slane %v4048_v62, 9  ;;  %v1653_v61 = vrot.slane %v5333_v23, 5 }
  0xc2   : > { %3212 = vmatprep.mubr.bf16.mxu1 %v4160_v5  ;;  %v1752_v57 = vor.u32 %v1751_v44, %v1748_v28  ;;  %v1767_v46 = vrot.slane %v1765_v38, 5  ;;  %v5721_v28 = vld [vmem:[%s5209_s16 + $0x34] sm:$0xf]  ;;  %v5729_v38 = vld [vmem:[%s5209_s16 + $0x38] sm:$0x1]  ;;  %v1770_v30 = vshrl.u32 %v5701_v43, 16 }
  0xc3   : > { %v1460_v16 = vsel %vm5238_vm12, %v1455_v7, %v1459_v10  ;;  %v1761_v37 = vrot.slane %v1759_v54, 4  ;;  %v1654_v3 = vsel %vm5248_vm13, %v4056_v53, %v1653_v61  ;;  %v1655_v62 = vrot.slane %v1653_v61, 4 }
  0xc4   : > { %3116 = vmatmul.mubr.bf16.vlgmr.msra.gmra.mrb[32].mxu0 %v5656_v34  ;;  %v5707_v63 = vcombine.low %v1450_v27, %v1460_v16  ;;  %v1471_v10 = vshll.u32 %v5333_v23, 16  ;;  %v1477_v27 = vrot.slane %v1475_v31, 4  ;;  %v1481_v54 = vshll.u32 %v4040_v52, 16  ;;  %v4777_v16 = vld [vmem:[%s6232_s1 + $0x220] sm:$0xff]  }
  0xc5   : > { %4583 = vmatpush3.bf16.msra.mxu0 %v4769_v47  ;;  %3123 = vmatprep.mubr.bf16.mxu0 %v4145_v29  ;;  %v1757_v47 = vrot.slane %v1755_v20, 5  ;;  %v1656_v20 = vrot.slane %v4040_v52, 5  ;;  %v1753_v29 = vrot.slane %v1752_v57, 4  ;;  %v1773_v57 = vshll.u32 %v5701_v43, 16 }
  0xc6   : > { %4584 = vmatprep.subr.bf16.mxu0 %v4771_v0  ;;  %3213 = vmatmul.mubr.bf16.vlgmr.msra.gmra.mrb[32].mxu1 %v4152_v60  ;;  %v4775_v60 = vld [vmem:[%s6232_s1 + $0x218] sm:$0xff]   ;;  %v1473_v31 = vrot.slane %v1471_v10, 5  ;;  %v4153_v53 = vcombine.low %v5663_v59, %v5669_v45  ;;  %v1779_v61 = vshll.u32 %v5721_v28, 16  ;;  %v1783_v52 = vshrl.u32 %v5721_v28, 16 }
  0xc7   : > { %v1762_v5 = vor.u32 %v1761_v37, %v1757_v47  ;;  %v1758_v44 = vsel %vm5238_vm12, %v1753_v29, %v1757_v47  ;;  %v1657_v7 = vsel %vm5248_vm13, %v1655_v62, %v1656_v20  ;;  %v1772_v47 = vrot.slane %v1770_v30, 4 }
  0xc8   : > { %v4146_v23 = vcombine.low %v1654_v3, %v1657_v7  ;;  %v1478_v20 = vor.u32 %v1477_v27, %v1473_v31  ;;  %v1775_v29 = vrot.slane %v1773_v57, 5  ;;  %v4041_v3 = vld [vmem:[%s5209_s16 + $0x38] sm:$0x1]  ;;  %v1781_v62 = vrot.slane %v1779_v61, 5 }
  0xc9   : > { %4585 = vmatpush3.bf16.msra.mxu0 %v4771_v0  ;;  %v1469_v0 = vrot.slane %v1468_v13, 4  ;;  %v1763_v13 = vrot.slane %v1762_v5, 4  ;;  %v1785_v5 = vrot.slane %v1783_v52, 4  ;;  %v1789_v10 = vshll.u32 %v5729_v38, 16 }
  0xca   : > { %4586 = vmatprep.subr.bf16.mxu0 %v4773_v33  ;;  %v1479_v30 = vrot.slane %v1478_v20, 4  ;;  %v1776_v19 = vor.u32 %v1775_v29, %v1772_v47  ;;  %v1505_v21 = vshll.u32 %v4041_v3, 16  ;;  %v1794_v20 = vshrl.u32 %v5748_v1, 16 }
  0xcb   : > { %v1768_v37 = vsel %vm5238_vm12, %v1763_v13, %v1767_v46  ;;  %v1474_v7 = vsel %vm5238_vm12, %v1469_v0, %v1473_v31  ;;  %v1786_v46 = vor.u32 %v1785_v5, %v1781_v62  ;;  %v1791_v27 = vrot.slane %v1789_v10, 5 }
  0xcc   : > { %3124 = vmatmul.mubr.bf16.gmra.mrb[36].mxu0 %v5707_v63  ;;  %v4161_v59 = vcombine.low %v1758_v44, %v1768_v37  ;;  %v1663_v13 = vrot.slane %v4041_v3, 5  ;;  %v4779_v44 = vld [vmem:[%s6232_s1 + $0x228] sm:$0xff]   ;;  %v1777_v36 = vrot.slane %v1776_v19, 4  ;;  %v1501_v19 = vrot.slane %v1499_v9, 4  ;;  %v5777_v37 = vld [vmem:[%s5209_s16 + $0x44] sm:$0x1] }
  0xcd   : > { %4587 = vmatpush3.bf16.msra.mxu0 %v4773_v33  ;;  %3131 = vmatprep.mubr.bf16.mxu0 %v4146_v23  ;;  %v1483_v33 = vrot.slane %v1481_v54, 5  ;;  %v1660_v54 = vrot.slane %v5393_v58, 5  ;;  %v1495_v23 = vshll.u32 %v5393_v58, 16  ;;  %v1787_v57 = vrot.slane %v1786_v46, 4  ;;  %v4781_v9 = vld [vmem:[%s6232_s1 + $0x230] sm:$0xff]  }
  0xce   : > { %4588 = vmatprep.subr.bf16.mxu0 %v4775_v60  ;;  %3220 = vmatprep.mubr.bf16.mxu1 %v4161_v59  ;;  %v1797_v58 = vshll.u32 %v5748_v1, 16  ;;  %v4050_v59 = vld [vmem:[%s5209_s16 + $0x3c] sm:$0xe]  ;;  %v1796_v5 = vrot.slane %v1794_v20, 4  ;;  %v1517_v20 = vrot.slane %v1516_v39, 4 }
  0xcf   : > { %3221 = vmatmul.mubr.bf16.gmra.mrb[36].mxu1 %v4153_v53  ;;  %v1484_v0 = vsel %vm5238_vm12, %v1479_v30, %v1483_v33  ;;  %v1661_v47 = vsel %vm5248_vm13, %v4057_v26, %v1660_v54  ;;  %v1662_v61 = vrot.slane %v1660_v54, 4  ;;  %v1782_v53 = vsel %vm5238_vm12, %v1777_v36, %v1781_v62  ;;  %v4042_v30 = vld [vmem:[%s5209_s16 + $0x44] sm:$0x1] }
  0xd0   : > { %v5760_v31 = vcombine.low %v1474_v7, %v1484_v0  ;;  %v1497_v52 = vrot.slane %v1495_v23, 5  ;;  %v4154_v33 = vcombine.low %v5701_v43, %v5721_v28  ;;  %v1507_v62 = vrot.slane %v1505_v21, 5 }
  0xd1   : > { %4589 = vmatpush3.bf16.msra.mxu0 %v4775_v60  ;;  %v1493_v60 = vrot.slane %v1492_v25, 4  ;;  %v1792_v25 = vsel %vm5238_vm12, %v1787_v57, %v1791_v27  ;;  %v1664_v26 = vsel %vm5248_vm13, %v1662_v61, %v1663_v13  ;;  %v1799_v10 = vrot.slane %v1797_v58, 5 }
  0xd2   : > { %4590 = vmatprep.subr.bf16.mxu0 %v4777_v16  ;;  %v4147_v29 = vcombine.low %v1661_v47, %v1664_v26  ;;  %v1502_v3 = vor.u32 %v1501_v19, %v1497_v52  ;;  %v1803_v7 = vshll.u32 %v5769_v22, 16  ;;  %v1807_v54 = vshrl.u32 %v5769_v22, 16 }
  0xd3   : > { %v1498_v46 = vsel %vm5238_vm12, %v1493_v60, %v1497_v52  ;;  %v1813_v43 = vshll.u32 %v5777_v37, 16  ;;  %v1800_v13 = vor.u32 %v1799_v10, %v1796_v5  ;;  %v4058_v36 = vrot.slane %v4050_v59, 9  ;;  %v5797_v60 = vld [vmem:[%s5209_s16 + $0x48] sm:$0xf]  ;;  %v4783_v52 = vld [vmem:[%s6232_s1 + $0x238] sm:$0xff]  }
  0xd4   : > { %3132 = vmatmul.mubr.bf16.gmra.mrb[40].mxu0 %v5760_v31  ;;  %v1503_v27 = vrot.slane %v1502_v3, 4  ;;  %v1805_v0 = vrot.slane %v1803_v7, 5  ;;  %v1667_v23 = vrot.slane %v5450_v55, 5  ;;  %v1809_v47 = vrot.slane %v1807_v54, 4 }
  0xd5   : > { %4591 = vmatpush3.bf16.msra.mxu0 %v4777_v16  ;;  %v4162_v16 = vcombine.low %v1782_v53, %v1792_v25  ;;  %3139 = vmatprep.mubr.bf16.mxu0 %v4147_v29  ;;  %v1815_v61 = vrot.slane %v1813_v43, 5  ;;  %v1670_v53 = vrot.slane %v4042_v30, 5  ;;  %v1801_v21 = vrot.slane %v1800_v13, 4 }
  0xd6   : > { %4592 = vmatprep.subr.bf16.mxu0 %v4779_v44  ;;  %v1508_v57 = vsel %vm5238_vm12, %v1503_v27, %v1507_v62  ;;  %v1669_v25 = vrot.slane %v1667_v23, 4  ;;  %v1810_v26 = vor.u32 %v1809_v47, %v1805_v0  ;;  %v1519_v58 = vshll.u32 %v5450_v55, 16  ;;  %v5822_v55 = vld [vmem:[%s5209_s16 + $0x50] sm:$0x1] }
  0xd7   : > { %3228 = vmatprep.mubr.bf16.mxu1 %v4162_v16  ;;  %v5802_v19 = vcombine.low %v1498_v46, %v1508_v57  ;;  %v1525_v16 = vrot.slane %v1523_v12, 4  ;;  %v1806_v29 = vsel %vm5238_vm12, %v1801_v21, %v1805_v0  ;;  %v1529_v59 = vshll.u32 %v4042_v30, 16  ;;  %v4051_v30 = vld [vmem:[%s5209_s16 + $0x48] sm:$0xe]  ;;  %v4043_v0 = vld [vmem:[%s5209_s16 + $0x50] sm:$0x1] }
  0xd8   : > { %3229 = vmatmul.mubr.bf16.gmra.mrb[40].mxu1 %v4154_v33  ;;  %v5813_v33 = vld [vmem:[%s5209_s16 + $0x4c] sm:$0xf]  ;;  %v1671_v3 = vsel %vm5248_vm13, %v1669_v25, %v1670_v53  ;;  %v1818_v8 = vshrl.u32 %v5797_v60, 16  ;;  %v1811_v18 = vrot.slane %v1810_v26, 4  ;;  %v1521_v62 = vrot.slane %v1519_v58, 5 }
  0xd9   : > { %4593 = vmatpush3.bf16.msra.mxu0 %v4779_v44  ;;  %v1668_v44 = vsel %vm5248_vm13, %v4058_v36, %v1667_v23  ;;  %v1821_v12 = vshll.u32 %v5797_v60, 16  ;;  %v4155_v5 = vcombine.low %v5748_v1, %v5769_v22  ;;  %v1827_v7 = vshll.u32 %v5813_v33, 16 }
  0xda   : > { %4594 = vmatprep.subr.bf16.mxu0 %v4781_v9  ;;  %v4148_v39 = vcombine.low %v1668_v44, %v1671_v3  ;;  %v1820_v10 = vrot.slane %v1818_v8, 4  ;;  %v1831_v46 = vshrl.u32 %v5813_v33, 16  ;;  %v1816_v27 = vsel %vm5238_vm12, %v1811_v18, %v1815_v61 }
  0xdb   : > { %v1526_v54 = vor.u32 %v1525_v16, %v1521_v62  ;;  %v1531_v43 = vrot.slane %v1529_v59, 5  ;;  %v1823_v13 = vrot.slane %v1821_v12, 5  ;;  %v4163_v36 = vcombine.low %v1806_v29, %v1816_v27 }
  0xdc   : > { %3140 = vmatmul.mubr.bf16.gmra.mrb[44].mxu0 %v5802_v19  ;;  %v1833_v23 = vrot.slane %v1831_v46, 4  ;;  %v1837_v1 = vshll.u32 %v5822_v55, 16  ;;  %v1522_v57 = vsel %vm5238_vm12, %v1517_v20, %v1521_v62  ;;  %v4059_v21 = vrot.slane %v4051_v30, 9 }
  0xdd   : > { %4595 = vmatpush3.bf16.msra.mxu0 %v4781_v9  ;;  %3147 = vmatprep.mubr.bf16.mxu0 %v4148_v39  ;;  %v1829_v9 = vrot.slane %v1827_v7, 5  ;;  %v1527_v47 = vrot.slane %v1526_v54, 4  ;;  %v1824_v53 = vor.u32 %v1823_v13, %v1820_v10  ;;  %v1674_v25 = vrot.slane %v5501_v42, 5  ;;  %v5863_v10 = vld [vmem:[%s5209_s16 + $0x5c] sm:$0x1] }
  0xde   : > { %4596 = vmatprep.subr.bf16.mxu0 %v4783_v52  ;;  %3236 = vmatprep.mubr.bf16.mxu1 %v4163_v36  ;;  %v1839_v44 = vrot.slane %v1837_v1, 5  ;;  %v1677_v26 = vrot.slane %v4043_v0, 5  ;;  %v1541_v20 = vrot.slane %v1540_v40, 4  ;;  %v1543_v29 = vshll.u32 %v5501_v42, 16  ;;  %v5855_v40 = vld [vmem:[%s5209_s16 + $0x58] sm:$0xf] }
  0xdf   : > { %v1834_v61 = vor.u32 %v1833_v23, %v1829_v9  ;;  %v1532_v58 = vsel %vm5238_vm12, %v1527_v47, %v1531_v43  ;;  %v1825_v16 = vrot.slane %v1824_v53, 4  ;;  %v1675_v8 = vsel %vm5248_vm13, %v4059_v21, %v1674_v25  ;;  %v4052_v54 = vld [vmem:[%s5209_s16 + $0x54] sm:$0xe] }
  0xe0   : > { %3237 = vmatmul.mubr.bf16.gmra.mrb[44].mxu1 %v4155_v5  ;;  %v5846_v3 = vcombine.low %v1522_v57, %v1532_v58  ;;  %v1676_v18 = vrot.slane %v1674_v25, 4  ;;  %v1545_v62 = vrot.slane %v1543_v29, 5  ;;  %v1553_v14 = vshll.u32 %v4043_v0, 16 }
  0xe1   : > { %4597 = vmatpush3.bf16.msra.mxu0 %v4783_v52  ;;  %v5844_v52 = vld [vmem:[%s5209_s16 + $0x54] sm:$0xf]  ;;  %v1835_v59 = vrot.slane %v1834_v61, 4  ;;  %v1830_v39 = vsel %vm5238_vm12, %v1825_v16, %v1829_v9  ;;  %v4156_v4 = vcombine.low %v5797_v60, %v5813_v33  ;;  %v1851_v36 = vshll.u32 %v5855_v40, 16  ;;  %v4044_v9 = vld [vmem:[%s5209_s16 + $0x5c] sm:$0x1] }
  0xe2   : > { %v1678_v5 = vsel %vm5248_vm13, %v1676_v18, %v1677_v26  ;;  %v1842_v7 = vshrl.u32 %v5844_v52, 16  ;;  %v1845_v46 = vshll.u32 %v5844_v52, 16  ;;  %v1550_v27 = vor.u32 %v1549_v11, %v1545_v62  ;;  %v5880_v16 = vld [vmem:[%s5209_s16 + $0x60] sm:$0xf] }
  0xe3   : > { %v1840_v12 = vsel %vm5238_vm12, %v1835_v59, %v1839_v44  ;;  %v4149_v30 = vcombine.low %v1675_v8, %v1678_v5  ;;  %v1555_v43 = vrot.slane %v1553_v14, 5  ;;  %v1546_v23 = vsel %vm5238_vm12, %v1541_v20, %v1545_v62  ;;  %v5893_v14 = vld [vmem:[%s5209_s16 + $0x64] sm:$0xf] }
  0xe4   : > { %3148 = vmatmul.mubr.bf16.gmra.mrb[48].mxu0 %v5846_v3  ;;  %v4164_v42 = vcombine.low %v1830_v39, %v1840_v12  ;;  %v1844_v13 = vrot.slane %v1842_v7, 4  ;;  %v1847_v0 = vrot.slane %v1845_v46, 5  ;;  %v1551_v1 = vrot.slane %v1550_v27, 4 }
  0xe5   : > { %3155 = vmatprep.mubr.bf16.mxu0 %v4149_v30  ;;  %v1855_v57 = vshrl.u32 %v5855_v40, 16  ;;  %v1861_v60 = vshll.u32 %v5863_v10, 16  ;;  %v1853_v53 = vrot.slane %v1851_v36, 5  ;;  %v4060_v21 = vrot.slane %v4052_v54, 9  ;;  %v4053_v54 = vld [vmem:[%s5209_s16 + $0x60] sm:$0xe] }
  0xe6   : > { %3244 = vmatprep.mubr.bf16.mxu1 %v4164_v42  ;;  %v1848_v47 = vor.u32 %v1847_v0, %v1844_v13  ;;  %v1681_v61 = vrot.slane %v5537_v50, 5  ;;  %v1556_v44 = vsel %vm5238_vm12, %v1551_v1, %v1555_v43  ;;  %v1684_v58 = vrot.slane %v4044_v9, 5 }
  0xe7   : > { %v1857_v25 = vrot.slane %v1855_v57, 4  ;;  %v1863_v26 = vrot.slane %v1861_v60, 5  ;;  %v5882_v20 = vcombine.low %v1546_v23, %v1556_v44  ;;  %v1565_v39 = vrot.slane %v1564_v41, 4 }
  0xe8   : > { %3245 = vmatmul.mubr.bf16.gmra.mrb[48].mxu1 %v4156_v4  ;;  %v1849_v29 = vrot.slane %v1848_v47, 4  ;;  %v1682_v59 = vsel %vm5248_vm13, %v4060_v21, %v1681_v61  ;;  %v1683_v8 = vrot.slane %v1681_v61, 4  ;;  %v1567_v62 = vshll.u32 %v5537_v50, 16  ;;  %v5902_v50 = vld [vmem:[%s5209_s16 + $0x68] sm:$0x1] }
  0xe9   : > { %v1858_v18 = vor.u32 %v1857_v25, %v1853_v53  ;;  %v1573_v11 = vrot.slane %v1571_v6, 4  ;;  %v1577_v7 = vshll.u32 %v4044_v9, 16  ;;  %v1866_v15 = vshrl.u32 %v5880_v16, 16  ;;  %v4045_v9 = vld [vmem:[%s5209_s16 + $0x68] sm:$0x1] }
  0xea   : > { %v1854_v12 = vsel %vm5238_vm12, %v1849_v29, %v1853_v53  ;;  %v1685_v5 = vsel %vm5248_vm13, %v1683_v8, %v1684_v58  ;;  %v1569_v46 = vrot.slane %v1567_v62, 5  ;;  %v1869_v6 = vshll.u32 %v5880_v16, 16 }
  0xeb   : > { %v1859_v24 = vrot.slane %v1858_v18, 4  ;;  %v4150_v41 = vcombine.low %v1682_v59, %v1685_v5  ;;  %v4157_v42 = vcombine.low %v5844_v52, %v5855_v40  ;;  %v1868_v4 = vrot.slane %v1866_v15, 4 }
  0xec   : > { %3156 = vmatmul.mubr.bf16.gmra.mrb[52].mxu0 %v5882_v20  ;;  %v1875_v30 = vshll.u32 %v5893_v14, 16  ;;  %v1879_v27 = vshrl.u32 %v5893_v14, 16  ;;  %v1574_v13 = vor.u32 %v1573_v11, %v1569_v46  ;;  %v1579_v0 = vrot.slane %v1577_v7, 5 }
  0xed   : > { %v1864_v43 = vsel %vm5238_vm12, %v1859_v24, %v1863_v26  ;;  %3163 = vmatprep.mubr.bf16.mxu0 %v4150_v41  ;;  %v1871_v36 = vrot.slane %v1869_v6, 5  ;;  %v1885_v52 = vshll.u32 %v5902_v50, 16  ;;  %v1570_v60 = vsel %vm5238_vm12, %v1565_v39, %v1569_v46  ;;  %v5924_v39 = vld [vmem:[%s5209_s16 + $0x6c] sm:$0xf]  ;;  %v5935_v41 = vld [vmem:[%s5209_s16 + $0x70] sm:$0xf] }
  0xee   : > { %v4165_v23 = vcombine.low %v1854_v12, %v1864_v43  ;;  %v1877_v1 = vrot.slane %v1875_v30, 5  ;;  %v1881_v57 = vrot.slane %v1879_v27, 4  ;;  %v1575_v47 = vrot.slane %v1574_v13, 4  ;;  %v4088_v13 = vld [vmem:[%s5209_s16 + $0x18] sm:$0xe] }
  0xef   : > { %v1872_v53 = vor.u32 %v1871_v36, %v1868_v4  ;;  %v4061_v21 = vrot.slane %v4053_v54, 9  ;;  %v1887_v44 = vrot.slane %v1885_v52, 5  ;;  %v1688_v25 = vrot.slane %v5582_v2, 5 }
  0xf0   : > { %3252 = vmatprep.mubr.bf16.mxu1 %v4165_v23  ;;  %v1882_v61 = vor.u32 %v1881_v57, %v1877_v1  ;;  %v1691_v26 = vrot.slane %v4045_v9, 5  ;;  %v1580_v58 = vsel %vm5238_vm12, %v1575_v47, %v1579_v0  ;;  %v6256_v59 = vor.u32 %v5587_v35, %v5585_v32 }
  0xf1   : > { %3253 = vmatmul.mubr.bf16.gmra.mrb[52].mxu1 %v4157_v42  ;;  %v1873_v29 = vrot.slane %v1872_v53, 4  ;;  %v1591_v18 = vshll.u32 %v5582_v2, 16  ;;  %v5926_v62 = vcombine.low %v1570_v60, %v1580_v58  ;;  %v1689_v12 = vsel %vm5248_vm13, %v4061_v21, %v1688_v25  ;;  %v5943_v42 = vld [vmem:[%s5209_s16 + $0x74] sm:$0x1] }
  0xf2   : > { %v1589_v8 = vrot.slane %v6256_v59, 4  ;;  %v1883_v11 = vrot.slane %v1882_v61, 4  ;;  %v1690_v5 = vrot.slane %v1688_v25, 4  ;;  %v6257_v32 = vshrl.u32 %v5582_v2, 16 }
  0xf3   : > { %v1878_v7 = vsel %vm5238_vm12, %v1873_v29, %v1877_v1  ;;  %v1593_v15 = vrot.slane %v1591_v18, 5  ;;  %v1601_v24 = vshll.u32 %v4045_v9, 16  ;;  %v1890_v4 = vshrl.u32 %v5924_v39, 16 }
  0xf4   : > { %v1597_v35 = vrot.slane %v6257_v32, 4  ;;  %3164 = vmatmul.mubr.bf16.gmra.mrb[56].mxu0 %v5926_v62  ;;  %v1888_v46 = vsel %vm5238_vm12, %v1883_v11, %v1887_v44  ;;  %v1692_v6 = vsel %vm5248_vm13, %v1690_v5, %v1691_v26  ;;  %v1893_v30 = vshll.u32 %v5924_v39, 16  ;;  %v4090_v44 = vld [vmem:[%s5209_s16 + $0x30] sm:$0xe] }
  0xf5   : > { %v4166_v2 = vcombine.low %v1878_v7, %v1888_v46  ;;  %v4158_v27 = vcombine.low %v5880_v16, %v5893_v14  ;;  %v4151_v54 = vcombine.low %v1689_v12, %v1692_v6  ;;  %v1603_v0 = vrot.slane %v1601_v24, 5  ;;  %v4089_v16 = vld [vmem:[%s5209_s16 + $0x24] sm:$0xe] }
  0xf6   : > { %v1598_v43 = vor.u32 %v1597_v35, %v1593_v15  ;;  %v1892_v36 = vrot.slane %v1890_v4, 4  ;;  %v1895_v9 = vrot.slane %v1893_v30, 5  ;;  %v1899_v23 = vshll.u32 %v5935_v41, 16  ;;  %v4091_v4 = vld [vmem:[%s5209_s16 + $0x3c] sm:$0xe] }
  0xf7   : > { %3260 = vmatprep.mubr.bf16.mxu1 %v4166_v2  ;;  %3171 = vmatprep.mubr.bf16.mxu0 %v4151_v54  ;;  %v1594_v1 = vsel %vm5238_vm12, %v1589_v8, %v1593_v15  ;;  %v1903_v52 = vshrl.u32 %v5935_v41, 16  ;;  %v1909_v60 = vshll.u32 %v5943_v42, 16  ;;  %v4096_v21 = vrot.slane %v4088_v13, 9  ;;  %v4092_v13 = vld [vmem:[%s5209_s16 + $0x48] sm:$0xe] }
  0xf8   : > { %v1599_v57 = vrot.slane %v1598_v43, 4  ;;  %v1896_v47 = vor.u32 %v1895_v9, %v1892_v36  ;;  %v1901_v53 = vrot.slane %v1899_v23, 5  ;;  %v1947_v61 = vrot.slane %v5635_v51, 5 }
  0xf9   : > { %3261 = vmatmul.mubr.bf16.gmra.mrb[56].mxu1 %v4158_v27  ;;  %v1905_v26 = vrot.slane %v1903_v52, 4  ;;  %v1911_v58 = vrot.slane %v1909_v60, 5  ;;  %v1950_v29 = vrot.slane %v5638_v49, 5  ;;  %v4097_v5 = vrot.slane %v4089_v16, 9 }
  0xfa   : > { %v1604_v25 = vsel %vm5238_vm12, %v1599_v57, %v1603_v0  ;;  %v1897_v8 = vrot.slane %v1896_v47, 4  ;;  %v1948_v18 = vsel %vm5248_vm13, %v4096_v21, %v1947_v61  ;;  %v1949_v11 = vrot.slane %v1947_v61, 4  ;;  %v4094_v21 = vld [vmem:[%s5209_s16 + $0x60] sm:$0xe] }
  0xfb   : > { %v5961_v59 = vcombine.low %v1594_v1, %v1604_v25  ;;  %v1906_v12 = vor.u32 %v1905_v26, %v1901_v53  ;;  %v1954_v51 = vrot.slane %v5669_v45, 5  ;;  %v4098_v7 = vrot.slane %v4090_v44, 9 }
  0xfc   : > { %v1902_v15 = vsel %vm5238_vm12, %v1897_v8, %v1901_v53  ;;  %v1951_v49 = vsel %vm5248_vm13, %v1949_v11, %v1950_v29  ;;  %v1961_v32 = vrot.slane %v5721_v28, 5  ;;  %v1964_v35 = vrot.slane %v5729_v38, 5  ;;  %v4093_v53 = vld [vmem:[%s5209_s16 + $0x54] sm:$0xe] }
  0xfd   : > { %3172 = vmatmul.mubr.bf16.gmra.mrb[60].mxu0 %v5961_v59  ;;  %v1907_v24 = vrot.slane %v1906_v12, 4  ;;  %v4168_v46 = vcombine.low %v1948_v18, %v1951_v49  ;;  %v1955_v6 = vsel %vm5248_vm13, %v4097_v5, %v1954_v51  ;;  %v1956_v45 = vrot.slane %v1954_v51, 4  ;;  %v4095_v5 = vld [vmem:[%s5209_s16 + $0x6c] sm:$0xe] }
  0xfe   : > { %v1962_v30 = vsel %vm5248_vm13, %v4098_v7, %v1961_v32  ;;  %v1963_v2 = vrot.slane %v1961_v32, 4  ;;  %v1968_v27 = vrot.slane %v5769_v22, 5  ;;  %v4159_v28 = vcombine.low %v5924_v39, %v5935_v41 }
  0xff   : > { %v1912_v54 = vsel %vm5238_vm12, %v1907_v24, %v1911_v58  ;;  %4598 = vmatprep.mubr.bf16.mxu0 %v4168_v46  ;;  %v6258_v38 = vrot.slane %v5686_v48, 5  ;;  %v4099_v23 = vrot.slane %v4091_v4, 9  ;;  %v1971_v1 = vrot.slane %v5777_v37, 5 }
 0x100   : > { %v4167_v0 = vcombine.low %v1902_v15, %v1912_v54  ;;  %v1965_v9 = vsel %vm5248_vm13, %v1963_v2, %v1964_v35  ;;  %v1970_v56 = vrot.slane %v1968_v27, 4  ;;  %v1975_v39 = vrot.slane %v5813_v33, 5 }
 0x101   : > { %v1958_v43 = vsel %vm5248_vm13, %v1956_v45, %v6258_v38  ;;  %v4170_v22 = vcombine.low %v1962_v30, %v1965_v9  ;;  %v4100_v48 = vrot.slane %v4092_v13, 9  ;;  %v1978_v57 = vrot.slane %v5822_v55, 5 }
 0x102   : > { %v4169_v36 = vcombine.low %v1955_v6, %v1958_v43  ;;  %3268 = vmatprep.mubr.bf16.mxu1 %v4167_v0  ;;  %v1977_v52 = vrot.slane %v1975_v39, 4  ;;  %v1969_v60 = vsel %vm5248_vm13, %v4099_v23, %v1968_v27  ;;  %v1972_v16 = vsel %vm5248_vm13, %v1970_v56, %v1971_v1 }
 0x103   : > { %3269 = vmatmul.mubr.bf16.gmra.mrb[60].mxu1 %v4159_v28  ;;  %v1982_v47 = vrot.slane %v5855_v40, 5  ;;  %v1976_v37 = vsel %vm5248_vm13, %v4100_v48, %v1975_v39  ;;  %v1989_v55 = vrot.slane %v5893_v14, 5  ;;  %v4171_v61 = vcombine.low %v1969_v60, %v1972_v16 }
 0x104   : > { %v1979_v33 = vsel %vm5248_vm13, %v1977_v52, %v1978_v57  ;;  %v4101_v25 = vrot.slane %v4093_v53, 9  ;;  %v1985_v58 = vrot.slane %v5863_v10, 5  ;;  %v4102_v29 = vrot.slane %v4094_v21, 9 }
 0x105   : > { %4599 = vmatmul.mubr.bf16.vlgmr.msra.gmra.mrb[64].mxu0 %v4169_v36  ;;  %v4172_v44 = vcombine.low %v1976_v37, %v1979_v33  ;;  %v1984_v26 = vrot.slane %v1982_v47, 4  ;;  %v1991_v8 = vrot.slane %v1989_v55, 4  ;;  %v1992_v40 = vrot.slane %v5902_v50, 5 }
 0x106   : > { %4602 = vmatprep.mubr.bf16.mxu0 %v4170_v22  ;;  %v1983_v18 = vsel %vm5248_vm13, %v4101_v25, %v1982_v47  ;;  %v1996_v11 = vrot.slane %v5935_v41, 5  ;;  %v1990_v12 = vsel %vm5248_vm13, %v4102_v29, %v1989_v55  ;;  %v4103_v50 = vrot.slane %v4095_v5, 9 }
 0x107   : > { %v1986_v14 = vsel %vm5248_vm13, %v1984_v26, %v1985_v58  ;;  %v1993_v10 = vsel %vm5248_vm13, %v1991_v8, %v1992_v40  ;;  %v1999_v49 = vrot.slane %v5943_v42, 5 }
 0x108   : > { %v4173_v51 = vcombine.low %v1983_v18, %v1986_v14  ;;  %v4174_v7 = vcombine.low %v1990_v12, %v1993_v10  ;;  %v1998_v15 = vrot.slane %v1996_v11, 4  ;;  %v1997_v32 = vsel %vm5248_vm13, %v4103_v50, %v1996_v11 }
 0x10a   : > { %v2000_v41 = vsel %vm5248_vm13, %v1998_v15, %v1999_v49 }
 0x10b   : > { %v4175_v35 = vcombine.low %v1997_v32, %v2000_v41 }
 0x10d   : > { %4603 = vmatmul.mubr.bf16.gmra.mrb[68].mxu0 %v4171_v61 }
 0x10e   : > { %4606 = vmatprep.mubr.bf16.mxu0 %v4172_v44 }
 0x115   : > { %4607 = vmatmul.mubr.bf16.gmra.mrb[72].mxu0 %v4173_v51 }
 0x116   : > { %4610 = vmatprep.mubr.bf16.mxu0 %v4174_v7 }
 0x11d   : > { %4611 = vmatmul.mubr.bf16.gmra.mrb[76].mxu0 %v4175_v35 }
 0x157   : > { %v4310_v24 = vpop.f32.mrb[0].mxu0 }
 0x158   : > { %v4374_v46 = vpop.f32.mrb[0].mxu1  ;;  %v4311_v6 = vpop.f32.mrb[1].mxu0 }
 0x159   : > { %v4312_v45 = vadd.f32 %v4311_v6, %v4310_v24  ;;  %v4375_v4 = vpop.f32.mrb[1].mxu1  ;;  %v4313_v30 = vpop.f32.mrb[2].mxu0 }
 0x15a   : > { %v4376_v2 = vadd.f32 %v4375_v4, %v4374_v46  ;;  %v4377_v27 = vpop.f32.mrb[2].mxu1  ;;  %v4314_v54 = vpop.f32.mrb[3].mxu0 }
 0x15b   : > { %v4315_v42 = vadd.f32 %v4314_v54, %v4313_v30  ;;  %v4378_v28 = vpop.f32.mrb[3].mxu1 }
 0x15c   : > { %v6022_v38 = vadd.f32 %v4376_v2, %v4312_v45  ;;  %v4379_v43 = vadd.f32 %v4378_v28, %v4377_v27 }
 0x15e   : > { %v6024_v13 = vadd.f32 %v4379_v43, %v4315_v42 }
 0x15f   : > { %v4316_v17 = vpop.f32.mrb[4].mxu0 }
 0x160   : > { %v4380_v0 = vpop.f32.mrb[4].mxu1  ;;  %v4317_v36 = vpop.f32.mrb[5].mxu0 }
 0x161   : > { %v4381_v9 = vpop.f32.mrb[5].mxu1  ;;  %v4318_v23 = vadd.f32 %v4317_v36, %v4316_v17  ;;  %v4319_v56 = vpop.f32.mrb[6].mxu0 }
 0x162   : > { %v4382_v22 = vadd.f32 %v4381_v9, %v4380_v0  ;;  %v4383_v1 = vpop.f32.mrb[6].mxu1  ;;  %v4320_v39 = vpop.f32.mrb[7].mxu0 }
 0x163   : > { %v4384_v48 = vpop.f32.mrb[7].mxu1  ;;  %v4321_v52 = vadd.f32 %v4320_v39, %v4319_v56 }
 0x164   : > { %v6026_v57 = vadd.f32 %v4382_v22, %v4318_v23  ;;  %v4385_v60 = vadd.f32 %v4384_v48, %v4383_v1 }
 0x166   : > { %v6028_v16 = vadd.f32 %v4385_v60, %v4321_v52 }
 0x167   : > { %v4322_v47 = vpop.f32.mrb[8].mxu0 }
 0x168   : > { %v4386_v37 = vpop.f32.mrb[8].mxu1  ;;  %v4323_v33 = vpop.f32.mrb[9].mxu0 }
 0x169   : > { %v4387_v53 = vpop.f32.mrb[9].mxu1  ;;  %v4324_v55 = vadd.f32 %v4323_v33, %v4322_v47  ;;  %v4325_v61 = vpop.f32.mrb[10].mxu0 }
 0x16a   : > { %v4388_v21 = vadd.f32 %v4387_v53, %v4386_v37  ;;  %v4389_v44 = vpop.f32.mrb[10].mxu1  ;;  %v4326_v25 = vpop.f32.mrb[11].mxu0 }
 0x16b   : > { %v4390_v26 = vpop.f32.mrb[11].mxu1  ;;  %v4327_v29 = vadd.f32 %v4326_v25, %v4325_v61 }
 0x16c   : > { %v6030_v58 = vadd.f32 %v4388_v21, %v4324_v55  ;;  %v4391_v8 = vadd.f32 %v4390_v26, %v4389_v44 }
 0x16e   : > { %v6032_v40 = vadd.f32 %v4391_v8, %v4327_v29 }
 0x16f   : > { %v4328_v18 = vpop.f32.mrb[12].mxu0 }
 0x170   : > { %v4392_v14 = vpop.f32.mrb[12].mxu1  ;;  %v4329_v11 = vpop.f32.mrb[13].mxu0 }
 0x171   : > { %v4393_v12 = vpop.f32.mrb[13].mxu1  ;;  %v4330_v10 = vadd.f32 %v4329_v11, %v4328_v18  ;;  %v4331_v51 = vpop.f32.mrb[14].mxu0 }
 0x172   : > { %v4394_v5 = vadd.f32 %v4393_v12, %v4392_v14  ;;  %v4395_v7 = vpop.f32.mrb[14].mxu1  ;;  %v4332_v50 = vpop.f32.mrb[15].mxu0 }
 0x173   : > { %v4396_v15 = vpop.f32.mrb[15].mxu1  ;;  %v4333_v32 = vadd.f32 %v4332_v50, %v4331_v51 }
 0x174   : > { %v6034_v49 = vadd.f32 %v4394_v5, %v4330_v10  ;;  %v4397_v41 = vadd.f32 %v4396_v15, %v4395_v7 }
 0x176   : > { %v6036_v35 = vadd.f32 %v4397_v41, %v4333_v32 }
 0x177   : > { %v4334_v24 = vpop.f32.mrb[16].mxu0 }
 0x178   : > { %v4398_v46 = vpop.f32.mrb[16].mxu1  ;;  %v4335_v6 = vpop.f32.mrb[17].mxu0 }
 0x179   : > { %v4399_v45 = vpop.f32.mrb[17].mxu1  ;;  %v4336_v4 = vadd.f32 %v4335_v6, %v4334_v24  ;;  %v4337_v2 = vpop.f32.mrb[18].mxu0 }
 0x17a   : > { %v4400_v30 = vadd.f32 %v4399_v45, %v4398_v46  ;;  %v4401_v27 = vpop.f32.mrb[18].mxu1  ;;  %v4338_v54 = vpop.f32.mrb[19].mxu0 }
 0x17b   : > { %v4402_v42 = vpop.f32.mrb[19].mxu1  ;;  %v4339_v43 = vadd.f32 %v4338_v54, %v4337_v2 }
 0x17c   : > { %v6038_v28 = vadd.f32 %v4400_v30, %v4336_v4  ;;  %v4403_v17 = vadd.f32 %v4402_v42, %v4401_v27 }
 0x17e   : > { %v6040_v0 = vadd.f32 %v4403_v17, %v4339_v43 }
 0x17f   : > { %v4340_v36 = vpop.f32.mrb[20].mxu0 }
 0x180   : > { %v4404_v9 = vpop.f32.mrb[20].mxu1  ;;  %v4341_v23 = vpop.f32.mrb[21].mxu0 }
 0x181   : > { %v4405_v22 = vpop.f32.mrb[21].mxu1  ;;  %v4342_v56 = vadd.f32 %v4341_v23, %v4340_v36  ;;  %v4343_v39 = vpop.f32.mrb[22].mxu0 }
 0x182   : > { %v4406_v1 = vadd.f32 %v4405_v22, %v4404_v9  ;;  %v4407_v48 = vpop.f32.mrb[22].mxu1  ;;  %v4344_v52 = vpop.f32.mrb[23].mxu0 }
 0x183   : > { %v4408_v60 = vpop.f32.mrb[23].mxu1  ;;  %v4345_v37 = vadd.f32 %v4344_v52, %v4343_v39 }
 0x184   : > { %v6042_v47 = vadd.f32 %v4406_v1, %v4342_v56  ;;  %v4409_v33 = vadd.f32 %v4408_v60, %v4407_v48 }
 0x186   : > { %v6044_v53 = vadd.f32 %v4409_v33, %v4345_v37 }
 0x187   : > { %v4346_v55 = vpop.f32.mrb[24].mxu0 }
 0x188   : > { %v4410_v21 = vpop.f32.mrb[24].mxu1  ;;  %v4347_v61 = vpop.f32.mrb[25].mxu0 }
 0x189   : > { %v4411_v44 = vpop.f32.mrb[25].mxu1  ;;  %v4348_v25 = vadd.f32 %v4347_v61, %v4346_v55  ;;  %v4349_v29 = vpop.f32.mrb[26].mxu0 }
 0x18a   : > { %v4412_v26 = vadd.f32 %v4411_v44, %v4410_v21  ;;  %v4413_v8 = vpop.f32.mrb[26].mxu1  ;;  %v4350_v18 = vpop.f32.mrb[27].mxu0 }
 0x18b   : > { %v4414_v14 = vpop.f32.mrb[27].mxu1  ;;  %v4351_v12 = vadd.f32 %v4350_v18, %v4349_v29 }
 0x18c   : > { %v6046_v11 = vadd.f32 %v4412_v26, %v4348_v25  ;;  %v4415_v10 = vadd.f32 %v4414_v14, %v4413_v8 }
 0x18e   : > { %v6048_v5 = vadd.f32 %v4415_v10, %v4351_v12 }
 0x18f   : > { %v4352_v7 = vpop.f32.mrb[28].mxu0 }
 0x190   : > { %v4416_v51 = vpop.f32.mrb[28].mxu1  ;;  %v4353_v15 = vpop.f32.mrb[29].mxu0 }
 0x191   : > { %v4417_v50 = vpop.f32.mrb[29].mxu1  ;;  %v4354_v24 = vadd.f32 %v4353_v15, %v4352_v7  ;;  %v4355_v46 = vpop.f32.mrb[30].mxu0 }
 0x192   : > { %v4418_v32 = vadd.f32 %v4417_v50, %v4416_v51  ;;  %v4419_v41 = vpop.f32.mrb[30].mxu1  ;;  %v4356_v45 = vpop.f32.mrb[31].mxu0 }
 0x193   : > { %v4420_v6 = vpop.f32.mrb[31].mxu1  ;;  %v4357_v2 = vadd.f32 %v4356_v45, %v4355_v46 }
 0x194   : > { %v4421_v4 = vadd.f32 %v4420_v6, %v4419_v41  ;;  %v6050_v30 = vadd.f32 %v4418_v32, %v4354_v24 }
 0x196   : > { %v6052_v27 = vadd.f32 %v4421_v4, %v4357_v2 }
 0x197   : > { %v4438_v54 = vpop.f32.mrb[32].mxu0 }
 0x198   : > { %v4439_v42 = vpop.f32.mrb[33].mxu0 }
 0x199   : > { %v4440_v43 = vadd.f32 %v4439_v42, %v4438_v54  ;;  %v4441_v17 = vpop.f32.mrb[34].mxu0  ;;  %v4502_v22 = vpop.f32.mrb[32].mxu1 }
 0x19a   : > { %v4442_v36 = vpop.f32.mrb[35].mxu0  ;;  %v4503_v1 = vpop.f32.mrb[33].mxu1 }
 0x19b   : > { %v3118_v9 = vadd.f32 %v4440_v43, %v6022_v38  ;;  %v4443_v23 = vadd.f32 %v4442_v36, %v4441_v17  ;;  %v4504_v39 = vadd.f32 %v4503_v1, %v4502_v22  ;;  %v4505_v48 = vpop.f32.mrb[34].mxu1 }
 0x19c   : > { %v4506_v52 = vpop.f32.mrb[35].mxu1 }
 0x19d   : > { %v3121_v56 = vadd.f32 %v4443_v23, %v6024_v13  ;;  %v4507_v37 = vadd.f32 %v4506_v52, %v4505_v48  ;;  %v6056_v55 = vadd.f32 %v4504_v39, %v3118_v9 }
 0x19f   : > { %v4444_v60 = vpop.f32.mrb[36].mxu0  ;;  %v6058_v25 = vadd.f32 %v4507_v37, %v3121_v56 }
 0x1a0   : > { %v4445_v33 = vpop.f32.mrb[37].mxu0 }
 0x1a1   : > { %v4446_v21 = vadd.f32 %v4445_v33, %v4444_v60  ;;  %v4447_v61 = vpop.f32.mrb[38].mxu0 }
 0x1a2   : > { %v4448_v44 = vpop.f32.mrb[39].mxu0  ;;  %v4508_v13 = vpop.f32.mrb[36].mxu1 }
 0x1a3   : > { %v3126_v38 = vadd.f32 %v4446_v21, %v6026_v57  ;;  %v4449_v26 = vadd.f32 %v4448_v44, %v4447_v61  ;;  %v4509_v8 = vpop.f32.mrb[37].mxu1 }
 0x1a4   : > { %v4510_v18 = vadd.f32 %v4509_v8, %v4508_v13  ;;  %v4511_v14 = vpop.f32.mrb[38].mxu1 }
 0x1a5   : > { %v3129_v29 = vadd.f32 %v4449_v26, %v6028_v16  ;;  %v4512_v12 = vpop.f32.mrb[39].mxu1 }
 0x1a6   : > { %v4513_v51 = vadd.f32 %v4512_v12, %v4511_v14  ;;  %v6062_v50 = vadd.f32 %v4510_v18, %v3126_v38 }
 0x1a7   : > { %v4450_v10 = vpop.f32.mrb[40].mxu0 }
 0x1a8   : > { %v4451_v7 = vpop.f32.mrb[41].mxu0  ;;  %v6064_v24 = vadd.f32 %v4513_v51, %v3129_v29 }
 0x1a9   : > { %v4452_v15 = vadd.f32 %v4451_v7, %v4450_v10  ;;  %v4453_v32 = vpop.f32.mrb[42].mxu0 }
 0x1aa   : > { %v4454_v41 = vpop.f32.mrb[43].mxu0 }
 0x1ab   : > { %v3134_v57 = vadd.f32 %v4452_v15, %v6030_v58  ;;  %v4455_v46 = vadd.f32 %v4454_v41, %v4453_v32  ;;  %v4514_v6 = vpop.f32.mrb[40].mxu1 }
 0x1ac   : > { %v4515_v45 = vpop.f32.mrb[41].mxu1 }
 0x1ad   : > { %v3137_v16 = vadd.f32 %v4455_v46, %v6032_v40  ;;  %v4516_v4 = vadd.f32 %v4515_v45, %v4514_v6  ;;  %v4517_v2 = vpop.f32.mrb[42].mxu1 }
 0x1ae   : > { %v4518_v54 = vpop.f32.mrb[43].mxu1 }
 0x1af   : > { %v4456_v42 = vpop.f32.mrb[44].mxu0  ;;  %v4519_v43 = vadd.f32 %v4518_v54, %v4517_v2  ;;  %v6068_v36 = vadd.f32 %v4516_v4, %v3134_v57 }
 0x1b0   : > { %v4457_v17 = vpop.f32.mrb[45].mxu0 }
 0x1b1   : > { %v4458_v9 = vadd.f32 %v4457_v17, %v4456_v42  ;;  %v4459_v23 = vpop.f32.mrb[46].mxu0  ;;  %v6070_v56 = vadd.f32 %v4519_v43, %v3137_v16 }
 0x1b2   : > { %v4460_v22 = vpop.f32.mrb[47].mxu0 }
 0x1b3   : > { %v3142_v58 = vadd.f32 %v4458_v9, %v6034_v49  ;;  %v4461_v1 = vadd.f32 %v4460_v22, %v4459_v23  ;;  %v4520_v40 = vpop.f32.mrb[44].mxu1 }
 0x1b4   : > { %v4521_v48 = vpop.f32.mrb[45].mxu1 }
 0x1b5   : > { %v3145_v39 = vadd.f32 %v4461_v1, %v6036_v35  ;;  %v4522_v52 = vadd.f32 %v4521_v48, %v4520_v40  ;;  %v4523_v60 = vpop.f32.mrb[46].mxu1 }
 0x1b6   : > { %v4524_v37 = vpop.f32.mrb[47].mxu1 }
 0x1b7   : > { %v4462_v33 = vpop.f32.mrb[48].mxu0  ;;  %v4525_v21 = vadd.f32 %v4524_v37, %v4523_v60  ;;  %v6074_v44 = vadd.f32 %v4522_v52, %v3142_v58 }
 0x1b8   : > { %v4463_v61 = vpop.f32.mrb[49].mxu0 }
 0x1b9   : > { %v4464_v38 = vadd.f32 %v4463_v61, %v4462_v33  ;;  %v4465_v26 = vpop.f32.mrb[50].mxu0  ;;  %v6076_v13 = vadd.f32 %v4525_v21, %v3145_v39 }
 0x1ba   : > { %v4466_v29 = vpop.f32.mrb[51].mxu0 }
 0x1bb   : > { %v3150_v49 = vadd.f32 %v4464_v38, %v6038_v28  ;;  %v4467_v8 = vadd.f32 %v4466_v29, %v4465_v26  ;;  %v4526_v18 = vpop.f32.mrb[48].mxu1 }
 0x1bc   : > { %v4527_v14 = vpop.f32.mrb[49].mxu1 }
 0x1bd   : > { %v3153_v35 = vadd.f32 %v4467_v8, %v6040_v0  ;;  %v4528_v12 = vadd.f32 %v4527_v14, %v4526_v18  ;;  %v4529_v10 = vpop.f32.mrb[50].mxu1 }
 0x1be   : > { %v4530_v51 = vpop.f32.mrb[51].mxu1 }
 0x1bf   : > { %v4468_v7 = vpop.f32.mrb[52].mxu0  ;;  %v4531_v15 = vadd.f32 %v4530_v51, %v4529_v10  ;;  %v6080_v41 = vadd.f32 %v4528_v12, %v3150_v49 }
 0x1c0   : > { %v4469_v32 = vpop.f32.mrb[53].mxu0 }
 0x1c1   : > { %v4470_v57 = vadd.f32 %v4469_v32, %v4468_v7  ;;  %v4471_v46 = vpop.f32.mrb[54].mxu0  ;;  %v6082_v16 = vadd.f32 %v4531_v15, %v3153_v35 }
 0x1c2   : > { %v4472_v6 = vpop.f32.mrb[55].mxu0 }
 0x1c3   : > { %v3158_v28 = vadd.f32 %v4470_v57, %v6042_v47  ;;  %v4473_v45 = vadd.f32 %v4472_v6, %v4471_v46 }
 0x1c4   : > { %v4532_v0 = vpop.f32.mrb[52].mxu1 }
 0x1c5   : > { %v3161_v4 = vadd.f32 %v4473_v45, %v6044_v53  ;;  %v4533_v2 = vpop.f32.mrb[53].mxu1 }
 0x1c6   : > { %v4534_v54 = vadd.f32 %v4533_v2, %v4532_v0  ;;  %v4535_v42 = vpop.f32.mrb[54].mxu1 }
 0x1c7   : > { %v4536_v43 = vpop.f32.mrb[55].mxu1  ;;  %v4474_v17 = vpop.f32.mrb[56].mxu0 }
 0x1c8   : > { %v4537_v9 = vadd.f32 %v4536_v43, %v4535_v42  ;;  %v4475_v23 = vpop.f32.mrb[57].mxu0  ;;  %v3255_v22 = vadd.f32 %v4534_v54, %v3158_v28 }
 0x1c9   : > { %v4476_v58 = vadd.f32 %v4475_v23, %v4474_v17  ;;  %v4477_v1 = vpop.f32.mrb[58].mxu0 }
 0x1ca   : > { %v4478_v39 = vpop.f32.mrb[59].mxu0  ;;  %v3258_v40 = vadd.f32 %v4537_v9, %v3161_v4 }
 0x1cb   : > { %v3166_v48 = vadd.f32 %v4476_v58, %v6046_v11  ;;  %v4479_v52 = vadd.f32 %v4478_v39, %v4477_v1 }
 0x1cc   : > { %v4538_v47 = vpop.f32.mrb[56].mxu1 }
 0x1cd   : > { %v3169_v60 = vadd.f32 %v4479_v52, %v6048_v5  ;;  %v4539_v53 = vpop.f32.mrb[57].mxu1 }
 0x1ce   : > { %v4540_v37 = vadd.f32 %v4539_v53, %v4538_v47  ;;  %v4541_v33 = vpop.f32.mrb[58].mxu1 }
 0x1cf   : > { %v4542_v21 = vpop.f32.mrb[59].mxu1 }
 0x1d0   : > { %v4480_v61 = vpop.f32.mrb[60].mxu0  ;;  %v4543_v38 = vadd.f32 %v4542_v21, %v4541_v33  ;;  %v3263_v29 = vadd.f32 %v4540_v37, %v3166_v48 }
 0x1d1   : > { %v4481_v26 = vpop.f32.mrb[61].mxu0 }
 0x1d2   : > { %v4482_v49 = vadd.f32 %v4481_v26, %v4480_v61  ;;  %v4483_v8 = vpop.f32.mrb[62].mxu0  ;;  %v3266_v35 = vadd.f32 %v4543_v38, %v3169_v60 }
 0x1d3   : > { %v4484_v18 = vpop.f32.mrb[63].mxu0 }
 0x1d4   : > { %v3174_v14 = vadd.f32 %v4482_v49, %v6050_v30  ;;  %v4485_v11 = vadd.f32 %v4484_v18, %v4483_v8 }
 0x1d6   : > { %v3177_v12 = vadd.f32 %v4485_v11, %v6052_v27  ;;  %v4544_v5 = vpop.f32.mrb[60].mxu1 }
 0x1d7   : > { %v4545_v10 = vpop.f32.mrb[61].mxu1 }
 0x1d8   : > { %v4600_v51 = vpop.f32.mrb[64].mxu0  ;;  %v4546_v7 = vadd.f32 %v4545_v10, %v4544_v5  ;;  %v4547_v15 = vpop.f32.mrb[62].mxu1 }
 0x1d9   : > { %v3320_v32 = vadd.f32 %v4600_v51, %v6062_v50  ;;  %v3311_v57 = vpop.f32.mrb[65].mxu0  ;;  %v4548_v46 = vpop.f32.mrb[63].mxu1 }
 0x1da   : > { %v3312_v6 = vadd.f32 %v3311_v57, %v6056_v55  ;;  %v4601_v28 = vpop.f32.mrb[66].mxu0  ;;  %v4549_v30 = vadd.f32 %v4548_v46, %v4547_v15  ;;  %v3271_v4 = vadd.f32 %v4546_v7, %v3174_v14 }
 0x1db   : > { %3376 = vst [vmem:[%s4942_s14 + $0x10] sm:$0xff] %v3320_v32  ;;  %v3323_v27 = vadd.f32 %v4601_v28, %v6064_v24  ;;  %v3314_v45 = vpop.f32.mrb[67].mxu0 }
 0x1dc   : > { %3374 = vst [vmem:[%s4942_s14] sm:$0xff] %v3312_v6  ;;  %v3315_v0 = vadd.f32 %v3314_v45, %v6058_v25  ;;  %v3274_v50 = vadd.f32 %v4549_v30, %v3177_v12 }
 0x1dd   : > { %3377 = vst [vmem:[%s4942_s14 + $0x18] sm:$0xff] %v3323_v27 }
 0x1de   : > { %3375 = vst [vmem:[%s4942_s14 + $0x8] sm:$0xff] %v3315_v0 }
 0x1e0   : > { %v4604_v2 = vpop.f32.mrb[68].mxu0 }
 0x1e1   : > { %v6099_v55 = vadd.f32 %v4604_v2, %v6074_v44  ;;  %v3327_v54 = vpop.f32.mrb[69].mxu0 }
 0x1e2   : > { %v3328_v42 = vadd.f32 %v3327_v54, %v6068_v36  ;;  %v4605_v24 = vpop.f32.mrb[70].mxu0 }
 0x1e3   : > { %3380 = vst [vmem:[%s4942_s14 + $0x30] sm:$0xff] %v6099_v55  ;;  %v3339_v43 = vadd.f32 %v4605_v24, %v6076_v13  ;;  %v3330_v17 = vpop.f32.mrb[71].mxu0 }
 0x1e4   : > { %3378 = vst [vmem:[%s4942_s14 + $0x20] sm:$0xff] %v3328_v42  ;;  %v3331_v25 = vadd.f32 %v3330_v17, %v6070_v56 }
 0x1e5   : > { %3381 = vst [vmem:[%s4942_s14 + $0x38] sm:$0xff] %v3339_v43 }
 0x1e6   : > { %3379 = vst [vmem:[%s4942_s14 + $0x28] sm:$0xff] %v3331_v25 }
 0x1e8   : > { %v4608_v44 = vpop.f32.mrb[72].mxu0 }
 0x1e9   : > { %v6109_v9 = vadd.f32 %v4608_v44, %v3255_v22  ;;  %v3343_v23 = vpop.f32.mrb[73].mxu0 }
 0x1ea   : > { %v3344_v36 = vadd.f32 %v3343_v23, %v6080_v41  ;;  %v4609_v58 = vpop.f32.mrb[74].mxu0 }
 0x1eb   : > { %3384 = vst [vmem:[%s4942_s14 + $0x50] sm:$0xff] %v6109_v9  ;;  %v6114_v13 = vadd.f32 %v4609_v58, %v3258_v40  ;;  %v3346_v1 = vpop.f32.mrb[75].mxu0 }
 0x1ec   : > { %3382 = vst [vmem:[%s4942_s14 + $0x40] sm:$0xff] %v3344_v36  ;;  %v3347_v56 = vadd.f32 %v3346_v1, %v6082_v16  ;;  %v4834_v16 = vmov (!%p3976_p7), 0.0  }
 0x1ed   : > { %3385 = vst [vmem:[%s4942_s14 + $0x58] sm:$0xff] %v6114_v13  ;;  %3393 = vst [vmem:[%s4932_s28] sm:$0x1] (!%p3976_p7), %v4834_v16 }
 0x1ee   : > { %3383 = vst [vmem:[%s4942_s14 + $0x48] sm:$0xff] %v3347_v56  ;;  %3394 = vst [vmem:[%s4937_s3] sm:$0x1] (!%p3976_p7), %v4834_v16 }
 0x1f0   : > { %v4612_v22 = vpop.f32.mrb[76].mxu0  ;;  %3392 = sbr.rel (%p3976_p7) target bundleno = 503 (0x1f7), region = 48 }
 0x1f1   : > { %v6121_v39 = vadd.f32 %v4612_v22, %v3271_v4  ;;  %v3359_v48 = vpop.f32.mrb[77].mxu0 }
 0x1f2   : > { %v6123_v41 = vadd.f32 %v3359_v48, %v3263_v29  ;;  %v4613_v52 = vpop.f32.mrb[78].mxu0 }
 0x1f3   : > { %3388 = vst [vmem:[%s4942_s14 + $0x70] sm:$0xff] %v6121_v39  ;;  %v6127_v40 = vadd.f32 %v4613_v52, %v3274_v50  ;;  %v3362_v47 = vpop.f32.mrb[79].mxu0 }
 0x1f4   : > { %3386 = vst [vmem:[%s4942_s14 + $0x60] sm:$0xff] %v6123_v41  ;;  %v3363_v60 = vadd.f32 %v3362_v47, %v3266_v35 }
 0x1f5   : > { %3389 = vst [vmem:[%s4942_s14 + $0x78] sm:$0xff] %v6127_v40 }
 0x1f6   : > { %3387 = vst [vmem:[%s4942_s14 + $0x68] sm:$0xff] %v3363_v60 }
 0x1f7 PF: > { %v3396_v53 = vadd.f32 %v3315_v0, %v3312_v6  ;;  %v3420_v37 = vmul.f32 %v3312_v6, %v3312_v6  ;;  %v3421_v33 = vmul.f32 %v3315_v0, %v3315_v0  ;;  %4630 = vmatprep.mubr.bf16.mxu1 %v5656_v34  ;;  %v4785_v21 = vld [vmem:[%s6235_s4] sm:$0xff]   ;;  %v3422_v38 = vmul.f32 %v3320_v32, %v3320_v32  ;;  %v4786_v26 = vld [vmem:[%s6235_s4 + $0x8] sm:$0xff]   ;;  %v4787_v34 = vld [vmem:[%s6235_s4 + $0x10] sm:$0xff]  }
 0x1f8   : > { %4614 = vmatprep.subr.bf16.mxu1 %v4785_v21  ;;  %v3423_v49 = vmul.f32 %v3323_v27, %v3323_v27  ;;  %v3424_v35 = vmul.f32 %v3328_v42, %v3328_v42  ;;  %v3425_v12 = vmul.f32 %v3331_v25, %v3331_v25  ;;  %v4788_v10 = vld [vmem:[%s6235_s4 + $0x18] sm:$0xff]   ;;  %v3426_v7 = vmul.f32 %v6099_v55, %v6099_v55  ;;  %v4789_v6 = vld [vmem:[%s6235_s4 + $0x20] sm:$0xff]   ;;  %v4790_v50 = vld [vmem:[%s6235_s4 + $0x28] sm:$0xff]  }
 0x1f9   : > { %v3397_v61 = vadd.f32 %v3396_v53, %v3320_v32  ;;  %v3436_v8 = vadd.f32 %v3421_v33, %v3420_v37  ;;  %4615 = vmatpush3.bf16.msra.mxu1 %v4785_v21  ;;  %v3427_v57 = vmul.f32 %v3339_v43, %v3339_v43  ;;  %v3428_v30 = vmul.f32 %v3344_v36, %v3344_v36  ;;  %v4791_v17 = vld [vmem:[%s6235_s4 + $0x30] sm:$0xff]  }
 0x1fa   : > { %4616 = vmatprep.subr.bf16.mxu1 %v4786_v26  ;;  %v3429_v4 = vmul.f32 %v3347_v56, %v3347_v56  ;;  %v3431_v24 = vmul.f32 %v6114_v13, %v6114_v13  ;;  %v3432_v44 = vmul.f32 %v6123_v41, %v6123_v41 }
 0x1fb   : > { %v3398_v29 = vadd.f32 %v3397_v61, %v3323_v27  ;;  %v3437_v14 = vadd.f32 %v3436_v8, %v3422_v38  ;;  %v3395_v38 = vld [vmem:[%s4932_s28] sm:$0x1] }
 0x1fd   : > { %v3399_v18 = vadd.f32 %v3398_v29, %v3328_v42  ;;  %v3438_v5 = vadd.f32 %v3437_v14, %v3423_v49  ;;  %4617 = vmatpush3.bf16.msra.mxu1 %v4786_v26 }
 0x1fe   : > { %4618 = vmatprep.subr.bf16.mxu1 %v4787_v34 }
 0x1ff   : > { %v3400_v11 = vadd.f32 %v3399_v18, %v3331_v25  ;;  %v3439_v15 = vadd.f32 %v3438_v5, %v3424_v35 }
 0x201   : > { %v3401_v51 = vadd.f32 %v3400_v11, %v6099_v55  ;;  %v3440_v46 = vadd.f32 %v3439_v15, %v3425_v12  ;;  %4619 = vmatpush3.bf16.msra.mxu1 %v4787_v34  ;;  %v3430_v55 = vmul.f32 %v6109_v9, %v6109_v9  ;;  %v3419_v34 = vld [vmem:[%s4937_s3] sm:$0x1] }
 0x202   : > { %4620 = vmatprep.subr.bf16.mxu1 %v4788_v10 }
 0x203   : > { %v3402_v32 = vadd.f32 %v3401_v51, %v3339_v43  ;;  %v3441_v27 = vadd.f32 %v3440_v46, %v3426_v7 }
 0x205   : > { %v3403_v28 = vadd.f32 %v3402_v32, %v3344_v36  ;;  %v3442_v0 = vadd.f32 %v3441_v27, %v3427_v57  ;;  %4621 = vmatpush3.bf16.msra.mxu1 %v4788_v10  ;;  %v3433_v36 = vmul.f32 %v3363_v60, %v3363_v60  ;;  %v4835_v57 = vmov (!%p3976_p7), 0.0  }
 0x206   : > { %4622 = vmatprep.subr.bf16.mxu1 %v4789_v6  ;;  %3639 = vst [vmem:[%s4952_s24] sm:$0x1] (!%p3976_p7), %v4835_v57  ;;  %3640 = vst [vmem:[%s4957_s27] sm:$0x1] (!%p3976_p7), %v4835_v57 }
 0x207   : > { %v3404_v45 = vadd.f32 %v3403_v28, %v3347_v56  ;;  %v3443_v54 = vadd.f32 %v3442_v0, %v3428_v30  ;;  %v3434_v56 = vmul.f32 %v6121_v39, %v6121_v39 }
 0x209   : > { %v3405_v2 = vadd.f32 %v3404_v45, %v6109_v9  ;;  %v3444_v43 = vadd.f32 %v3443_v54, %v3429_v4  ;;  %4623 = vmatpush3.bf16.msra.mxu1 %v4789_v6 }
 0x20a   : > { %4624 = vmatprep.subr.bf16.mxu1 %v4790_v50 }
 0x20b   : > { %v3406_v42 = vadd.f32 %v3405_v2, %v6114_v13  ;;  %v3445_v23 = vadd.f32 %v3444_v43, %v3430_v55  ;;  %v4792_v13 = vld [vmem:[%s6235_s4 + $0x38] sm:$0xff]  }
 0x20d   : > { %v3407_v25 = vadd.f32 %v3406_v42, %v6123_v41  ;;  %v3446_v58 = vadd.f32 %v3445_v23, %v3431_v24  ;;  %4625 = vmatpush3.bf16.msra.mxu1 %v4790_v50  ;;  %v3435_v41 = vmul.f32 %v6127_v40, %v6127_v40 }
 0x20e   : > { %4626 = vmatprep.subr.bf16.mxu1 %v4791_v17 }
 0x20f   : > { %v3408_v9 = vadd.f32 %v3407_v25, %v3363_v60  ;;  %v3447_v22 = vadd.f32 %v3446_v58, %v3432_v44 }
 0x211   : > { %v3409_v1 = vadd.f32 %v3408_v9, %v6121_v39  ;;  %v3448_v52 = vadd.f32 %v3447_v22, %v3433_v36  ;;  %4627 = vmatpush3.bf16.msra.mxu1 %v4791_v17 }
 0x212   : > { %4628 = vmatprep.subr.bf16.mxu1 %v4792_v13 }
 0x213   : > { %v3410_v48 = vadd.f32 %v3409_v1, %v6127_v40  ;;  %v3449_v60 = vadd.f32 %v3448_v52, %v3434_v56 }
 0x215   : > { %v3411_v47 = vrot.slane %v3410_v48, 4  ;;  %v3450_v53 = vadd.f32 %v3449_v60, %v3435_v41  ;;  %4629 = vmatpush3.bf16.msra.mxu1 %v4792_v13 }
 0x217   : > { %v3412_v16 = vadd.f32 %v3411_v47, %v3410_v48  ;;  %v3451_v33 = vrot.slane %v3450_v53, 4 }
 0x218   : > { %4631 = vmatmul.mubr.bf16.vlgmr.msra.gmra.mrb[64].mxu1 %v5707_v63 }
 0x219   : > { %v3413_v37 = vrot.slane %v3412_v16, 2  ;;  %v3452_v21 = vadd.f32 %v3451_v33, %v3450_v53  ;;  %4634 = vmatprep.mubr.bf16.mxu1 %v5760_v31 }
 0x21b   : > { %v3414_v39 = vadd.f32 %v3413_v37, %v3412_v16  ;;  %v3453_v61 = vrot.slane %v3452_v21, 2 }
 0x21d   : > { %v3415_v40 = vrot.slane %v3414_v39, 1  ;;  %v3454_v29 = vadd.f32 %v3453_v61, %v3452_v21 }
 0x21f   : > { %v3416_v26 = vadd.f32 %v3415_v40, %v3414_v39  ;;  %v3455_v8 = vrot.slane %v3454_v29, 1 }
 0x220   : > { %4635 = vmatmul.mubr.bf16.gmra.mrb[68].mxu1 %v5802_v19 }
 0x221   : > { %v3417_v49 = vadd.f32 %v3416_v26, %v3395_v38  ;;  %v3456_v63 = vadd.f32 %v3455_v8, %v3454_v29  ;;  %4638 = vmatprep.mubr.bf16.mxu1 %v5846_v3 }
 0x223   : > { %3418 = vst [vmem:[%s4932_s28] sm:$0x1] %v3417_v49  ;;  %v3457_v31 = vadd.f32 %v3456_v63, %v3419_v34 }
 0x225   : > { %3458 = vst [vmem:[%s4937_s3] sm:$0x1] %v3457_v31 }
 0x228   : > { %4639 = vmatmul.mubr.bf16.gmra.mrb[72].mxu1 %v5882_v20 }
 0x229   : > { %4642 = vmatprep.mubr.bf16.mxu1 %v5926_v62 }
 0x230   : > { %4643 = vmatmul.mubr.bf16.gmra.mrb[76].mxu1 %v5961_v59 }
 0x2eb   : > { %v4632_v18 = vpop.f32.mrb[64].mxu1 }
 0x2ec   : > { %3622 = vst [vmem:[%s4947_s18 + $0x10] sm:$0xff] %v4632_v18  ;;  %v3557_v19 = vpop.f32.mrb[65].mxu1 }
 0x2ed   : > { %3620 = vst [vmem:[%s4947_s18] sm:$0xff] %v3557_v19  ;;  %v4633_v35 = vpop.f32.mrb[66].mxu1 }
 0x2ee   : > { %3623 = vst [vmem:[%s4947_s18 + $0x18] sm:$0xff] %v4633_v35  ;;  %v3560_v3 = vpop.f32.mrb[67].mxu1 }
 0x2ef   : > { %3621 = vst [vmem:[%s4947_s18 + $0x8] sm:$0xff] %v3560_v3 }
 0x2f3   : > { %v4636_v14 = vpop.f32.mrb[68].mxu1 }
 0x2f4   : > { %3626 = vst [vmem:[%s4947_s18 + $0x30] sm:$0xff] %v4636_v14  ;;  %v3573_v20 = vpop.f32.mrb[69].mxu1 }
 0x2f5   : > { %3624 = vst [vmem:[%s4947_s18 + $0x20] sm:$0xff] %v3573_v20  ;;  %v4637_v62 = vpop.f32.mrb[70].mxu1 }
 0x2f6   : > { %3627 = vst [vmem:[%s4947_s18 + $0x38] sm:$0xff] %v4637_v62  ;;  %v3576_v59 = vpop.f32.mrb[71].mxu1 }
 0x2f7   : > { %3625 = vst [vmem:[%s4947_s18 + $0x28] sm:$0xff] %v3576_v59 }
 0x2fb   : > { %v4640_v11 = vpop.f32.mrb[72].mxu1 }
 0x2fc   : > { %3630 = vst [vmem:[%s4947_s18 + $0x50] sm:$0xff] %v4640_v11  ;;  %v3589_v12 = vpop.f32.mrb[73].mxu1 }
 0x2fd   : > { %3628 = vst [vmem:[%s4947_s18 + $0x40] sm:$0xff] %v3589_v12  ;;  %v4641_v5 = vpop.f32.mrb[74].mxu1 }
 0x2fe   : > { %3631 = vst [vmem:[%s4947_s18 + $0x58] sm:$0xff] %v4641_v5  ;;  %v3592_v10 = vpop.f32.mrb[75].mxu1 }
 0x2ff   : > { %3629 = vst [vmem:[%s4947_s18 + $0x48] sm:$0xff] %v3592_v10 }
 0x301   : > { %3638 = sbr.rel (%p3976_p7) target bundleno = 776 (0x308), region = 52 }
 0x303   : > { %v4644_v51 = vpop.f32.mrb[76].mxu1 }
 0x304   : > { %3634 = vst [vmem:[%s4947_s18 + $0x70] sm:$0xff] %v4644_v51  ;;  %v3605_v7 = vpop.f32.mrb[77].mxu1 }
 0x305   : > { %3632 = vst [vmem:[%s4947_s18 + $0x60] sm:$0xff] %v3605_v7  ;;  %v4645_v15 = vpop.f32.mrb[78].mxu1 }
 0x306   : > { %3635 = vst [vmem:[%s4947_s18 + $0x78] sm:$0xff] %v4645_v15  ;;  %v3608_v32 = vpop.f32.mrb[79].mxu1 }
 0x307   : > { %3633 = vst [vmem:[%s4947_s18 + $0x68] sm:$0xff] %v3608_v32 }
 0x308 PF: > { %v3642_v46 = vadd.f32 %v3560_v3, %v3557_v19  ;;  %v3666_v6 = vmul.f32 %v3557_v19, %v3557_v19  ;;  %v3667_v28 = vmul.f32 %v3560_v3, %v3560_v3  ;;  %v3668_v27 = vmul.f32 %v4632_v18, %v4632_v18 }
 0x309   : > { %v3669_v4 = vmul.f32 %v4633_v35, %v4633_v35  ;;  %v3670_v2 = vmul.f32 %v3573_v20, %v3573_v20  ;;  %v3671_v42 = vmul.f32 %v3576_v59, %v3576_v59  ;;  %v3672_v17 = vmul.f32 %v4636_v14, %v4636_v14 }
 0x30a   : > { %v3643_v30 = vadd.f32 %v4632_v18, %v3642_v46  ;;  %v3682_v0 = vadd.f32 %v3667_v28, %v3666_v6  ;;  %v3673_v23 = vmul.f32 %v4637_v62, %v4637_v62  ;;  %v3674_v58 = vmul.f32 %v3589_v12, %v3589_v12 }
 0x30b   : > { %v3675_v56 = vmul.f32 %v3592_v10, %v3592_v10  ;;  %v3676_v41 = vmul.f32 %v4640_v11, %v4640_v11  ;;  %v3677_v60 = vmul.f32 %v4641_v5, %v4641_v5  ;;  %v3678_v37 = vmul.f32 %v3605_v7, %v3605_v7 }
 0x30c   : > { %v3644_v45 = vadd.f32 %v4633_v35, %v3643_v30  ;;  %v3683_v55 = vadd.f32 %v3682_v0, %v3668_v27  ;;  %v3679_v21 = vmul.f32 %v3608_v32, %v3608_v32  ;;  %v3680_v38 = vmul.f32 %v4644_v51, %v4644_v51 }
 0x30d   : > { %v3681_v49 = vmul.f32 %v4645_v15, %v4645_v15 }
 0x30e   : > { %v3645_v50 = vadd.f32 %v3644_v45, %v3573_v20  ;;  %v3684_v24 = vadd.f32 %v3683_v55, %v3669_v4 }
 0x310   : > { %v3646_v54 = vadd.f32 %v3645_v50, %v3576_v59  ;;  %v3685_v25 = vadd.f32 %v3684_v24, %v3670_v2  ;;  %v3641_v59 = vld [vmem:[%s4952_s24] sm:$0x1] }
 0x312   : > { %v3647_v43 = vadd.f32 %v4636_v14, %v3646_v54  ;;  %v3686_v9 = vadd.f32 %v3685_v25, %v3671_v42 }
 0x314   : > { %v3648_v44 = vadd.f32 %v4637_v62, %v3647_v43  ;;  %v3687_v13 = vadd.f32 %v3686_v9, %v3672_v17 }
 0x316   : > { %v3649_v36 = vadd.f32 %v3648_v44, %v3589_v12  ;;  %v3688_v22 = vadd.f32 %v3687_v13, %v3673_v23 }
 0x318   : > { %v3650_v1 = vadd.f32 %v3649_v36, %v3592_v10  ;;  %v3689_v52 = vadd.f32 %v3688_v22, %v3674_v58 }
 0x31a   : > { %v3651_v48 = vadd.f32 %v4640_v11, %v3650_v1  ;;  %v3690_v16 = vadd.f32 %v3689_v52, %v3675_v56 }
 0x31c   : > { %v3652_v47 = vadd.f32 %v4641_v5, %v3651_v48  ;;  %v3691_v33 = vadd.f32 %v3690_v16, %v3676_v41 }
 0x31e   : > { %v3653_v53 = vadd.f32 %v3652_v47, %v3605_v7  ;;  %v3692_v40 = vadd.f32 %v3691_v33, %v3677_v60 }
 0x320   : > { %v3654_v39 = vadd.f32 %v3653_v53, %v3608_v32  ;;  %v3693_v26 = vadd.f32 %v3692_v40, %v3678_v37 }
 0x322   : > { %v3655_v61 = vadd.f32 %v4644_v51, %v3654_v39  ;;  %v3694_v8 = vadd.f32 %v3693_v26, %v3679_v21  ;;  %v3665_v51 = vld [vmem:[%s4957_s27] sm:$0x1] }
 0x324   : > { %v3656_v29 = vadd.f32 %v4645_v15, %v3655_v61  ;;  %v3695_v63 = vadd.f32 %v3694_v8, %v3680_v38 }
 0x326   : > { %v3657_v34 = vrot.slane %v3656_v29, 4  ;;  %v3696_v18 = vadd.f32 %v3695_v63, %v3681_v49 }
 0x328   : > { %v3658_v31 = vadd.f32 %v3657_v34, %v3656_v29  ;;  %v3697_v35 = vrot.slane %v3696_v18, 4 }
 0x32a   : > { %v3659_v19 = vrot.slane %v3658_v31, 2  ;;  %v3698_v14 = vadd.f32 %v3697_v35, %v3696_v18 }
 0x32c   : > { %v3660_v3 = vadd.f32 %v3659_v19, %v3658_v31  ;;  %v3699_v62 = vrot.slane %v3698_v14, 2 }
 0x32e   : > { %v3661_v20 = vrot.slane %v3660_v3, 1  ;;  %v3700_v12 = vadd.f32 %v3699_v62, %v3698_v14 }
 0x330   : > { %v3662_v11 = vadd.f32 %v3661_v20, %v3660_v3  ;;  %v3701_v10 = vrot.slane %v3700_v12, 1 }
 0x332   : > { %v3663_v5 = vadd.f32 %v3662_v11, %v3641_v59  ;;  %v3702_v7 = vadd.f32 %v3701_v10, %v3700_v12 }
 0x334   : > { %3664 = vst [vmem:[%s4952_s24] sm:$0x1] %v3663_v5  ;;  %v3703_v15 = vadd.f32 %v3702_v7, %v3665_v51 }
 0x336   : > { %3704 = vst [vmem:[%s4957_s27] sm:$0x1] %v3703_v15 }
 0x337 PF: > { %s21_s15 = sadd.s32 1, %s4831_s15   ;;  %s6259_s12 = sld [smem:[#allocation3_spill]] }
 0x338   : > { %p18_p8 = scmp.ge.s32.totalorder %s21_s15, 6   ;;  %s6260_s28 = sld [smem:[#allocation4_spill]] }
 0x339   : > { %s6261_s14 = sld [smem:[#allocation5_spill]]  ;;  %s6262_s11 = smov %s4823_s13 }
 0x33a   :  { %20 = sbr.rel (!%p18_p8) target bundleno = 3 (0x3), region = 146 }
 0x33e   : > { %s6263_s13 = smov %s6260_s28 }

</bundles_post_ra>
